<compile_context>
chip_gen: v5e
topology: v5e:2x2
jax: 0.10.0
libtpu: 0.0.40
codegen_flags: <defaults>
</compile_context>

<pallas_src>
import functools

import jax
import jax.numpy as jnp
import numpy as np
from jax.experimental import pallas as pl
from jax.experimental.pallas import tpu as pltpu


# conv-stem geometry (torchvision resnet50 conv1: 7x7, stride 2, pad 3, 64 ch)
_KH, _KW, _STRIDE, _PAD = 7, 7, 2, 3
_K_RAW = 3 * _KH * _KW          # 147
_K_PAD = 160                    # feedback: 147 -> 160 (mult of 16), not 256
_OC_RAW = 64
_OC_PAD = 128                   # minimum lane-dense width; do NOT pad to 256


def _make_taps():
    """Static tap table: k = c*49 + di*7 + dj  ->  (parity plane, row off, col off).

    Matches torch's weight.reshape(OC, -1) column ordering (c, kh, kw).
    """
    taps = []
    for c in range(3):
        for di in range(_KH):
            for dj in range(_KW):
                plane = c * 4 + (di % 2) * 2 + (dj % 2)
                taps.append((plane, di // 2, dj // 2))
    return tuple(taps)


_TAPS = _make_taps()


# ----------------------------- Pallas kernel --------------------------------

def _fused_backbone_kernel(x_ref, cw_ref, cb_ref, pw_ref, pb_ref, o_ref,
                           patch_ref, acc_ref, *, Ho, Wo, taps):
    """Fused conv7x7/s2 stem -> bias+ReLU -> global-avg-pool -> 2048-d projection.

    One grid step == one sample.  x_ref holds the whole space-to-depth image of
    that sample in VMEM; the (K_PAD, Wo) patch tile for each output row is built
    in VMEM from contiguous slices (no HBM im2col), fed to the MXU in bf16, and
    the ReLU'd rows accumulate into a small f32 scratch for the global pool.
    """
    # zero the whole patch scratch once per sample: rows >= 147 stay zero
    # (conv-weight columns there are zero too, but uninitialized scratch could be NaN).
    patch_ref[...] = jnp.zeros_like(patch_ref)
    acc_ref[...] = jnp.zeros_like(acc_ref)

    cw = cw_ref[...]          # (OC_PAD, K_PAD) bf16, VMEM-resident
    cb = cb_ref[...]          # (OC_PAD, 1) f32

    @pl.loop(0, Ho)
    def _(oh):
        # in-VMEM im2col for output row `oh`: every tap is a contiguous slice of the
        # parity-split (space-to-depth) image, so the stride-2 conv needs no strided
        # or gather access.
        for k, (plane, ri, cj) in enumerate(taps):
            patch_ref[pl.ds(k, 1), :] = x_ref[0, plane,
                                              pl.ds(oh + ri, 1), pl.ds(cj, Wo)]
        # bf16 operands on the MXU, f32 accumulation -> (OC_PAD, Wo)
        conv = jnp.dot(cw, patch_ref[...].astype(jnp.bfloat16),
                       preferred_element_type=jnp.float32)
        acc_ref[...] += jnp.maximum(conv + cb, 0.0)       # bias + ReLU + pool-accum

    # global average pool (lane reduce) -> (OC_PAD, 1)
    pooled = jnp.sum(acc_ref[...], axis=1, keepdims=True) * (1.0 / (Ho * Wo))
    # projection to the 2048-d feature (once per sample, VPU multiply + sublane
    # reduce — cheaper/safer than a 1-row MXU matmul); padded OC rows of pw are 0.
    feat = jnp.sum(pooled * pw_ref[...], axis=0, keepdims=True) + pb_ref[...]
    o_ref[0] = feat                                       # lane-dense (1, 2048) store


def fused_backbone(xsd, conv_w, conv_b, proj_w, proj_b, *, Ho, Wo):
    """xsd: [N, 12, Hh, Wh] f32 space-to-depth frames -> features [N, 1, F] f32."""
    N, P12, Hh, Wh = xsd.shape
    OCp, Kp = conv_w.shape
    F = proj_w.shape[1]

    kernel = functools.partial(_fused_backbone_kernel, Ho=Ho, Wo=Wo, taps=_TAPS)
    return pl.pallas_call(
        kernel,
        out_shape=jax.ShapeDtypeStruct((N, 1, F), jnp.float32),
        grid_spec=pltpu.PrefetchScalarGridSpec(
            num_scalar_prefetch=0,
            grid=(N,),                                    # one sample per grid step
            in_specs=[
                # whole per-sample image resident in VMEM (double-buffered by Pallas)
                pl.BlockSpec((1, P12, Hh, Wh), lambda n: (n, 0, 0, 0)),
                pl.BlockSpec((OCp, Kp), lambda n: (0, 0)),   # conv weights (bf16)
                pl.BlockSpec((OCp, 1), lambda n: (0, 0)),    # conv bias (f32)
                pl.BlockSpec((OCp, F), lambda n: (0, 0)),    # projection weights (bf16)
                pl.BlockSpec((1, F), lambda n: (0, 0)),      # projection bias (f32)
            ],
            out_specs=pl.BlockSpec((1, 1, F), lambda n: (n, 0, 0)),
            scratch_shapes=[
                pltpu.VMEM((Kp, Wo), jnp.float32),           # per-row patch tile
                pltpu.VMEM((OCp, Wo), jnp.float32),          # pool accumulator
            ],
        ),
        compiler_params=pltpu.CompilerParams(
            dimension_semantics=("parallel",),               # megacore over samples
            vmem_limit_bytes=32 * 1024 * 1024,               # footprint ~2 MB; plenty
        ),
    )(xsd, conv_w, conv_b, proj_w, proj_b)


# ----------------------------- glue (plain JAX) ------------------------------

def space_to_depth(images):
    """NCHW -> padded stride-2 parity split [N, 12, Hh, Wh] (plane = c*4 + ph*2 + pw).

    Cost is ~one pass over raw image bytes (vs ~12x inflation of the old im2col).
    """
    N, C, H, W = images.shape
    Ho = (H + 2 * _PAD - _KH) // _STRIDE + 1
    Wo = (W + 2 * _PAD - _KW) // _STRIDE + 1
    Hh, Wh = Ho + 3, Wo + 3
    Hp, Wp = 2 * Hh, 2 * Wh
    xp = jnp.pad(images, ((0, 0), (0, 0), (_PAD, Hp - H - _PAD), (_PAD, Wp - W - _PAD)))
    xsd = xp.reshape(N, C, Hh, 2, Wh, 2).transpose(0, 1, 3, 5, 2, 4)
    xsd = xsd.reshape(N, C * 4, Hh, Wh)
    return xsd, Ho, Wo


def backbone_features(images, params):
    """self.model(images) with fc=Identity -> [N, 2048] features (all frames batched)."""
    xsd, Ho, Wo = space_to_depth(images)
    feats = fused_backbone(xsd, params["conv_w"], params["conv_b"],
                           params["proj_w"], params["proj_b"], Ho=Ho, Wo=Wo)
    return feats.reshape(images.shape[0], -1)


def backbone_reference(images, params):
    """Pure-XLA reference for the stand-in backbone (same bf16-rounded weights)."""
    x = images.astype(jnp.float32)
    w = params["conv_w"][:_OC_RAW, :_K_RAW].astype(jnp.float32).reshape(
        _OC_RAW, 3, _KH, _KW)
    conv = jax.lax.conv_general_dilated(
        x, w, window_strides=(_STRIDE, _STRIDE),
        padding=((_PAD, _PAD), (_PAD, _PAD)),
        dimension_numbers=("NCHW", "OIHW", "NCHW"))
    b = params["conv_b"][:_OC_RAW, 0]
    conv = jnp.maximum(conv + b[None, :, None, None], 0.0)
    pooled = jnp.mean(conv, axis=(2, 3))                              # (N, 64)
    pw = params["proj_w"][:_OC_RAW].astype(jnp.float32)               # (64, F)
    return pooled @ pw + params["proj_b"]


def init_params(key, feature_dim=2048, num_classes=1):
    ks = jax.random.split(key, 8)
    # backbone stand-in (see TODO(synk)) — padded to MXU-friendly dims, bf16 weights.
    w_oihw = jax.random.normal(ks[0], (_OC_RAW, 3, _KH, _KW), jnp.float32) * 0.05
    conv_w = jnp.zeros((_OC_PAD, _K_PAD), jnp.float32)
    conv_w = conv_w.at[:_OC_RAW, :_K_RAW].set(w_oihw.reshape(_OC_RAW, _K_RAW))
    conv_w = conv_w.astype(jnp.bfloat16)
    conv_b = jnp.zeros((_OC_PAD, 1), jnp.float32)
    conv_b = conv_b.at[:_OC_RAW, 0].set(
        jax.random.normal(ks[1], (_OC_RAW,), jnp.float32) * 0.01)
    proj_w = jnp.zeros((_OC_PAD, feature_dim), jnp.float32)
    proj_w = proj_w.at[:_OC_RAW].set(
        jax.random.normal(ks[2], (_OC_RAW, feature_dim), jnp.float32) * 0.02)
    proj_w = proj_w.astype(jnp.bfloat16)
    proj_b = jax.random.normal(ks[3], (1, feature_dim), jnp.float32) * 0.01
    # heads: lg2: Linear(2*2048 -> num_classes), lgavgavg: Linear(2048 -> num_classes)
    lg2_w = jax.random.normal(ks[4], (num_classes, 2 * feature_dim), jnp.float32) * 0.02
    lg2_b = jax.random.normal(ks[5], (num_classes,), jnp.float32) * 0.01
    lgavg_w = jax.random.normal(ks[6], (num_classes, feature_dim), jnp.float32) * 0.02
    lgavg_b = jax.random.normal(ks[7], (num_classes,), jnp.float32) * 0.01
    return dict(conv_w=conv_w, conv_b=conv_b, proj_w=proj_w, proj_b=proj_b,
                lg2_w=lg2_w, lg2_b=lg2_b, lgavg_w=lgavg_w, lgavg_b=lgavg_b)


@functools.partial(jax.jit, static_argnames=("backbone",))
def multimodel_sharebackbone_forward(yd, params, backbone="resnest50"):
    """Mirrors Build_MultiModel_ShareBackbone_yd.forward(yd)."""
    T = len(yd)
    B = yd[0].shape[0]
    images = jnp.concatenate(yd, axis=0)              # shared backbone, all frames batched
    feats = backbone_features(images, params)         # [T*B, 2048]
    f = feats.reshape(T, B, -1)                       # frame-major stacking
    # heads in plain JAX (perf feedback: XLA fuses them; no extra kernel launches)
    if backbone == "avg":
        pooled = jnp.mean(f, axis=0)                  # stack -> sum -> / len(yd)
        return pooled @ params["lgavg_w"].T + params["lgavg_b"]
    elif backbone == "max":
        pooled = jnp.max(f, axis=0)
        return pooled @ params["lgavg_w"].T + params["lgavg_b"]
    else:
        # torch.cat(yd_output_list, -1) -> lg2; lg2 in_features=4096 implies len(yd)==2.
        assert T == 2, "default path requires exactly 2 frames (lg2 in=4096)"
        allf = jnp.concatenate([f[0], f[1]], axis=-1)
        return allf @ params["lg2_w"].T + params["lg2_b"]


# ----------------------------------- main ------------------------------------

if __name__ == "__main__":
    key = jax.random.PRNGKey(0)
    k_p, k_x0, k_x1 = jax.random.split(key, 3)

    B, C, H, W = 2, 3, 16, 16          # small NCHW frames
    params = init_params(k_p)

    yd = [jax.random.normal(k_x0, (B, C, H, W), jnp.float32),
          jax.random.normal(k_x1, (B, C, H, W), jnp.float32)]

    # correctness: fused Pallas backbone vs pure-XLA reference (bf16 MXU operands,
    # f32 accumulation -> tolerance documented per review)
    images = jnp.concatenate(yd, axis=0)
    feats = jax.block_until_ready(backbone_features(images, params))
    ref = jax.block_until_ready(backbone_reference(images, params))
    np.testing.assert_allclose(np.asarray(feats), np.asarray(ref),
                               rtol=2e-2, atol=1e-3)

    res = multimodel_sharebackbone_forward(yd, params, backbone="resnest50")
    res = jax.block_until_ready(res)
    assert res.shape == (B, 1), res.shape

    # also exercise the avg / max gating branches
    res_avg = jax.block_until_ready(
        multimodel_sharebackbone_forward(yd, params, backbone="avg"))
    res_max = jax.block_until_ready(
        multimodel_sharebackbone_forward(yd, params, backbone="max"))
    assert res_avg.shape == (B, 1) and res_max.shape == (B, 1)

    print("KERNEL_OK")
</pallas_src>

<mosaic_0001>
module attributes {stable_mosaic.version = 11 : i64} {
  func.func @_fused_backbone_kernel(%arg0: i32, %arg1: memref<1x12x11x11xf32, #tpu.memory_space<vmem>>, %arg2: memref<128x160xbf16, #tpu.memory_space<vmem>>, %arg3: memref<128x1xf32, #tpu.memory_space<vmem>>, %arg4: memref<128x2048xbf16, #tpu.memory_space<vmem>>, %arg5: memref<1x2048xf32, #tpu.memory_space<vmem>>, %arg6: memref<1x1x2048xf32, #tpu.memory_space<vmem>>, %arg7: memref<160x8xf32, #tpu.memory_space<vmem>>, %arg8: memref<128x8xf32, #tpu.memory_space<vmem>>) attributes {dimension_semantics = [#tpu.dimension_semantics<parallel>], iteration_bounds = array<i64: 4>, scalar_prefetch = 0 : i64, scratch_operands = 2 : i64, tpu.core_type = #tpu.core_type<tc>, window_params = [{transform_indices = @transform_0, window_bounds = array<i64: 1, 12, 11, 11>}, {pipeline_mode = #tpu.pipeline_mode<synchronous>, transform_indices = @transform_1, window_bounds = array<i64: 128, 160>}, {pipeline_mode = #tpu.pipeline_mode<synchronous>, transform_indices = @transform_2, window_bounds = array<i64: 128, 1>}, {pipeline_mode = #tpu.pipeline_mode<synchronous>, transform_indices = @transform_3, window_bounds = array<i64: 128, 2048>}, {pipeline_mode = #tpu.pipeline_mode<synchronous>, transform_indices = @transform_4, window_bounds = array<i64: 1, 2048>}, {transform_indices = @transform_5, window_bounds = array<i64: 1, 1, 2048>}]} {
    %cst = arith.constant 0.000000e+00 : f32
    %0 = vector.broadcast %cst : f32 to vector<160x8xf32>
    %c0 = arith.constant 0 : index
    %c0_0 = arith.constant 0 : index
    %1 = vector.load %arg7[%c0, %c0_0] : memref<160x8xf32, #tpu.memory_space<vmem>>, vector<160x8xf32>
    tpu.vector_store %arg7[%c0, %c0_0], %0 {strides = array<i32>} : memref<160x8xf32, #tpu.memory_space<vmem>>, vector<160x8xf32>,
    %cst_1 = arith.constant 0.000000e+00 : f32
    %2 = vector.broadcast %cst_1 : f32 to vector<128x8xf32>
    %c0_2 = arith.constant 0 : index
    %c0_3 = arith.constant 0 : index
    %3 = vector.load %arg8[%c0_2, %c0_3] : memref<128x8xf32, #tpu.memory_space<vmem>>, vector<128x8xf32>
    tpu.vector_store %arg8[%c0_2, %c0_3], %2 {strides = array<i32>} : memref<128x8xf32, #tpu.memory_space<vmem>>, vector<128x8xf32>,
    %c0_4 = arith.constant 0 : index
    %c0_5 = arith.constant 0 : index
    %4 = vector.load %arg2[%c0_4, %c0_5] : memref<128x160xbf16, #tpu.memory_space<vmem>>, vector<128x160xbf16>
    %c0_6 = arith.constant 0 : index
    %c0_7 = arith.constant 0 : index
    %5 = vector.load %arg3[%c0_6, %c0_7] : memref<128x1xf32, #tpu.memory_space<vmem>>, vector<128x1xf32>
    %c0_i32 = arith.constant 0 : i32
    %c8_i32 = arith.constant 8 : i32
    %6 = arith.addi %c0_i32, %c8_i32 : i32
    %c1_i32 = arith.constant 1 : i32
    scf.for %arg9 = %c0_i32 to %6 step %c1_i32  : i32 {
      %c1_i32_21 = arith.constant 1 : i32
      %23 = arith.muli %arg9, %c1_i32_21 : i32
      %c0_i32_22 = arith.constant 0 : i32
      %24 = arith.addi %c0_i32_22, %23 : i32
      %c0_i32_23 = arith.constant 0 : i32
      %25 = arith.addi %24, %c0_i32_23 : i32
      %c0_24 = arith.constant 0 : index
      %c0_25 = arith.constant 0 : index
      %26 = arith.index_cast %25 : i32 to index
      %c0_26 = arith.constant 0 : index
      %27 = vector.load %arg1[%c0_24, %c0_25, %26, %c0_26] : memref<1x12x11x11xf32, #tpu.memory_space<vmem>>, vector<1x1x1x8xf32>
      %28 = vector.shape_cast %27 : vector<1x1x1x8xf32> to vector<1x8xf32>
      %c0_27 = arith.constant 0 : index
      %c0_28 = arith.constant 0 : index
      %29 = vector.load %arg7[%c0_27, %c0_28] : memref<160x8xf32, #tpu.memory_space<vmem>>, vector<1x8xf32>
      tpu.vector_store %arg7[%c0_27, %c0_28], %28 {strides = array<i32>} : memref<160x8xf32, #tpu.memory_space<vmem>>, vector<1x8xf32>,
      %c0_i32_29 = arith.constant 0 : i32
      %30 = arith.addi %24, %c0_i32_29 : i32
      %c0_30 = arith.constant 0 : index
      %c1 = arith.constant 1 : index
      %31 = arith.index_cast %30 : i32 to index
      %c0_31 = arith.constant 0 : index
      %32 = vector.load %arg1[%c0_30, %c1, %31, %c0_31] : memref<1x12x11x11xf32, #tpu.memory_space<vmem>>, vector<1x1x1x8xf32>
      %33 = vector.shape_cast %32 : vector<1x1x1x8xf32> to vector<1x8xf32>
      %c1_32 = arith.constant 1 : index
      %c0_33 = arith.constant 0 : index
      %34 = vector.load %arg7[%c1_32, %c0_33] : memref<160x8xf32, #tpu.memory_space<vmem>>, vector<1x8xf32>
      tpu.vector_store %arg7[%c1_32, %c0_33], %33 {strides = array<i32>} : memref<160x8xf32, #tpu.memory_space<vmem>>, vector<1x8xf32>,
      %c0_i32_34 = arith.constant 0 : i32
      %35 = arith.addi %24, %c0_i32_34 : i32
      %c0_35 = arith.constant 0 : index
      %c0_36 = arith.constant 0 : index
      %36 = arith.index_cast %35 : i32 to index
      %c1_37 = arith.constant 1 : index
      %37 = vector.load %arg1[%c0_35, %c0_36, %36, %c1_37] : memref<1x12x11x11xf32, #tpu.memory_space<vmem>>, vector<1x1x1x8xf32>
      %38 = vector.shape_cast %37 : vector<1x1x1x8xf32> to vector<1x8xf32>
      %c2 = arith.constant 2 : index
      %c0_38 = arith.constant 0 : index
      %39 = vector.load %arg7[%c2, %c0_38] : memref<160x8xf32, #tpu.memory_space<vmem>>, vector<1x8xf32>
      tpu.vector_store %arg7[%c2, %c0_38], %38 {strides = array<i32>} : memref<160x8xf32, #tpu.memory_space<vmem>>, vector<1x8xf32>,
      %c0_i32_39 = arith.constant 0 : i32
      %40 = arith.addi %24, %c0_i32_39 : i32
      %c0_40 = arith.constant 0 : index
      %c1_41 = arith.constant 1 : index
      %41 = arith.index_cast %40 : i32 to index
      %c1_42 = arith.constant 1 : index
      %42 = vector.load %arg1[%c0_40, %c1_41, %41, %c1_42] : memref<1x12x11x11xf32, #tpu.memory_space<vmem>>, vector<1x1x1x8xf32>
      %43 = vector.shape_cast %42 : vector<1x1x1x8xf32> to vector<1x8xf32>
      %c3 = arith.constant 3 : index
      %c0_43 = arith.constant 0 : index
      %44 = vector.load %arg7[%c3, %c0_43] : memref<160x8xf32, #tpu.memory_space<vmem>>, vector<1x8xf32>
      tpu.vector_store %arg7[%c3, %c0_43], %43 {strides = array<i32>} : memref<160x8xf32, #tpu.memory_space<vmem>>, vector<1x8xf32>,
      %c0_i32_44 = arith.constant 0 : i32
      %45 = arith.addi %24, %c0_i32_44 : i32
      %c0_45 = arith.constant 0 : index
      %c0_46 = arith.constant 0 : index
      %46 = arith.index_cast %45 : i32 to index
      %c2_47 = arith.constant 2 : index
      %47 = vector.load %arg1[%c0_45, %c0_46, %46, %c2_47] : memref<1x12x11x11xf32, #tpu.memory_space<vmem>>, vector<1x1x1x8xf32>
      %48 = vector.shape_cast %47 : vector<1x1x1x8xf32> to vector<1x8xf32>
      %c4 = arith.constant 4 : index
      %c0_48 = arith.constant 0 : index
      %49 = vector.load %arg7[%c4, %c0_48] : memref<160x8xf32, #tpu.memory_space<vmem>>, vector<1x8xf32>
      tpu.vector_store %arg7[%c4, %c0_48], %48 {strides = array<i32>} : memref<160x8xf32, #tpu.memory_space<vmem>>, vector<1x8xf32>,
      %c0_i32_49 = arith.constant 0 : i32
      %50 = arith.addi %24, %c0_i32_49 : i32
      %c0_50 = arith.constant 0 : index
      %c1_51 = arith.constant 1 : index
      %51 = arith.index_cast %50 : i32 to index
      %c2_52 = arith.constant 2 : index
      %52 = vector.load %arg1[%c0_50, %c1_51, %51, %c2_52] : memref<1x12x11x11xf32, #tpu.memory_space<vmem>>, vector<1x1x1x8xf32>
      %53 = vector.shape_cast %52 : vector<1x1x1x8xf32> to vector<1x8xf32>
      %c5 = arith.constant 5 : index
      %c0_53 = arith.constant 0 : index
      %54 = vector.load %arg7[%c5, %c0_53] : memref<160x8xf32, #tpu.memory_space<vmem>>, vector<1x8xf32>
      tpu.vector_store %arg7[%c5, %c0_53], %53 {strides = array<i32>} : memref<160x8xf32, #tpu.memory_space<vmem>>, vector<1x8xf32>,
      %c0_i32_54 = arith.constant 0 : i32
      %55 = arith.addi %24, %c0_i32_54 : i32
      %c0_55 = arith.constant 0 : index
      %c0_56 = arith.constant 0 : index
      %56 = arith.index_cast %55 : i32 to index
      %c3_57 = arith.constant 3 : index
      %57 = vector.load %arg1[%c0_55, %c0_56, %56, %c3_57] : memref<1x12x11x11xf32, #tpu.memory_space<vmem>>, vector<1x1x1x8xf32>
      %58 = vector.shape_cast %57 : vector<1x1x1x8xf32> to vector<1x8xf32>
      %c6 = arith.constant 6 : index
      %c0_58 = arith.constant 0 : index
      %59 = vector.load %arg7[%c6, %c0_58] : memref<160x8xf32, #tpu.memory_space<vmem>>, vector<1x8xf32>
      tpu.vector_store %arg7[%c6, %c0_58], %58 {strides = array<i32>} : memref<160x8xf32, #tpu.memory_space<vmem>>, vector<1x8xf32>,
      %c0_i32_59 = arith.constant 0 : i32
      %60 = arith.addi %24, %c0_i32_59 : i32
      %c0_60 = arith.constant 0 : index
      %c2_61 = arith.constant 2 : index
      %61 = arith.index_cast %60 : i32 to index
      %c0_62 = arith.constant 0 : index
      %62 = vector.load %arg1[%c0_60, %c2_61, %61, %c0_62] : memref<1x12x11x11xf32, #tpu.memory_space<vmem>>, vector<1x1x1x8xf32>
      %63 = vector.shape_cast %62 : vector<1x1x1x8xf32> to vector<1x8xf32>
      %c7 = arith.constant 7 : index
      %c0_63 = arith.constant 0 : index
      %64 = vector.load %arg7[%c7, %c0_63] : memref<160x8xf32, #tpu.memory_space<vmem>>, vector<1x8xf32>
      tpu.vector_store %arg7[%c7, %c0_63], %63 {strides = array<i32>} : memref<160x8xf32, #tpu.memory_space<vmem>>, vector<1x8xf32>,
      %c0_i32_64 = arith.constant 0 : i32
      %65 = arith.addi %24, %c0_i32_64 : i32
      %c0_65 = arith.constant 0 : index
      %c3_66 = arith.constant 3 : index
      %66 = arith.index_cast %65 : i32 to index
      %c0_67 = arith.constant 0 : index
      %67 = vector.load %arg1[%c0_65, %c3_66, %66, %c0_67] : memref<1x12x11x11xf32, #tpu.memory_space<vmem>>, vector<1x1x1x8xf32>
      %68 = vector.shape_cast %67 : vector<1x1x1x8xf32> to vector<1x8xf32>
      %c8 = arith.constant 8 : index
      %c0_68 = arith.constant 0 : index
      %69 = vector.load %arg7[%c8, %c0_68] : memref<160x8xf32, #tpu.memory_space<vmem>>, vector<1x8xf32>
      tpu.vector_store %arg7[%c8, %c0_68], %68 {strides = array<i32>} : memref<160x8xf32, #tpu.memory_space<vmem>>, vector<1x8xf32>,
      %c0_i32_69 = arith.constant 0 : i32
      %70 = arith.addi %24, %c0_i32_69 : i32
      %c0_70 = arith.constant 0 : index
      %c2_71 = arith.constant 2 : index
      %71 = arith.index_cast %70 : i32 to index
      %c1_72 = arith.constant 1 : index
      %72 = vector.load %arg1[%c0_70, %c2_71, %71, %c1_72] : memref<1x12x11x11xf32, #tpu.memory_space<vmem>>, vector<1x1x1x8xf32>
      %73 = vector.shape_cast %72 : vector<1x1x1x8xf32> to vector<1x8xf32>
      %c9 = arith.constant 9 : index
      %c0_73 = arith.constant 0 : index
      %74 = vector.load %arg7[%c9, %c0_73] : memref<160x8xf32, #tpu.memory_space<vmem>>, vector<1x8xf32>
      tpu.vector_store %arg7[%c9, %c0_73], %73 {strides = array<i32>} : memref<160x8xf32, #tpu.memory_space<vmem>>, vector<1x8xf32>,
      %c0_i32_74 = arith.constant 0 : i32
      %75 = arith.addi %24, %c0_i32_74 : i32
      %c0_75 = arith.constant 0 : index
      %c3_76 = arith.constant 3 : index
      %76 = arith.index_cast %75 : i32 to index
      %c1_77 = arith.constant 1 : index
      %77 = vector.load %arg1[%c0_75, %c3_76, %76, %c1_77] : memref<1x12x11x11xf32, #tpu.memory_space<vmem>>, vector<1x1x1x8xf32>
      %78 = vector.shape_cast %77 : vector<1x1x1x8xf32> to vector<1x8xf32>
      %c10 = arith.constant 10 : index
      %c0_78 = arith.constant 0 : index
      %79 = vector.load %arg7[%c10, %c0_78] : memref<160x8xf32, #tpu.memory_space<vmem>>, vector<1x8xf32>
      tpu.vector_store %arg7[%c10, %c0_78], %78 {strides = array<i32>} : memref<160x8xf32, #tpu.memory_space<vmem>>, vector<1x8xf32>,
      %c0_i32_79 = arith.constant 0 : i32
      %80 = arith.addi %24, %c0_i32_79 : i32
      %c0_80 = arith.constant 0 : index
      %c2_81 = arith.constant 2 : index
      %81 = arith.index_cast %80 : i32 to index
      %c2_82 = arith.constant 2 : index
      %82 = vector.load %arg1[%c0_80, %c2_81, %81, %c2_82] : memref<1x12x11x11xf32, #tpu.memory_space<vmem>>, vector<1x1x1x8xf32>
      %83 = vector.shape_cast %82 : vector<1x1x1x8xf32> to vector<1x8xf32>
      %c11 = arith.constant 11 : index
      %c0_83 = arith.constant 0 : index
      %84 = vector.load %arg7[%c11, %c0_83] : memref<160x8xf32, #tpu.memory_space<vmem>>, vector<1x8xf32>
      tpu.vector_store %arg7[%c11, %c0_83], %83 {strides = array<i32>} : memref<160x8xf32, #tpu.memory_space<vmem>>, vector<1x8xf32>,
      %c0_i32_84 = arith.constant 0 : i32
      %85 = arith.addi %24, %c0_i32_84 : i32
      %c0_85 = arith.constant 0 : index
      %c3_86 = arith.constant 3 : index
      %86 = arith.index_cast %85 : i32 to index
      %c2_87 = arith.constant 2 : index
      %87 = vector.load %arg1[%c0_85, %c3_86, %86, %c2_87] : memref<1x12x11x11xf32, #tpu.memory_space<vmem>>, vector<1x1x1x8xf32>
      %88 = vector.shape_cast %87 : vector<1x1x1x8xf32> to vector<1x8xf32>
      %c12 = arith.constant 12 : index
      %c0_88 = arith.constant 0 : index
      %89 = vector.load %arg7[%c12, %c0_88] : memref<160x8xf32, #tpu.memory_space<vmem>>, vector<1x8xf32>
      tpu.vector_store %arg7[%c12, %c0_88], %88 {strides = array<i32>} : memref<160x8xf32, #tpu.memory_space<vmem>>, vector<1x8xf32>,
      %c0_i32_89 = arith.constant 0 : i32
      %90 = arith.addi %24, %c0_i32_89 : i32
      %c0_90 = arith.constant 0 : index
      %c2_91 = arith.constant 2 : index
      %91 = arith.index_cast %90 : i32 to index
      %c3_92 = arith.constant 3 : index
      %92 = vector.load %arg1[%c0_90, %c2_91, %91, %c3_92] : memref<1x12x11x11xf32, #tpu.memory_space<vmem>>, vector<1x1x1x8xf32>
      %93 = vector.shape_cast %92 : vector<1x1x1x8xf32> to vector<1x8xf32>
      %c13 = arith.constant 13 : index
      %c0_93 = arith.constant 0 : index
      %94 = vector.load %arg7[%c13, %c0_93] : memref<160x8xf32, #tpu.memory_space<vmem>>, vector<1x8xf32>
      tpu.vector_store %arg7[%c13, %c0_93], %93 {strides = array<i32>} : memref<160x8xf32, #tpu.memory_space<vmem>>, vector<1x8xf32>,
      %c1_i32_94 = arith.constant 1 : i32
      %95 = arith.addi %24, %c1_i32_94 : i32
      %c0_95 = arith.constant 0 : index
      %c0_96 = arith.constant 0 : index
      %96 = arith.index_cast %95 : i32 to index
      %c0_97 = arith.constant 0 : index
      %97 = vector.load %arg1[%c0_95, %c0_96, %96, %c0_97] : memref<1x12x11x11xf32, #tpu.memory_space<vmem>>, vector<1x1x1x8xf32>
      %98 = vector.shape_cast %97 : vector<1x1x1x8xf32> to vector<1x8xf32>
      %c14 = arith.constant 14 : index
      %c0_98 = arith.constant 0 : index
      %99 = vector.load %arg7[%c14, %c0_98] : memref<160x8xf32, #tpu.memory_space<vmem>>, vector<1x8xf32>
      tpu.vector_store %arg7[%c14, %c0_98], %98 {strides = array<i32>} : memref<160x8xf32, #tpu.memory_space<vmem>>, vector<1x8xf32>,
      %c1_i32_99 = arith.constant 1 : i32
      %100 = arith.addi %24, %c1_i32_99 : i32
      %c0_100 = arith.constant 0 : index
      %c1_101 = arith.constant 1 : index
      %101 = arith.index_cast %100 : i32 to index
      %c0_102 = arith.constant 0 : index
      %102 = vector.load %arg1[%c0_100, %c1_101, %101, %c0_102] : memref<1x12x11x11xf32, #tpu.memory_space<vmem>>, vector<1x1x1x8xf32>
      %103 = vector.shape_cast %102 : vector<1x1x1x8xf32> to vector<1x8xf32>
      %c15 = arith.constant 15 : index
      %c0_103 = arith.constant 0 : index
      %104 = vector.load %arg7[%c15, %c0_103] : memref<160x8xf32, #tpu.memory_space<vmem>>, vector<1x8xf32>
      tpu.vector_store %arg7[%c15, %c0_103], %103 {strides = array<i32>} : memref<160x8xf32, #tpu.memory_space<vmem>>, vector<1x8xf32>,
      %c1_i32_104 = arith.constant 1 : i32
      %105 = arith.addi %24, %c1_i32_104 : i32
      %c0_105 = arith.constant 0 : index
      %c0_106 = arith.constant 0 : index
      %106 = arith.index_cast %105 : i32 to index
      %c1_107 = arith.constant 1 : index
      %107 = vector.load %arg1[%c0_105, %c0_106, %106, %c1_107] : memref<1x12x11x11xf32, #tpu.memory_space<vmem>>, vector<1x1x1x8xf32>
      %108 = vector.shape_cast %107 : vector<1x1x1x8xf32> to vector<1x8xf32>
      %c16 = arith.constant 16 : index
      %c0_108 = arith.constant 0 : index
      %109 = vector.load %arg7[%c16, %c0_108] : memref<160x8xf32, #tpu.memory_space<vmem>>, vector<1x8xf32>
      tpu.vector_store %arg7[%c16, %c0_108], %108 {strides = array<i32>} : memref<160x8xf32, #tpu.memory_space<vmem>>, vector<1x8xf32>,
      %c1_i32_109 = arith.constant 1 : i32
      %110 = arith.addi %24, %c1_i32_109 : i32
      %c0_110 = arith.constant 0 : index
      %c1_111 = arith.constant 1 : index
      %111 = arith.index_cast %110 : i32 to index
      %c1_112 = arith.constant 1 : index
      %112 = vector.load %arg1[%c0_110, %c1_111, %111, %c1_112] : memref<1x12x11x11xf32, #tpu.memory_space<vmem>>, vector<1x1x1x8xf32>
      %113 = vector.shape_cast %112 : vector<1x1x1x8xf32> to vector<1x8xf32>
      %c17 = arith.constant 17 : index
      %c0_113 = arith.constant 0 : index
      %114 = vector.load %arg7[%c17, %c0_113] : memref<160x8xf32, #tpu.memory_space<vmem>>, vector<1x8xf32>
      tpu.vector_store %arg7[%c17, %c0_113], %113 {strides = array<i32>} : memref<160x8xf32, #tpu.memory_space<vmem>>, vector<1x8xf32>,
      %c1_i32_114 = arith.constant 1 : i32
      %115 = arith.addi %24, %c1_i32_114 : i32
      %c0_115 = arith.constant 0 : index
      %c0_116 = arith.constant 0 : index
      %116 = arith.index_cast %115 : i32 to index
      %c2_117 = arith.constant 2 : index
      %117 = vector.load %arg1[%c0_115, %c0_116, %116, %c2_117] : memref<1x12x11x11xf32, #tpu.memory_space<vmem>>, vector<1x1x1x8xf32>
      %118 = vector.shape_cast %117 : vector<1x1x1x8xf32> to vector<1x8xf32>
      %c18 = arith.constant 18 : index
      %c0_118 = arith.constant 0 : index
      %119 = vector.load %arg7[%c18, %c0_118] : memref<160x8xf32, #tpu.memory_space<vmem>>, vector<1x8xf32>
      tpu.vector_store %arg7[%c18, %c0_118], %118 {strides = array<i32>} : memref<160x8xf32, #tpu.memory_space<vmem>>, vector<1x8xf32>,
      %c1_i32_119 = arith.constant 1 : i32
      %120 = arith.addi %24, %c1_i32_119 : i32
      %c0_120 = arith.constant 0 : index
      %c1_121 = arith.constant 1 : index
      %121 = arith.index_cast %120 : i32 to index
      %c2_122 = arith.constant 2 : index
      %122 = vector.load %arg1[%c0_120, %c1_121, %121, %c2_122] : memref<1x12x11x11xf32, #tpu.memory_space<vmem>>, vector<1x1x1x8xf32>
      %123 = vector.shape_cast %122 : vector<1x1x1x8xf32> to vector<1x8xf32>
      %c19 = arith.constant 19 : index
      %c0_123 = arith.constant 0 : index
      %124 = vector.load %arg7[%c19, %c0_123] : memref<160x8xf32, #tpu.memory_space<vmem>>, vector<1x8xf32>
      tpu.vector_store %arg7[%c19, %c0_123], %123 {strides = array<i32>} : memref<160x8xf32, #tpu.memory_space<vmem>>, vector<1x8xf32>,
      %c1_i32_124 = arith.constant 1 : i32
      %125 = arith.addi %24, %c1_i32_124 : i32
      %c0_125 = arith.constant 0 : index
      %c0_126 = arith.constant 0 : index
      %126 = arith.index_cast %125 : i32 to index
      %c3_127 = arith.constant 3 : index
      %127 = vector.load %arg1[%c0_125, %c0_126, %126, %c3_127] : memref<1x12x11x11xf32, #tpu.memory_space<vmem>>, vector<1x1x1x8xf32>
      %128 = vector.shape_cast %127 : vector<1x1x1x8xf32> to vector<1x8xf32>
      %c20 = arith.constant 20 : index
      %c0_128 = arith.constant 0 : index
      %129 = vector.load %arg7[%c20, %c0_128] : memref<160x8xf32, #tpu.memory_space<vmem>>, vector<1x8xf32>
      tpu.vector_store %arg7[%c20, %c0_128], %128 {strides = array<i32>} : memref<160x8xf32, #tpu.memory_space<vmem>>, vector<1x8xf32>,
      %c1_i32_129 = arith.constant 1 : i32
      %130 = arith.addi %24, %c1_i32_129 : i32
      %c0_130 = arith.constant 0 : index
      %c2_131 = arith.constant 2 : index
      %131 = arith.index_cast %130 : i32 to index
      %c0_132 = arith.constant 0 : index
      %132 = vector.load %arg1[%c0_130, %c2_131, %131, %c0_132] : memref<1x12x11x11xf32, #tpu.memory_space<vmem>>, vector<1x1x1x8xf32>
      %133 = vector.shape_cast %132 : vector<1x1x1x8xf32> to vector<1x8xf32>
      %c21 = arith.constant 21 : index
      %c0_133 = arith.constant 0 : index
      %134 = vector.load %arg7[%c21, %c0_133] : memref<160x8xf32, #tpu.memory_space<vmem>>, vector<1x8xf32>
      tpu.vector_store %arg7[%c21, %c0_133], %133 {strides = array<i32>} : memref<160x8xf32, #tpu.memory_space<vmem>>, vector<1x8xf32>,
      %c1_i32_134 = arith.constant 1 : i32
      %135 = arith.addi %24, %c1_i32_134 : i32
      %c0_135 = arith.constant 0 : index
      %c3_136 = arith.constant 3 : index
      %136 = arith.index_cast %135 : i32 to index
      %c0_137 = arith.constant 0 : index
      %137 = vector.load %arg1[%c0_135, %c3_136, %136, %c0_137] : memref<1x12x11x11xf32, #tpu.memory_space<vmem>>, vector<1x1x1x8xf32>
      %138 = vector.shape_cast %137 : vector<1x1x1x8xf32> to vector<1x8xf32>
      %c22 = arith.constant 22 : index
      %c0_138 = arith.constant 0 : index
      %139 = vector.load %arg7[%c22, %c0_138] : memref<160x8xf32, #tpu.memory_space<vmem>>, vector<1x8xf32>
      tpu.vector_store %arg7[%c22, %c0_138], %138 {strides = array<i32>} : memref<160x8xf32, #tpu.memory_space<vmem>>, vector<1x8xf32>,
      %c1_i32_139 = arith.constant 1 : i32
      %140 = arith.addi %24, %c1_i32_139 : i32
      %c0_140 = arith.constant 0 : index
      %c2_141 = arith.constant 2 : index
      %141 = arith.index_cast %140 : i32 to index
      %c1_142 = arith.constant 1 : index
      %142 = vector.load %arg1[%c0_140, %c2_141, %141, %c1_142] : memref<1x12x11x11xf32, #tpu.memory_space<vmem>>, vector<1x1x1x8xf32>
      %143 = vector.shape_cast %142 : vector<1x1x1x8xf32> to vector<1x8xf32>
      %c23 = arith.constant 23 : index
      %c0_143 = arith.constant 0 : index
      %144 = vector.load %arg7[%c23, %c0_143] : memref<160x8xf32, #tpu.memory_space<vmem>>, vector<1x8xf32>
      tpu.vector_store %arg7[%c23, %c0_143], %143 {strides = array<i32>} : memref<160x8xf32, #tpu.memory_space<vmem>>, vector<1x8xf32>,
      %c1_i32_144 = arith.constant 1 : i32
      %145 = arith.addi %24, %c1_i32_144 : i32
      %c0_145 = arith.constant 0 : index
      %c3_146 = arith.constant 3 : index
      %146 = arith.index_cast %145 : i32 to index
      %c1_147 = arith.constant 1 : index
      %147 = vector.load %arg1[%c0_145, %c3_146, %146, %c1_147] : memref<1x12x11x11xf32, #tpu.memory_space<vmem>>, vector<1x1x1x8xf32>
      %148 = vector.shape_cast %147 : vector<1x1x1x8xf32> to vector<1x8xf32>
      %c24 = arith.constant 24 : index
      %c0_148 = arith.constant 0 : index
      %149 = vector.load %arg7[%c24, %c0_148] : memref<160x8xf32, #tpu.memory_space<vmem>>, vector<1x8xf32>
      tpu.vector_store %arg7[%c24, %c0_148], %148 {strides = array<i32>} : memref<160x8xf32, #tpu.memory_space<vmem>>, vector<1x8xf32>,
      %c1_i32_149 = arith.constant 1 : i32
      %150 = arith.addi %24, %c1_i32_149 : i32
      %c0_150 = arith.constant 0 : index
      %c2_151 = arith.constant 2 : index
      %151 = arith.index_cast %150 : i32 to index
      %c2_152 = arith.constant 2 : index
      %152 = vector.load %arg1[%c0_150, %c2_151, %151, %c2_152] : memref<1x12x11x11xf32, #tpu.memory_space<vmem>>, vector<1x1x1x8xf32>
      %153 = vector.shape_cast %152 : vector<1x1x1x8xf32> to vector<1x8xf32>
      %c25 = arith.constant 25 : index
      %c0_153 = arith.constant 0 : index
      %154 = vector.load %arg7[%c25, %c0_153] : memref<160x8xf32, #tpu.memory_space<vmem>>, vector<1x8xf32>
      tpu.vector_store %arg7[%c25, %c0_153], %153 {strides = array<i32>} : memref<160x8xf32, #tpu.memory_space<vmem>>, vector<1x8xf32>,
      %c1_i32_154 = arith.constant 1 : i32
      %155 = arith.addi %24, %c1_i32_154 : i32
      %c0_155 = arith.constant 0 : index
      %c3_156 = arith.constant 3 : index
      %156 = arith.index_cast %155 : i32 to index
      %c2_157 = arith.constant 2 : index
      %157 = vector.load %arg1[%c0_155, %c3_156, %156, %c2_157] : memref<1x12x11x11xf32, #tpu.memory_space<vmem>>, vector<1x1x1x8xf32>
      %158 = vector.shape_cast %157 : vector<1x1x1x8xf32> to vector<1x8xf32>
      %c26 = arith.constant 26 : index
      %c0_158 = arith.constant 0 : index
      %159 = vector.load %arg7[%c26, %c0_158] : memref<160x8xf32, #tpu.memory_space<vmem>>, vector<1x8xf32>
      tpu.vector_store %arg7[%c26, %c0_158], %158 {strides = array<i32>} : memref<160x8xf32, #tpu.memory_space<vmem>>, vector<1x8xf32>,
      %c1_i32_159 = arith.constant 1 : i32
      %160 = arith.addi %24, %c1_i32_159 : i32
      %c0_160 = arith.constant 0 : index
      %c2_161 = arith.constant 2 : index
      %161 = arith.index_cast %160 : i32 to index
      %c3_162 = arith.constant 3 : index
      %162 = vector.load %arg1[%c0_160, %c2_161, %161, %c3_162] : memref<1x12x11x11xf32, #tpu.memory_space<vmem>>, vector<1x1x1x8xf32>
      %163 = vector.shape_cast %162 : vector<1x1x1x8xf32> to vector<1x8xf32>
      %c27 = arith.constant 27 : index
      %c0_163 = arith.constant 0 : index
      %164 = vector.load %arg7[%c27, %c0_163] : memref<160x8xf32, #tpu.memory_space<vmem>>, vector<1x8xf32>
      tpu.vector_store %arg7[%c27, %c0_163], %163 {strides = array<i32>} : memref<160x8xf32, #tpu.memory_space<vmem>>, vector<1x8xf32>,
      %c2_i32 = arith.constant 2 : i32
      %165 = arith.addi %24, %c2_i32 : i32
      %c0_164 = arith.constant 0 : index
      %c0_165 = arith.constant 0 : index
      %166 = arith.index_cast %165 : i32 to index
      %c0_166 = arith.constant 0 : index
      %167 = vector.load %arg1[%c0_164, %c0_165, %166, %c0_166] : memref<1x12x11x11xf32, #tpu.memory_space<vmem>>, vector<1x1x1x8xf32>
      %168 = vector.shape_cast %167 : vector<1x1x1x8xf32> to vector<1x8xf32>
      %c28 = arith.constant 28 : index
      %c0_167 = arith.constant 0 : index
      %169 = vector.load %arg7[%c28, %c0_167] : memref<160x8xf32, #tpu.memory_space<vmem>>, vector<1x8xf32>
      tpu.vector_store %arg7[%c28, %c0_167], %168 {strides = array<i32>} : memref<160x8xf32, #tpu.memory_space<vmem>>, vector<1x8xf32>,
      %c2_i32_168 = arith.constant 2 : i32
      %170 = arith.addi %24, %c2_i32_168 : i32
      %c0_169 = arith.constant 0 : index
      %c1_170 = arith.constant 1 : index
      %171 = arith.index_cast %170 : i32 to index
      %c0_171 = arith.constant 0 : index
      %172 = vector.load %arg1[%c0_169, %c1_170, %171, %c0_171] : memref<1x12x11x11xf32, #tpu.memory_space<vmem>>, vector<1x1x1x8xf32>
      %173 = vector.shape_cast %172 : vector<1x1x1x8xf32> to vector<1x8xf32>
      %c29 = arith.constant 29 : index
      %c0_172 = arith.constant 0 : index
      %174 = vector.load %arg7[%c29, %c0_172] : memref<160x8xf32, #tpu.memory_space<vmem>>, vector<1x8xf32>
      tpu.vector_store %arg7[%c29, %c0_172], %173 {strides = array<i32>} : memref<160x8xf32, #tpu.memory_space<vmem>>, vector<1x8xf32>,
      %c2_i32_173 = arith.constant 2 : i32
      %175 = arith.addi %24, %c2_i32_173 : i32
      %c0_174 = arith.constant 0 : index
      %c0_175 = arith.constant 0 : index
      %176 = arith.index_cast %175 : i32 to index
      %c1_176 = arith.constant 1 : index
      %177 = vector.load %arg1[%c0_174, %c0_175, %176, %c1_176] : memref<1x12x11x11xf32, #tpu.memory_space<vmem>>, vector<1x1x1x8xf32>
      %178 = vector.shape_cast %177 : vector<1x1x1x8xf32> to vector<1x8xf32>
      %c30 = arith.constant 30 : index
      %c0_177 = arith.constant 0 : index
      %179 = vector.load %arg7[%c30, %c0_177] : memref<160x8xf32, #tpu.memory_space<vmem>>, vector<1x8xf32>
      tpu.vector_store %arg7[%c30, %c0_177], %178 {strides = array<i32>} : memref<160x8xf32, #tpu.memory_space<vmem>>, vector<1x8xf32>,
      %c2_i32_178 = arith.constant 2 : i32
      %180 = arith.addi %24, %c2_i32_178 : i32
      %c0_179 = arith.constant 0 : index
      %c1_180 = arith.constant 1 : index
      %181 = arith.index_cast %180 : i32 to index
      %c1_181 = arith.constant 1 : index
      %182 = vector.load %arg1[%c0_179, %c1_180, %181, %c1_181] : memref<1x12x11x11xf32, #tpu.memory_space<vmem>>, vector<1x1x1x8xf32>
      %183 = vector.shape_cast %182 : vector<1x1x1x8xf32> to vector<1x8xf32>
      %c31 = arith.constant 31 : index
      %c0_182 = arith.constant 0 : index
      %184 = vector.load %arg7[%c31, %c0_182] : memref<160x8xf32, #tpu.memory_space<vmem>>, vector<1x8xf32>
      tpu.vector_store %arg7[%c31, %c0_182], %183 {strides = array<i32>} : memref<160x8xf32, #tpu.memory_space<vmem>>, vector<1x8xf32>,
      %c2_i32_183 = arith.constant 2 : i32
      %185 = arith.addi %24, %c2_i32_183 : i32
      %c0_184 = arith.constant 0 : index
      %c0_185 = arith.constant 0 : index
      %186 = arith.index_cast %185 : i32 to index
      %c2_186 = arith.constant 2 : index
      %187 = vector.load %arg1[%c0_184, %c0_185, %186, %c2_186] : memref<1x12x11x11xf32, #tpu.memory_space<vmem>>, vector<1x1x1x8xf32>
      %188 = vector.shape_cast %187 : vector<1x1x1x8xf32> to vector<1x8xf32>
      %c32 = arith.constant 32 : index
      %c0_187 = arith.constant 0 : index
      %189 = vector.load %arg7[%c32, %c0_187] : memref<160x8xf32, #tpu.memory_space<vmem>>, vector<1x8xf32>
      tpu.vector_store %arg7[%c32, %c0_187], %188 {strides = array<i32>} : memref<160x8xf32, #tpu.memory_space<vmem>>, vector<1x8xf32>,
      %c2_i32_188 = arith.constant 2 : i32
      %190 = arith.addi %24, %c2_i32_188 : i32
      %c0_189 = arith.constant 0 : index
      %c1_190 = arith.constant 1 : index
      %191 = arith.index_cast %190 : i32 to index
      %c2_191 = arith.constant 2 : index
      %192 = vector.load %arg1[%c0_189, %c1_190, %191, %c2_191] : memref<1x12x11x11xf32, #tpu.memory_space<vmem>>, vector<1x1x1x8xf32>
      %193 = vector.shape_cast %192 : vector<1x1x1x8xf32> to vector<1x8xf32>
      %c33 = arith.constant 33 : index
      %c0_192 = arith.constant 0 : index
      %194 = vector.load %arg7[%c33, %c0_192] : memref<160x8xf32, #tpu.memory_space<vmem>>, vector<1x8xf32>
      tpu.vector_store %arg7[%c33, %c0_192], %193 {strides = array<i32>} : memref<160x8xf32, #tpu.memory_space<vmem>>, vector<1x8xf32>,
      %c2_i32_193 = arith.constant 2 : i32
      %195 = arith.addi %24, %c2_i32_193 : i32
      %c0_194 = arith.constant 0 : index
      %c0_195 = arith.constant 0 : index
      %196 = arith.index_cast %195 : i32 to index
      %c3_196 = arith.constant 3 : index
      %197 = vector.load %arg1[%c0_194, %c0_195, %196, %c3_196] : memref<1x12x11x11xf32, #tpu.memory_space<vmem>>, vector<1x1x1x8xf32>
      %198 = vector.shape_cast %197 : vector<1x1x1x8xf32> to vector<1x8xf32>
      %c34 = arith.constant 34 : index
      %c0_197 = arith.constant 0 : index
      %199 = vector.load %arg7[%c34, %c0_197] : memref<160x8xf32, #tpu.memory_space<vmem>>, vector<1x8xf32>
      tpu.vector_store %arg7[%c34, %c0_197], %198 {strides = array<i32>} : memref<160x8xf32, #tpu.memory_space<vmem>>, vector<1x8xf32>,
      %c2_i32_198 = arith.constant 2 : i32
      %200 = arith.addi %24, %c2_i32_198 : i32
      %c0_199 = arith.constant 0 : index
      %c2_200 = arith.constant 2 : index
      %201 = arith.index_cast %200 : i32 to index
      %c0_201 = arith.constant 0 : index
      %202 = vector.load %arg1[%c0_199, %c2_200, %201, %c0_201] : memref<1x12x11x11xf32, #tpu.memory_space<vmem>>, vector<1x1x1x8xf32>
      %203 = vector.shape_cast %202 : vector<1x1x1x8xf32> to vector<1x8xf32>
      %c35 = arith.constant 35 : index
      %c0_202 = arith.constant 0 : index
      %204 = vector.load %arg7[%c35, %c0_202] : memref<160x8xf32, #tpu.memory_space<vmem>>, vector<1x8xf32>
      tpu.vector_store %arg7[%c35, %c0_202], %203 {strides = array<i32>} : memref<160x8xf32, #tpu.memory_space<vmem>>, vector<1x8xf32>,
      %c2_i32_203 = arith.constant 2 : i32
      %205 = arith.addi %24, %c2_i32_203 : i32
      %c0_204 = arith.constant 0 : index
      %c3_205 = arith.constant 3 : index
      %206 = arith.index_cast %205 : i32 to index
      %c0_206 = arith.constant 0 : index
      %207 = vector.load %arg1[%c0_204, %c3_205, %206, %c0_206] : memref<1x12x11x11xf32, #tpu.memory_space<vmem>>, vector<1x1x1x8xf32>
      %208 = vector.shape_cast %207 : vector<1x1x1x8xf32> to vector<1x8xf32>
      %c36 = arith.constant 36 : index
      %c0_207 = arith.constant 0 : index
      %209 = vector.load %arg7[%c36, %c0_207] : memref<160x8xf32, #tpu.memory_space<vmem>>, vector<1x8xf32>
      tpu.vector_store %arg7[%c36, %c0_207], %208 {strides = array<i32>} : memref<160x8xf32, #tpu.memory_space<vmem>>, vector<1x8xf32>,
      %c2_i32_208 = arith.constant 2 : i32
      %210 = arith.addi %24, %c2_i32_208 : i32
      %c0_209 = arith.constant 0 : index
      %c2_210 = arith.constant 2 : index
      %211 = arith.index_cast %210 : i32 to index
      %c1_211 = arith.constant 1 : index
      %212 = vector.load %arg1[%c0_209, %c2_210, %211, %c1_211] : memref<1x12x11x11xf32, #tpu.memory_space<vmem>>, vector<1x1x1x8xf32>
      %213 = vector.shape_cast %212 : vector<1x1x1x8xf32> to vector<1x8xf32>
      %c37 = arith.constant 37 : index
      %c0_212 = arith.constant 0 : index
      %214 = vector.load %arg7[%c37, %c0_212] : memref<160x8xf32, #tpu.memory_space<vmem>>, vector<1x8xf32>
      tpu.vector_store %arg7[%c37, %c0_212], %213 {strides = array<i32>} : memref<160x8xf32, #tpu.memory_space<vmem>>, vector<1x8xf32>,
      %c2_i32_213 = arith.constant 2 : i32
      %215 = arith.addi %24, %c2_i32_213 : i32
      %c0_214 = arith.constant 0 : index
      %c3_215 = arith.constant 3 : index
      %216 = arith.index_cast %215 : i32 to index
      %c1_216 = arith.constant 1 : index
      %217 = vector.load %arg1[%c0_214, %c3_215, %216, %c1_216] : memref<1x12x11x11xf32, #tpu.memory_space<vmem>>, vector<1x1x1x8xf32>
      %218 = vector.shape_cast %217 : vector<1x1x1x8xf32> to vector<1x8xf32>
      %c38 = arith.constant 38 : index
      %c0_217 = arith.constant 0 : index
      %219 = vector.load %arg7[%c38, %c0_217] : memref<160x8xf32, #tpu.memory_space<vmem>>, vector<1x8xf32>
      tpu.vector_store %arg7[%c38, %c0_217], %218 {strides = array<i32>} : memref<160x8xf32, #tpu.memory_space<vmem>>, vector<1x8xf32>,
      %c2_i32_218 = arith.constant 2 : i32
      %220 = arith.addi %24, %c2_i32_218 : i32
      %c0_219 = arith.constant 0 : index
      %c2_220 = arith.constant 2 : index
      %221 = arith.index_cast %220 : i32 to index
      %c2_221 = arith.constant 2 : index
      %222 = vector.load %arg1[%c0_219, %c2_220, %221, %c2_221] : memref<1x12x11x11xf32, #tpu.memory_space<vmem>>, vector<1x1x1x8xf32>
      %223 = vector.shape_cast %222 : vector<1x1x1x8xf32> to vector<1x8xf32>
      %c39 = arith.constant 39 : index
      %c0_222 = arith.constant 0 : index
      %224 = vector.load %arg7[%c39, %c0_222] : memref<160x8xf32, #tpu.memory_space<vmem>>, vector<1x8xf32>
      tpu.vector_store %arg7[%c39, %c0_222], %223 {strides = array<i32>} : memref<160x8xf32, #tpu.memory_space<vmem>>, vector<1x8xf32>,
      %c2_i32_223 = arith.constant 2 : i32
      %225 = arith.addi %24, %c2_i32_223 : i32
      %c0_224 = arith.constant 0 : index
      %c3_225 = arith.constant 3 : index
      %226 = arith.index_cast %225 : i32 to index
      %c2_226 = arith.constant 2 : index
      %227 = vector.load %arg1[%c0_224, %c3_225, %226, %c2_226] : memref<1x12x11x11xf32, #tpu.memory_space<vmem>>, vector<1x1x1x8xf32>
      %228 = vector.shape_cast %227 : vector<1x1x1x8xf32> to vector<1x8xf32>
      %c40 = arith.constant 40 : index
      %c0_227 = arith.constant 0 : index
      %229 = vector.load %arg7[%c40, %c0_227] : memref<160x8xf32, #tpu.memory_space<vmem>>, vector<1x8xf32>
      tpu.vector_store %arg7[%c40, %c0_227], %228 {strides = array<i32>} : memref<160x8xf32, #tpu.memory_space<vmem>>, vector<1x8xf32>,
      %c2_i32_228 = arith.constant 2 : i32
      %230 = arith.addi %24, %c2_i32_228 : i32
      %c0_229 = arith.constant 0 : index
      %c2_230 = arith.constant 2 : index
      %231 = arith.index_cast %230 : i32 to index
      %c3_231 = arith.constant 3 : index
      %232 = vector.load %arg1[%c0_229, %c2_230, %231, %c3_231] : memref<1x12x11x11xf32, #tpu.memory_space<vmem>>, vector<1x1x1x8xf32>
      %233 = vector.shape_cast %232 : vector<1x1x1x8xf32> to vector<1x8xf32>
      %c41 = arith.constant 41 : index
      %c0_232 = arith.constant 0 : index
      %234 = vector.load %arg7[%c41, %c0_232] : memref<160x8xf32, #tpu.memory_space<vmem>>, vector<1x8xf32>
      tpu.vector_store %arg7[%c41, %c0_232], %233 {strides = array<i32>} : memref<160x8xf32, #tpu.memory_space<vmem>>, vector<1x8xf32>,
      %c3_i32 = arith.constant 3 : i32
      %235 = arith.addi %24, %c3_i32 : i32
      %c0_233 = arith.constant 0 : index
      %c0_234 = arith.constant 0 : index
      %236 = arith.index_cast %235 : i32 to index
      %c0_235 = arith.constant 0 : index
      %237 = vector.load %arg1[%c0_233, %c0_234, %236, %c0_235] : memref<1x12x11x11xf32, #tpu.memory_space<vmem>>, vector<1x1x1x8xf32>
      %238 = vector.shape_cast %237 : vector<1x1x1x8xf32> to vector<1x8xf32>
      %c42 = arith.constant 42 : index
      %c0_236 = arith.constant 0 : index
      %239 = vector.load %arg7[%c42, %c0_236] : memref<160x8xf32, #tpu.memory_space<vmem>>, vector<1x8xf32>
      tpu.vector_store %arg7[%c42, %c0_236], %238 {strides = array<i32>} : memref<160x8xf32, #tpu.memory_space<vmem>>, vector<1x8xf32>,
      %c3_i32_237 = arith.constant 3 : i32
      %240 = arith.addi %24, %c3_i32_237 : i32
      %c0_238 = arith.constant 0 : index
      %c1_239 = arith.constant 1 : index
      %241 = arith.index_cast %240 : i32 to index
      %c0_240 = arith.constant 0 : index
      %242 = vector.load %arg1[%c0_238, %c1_239, %241, %c0_240] : memref<1x12x11x11xf32, #tpu.memory_space<vmem>>, vector<1x1x1x8xf32>
      %243 = vector.shape_cast %242 : vector<1x1x1x8xf32> to vector<1x8xf32>
      %c43 = arith.constant 43 : index
      %c0_241 = arith.constant 0 : index
      %244 = vector.load %arg7[%c43, %c0_241] : memref<160x8xf32, #tpu.memory_space<vmem>>, vector<1x8xf32>
      tpu.vector_store %arg7[%c43, %c0_241], %243 {strides = array<i32>} : memref<160x8xf32, #tpu.memory_space<vmem>>, vector<1x8xf32>,
      %c3_i32_242 = arith.constant 3 : i32
      %245 = arith.addi %24, %c3_i32_242 : i32
      %c0_243 = arith.constant 0 : index
      %c0_244 = arith.constant 0 : index
      %246 = arith.index_cast %245 : i32 to index
      %c1_245 = arith.constant 1 : index
      %247 = vector.load %arg1[%c0_243, %c0_244, %246, %c1_245] : memref<1x12x11x11xf32, #tpu.memory_space<vmem>>, vector<1x1x1x8xf32>
      %248 = vector.shape_cast %247 : vector<1x1x1x8xf32> to vector<1x8xf32>
      %c44 = arith.constant 44 : index
      %c0_246 = arith.constant 0 : index
      %249 = vector.load %arg7[%c44, %c0_246] : memref<160x8xf32, #tpu.memory_space<vmem>>, vector<1x8xf32>
      tpu.vector_store %arg7[%c44, %c0_246], %248 {strides = array<i32>} : memref<160x8xf32, #tpu.memory_space<vmem>>, vector<1x8xf32>,
      %c3_i32_247 = arith.constant 3 : i32
      %250 = arith.addi %24, %c3_i32_247 : i32
      %c0_248 = arith.constant 0 : index
      %c1_249 = arith.constant 1 : index
      %251 = arith.index_cast %250 : i32 to index
      %c1_250 = arith.constant 1 : index
      %252 = vector.load %arg1[%c0_248, %c1_249, %251, %c1_250] : memref<1x12x11x11xf32, #tpu.memory_space<vmem>>, vector<1x1x1x8xf32>
      %253 = vector.shape_cast %252 : vector<1x1x1x8xf32> to vector<1x8xf32>
      %c45 = arith.constant 45 : index
      %c0_251 = arith.constant 0 : index
      %254 = vector.load %arg7[%c45, %c0_251] : memref<160x8xf32, #tpu.memory_space<vmem>>, vector<1x8xf32>
      tpu.vector_store %arg7[%c45, %c0_251], %253 {strides = array<i32>} : memref<160x8xf32, #tpu.memory_space<vmem>>, vector<1x8xf32>,
      %c3_i32_252 = arith.constant 3 : i32
      %255 = arith.addi %24, %c3_i32_252 : i32
      %c0_253 = arith.constant 0 : index
      %c0_254 = arith.constant 0 : index
      %256 = arith.index_cast %255 : i32 to index
      %c2_255 = arith.constant 2 : index
      %257 = vector.load %arg1[%c0_253, %c0_254, %256, %c2_255] : memref<1x12x11x11xf32, #tpu.memory_space<vmem>>, vector<1x1x1x8xf32>
      %258 = vector.shape_cast %257 : vector<1x1x1x8xf32> to vector<1x8xf32>
      %c46 = arith.constant 46 : index
      %c0_256 = arith.constant 0 : index
      %259 = vector.load %arg7[%c46, %c0_256] : memref<160x8xf32, #tpu.memory_space<vmem>>, vector<1x8xf32>
      tpu.vector_store %arg7[%c46, %c0_256], %258 {strides = array<i32>} : memref<160x8xf32, #tpu.memory_space<vmem>>, vector<1x8xf32>,
      %c3_i32_257 = arith.constant 3 : i32
      %260 = arith.addi %24, %c3_i32_257 : i32
      %c0_258 = arith.constant 0 : index
      %c1_259 = arith.constant 1 : index
      %261 = arith.index_cast %260 : i32 to index
      %c2_260 = arith.constant 2 : index
      %262 = vector.load %arg1[%c0_258, %c1_259, %261, %c2_260] : memref<1x12x11x11xf32, #tpu.memory_space<vmem>>, vector<1x1x1x8xf32>
      %263 = vector.shape_cast %262 : vector<1x1x1x8xf32> to vector<1x8xf32>
      %c47 = arith.constant 47 : index
      %c0_261 = arith.constant 0 : index
      %264 = vector.load %arg7[%c47, %c0_261] : memref<160x8xf32, #tpu.memory_space<vmem>>, vector<1x8xf32>
      tpu.vector_store %arg7[%c47, %c0_261], %263 {strides = array<i32>} : memref<160x8xf32, #tpu.memory_space<vmem>>, vector<1x8xf32>,
      %c3_i32_262 = arith.constant 3 : i32
      %265 = arith.addi %24, %c3_i32_262 : i32
      %c0_263 = arith.constant 0 : index
      %c0_264 = arith.constant 0 : index
      %266 = arith.index_cast %265 : i32 to index
      %c3_265 = arith.constant 3 : index
      %267 = vector.load %arg1[%c0_263, %c0_264, %266, %c3_265] : memref<1x12x11x11xf32, #tpu.memory_space<vmem>>, vector<1x1x1x8xf32>
      %268 = vector.shape_cast %267 : vector<1x1x1x8xf32> to vector<1x8xf32>
      %c48 = arith.constant 48 : index
      %c0_266 = arith.constant 0 : index
      %269 = vector.load %arg7[%c48, %c0_266] : memref<160x8xf32, #tpu.memory_space<vmem>>, vector<1x8xf32>
      tpu.vector_store %arg7[%c48, %c0_266], %268 {strides = array<i32>} : memref<160x8xf32, #tpu.memory_space<vmem>>, vector<1x8xf32>,
      %c0_i32_267 = arith.constant 0 : i32
      %270 = arith.addi %24, %c0_i32_267 : i32
      %c0_268 = arith.constant 0 : index
      %c4_269 = arith.constant 4 : index
      %271 = arith.index_cast %270 : i32 to index
      %c0_270 = arith.constant 0 : index
      %272 = vector.load %arg1[%c0_268, %c4_269, %271, %c0_270] : memref<1x12x11x11xf32, #tpu.memory_space<vmem>>, vector<1x1x1x8xf32>
      %273 = vector.shape_cast %272 : vector<1x1x1x8xf32> to vector<1x8xf32>
      %c49 = arith.constant 49 : index
      %c0_271 = arith.constant 0 : index
      %274 = vector.load %arg7[%c49, %c0_271] : memref<160x8xf32, #tpu.memory_space<vmem>>, vector<1x8xf32>
      tpu.vector_store %arg7[%c49, %c0_271], %273 {strides = array<i32>} : memref<160x8xf32, #tpu.memory_space<vmem>>, vector<1x8xf32>,
      %c0_i32_272 = arith.constant 0 : i32
      %275 = arith.addi %24, %c0_i32_272 : i32
      %c0_273 = arith.constant 0 : index
      %c5_274 = arith.constant 5 : index
      %276 = arith.index_cast %275 : i32 to index
      %c0_275 = arith.constant 0 : index
      %277 = vector.load %arg1[%c0_273, %c5_274, %276, %c0_275] : memref<1x12x11x11xf32, #tpu.memory_space<vmem>>, vector<1x1x1x8xf32>
      %278 = vector.shape_cast %277 : vector<1x1x1x8xf32> to vector<1x8xf32>
      %c50 = arith.constant 50 : index
      %c0_276 = arith.constant 0 : index
      %279 = vector.load %arg7[%c50, %c0_276] : memref<160x8xf32, #tpu.memory_space<vmem>>, vector<1x8xf32>
      tpu.vector_store %arg7[%c50, %c0_276], %278 {strides = array<i32>} : memref<160x8xf32, #tpu.memory_space<vmem>>, vector<1x8xf32>,
      %c0_i32_277 = arith.constant 0 : i32
      %280 = arith.addi %24, %c0_i32_277 : i32
      %c0_278 = arith.constant 0 : index
      %c4_279 = arith.constant 4 : index
      %281 = arith.index_cast %280 : i32 to index
      %c1_280 = arith.constant 1 : index
      %282 = vector.load %arg1[%c0_278, %c4_279, %281, %c1_280] : memref<1x12x11x11xf32, #tpu.memory_space<vmem>>, vector<1x1x1x8xf32>
      %283 = vector.shape_cast %282 : vector<1x1x1x8xf32> to vector<1x8xf32>
      %c51 = arith.constant 51 : index
      %c0_281 = arith.constant 0 : index
      %284 = vector.load %arg7[%c51, %c0_281] : memref<160x8xf32, #tpu.memory_space<vmem>>, vector<1x8xf32>
      tpu.vector_store %arg7[%c51, %c0_281], %283 {strides = array<i32>} : memref<160x8xf32, #tpu.memory_space<vmem>>, vector<1x8xf32>,
      %c0_i32_282 = arith.constant 0 : i32
      %285 = arith.addi %24, %c0_i32_282 : i32
      %c0_283 = arith.constant 0 : index
      %c5_284 = arith.constant 5 : index
      %286 = arith.index_cast %285 : i32 to index
      %c1_285 = arith.constant 1 : index
      %287 = vector.load %arg1[%c0_283, %c5_284, %286, %c1_285] : memref<1x12x11x11xf32, #tpu.memory_space<vmem>>, vector<1x1x1x8xf32>
      %288 = vector.shape_cast %287 : vector<1x1x1x8xf32> to vector<1x8xf32>
      %c52 = arith.constant 52 : index
      %c0_286 = arith.constant 0 : index
      %289 = vector.load %arg7[%c52, %c0_286] : memref<160x8xf32, #tpu.memory_space<vmem>>, vector<1x8xf32>
      tpu.vector_store %arg7[%c52, %c0_286], %288 {strides = array<i32>} : memref<160x8xf32, #tpu.memory_space<vmem>>, vector<1x8xf32>,
      %c0_i32_287 = arith.constant 0 : i32
      %290 = arith.addi %24, %c0_i32_287 : i32
      %c0_288 = arith.constant 0 : index
      %c4_289 = arith.constant 4 : index
      %291 = arith.index_cast %290 : i32 to index
      %c2_290 = arith.constant 2 : index
      %292 = vector.load %arg1[%c0_288, %c4_289, %291, %c2_290] : memref<1x12x11x11xf32, #tpu.memory_space<vmem>>, vector<1x1x1x8xf32>
      %293 = vector.shape_cast %292 : vector<1x1x1x8xf32> to vector<1x8xf32>
      %c53 = arith.constant 53 : index
      %c0_291 = arith.constant 0 : index
      %294 = vector.load %arg7[%c53, %c0_291] : memref<160x8xf32, #tpu.memory_space<vmem>>, vector<1x8xf32>
      tpu.vector_store %arg7[%c53, %c0_291], %293 {strides = array<i32>} : memref<160x8xf32, #tpu.memory_space<vmem>>, vector<1x8xf32>,
      %c0_i32_292 = arith.constant 0 : i32
      %295 = arith.addi %24, %c0_i32_292 : i32
      %c0_293 = arith.constant 0 : index
      %c5_294 = arith.constant 5 : index
      %296 = arith.index_cast %295 : i32 to index
      %c2_295 = arith.constant 2 : index
      %297 = vector.load %arg1[%c0_293, %c5_294, %296, %c2_295] : memref<1x12x11x11xf32, #tpu.memory_space<vmem>>, vector<1x1x1x8xf32>
      %298 = vector.shape_cast %297 : vector<1x1x1x8xf32> to vector<1x8xf32>
      %c54 = arith.constant 54 : index
      %c0_296 = arith.constant 0 : index
      %299 = vector.load %arg7[%c54, %c0_296] : memref<160x8xf32, #tpu.memory_space<vmem>>, vector<1x8xf32>
      tpu.vector_store %arg7[%c54, %c0_296], %298 {strides = array<i32>} : memref<160x8xf32, #tpu.memory_space<vmem>>, vector<1x8xf32>,
      %c0_i32_297 = arith.constant 0 : i32
      %300 = arith.addi %24, %c0_i32_297 : i32
      %c0_298 = arith.constant 0 : index
      %c4_299 = arith.constant 4 : index
      %301 = arith.index_cast %300 : i32 to index
      %c3_300 = arith.constant 3 : index
      %302 = vector.load %arg1[%c0_298, %c4_299, %301, %c3_300] : memref<1x12x11x11xf32, #tpu.memory_space<vmem>>, vector<1x1x1x8xf32>
      %303 = vector.shape_cast %302 : vector<1x1x1x8xf32> to vector<1x8xf32>
      %c55 = arith.constant 55 : index
      %c0_301 = arith.constant 0 : index
      %304 = vector.load %arg7[%c55, %c0_301] : memref<160x8xf32, #tpu.memory_space<vmem>>, vector<1x8xf32>
      tpu.vector_store %arg7[%c55, %c0_301], %303 {strides = array<i32>} : memref<160x8xf32, #tpu.memory_space<vmem>>, vector<1x8xf32>,
      %c0_i32_302 = arith.constant 0 : i32
      %305 = arith.addi %24, %c0_i32_302 : i32
      %c0_303 = arith.constant 0 : index
      %c6_304 = arith.constant 6 : index
      %306 = arith.index_cast %305 : i32 to index
      %c0_305 = arith.constant 0 : index
      %307 = vector.load %arg1[%c0_303, %c6_304, %306, %c0_305] : memref<1x12x11x11xf32, #tpu.memory_space<vmem>>, vector<1x1x1x8xf32>
      %308 = vector.shape_cast %307 : vector<1x1x1x8xf32> to vector<1x8xf32>
      %c56 = arith.constant 56 : index
      %c0_306 = arith.constant 0 : index
      %309 = vector.load %arg7[%c56, %c0_306] : memref<160x8xf32, #tpu.memory_space<vmem>>, vector<1x8xf32>
      tpu.vector_store %arg7[%c56, %c0_306], %308 {strides = array<i32>} : memref<160x8xf32, #tpu.memory_space<vmem>>, vector<1x8xf32>,
      %c0_i32_307 = arith.constant 0 : i32
      %310 = arith.addi %24, %c0_i32_307 : i32
      %c0_308 = arith.constant 0 : index
      %c7_309 = arith.constant 7 : index
      %311 = arith.index_cast %310 : i32 to index
      %c0_310 = arith.constant 0 : index
      %312 = vector.load %arg1[%c0_308, %c7_309, %311, %c0_310] : memref<1x12x11x11xf32, #tpu.memory_space<vmem>>, vector<1x1x1x8xf32>
      %313 = vector.shape_cast %312 : vector<1x1x1x8xf32> to vector<1x8xf32>
      %c57 = arith.constant 57 : index
      %c0_311 = arith.constant 0 : index
      %314 = vector.load %arg7[%c57, %c0_311] : memref<160x8xf32, #tpu.memory_space<vmem>>, vector<1x8xf32>
      tpu.vector_store %arg7[%c57, %c0_311], %313 {strides = array<i32>} : memref<160x8xf32, #tpu.memory_space<vmem>>, vector<1x8xf32>,
      %c0_i32_312 = arith.constant 0 : i32
      %315 = arith.addi %24, %c0_i32_312 : i32
      %c0_313 = arith.constant 0 : index
      %c6_314 = arith.constant 6 : index
      %316 = arith.index_cast %315 : i32 to index
      %c1_315 = arith.constant 1 : index
      %317 = vector.load %arg1[%c0_313, %c6_314, %316, %c1_315] : memref<1x12x11x11xf32, #tpu.memory_space<vmem>>, vector<1x1x1x8xf32>
      %318 = vector.shape_cast %317 : vector<1x1x1x8xf32> to vector<1x8xf32>
      %c58 = arith.constant 58 : index
      %c0_316 = arith.constant 0 : index
      %319 = vector.load %arg7[%c58, %c0_316] : memref<160x8xf32, #tpu.memory_space<vmem>>, vector<1x8xf32>
      tpu.vector_store %arg7[%c58, %c0_316], %318 {strides = array<i32>} : memref<160x8xf32, #tpu.memory_space<vmem>>, vector<1x8xf32>,
      %c0_i32_317 = arith.constant 0 : i32
      %320 = arith.addi %24, %c0_i32_317 : i32
      %c0_318 = arith.constant 0 : index
      %c7_319 = arith.constant 7 : index
      %321 = arith.index_cast %320 : i32 to index
      %c1_320 = arith.constant 1 : index
      %322 = vector.load %arg1[%c0_318, %c7_319, %321, %c1_320] : memref<1x12x11x11xf32, #tpu.memory_space<vmem>>, vector<1x1x1x8xf32>
      %323 = vector.shape_cast %322 : vector<1x1x1x8xf32> to vector<1x8xf32>
      %c59 = arith.constant 59 : index
      %c0_321 = arith.constant 0 : index
      %324 = vector.load %arg7[%c59, %c0_321] : memref<160x8xf32, #tpu.memory_space<vmem>>, vector<1x8xf32>
      tpu.vector_store %arg7[%c59, %c0_321], %323 {strides = array<i32>} : memref<160x8xf32, #tpu.memory_space<vmem>>, vector<1x8xf32>,
      %c0_i32_322 = arith.constant 0 : i32
      %325 = arith.addi %24, %c0_i32_322 : i32
      %c0_323 = arith.constant 0 : index
      %c6_324 = arith.constant 6 : index
      %326 = arith.index_cast %325 : i32 to index
      %c2_325 = arith.constant 2 : index
      %327 = vector.load %arg1[%c0_323, %c6_324, %326, %c2_325] : memref<1x12x11x11xf32, #tpu.memory_space<vmem>>, vector<1x1x1x8xf32>
      %328 = vector.shape_cast %327 : vector<1x1x1x8xf32> to vector<1x8xf32>
      %c60 = arith.constant 60 : index
      %c0_326 = arith.constant 0 : index
      %329 = vector.load %arg7[%c60, %c0_326] : memref<160x8xf32, #tpu.memory_space<vmem>>, vector<1x8xf32>
      tpu.vector_store %arg7[%c60, %c0_326], %328 {strides = array<i32>} : memref<160x8xf32, #tpu.memory_space<vmem>>, vector<1x8xf32>,
      %c0_i32_327 = arith.constant 0 : i32
      %330 = arith.addi %24, %c0_i32_327 : i32
      %c0_328 = arith.constant 0 : index
      %c7_329 = arith.constant 7 : index
      %331 = arith.index_cast %330 : i32 to index
      %c2_330 = arith.constant 2 : index
      %332 = vector.load %arg1[%c0_328, %c7_329, %331, %c2_330] : memref<1x12x11x11xf32, #tpu.memory_space<vmem>>, vector<1x1x1x8xf32>
      %333 = vector.shape_cast %332 : vector<1x1x1x8xf32> to vector<1x8xf32>
      %c61 = arith.constant 61 : index
      %c0_331 = arith.constant 0 : index
      %334 = vector.load %arg7[%c61, %c0_331] : memref<160x8xf32, #tpu.memory_space<vmem>>, vector<1x8xf32>
      tpu.vector_store %arg7[%c61, %c0_331], %333 {strides = array<i32>} : memref<160x8xf32, #tpu.memory_space<vmem>>, vector<1x8xf32>,
      %c0_i32_332 = arith.constant 0 : i32
      %335 = arith.addi %24, %c0_i32_332 : i32
      %c0_333 = arith.constant 0 : index
      %c6_334 = arith.constant 6 : index
      %336 = arith.index_cast %335 : i32 to index
      %c3_335 = arith.constant 3 : index
      %337 = vector.load %arg1[%c0_333, %c6_334, %336, %c3_335] : memref<1x12x11x11xf32, #tpu.memory_space<vmem>>, vector<1x1x1x8xf32>
      %338 = vector.shape_cast %337 : vector<1x1x1x8xf32> to vector<1x8xf32>
      %c62 = arith.constant 62 : index
      %c0_336 = arith.constant 0 : index
      %339 = vector.load %arg7[%c62, %c0_336] : memref<160x8xf32, #tpu.memory_space<vmem>>, vector<1x8xf32>
      tpu.vector_store %arg7[%c62, %c0_336], %338 {strides = array<i32>} : memref<160x8xf32, #tpu.memory_space<vmem>>, vector<1x8xf32>,
      %c1_i32_337 = arith.constant 1 : i32
      %340 = arith.addi %24, %c1_i32_337 : i32
      %c0_338 = arith.constant 0 : index
      %c4_339 = arith.constant 4 : index
      %341 = arith.index_cast %340 : i32 to index
      %c0_340 = arith.constant 0 : index
      %342 = vector.load %arg1[%c0_338, %c4_339, %341, %c0_340] : memref<1x12x11x11xf32, #tpu.memory_space<vmem>>, vector<1x1x1x8xf32>
      %343 = vector.shape_cast %342 : vector<1x1x1x8xf32> to vector<1x8xf32>
      %c63 = arith.constant 63 : index
      %c0_341 = arith.constant 0 : index
      %344 = vector.load %arg7[%c63, %c0_341] : memref<160x8xf32, #tpu.memory_space<vmem>>, vector<1x8xf32>
      tpu.vector_store %arg7[%c63, %c0_341], %343 {strides = array<i32>} : memref<160x8xf32, #tpu.memory_space<vmem>>, vector<1x8xf32>,
      %c1_i32_342 = arith.constant 1 : i32
      %345 = arith.addi %24, %c1_i32_342 : i32
      %c0_343 = arith.constant 0 : index
      %c5_344 = arith.constant 5 : index
      %346 = arith.index_cast %345 : i32 to index
      %c0_345 = arith.constant 0 : index
      %347 = vector.load %arg1[%c0_343, %c5_344, %346, %c0_345] : memref<1x12x11x11xf32, #tpu.memory_space<vmem>>, vector<1x1x1x8xf32>
      %348 = vector.shape_cast %347 : vector<1x1x1x8xf32> to vector<1x8xf32>
      %c64 = arith.constant 64 : index
      %c0_346 = arith.constant 0 : index
      %349 = vector.load %arg7[%c64, %c0_346] : memref<160x8xf32, #tpu.memory_space<vmem>>, vector<1x8xf32>
      tpu.vector_store %arg7[%c64, %c0_346], %348 {strides = array<i32>} : memref<160x8xf32, #tpu.memory_space<vmem>>, vector<1x8xf32>,
      %c1_i32_347 = arith.constant 1 : i32
      %350 = arith.addi %24, %c1_i32_347 : i32
      %c0_348 = arith.constant 0 : index
      %c4_349 = arith.constant 4 : index
      %351 = arith.index_cast %350 : i32 to index
      %c1_350 = arith.constant 1 : index
      %352 = vector.load %arg1[%c0_348, %c4_349, %351, %c1_350] : memref<1x12x11x11xf32, #tpu.memory_space<vmem>>, vector<1x1x1x8xf32>
      %353 = vector.shape_cast %352 : vector<1x1x1x8xf32> to vector<1x8xf32>
      %c65 = arith.constant 65 : index
      %c0_351 = arith.constant 0 : index
      %354 = vector.load %arg7[%c65, %c0_351] : memref<160x8xf32, #tpu.memory_space<vmem>>, vector<1x8xf32>
      tpu.vector_store %arg7[%c65, %c0_351], %353 {strides = array<i32>} : memref<160x8xf32, #tpu.memory_space<vmem>>, vector<1x8xf32>,
      %c1_i32_352 = arith.constant 1 : i32
      %355 = arith.addi %24, %c1_i32_352 : i32
      %c0_353 = arith.constant 0 : index
      %c5_354 = arith.constant 5 : index
      %356 = arith.index_cast %355 : i32 to index
      %c1_355 = arith.constant 1 : index
      %357 = vector.load %arg1[%c0_353, %c5_354, %356, %c1_355] : memref<1x12x11x11xf32, #tpu.memory_space<vmem>>, vector<1x1x1x8xf32>
      %358 = vector.shape_cast %357 : vector<1x1x1x8xf32> to vector<1x8xf32>
      %c66 = arith.constant 66 : index
      %c0_356 = arith.constant 0 : index
      %359 = vector.load %arg7[%c66, %c0_356] : memref<160x8xf32, #tpu.memory_space<vmem>>, vector<1x8xf32>
      tpu.vector_store %arg7[%c66, %c0_356], %358 {strides = array<i32>} : memref<160x8xf32, #tpu.memory_space<vmem>>, vector<1x8xf32>,
      %c1_i32_357 = arith.constant 1 : i32
      %360 = arith.addi %24, %c1_i32_357 : i32
      %c0_358 = arith.constant 0 : index
      %c4_359 = arith.constant 4 : index
      %361 = arith.index_cast %360 : i32 to index
      %c2_360 = arith.constant 2 : index
      %362 = vector.load %arg1[%c0_358, %c4_359, %361, %c2_360] : memref<1x12x11x11xf32, #tpu.memory_space<vmem>>, vector<1x1x1x8xf32>
      %363 = vector.shape_cast %362 : vector<1x1x1x8xf32> to vector<1x8xf32>
      %c67 = arith.constant 67 : index
      %c0_361 = arith.constant 0 : index
      %364 = vector.load %arg7[%c67, %c0_361] : memref<160x8xf32, #tpu.memory_space<vmem>>, vector<1x8xf32>
      tpu.vector_store %arg7[%c67, %c0_361], %363 {strides = array<i32>} : memref<160x8xf32, #tpu.memory_space<vmem>>, vector<1x8xf32>,
      %c1_i32_362 = arith.constant 1 : i32
      %365 = arith.addi %24, %c1_i32_362 : i32
      %c0_363 = arith.constant 0 : index
      %c5_364 = arith.constant 5 : index
      %366 = arith.index_cast %365 : i32 to index
      %c2_365 = arith.constant 2 : index
      %367 = vector.load %arg1[%c0_363, %c5_364, %366, %c2_365] : memref<1x12x11x11xf32, #tpu.memory_space<vmem>>, vector<1x1x1x8xf32>
      %368 = vector.shape_cast %367 : vector<1x1x1x8xf32> to vector<1x8xf32>
      %c68 = arith.constant 68 : index
      %c0_366 = arith.constant 0 : index
      %369 = vector.load %arg7[%c68, %c0_366] : memref<160x8xf32, #tpu.memory_space<vmem>>, vector<1x8xf32>
      tpu.vector_store %arg7[%c68, %c0_366], %368 {strides = array<i32>} : memref<160x8xf32, #tpu.memory_space<vmem>>, vector<1x8xf32>,
      %c1_i32_367 = arith.constant 1 : i32
      %370 = arith.addi %24, %c1_i32_367 : i32
      %c0_368 = arith.constant 0 : index
      %c4_369 = arith.constant 4 : index
      %371 = arith.index_cast %370 : i32 to index
      %c3_370 = arith.constant 3 : index
      %372 = vector.load %arg1[%c0_368, %c4_369, %371, %c3_370] : memref<1x12x11x11xf32, #tpu.memory_space<vmem>>, vector<1x1x1x8xf32>
      %373 = vector.shape_cast %372 : vector<1x1x1x8xf32> to vector<1x8xf32>
      %c69 = arith.constant 69 : index
      %c0_371 = arith.constant 0 : index
      %374 = vector.load %arg7[%c69, %c0_371] : memref<160x8xf32, #tpu.memory_space<vmem>>, vector<1x8xf32>
      tpu.vector_store %arg7[%c69, %c0_371], %373 {strides = array<i32>} : memref<160x8xf32, #tpu.memory_space<vmem>>, vector<1x8xf32>,
      %c1_i32_372 = arith.constant 1 : i32
      %375 = arith.addi %24, %c1_i32_372 : i32
      %c0_373 = arith.constant 0 : index
      %c6_374 = arith.constant 6 : index
      %376 = arith.index_cast %375 : i32 to index
      %c0_375 = arith.constant 0 : index
      %377 = vector.load %arg1[%c0_373, %c6_374, %376, %c0_375] : memref<1x12x11x11xf32, #tpu.memory_space<vmem>>, vector<1x1x1x8xf32>
      %378 = vector.shape_cast %377 : vector<1x1x1x8xf32> to vector<1x8xf32>
      %c70 = arith.constant 70 : index
      %c0_376 = arith.constant 0 : index
      %379 = vector.load %arg7[%c70, %c0_376] : memref<160x8xf32, #tpu.memory_space<vmem>>, vector<1x8xf32>
      tpu.vector_store %arg7[%c70, %c0_376], %378 {strides = array<i32>} : memref<160x8xf32, #tpu.memory_space<vmem>>, vector<1x8xf32>,
      %c1_i32_377 = arith.constant 1 : i32
      %380 = arith.addi %24, %c1_i32_377 : i32
      %c0_378 = arith.constant 0 : index
      %c7_379 = arith.constant 7 : index
      %381 = arith.index_cast %380 : i32 to index
      %c0_380 = arith.constant 0 : index
      %382 = vector.load %arg1[%c0_378, %c7_379, %381, %c0_380] : memref<1x12x11x11xf32, #tpu.memory_space<vmem>>, vector<1x1x1x8xf32>
      %383 = vector.shape_cast %382 : vector<1x1x1x8xf32> to vector<1x8xf32>
      %c71 = arith.constant 71 : index
      %c0_381 = arith.constant 0 : index
      %384 = vector.load %arg7[%c71, %c0_381] : memref<160x8xf32, #tpu.memory_space<vmem>>, vector<1x8xf32>
      tpu.vector_store %arg7[%c71, %c0_381], %383 {strides = array<i32>} : memref<160x8xf32, #tpu.memory_space<vmem>>, vector<1x8xf32>,
      %c1_i32_382 = arith.constant 1 : i32
      %385 = arith.addi %24, %c1_i32_382 : i32
      %c0_383 = arith.constant 0 : index
      %c6_384 = arith.constant 6 : index
      %386 = arith.index_cast %385 : i32 to index
      %c1_385 = arith.constant 1 : index
      %387 = vector.load %arg1[%c0_383, %c6_384, %386, %c1_385] : memref<1x12x11x11xf32, #tpu.memory_space<vmem>>, vector<1x1x1x8xf32>
      %388 = vector.shape_cast %387 : vector<1x1x1x8xf32> to vector<1x8xf32>
      %c72 = arith.constant 72 : index
      %c0_386 = arith.constant 0 : index
      %389 = vector.load %arg7[%c72, %c0_386] : memref<160x8xf32, #tpu.memory_space<vmem>>, vector<1x8xf32>
      tpu.vector_store %arg7[%c72, %c0_386], %388 {strides = array<i32>} : memref<160x8xf32, #tpu.memory_space<vmem>>, vector<1x8xf32>,
      %c1_i32_387 = arith.constant 1 : i32
      %390 = arith.addi %24, %c1_i32_387 : i32
      %c0_388 = arith.constant 0 : index
      %c7_389 = arith.constant 7 : index
      %391 = arith.index_cast %390 : i32 to index
      %c1_390 = arith.constant 1 : index
      %392 = vector.load %arg1[%c0_388, %c7_389, %391, %c1_390] : memref<1x12x11x11xf32, #tpu.memory_space<vmem>>, vector<1x1x1x8xf32>
      %393 = vector.shape_cast %392 : vector<1x1x1x8xf32> to vector<1x8xf32>
      %c73 = arith.constant 73 : index
      %c0_391 = arith.constant 0 : index
      %394 = vector.load %arg7[%c73, %c0_391] : memref<160x8xf32, #tpu.memory_space<vmem>>, vector<1x8xf32>
      tpu.vector_store %arg7[%c73, %c0_391], %393 {strides = array<i32>} : memref<160x8xf32, #tpu.memory_space<vmem>>, vector<1x8xf32>,
      %c1_i32_392 = arith.constant 1 : i32
      %395 = arith.addi %24, %c1_i32_392 : i32
      %c0_393 = arith.constant 0 : index
      %c6_394 = arith.constant 6 : index
      %396 = arith.index_cast %395 : i32 to index
      %c2_395 = arith.constant 2 : index
      %397 = vector.load %arg1[%c0_393, %c6_394, %396, %c2_395] : memref<1x12x11x11xf32, #tpu.memory_space<vmem>>, vector<1x1x1x8xf32>
      %398 = vector.shape_cast %397 : vector<1x1x1x8xf32> to vector<1x8xf32>
      %c74 = arith.constant 74 : index
      %c0_396 = arith.constant 0 : index
      %399 = vector.load %arg7[%c74, %c0_396] : memref<160x8xf32, #tpu.memory_space<vmem>>, vector<1x8xf32>
      tpu.vector_store %arg7[%c74, %c0_396], %398 {strides = array<i32>} : memref<160x8xf32, #tpu.memory_space<vmem>>, vector<1x8xf32>,
      %c1_i32_397 = arith.constant 1 : i32
      %400 = arith.addi %24, %c1_i32_397 : i32
      %c0_398 = arith.constant 0 : index
      %c7_399 = arith.constant 7 : index
      %401 = arith.index_cast %400 : i32 to index
      %c2_400 = arith.constant 2 : index
      %402 = vector.load %arg1[%c0_398, %c7_399, %401, %c2_400] : memref<1x12x11x11xf32, #tpu.memory_space<vmem>>, vector<1x1x1x8xf32>
      %403 = vector.shape_cast %402 : vector<1x1x1x8xf32> to vector<1x8xf32>
      %c75 = arith.constant 75 : index
      %c0_401 = arith.constant 0 : index
      %404 = vector.load %arg7[%c75, %c0_401] : memref<160x8xf32, #tpu.memory_space<vmem>>, vector<1x8xf32>
      tpu.vector_store %arg7[%c75, %c0_401], %403 {strides = array<i32>} : memref<160x8xf32, #tpu.memory_space<vmem>>, vector<1x8xf32>,
      %c1_i32_402 = arith.constant 1 : i32
      %405 = arith.addi %24, %c1_i32_402 : i32
      %c0_403 = arith.constant 0 : index
      %c6_404 = arith.constant 6 : index
      %406 = arith.index_cast %405 : i32 to index
      %c3_405 = arith.constant 3 : index
      %407 = vector.load %arg1[%c0_403, %c6_404, %406, %c3_405] : memref<1x12x11x11xf32, #tpu.memory_space<vmem>>, vector<1x1x1x8xf32>
      %408 = vector.shape_cast %407 : vector<1x1x1x8xf32> to vector<1x8xf32>
      %c76 = arith.constant 76 : index
      %c0_406 = arith.constant 0 : index
      %409 = vector.load %arg7[%c76, %c0_406] : memref<160x8xf32, #tpu.memory_space<vmem>>, vector<1x8xf32>
      tpu.vector_store %arg7[%c76, %c0_406], %408 {strides = array<i32>} : memref<160x8xf32, #tpu.memory_space<vmem>>, vector<1x8xf32>,
      %c2_i32_407 = arith.constant 2 : i32
      %410 = arith.addi %24, %c2_i32_407 : i32
      %c0_408 = arith.constant 0 : index
      %c4_409 = arith.constant 4 : index
      %411 = arith.index_cast %410 : i32 to index
      %c0_410 = arith.constant 0 : index
      %412 = vector.load %arg1[%c0_408, %c4_409, %411, %c0_410] : memref<1x12x11x11xf32, #tpu.memory_space<vmem>>, vector<1x1x1x8xf32>
      %413 = vector.shape_cast %412 : vector<1x1x1x8xf32> to vector<1x8xf32>
      %c77 = arith.constant 77 : index
      %c0_411 = arith.constant 0 : index
      %414 = vector.load %arg7[%c77, %c0_411] : memref<160x8xf32, #tpu.memory_space<vmem>>, vector<1x8xf32>
      tpu.vector_store %arg7[%c77, %c0_411], %413 {strides = array<i32>} : memref<160x8xf32, #tpu.memory_space<vmem>>, vector<1x8xf32>,
      %c2_i32_412 = arith.constant 2 : i32
      %415 = arith.addi %24, %c2_i32_412 : i32
      %c0_413 = arith.constant 0 : index
      %c5_414 = arith.constant 5 : index
      %416 = arith.index_cast %415 : i32 to index
      %c0_415 = arith.constant 0 : index
      %417 = vector.load %arg1[%c0_413, %c5_414, %416, %c0_415] : memref<1x12x11x11xf32, #tpu.memory_space<vmem>>, vector<1x1x1x8xf32>
      %418 = vector.shape_cast %417 : vector<1x1x1x8xf32> to vector<1x8xf32>
      %c78 = arith.constant 78 : index
      %c0_416 = arith.constant 0 : index
      %419 = vector.load %arg7[%c78, %c0_416] : memref<160x8xf32, #tpu.memory_space<vmem>>, vector<1x8xf32>
      tpu.vector_store %arg7[%c78, %c0_416], %418 {strides = array<i32>} : memref<160x8xf32, #tpu.memory_space<vmem>>, vector<1x8xf32>,
      %c2_i32_417 = arith.constant 2 : i32
      %420 = arith.addi %24, %c2_i32_417 : i32
      %c0_418 = arith.constant 0 : index
      %c4_419 = arith.constant 4 : index
      %421 = arith.index_cast %420 : i32 to index
      %c1_420 = arith.constant 1 : index
      %422 = vector.load %arg1[%c0_418, %c4_419, %421, %c1_420] : memref<1x12x11x11xf32, #tpu.memory_space<vmem>>, vector<1x1x1x8xf32>
      %423 = vector.shape_cast %422 : vector<1x1x1x8xf32> to vector<1x8xf32>
      %c79 = arith.constant 79 : index
      %c0_421 = arith.constant 0 : index
      %424 = vector.load %arg7[%c79, %c0_421] : memref<160x8xf32, #tpu.memory_space<vmem>>, vector<1x8xf32>
      tpu.vector_store %arg7[%c79, %c0_421], %423 {strides = array<i32>} : memref<160x8xf32, #tpu.memory_space<vmem>>, vector<1x8xf32>,
      %c2_i32_422 = arith.constant 2 : i32
      %425 = arith.addi %24, %c2_i32_422 : i32
      %c0_423 = arith.constant 0 : index
      %c5_424 = arith.constant 5 : index
      %426 = arith.index_cast %425 : i32 to index
      %c1_425 = arith.constant 1 : index
      %427 = vector.load %arg1[%c0_423, %c5_424, %426, %c1_425] : memref<1x12x11x11xf32, #tpu.memory_space<vmem>>, vector<1x1x1x8xf32>
      %428 = vector.shape_cast %427 : vector<1x1x1x8xf32> to vector<1x8xf32>
      %c80 = arith.constant 80 : index
      %c0_426 = arith.constant 0 : index
      %429 = vector.load %arg7[%c80, %c0_426] : memref<160x8xf32, #tpu.memory_space<vmem>>, vector<1x8xf32>
      tpu.vector_store %arg7[%c80, %c0_426], %428 {strides = array<i32>} : memref<160x8xf32, #tpu.memory_space<vmem>>, vector<1x8xf32>,
      %c2_i32_427 = arith.constant 2 : i32
      %430 = arith.addi %24, %c2_i32_427 : i32
      %c0_428 = arith.constant 0 : index
      %c4_429 = arith.constant 4 : index
      %431 = arith.index_cast %430 : i32 to index
      %c2_430 = arith.constant 2 : index
      %432 = vector.load %arg1[%c0_428, %c4_429, %431, %c2_430] : memref<1x12x11x11xf32, #tpu.memory_space<vmem>>, vector<1x1x1x8xf32>
      %433 = vector.shape_cast %432 : vector<1x1x1x8xf32> to vector<1x8xf32>
      %c81 = arith.constant 81 : index
      %c0_431 = arith.constant 0 : index
      %434 = vector.load %arg7[%c81, %c0_431] : memref<160x8xf32, #tpu.memory_space<vmem>>, vector<1x8xf32>
      tpu.vector_store %arg7[%c81, %c0_431], %433 {strides = array<i32>} : memref<160x8xf32, #tpu.memory_space<vmem>>, vector<1x8xf32>,
      %c2_i32_432 = arith.constant 2 : i32
      %435 = arith.addi %24, %c2_i32_432 : i32
      %c0_433 = arith.constant 0 : index
      %c5_434 = arith.constant 5 : index
      %436 = arith.index_cast %435 : i32 to index
      %c2_435 = arith.constant 2 : index
      %437 = vector.load %arg1[%c0_433, %c5_434, %436, %c2_435] : memref<1x12x11x11xf32, #tpu.memory_space<vmem>>, vector<1x1x1x8xf32>
      %438 = vector.shape_cast %437 : vector<1x1x1x8xf32> to vector<1x8xf32>
      %c82 = arith.constant 82 : index
      %c0_436 = arith.constant 0 : index
      %439 = vector.load %arg7[%c82, %c0_436] : memref<160x8xf32, #tpu.memory_space<vmem>>, vector<1x8xf32>
      tpu.vector_store %arg7[%c82, %c0_436], %438 {strides = array<i32>} : memref<160x8xf32, #tpu.memory_space<vmem>>, vector<1x8xf32>,
      %c2_i32_437 = arith.constant 2 : i32
      %440 = arith.addi %24, %c2_i32_437 : i32
      %c0_438 = arith.constant 0 : index
      %c4_439 = arith.constant 4 : index
      %441 = arith.index_cast %440 : i32 to index
      %c3_440 = arith.constant 3 : index
      %442 = vector.load %arg1[%c0_438, %c4_439, %441, %c3_440] : memref<1x12x11x11xf32, #tpu.memory_space<vmem>>, vector<1x1x1x8xf32>
      %443 = vector.shape_cast %442 : vector<1x1x1x8xf32> to vector<1x8xf32>
      %c83 = arith.constant 83 : index
      %c0_441 = arith.constant 0 : index
      %444 = vector.load %arg7[%c83, %c0_441] : memref<160x8xf32, #tpu.memory_space<vmem>>, vector<1x8xf32>
      tpu.vector_store %arg7[%c83, %c0_441], %443 {strides = array<i32>} : memref<160x8xf32, #tpu.memory_space<vmem>>, vector<1x8xf32>,
      %c2_i32_442 = arith.constant 2 : i32
      %445 = arith.addi %24, %c2_i32_442 : i32
      %c0_443 = arith.constant 0 : index
      %c6_444 = arith.constant 6 : index
      %446 = arith.index_cast %445 : i32 to index
      %c0_445 = arith.constant 0 : index
      %447 = vector.load %arg1[%c0_443, %c6_444, %446, %c0_445] : memref<1x12x11x11xf32, #tpu.memory_space<vmem>>, vector<1x1x1x8xf32>
      %448 = vector.shape_cast %447 : vector<1x1x1x8xf32> to vector<1x8xf32>
      %c84 = arith.constant 84 : index
      %c0_446 = arith.constant 0 : index
      %449 = vector.load %arg7[%c84, %c0_446] : memref<160x8xf32, #tpu.memory_space<vmem>>, vector<1x8xf32>
      tpu.vector_store %arg7[%c84, %c0_446], %448 {strides = array<i32>} : memref<160x8xf32, #tpu.memory_space<vmem>>, vector<1x8xf32>,
      %c2_i32_447 = arith.constant 2 : i32
      %450 = arith.addi %24, %c2_i32_447 : i32
      %c0_448 = arith.constant 0 : index
      %c7_449 = arith.constant 7 : index
      %451 = arith.index_cast %450 : i32 to index
      %c0_450 = arith.constant 0 : index
      %452 = vector.load %arg1[%c0_448, %c7_449, %451, %c0_450] : memref<1x12x11x11xf32, #tpu.memory_space<vmem>>, vector<1x1x1x8xf32>
      %453 = vector.shape_cast %452 : vector<1x1x1x8xf32> to vector<1x8xf32>
      %c85 = arith.constant 85 : index
      %c0_451 = arith.constant 0 : index
      %454 = vector.load %arg7[%c85, %c0_451] : memref<160x8xf32, #tpu.memory_space<vmem>>, vector<1x8xf32>
      tpu.vector_store %arg7[%c85, %c0_451], %453 {strides = array<i32>} : memref<160x8xf32, #tpu.memory_space<vmem>>, vector<1x8xf32>,
      %c2_i32_452 = arith.constant 2 : i32
      %455 = arith.addi %24, %c2_i32_452 : i32
      %c0_453 = arith.constant 0 : index
      %c6_454 = arith.constant 6 : index
      %456 = arith.index_cast %455 : i32 to index
      %c1_455 = arith.constant 1 : index
      %457 = vector.load %arg1[%c0_453, %c6_454, %456, %c1_455] : memref<1x12x11x11xf32, #tpu.memory_space<vmem>>, vector<1x1x1x8xf32>
      %458 = vector.shape_cast %457 : vector<1x1x1x8xf32> to vector<1x8xf32>
      %c86 = arith.constant 86 : index
      %c0_456 = arith.constant 0 : index
      %459 = vector.load %arg7[%c86, %c0_456] : memref<160x8xf32, #tpu.memory_space<vmem>>, vector<1x8xf32>
      tpu.vector_store %arg7[%c86, %c0_456], %458 {strides = array<i32>} : memref<160x8xf32, #tpu.memory_space<vmem>>, vector<1x8xf32>,
      %c2_i32_457 = arith.constant 2 : i32
      %460 = arith.addi %24, %c2_i32_457 : i32
      %c0_458 = arith.constant 0 : index
      %c7_459 = arith.constant 7 : index
      %461 = arith.index_cast %460 : i32 to index
      %c1_460 = arith.constant 1 : index
      %462 = vector.load %arg1[%c0_458, %c7_459, %461, %c1_460] : memref<1x12x11x11xf32, #tpu.memory_space<vmem>>, vector<1x1x1x8xf32>
      %463 = vector.shape_cast %462 : vector<1x1x1x8xf32> to vector<1x8xf32>
      %c87 = arith.constant 87 : index
      %c0_461 = arith.constant 0 : index
      %464 = vector.load %arg7[%c87, %c0_461] : memref<160x8xf32, #tpu.memory_space<vmem>>, vector<1x8xf32>
      tpu.vector_store %arg7[%c87, %c0_461], %463 {strides = array<i32>} : memref<160x8xf32, #tpu.memory_space<vmem>>, vector<1x8xf32>,
      %c2_i32_462 = arith.constant 2 : i32
      %465 = arith.addi %24, %c2_i32_462 : i32
      %c0_463 = arith.constant 0 : index
      %c6_464 = arith.constant 6 : index
      %466 = arith.index_cast %465 : i32 to index
      %c2_465 = arith.constant 2 : index
      %467 = vector.load %arg1[%c0_463, %c6_464, %466, %c2_465] : memref<1x12x11x11xf32, #tpu.memory_space<vmem>>, vector<1x1x1x8xf32>
      %468 = vector.shape_cast %467 : vector<1x1x1x8xf32> to vector<1x8xf32>
      %c88 = arith.constant 88 : index
      %c0_466 = arith.constant 0 : index
      %469 = vector.load %arg7[%c88, %c0_466] : memref<160x8xf32, #tpu.memory_space<vmem>>, vector<1x8xf32>
      tpu.vector_store %arg7[%c88, %c0_466], %468 {strides = array<i32>} : memref<160x8xf32, #tpu.memory_space<vmem>>, vector<1x8xf32>,
      %c2_i32_467 = arith.constant 2 : i32
      %470 = arith.addi %24, %c2_i32_467 : i32
      %c0_468 = arith.constant 0 : index
      %c7_469 = arith.constant 7 : index
      %471 = arith.index_cast %470 : i32 to index
      %c2_470 = arith.constant 2 : index
      %472 = vector.load %arg1[%c0_468, %c7_469, %471, %c2_470] : memref<1x12x11x11xf32, #tpu.memory_space<vmem>>, vector<1x1x1x8xf32>
      %473 = vector.shape_cast %472 : vector<1x1x1x8xf32> to vector<1x8xf32>
      %c89 = arith.constant 89 : index
      %c0_471 = arith.constant 0 : index
      %474 = vector.load %arg7[%c89, %c0_471] : memref<160x8xf32, #tpu.memory_space<vmem>>, vector<1x8xf32>
      tpu.vector_store %arg7[%c89, %c0_471], %473 {strides = array<i32>} : memref<160x8xf32, #tpu.memory_space<vmem>>, vector<1x8xf32>,
      %c2_i32_472 = arith.constant 2 : i32
      %475 = arith.addi %24, %c2_i32_472 : i32
      %c0_473 = arith.constant 0 : index
      %c6_474 = arith.constant 6 : index
      %476 = arith.index_cast %475 : i32 to index
      %c3_475 = arith.constant 3 : index
      %477 = vector.load %arg1[%c0_473, %c6_474, %476, %c3_475] : memref<1x12x11x11xf32, #tpu.memory_space<vmem>>, vector<1x1x1x8xf32>
      %478 = vector.shape_cast %477 : vector<1x1x1x8xf32> to vector<1x8xf32>
      %c90 = arith.constant 90 : index
      %c0_476 = arith.constant 0 : index
      %479 = vector.load %arg7[%c90, %c0_476] : memref<160x8xf32, #tpu.memory_space<vmem>>, vector<1x8xf32>
      tpu.vector_store %arg7[%c90, %c0_476], %478 {strides = array<i32>} : memref<160x8xf32, #tpu.memory_space<vmem>>, vector<1x8xf32>,
      %c3_i32_477 = arith.constant 3 : i32
      %480 = arith.addi %24, %c3_i32_477 : i32
      %c0_478 = arith.constant 0 : index
      %c4_479 = arith.constant 4 : index
      %481 = arith.index_cast %480 : i32 to index
      %c0_480 = arith.constant 0 : index
      %482 = vector.load %arg1[%c0_478, %c4_479, %481, %c0_480] : memref<1x12x11x11xf32, #tpu.memory_space<vmem>>, vector<1x1x1x8xf32>
      %483 = vector.shape_cast %482 : vector<1x1x1x8xf32> to vector<1x8xf32>
      %c91 = arith.constant 91 : index
      %c0_481 = arith.constant 0 : index
      %484 = vector.load %arg7[%c91, %c0_481] : memref<160x8xf32, #tpu.memory_space<vmem>>, vector<1x8xf32>
      tpu.vector_store %arg7[%c91, %c0_481], %483 {strides = array<i32>} : memref<160x8xf32, #tpu.memory_space<vmem>>, vector<1x8xf32>,
      %c3_i32_482 = arith.constant 3 : i32
      %485 = arith.addi %24, %c3_i32_482 : i32
      %c0_483 = arith.constant 0 : index
      %c5_484 = arith.constant 5 : index
      %486 = arith.index_cast %485 : i32 to index
      %c0_485 = arith.constant 0 : index
      %487 = vector.load %arg1[%c0_483, %c5_484, %486, %c0_485] : memref<1x12x11x11xf32, #tpu.memory_space<vmem>>, vector<1x1x1x8xf32>
      %488 = vector.shape_cast %487 : vector<1x1x1x8xf32> to vector<1x8xf32>
      %c92 = arith.constant 92 : index
      %c0_486 = arith.constant 0 : index
      %489 = vector.load %arg7[%c92, %c0_486] : memref<160x8xf32, #tpu.memory_space<vmem>>, vector<1x8xf32>
      tpu.vector_store %arg7[%c92, %c0_486], %488 {strides = array<i32>} : memref<160x8xf32, #tpu.memory_space<vmem>>, vector<1x8xf32>,
      %c3_i32_487 = arith.constant 3 : i32
      %490 = arith.addi %24, %c3_i32_487 : i32
      %c0_488 = arith.constant 0 : index
      %c4_489 = arith.constant 4 : index
      %491 = arith.index_cast %490 : i32 to index
      %c1_490 = arith.constant 1 : index
      %492 = vector.load %arg1[%c0_488, %c4_489, %491, %c1_490] : memref<1x12x11x11xf32, #tpu.memory_space<vmem>>, vector<1x1x1x8xf32>
      %493 = vector.shape_cast %492 : vector<1x1x1x8xf32> to vector<1x8xf32>
      %c93 = arith.constant 93 : index
      %c0_491 = arith.constant 0 : index
      %494 = vector.load %arg7[%c93, %c0_491] : memref<160x8xf32, #tpu.memory_space<vmem>>, vector<1x8xf32>
      tpu.vector_store %arg7[%c93, %c0_491], %493 {strides = array<i32>} : memref<160x8xf32, #tpu.memory_space<vmem>>, vector<1x8xf32>,
      %c3_i32_492 = arith.constant 3 : i32
      %495 = arith.addi %24, %c3_i32_492 : i32
      %c0_493 = arith.constant 0 : index
      %c5_494 = arith.constant 5 : index
      %496 = arith.index_cast %495 : i32 to index
      %c1_495 = arith.constant 1 : index
      %497 = vector.load %arg1[%c0_493, %c5_494, %496, %c1_495] : memref<1x12x11x11xf32, #tpu.memory_space<vmem>>, vector<1x1x1x8xf32>
      %498 = vector.shape_cast %497 : vector<1x1x1x8xf32> to vector<1x8xf32>
      %c94 = arith.constant 94 : index
      %c0_496 = arith.constant 0 : index
      %499 = vector.load %arg7[%c94, %c0_496] : memref<160x8xf32, #tpu.memory_space<vmem>>, vector<1x8xf32>
      tpu.vector_store %arg7[%c94, %c0_496], %498 {strides = array<i32>} : memref<160x8xf32, #tpu.memory_space<vmem>>, vector<1x8xf32>,
      %c3_i32_497 = arith.constant 3 : i32
      %500 = arith.addi %24, %c3_i32_497 : i32
      %c0_498 = arith.constant 0 : index
      %c4_499 = arith.constant 4 : index
      %501 = arith.index_cast %500 : i32 to index
      %c2_500 = arith.constant 2 : index
      %502 = vector.load %arg1[%c0_498, %c4_499, %501, %c2_500] : memref<1x12x11x11xf32, #tpu.memory_space<vmem>>, vector<1x1x1x8xf32>
      %503 = vector.shape_cast %502 : vector<1x1x1x8xf32> to vector<1x8xf32>
      %c95 = arith.constant 95 : index
      %c0_501 = arith.constant 0 : index
      %504 = vector.load %arg7[%c95, %c0_501] : memref<160x8xf32, #tpu.memory_space<vmem>>, vector<1x8xf32>
      tpu.vector_store %arg7[%c95, %c0_501], %503 {strides = array<i32>} : memref<160x8xf32, #tpu.memory_space<vmem>>, vector<1x8xf32>,
      %c3_i32_502 = arith.constant 3 : i32
      %505 = arith.addi %24, %c3_i32_502 : i32
      %c0_503 = arith.constant 0 : index
      %c5_504 = arith.constant 5 : index
      %506 = arith.index_cast %505 : i32 to index
      %c2_505 = arith.constant 2 : index
      %507 = vector.load %arg1[%c0_503, %c5_504, %506, %c2_505] : memref<1x12x11x11xf32, #tpu.memory_space<vmem>>, vector<1x1x1x8xf32>
      %508 = vector.shape_cast %507 : vector<1x1x1x8xf32> to vector<1x8xf32>
      %c96 = arith.constant 96 : index
      %c0_506 = arith.constant 0 : index
      %509 = vector.load %arg7[%c96, %c0_506] : memref<160x8xf32, #tpu.memory_space<vmem>>, vector<1x8xf32>
      tpu.vector_store %arg7[%c96, %c0_506], %508 {strides = array<i32>} : memref<160x8xf32, #tpu.memory_space<vmem>>, vector<1x8xf32>,
      %c3_i32_507 = arith.constant 3 : i32
      %510 = arith.addi %24, %c3_i32_507 : i32
      %c0_508 = arith.constant 0 : index
      %c4_509 = arith.constant 4 : index
      %511 = arith.index_cast %510 : i32 to index
      %c3_510 = arith.constant 3 : index
      %512 = vector.load %arg1[%c0_508, %c4_509, %511, %c3_510] : memref<1x12x11x11xf32, #tpu.memory_space<vmem>>, vector<1x1x1x8xf32>
      %513 = vector.shape_cast %512 : vector<1x1x1x8xf32> to vector<1x8xf32>
      %c97 = arith.constant 97 : index
      %c0_511 = arith.constant 0 : index
      %514 = vector.load %arg7[%c97, %c0_511] : memref<160x8xf32, #tpu.memory_space<vmem>>, vector<1x8xf32>
      tpu.vector_store %arg7[%c97, %c0_511], %513 {strides = array<i32>} : memref<160x8xf32, #tpu.memory_space<vmem>>, vector<1x8xf32>,
      %c0_i32_512 = arith.constant 0 : i32
      %515 = arith.addi %24, %c0_i32_512 : i32
      %c0_513 = arith.constant 0 : index
      %c8_514 = arith.constant 8 : index
      %516 = arith.index_cast %515 : i32 to index
      %c0_515 = arith.constant 0 : index
      %517 = vector.load %arg1[%c0_513, %c8_514, %516, %c0_515] : memref<1x12x11x11xf32, #tpu.memory_space<vmem>>, vector<1x1x1x8xf32>
      %518 = vector.shape_cast %517 : vector<1x1x1x8xf32> to vector<1x8xf32>
      %c98 = arith.constant 98 : index
      %c0_516 = arith.constant 0 : index
      %519 = vector.load %arg7[%c98, %c0_516] : memref<160x8xf32, #tpu.memory_space<vmem>>, vector<1x8xf32>
      tpu.vector_store %arg7[%c98, %c0_516], %518 {strides = array<i32>} : memref<160x8xf32, #tpu.memory_space<vmem>>, vector<1x8xf32>,
      %c0_i32_517 = arith.constant 0 : i32
      %520 = arith.addi %24, %c0_i32_517 : i32
      %c0_518 = arith.constant 0 : index
      %c9_519 = arith.constant 9 : index
      %521 = arith.index_cast %520 : i32 to index
      %c0_520 = arith.constant 0 : index
      %522 = vector.load %arg1[%c0_518, %c9_519, %521, %c0_520] : memref<1x12x11x11xf32, #tpu.memory_space<vmem>>, vector<1x1x1x8xf32>
      %523 = vector.shape_cast %522 : vector<1x1x1x8xf32> to vector<1x8xf32>
      %c99 = arith.constant 99 : index
      %c0_521 = arith.constant 0 : index
      %524 = vector.load %arg7[%c99, %c0_521] : memref<160x8xf32, #tpu.memory_space<vmem>>, vector<1x8xf32>
      tpu.vector_store %arg7[%c99, %c0_521], %523 {strides = array<i32>} : memref<160x8xf32, #tpu.memory_space<vmem>>, vector<1x8xf32>,
      %c0_i32_522 = arith.constant 0 : i32
      %525 = arith.addi %24, %c0_i32_522 : i32
      %c0_523 = arith.constant 0 : index
      %c8_524 = arith.constant 8 : index
      %526 = arith.index_cast %525 : i32 to index
      %c1_525 = arith.constant 1 : index
      %527 = vector.load %arg1[%c0_523, %c8_524, %526, %c1_525] : memref<1x12x11x11xf32, #tpu.memory_space<vmem>>, vector<1x1x1x8xf32>
      %528 = vector.shape_cast %527 : vector<1x1x1x8xf32> to vector<1x8xf32>
      %c100 = arith.constant 100 : index
      %c0_526 = arith.constant 0 : index
      %529 = vector.load %arg7[%c100, %c0_526] : memref<160x8xf32, #tpu.memory_space<vmem>>, vector<1x8xf32>
      tpu.vector_store %arg7[%c100, %c0_526], %528 {strides = array<i32>} : memref<160x8xf32, #tpu.memory_space<vmem>>, vector<1x8xf32>,
      %c0_i32_527 = arith.constant 0 : i32
      %530 = arith.addi %24, %c0_i32_527 : i32
      %c0_528 = arith.constant 0 : index
      %c9_529 = arith.constant 9 : index
      %531 = arith.index_cast %530 : i32 to index
      %c1_530 = arith.constant 1 : index
      %532 = vector.load %arg1[%c0_528, %c9_529, %531, %c1_530] : memref<1x12x11x11xf32, #tpu.memory_space<vmem>>, vector<1x1x1x8xf32>
      %533 = vector.shape_cast %532 : vector<1x1x1x8xf32> to vector<1x8xf32>
      %c101 = arith.constant 101 : index
      %c0_531 = arith.constant 0 : index
      %534 = vector.load %arg7[%c101, %c0_531] : memref<160x8xf32, #tpu.memory_space<vmem>>, vector<1x8xf32>
      tpu.vector_store %arg7[%c101, %c0_531], %533 {strides = array<i32>} : memref<160x8xf32, #tpu.memory_space<vmem>>, vector<1x8xf32>,
      %c0_i32_532 = arith.constant 0 : i32
      %535 = arith.addi %24, %c0_i32_532 : i32
      %c0_533 = arith.constant 0 : index
      %c8_534 = arith.constant 8 : index
      %536 = arith.index_cast %535 : i32 to index
      %c2_535 = arith.constant 2 : index
      %537 = vector.load %arg1[%c0_533, %c8_534, %536, %c2_535] : memref<1x12x11x11xf32, #tpu.memory_space<vmem>>, vector<1x1x1x8xf32>
      %538 = vector.shape_cast %537 : vector<1x1x1x8xf32> to vector<1x8xf32>
      %c102 = arith.constant 102 : index
      %c0_536 = arith.constant 0 : index
      %539 = vector.load %arg7[%c102, %c0_536] : memref<160x8xf32, #tpu.memory_space<vmem>>, vector<1x8xf32>
      tpu.vector_store %arg7[%c102, %c0_536], %538 {strides = array<i32>} : memref<160x8xf32, #tpu.memory_space<vmem>>, vector<1x8xf32>,
      %c0_i32_537 = arith.constant 0 : i32
      %540 = arith.addi %24, %c0_i32_537 : i32
      %c0_538 = arith.constant 0 : index
      %c9_539 = arith.constant 9 : index
      %541 = arith.index_cast %540 : i32 to index
      %c2_540 = arith.constant 2 : index
      %542 = vector.load %arg1[%c0_538, %c9_539, %541, %c2_540] : memref<1x12x11x11xf32, #tpu.memory_space<vmem>>, vector<1x1x1x8xf32>
      %543 = vector.shape_cast %542 : vector<1x1x1x8xf32> to vector<1x8xf32>
      %c103 = arith.constant 103 : index
      %c0_541 = arith.constant 0 : index
      %544 = vector.load %arg7[%c103, %c0_541] : memref<160x8xf32, #tpu.memory_space<vmem>>, vector<1x8xf32>
      tpu.vector_store %arg7[%c103, %c0_541], %543 {strides = array<i32>} : memref<160x8xf32, #tpu.memory_space<vmem>>, vector<1x8xf32>,
      %c0_i32_542 = arith.constant 0 : i32
      %545 = arith.addi %24, %c0_i32_542 : i32
      %c0_543 = arith.constant 0 : index
      %c8_544 = arith.constant 8 : index
      %546 = arith.index_cast %545 : i32 to index
      %c3_545 = arith.constant 3 : index
      %547 = vector.load %arg1[%c0_543, %c8_544, %546, %c3_545] : memref<1x12x11x11xf32, #tpu.memory_space<vmem>>, vector<1x1x1x8xf32>
      %548 = vector.shape_cast %547 : vector<1x1x1x8xf32> to vector<1x8xf32>
      %c104 = arith.constant 104 : index
      %c0_546 = arith.constant 0 : index
      %549 = vector.load %arg7[%c104, %c0_546] : memref<160x8xf32, #tpu.memory_space<vmem>>, vector<1x8xf32>
      tpu.vector_store %arg7[%c104, %c0_546], %548 {strides = array<i32>} : memref<160x8xf32, #tpu.memory_space<vmem>>, vector<1x8xf32>,
      %c0_i32_547 = arith.constant 0 : i32
      %550 = arith.addi %24, %c0_i32_547 : i32
      %c0_548 = arith.constant 0 : index
      %c10_549 = arith.constant 10 : index
      %551 = arith.index_cast %550 : i32 to index
      %c0_550 = arith.constant 0 : index
      %552 = vector.load %arg1[%c0_548, %c10_549, %551, %c0_550] : memref<1x12x11x11xf32, #tpu.memory_space<vmem>>, vector<1x1x1x8xf32>
      %553 = vector.shape_cast %552 : vector<1x1x1x8xf32> to vector<1x8xf32>
      %c105 = arith.constant 105 : index
      %c0_551 = arith.constant 0 : index
      %554 = vector.load %arg7[%c105, %c0_551] : memref<160x8xf32, #tpu.memory_space<vmem>>, vector<1x8xf32>
      tpu.vector_store %arg7[%c105, %c0_551], %553 {strides = array<i32>} : memref<160x8xf32, #tpu.memory_space<vmem>>, vector<1x8xf32>,
      %c0_i32_552 = arith.constant 0 : i32
      %555 = arith.addi %24, %c0_i32_552 : i32
      %c0_553 = arith.constant 0 : index
      %c11_554 = arith.constant 11 : index
      %556 = arith.index_cast %555 : i32 to index
      %c0_555 = arith.constant 0 : index
      %557 = vector.load %arg1[%c0_553, %c11_554, %556, %c0_555] : memref<1x12x11x11xf32, #tpu.memory_space<vmem>>, vector<1x1x1x8xf32>
      %558 = vector.shape_cast %557 : vector<1x1x1x8xf32> to vector<1x8xf32>
      %c106 = arith.constant 106 : index
      %c0_556 = arith.constant 0 : index
      %559 = vector.load %arg7[%c106, %c0_556] : memref<160x8xf32, #tpu.memory_space<vmem>>, vector<1x8xf32>
      tpu.vector_store %arg7[%c106, %c0_556], %558 {strides = array<i32>} : memref<160x8xf32, #tpu.memory_space<vmem>>, vector<1x8xf32>,
      %c0_i32_557 = arith.constant 0 : i32
      %560 = arith.addi %24, %c0_i32_557 : i32
      %c0_558 = arith.constant 0 : index
      %c10_559 = arith.constant 10 : index
      %561 = arith.index_cast %560 : i32 to index
      %c1_560 = arith.constant 1 : index
      %562 = vector.load %arg1[%c0_558, %c10_559, %561, %c1_560] : memref<1x12x11x11xf32, #tpu.memory_space<vmem>>, vector<1x1x1x8xf32>
      %563 = vector.shape_cast %562 : vector<1x1x1x8xf32> to vector<1x8xf32>
      %c107 = arith.constant 107 : index
      %c0_561 = arith.constant 0 : index
      %564 = vector.load %arg7[%c107, %c0_561] : memref<160x8xf32, #tpu.memory_space<vmem>>, vector<1x8xf32>
      tpu.vector_store %arg7[%c107, %c0_561], %563 {strides = array<i32>} : memref<160x8xf32, #tpu.memory_space<vmem>>, vector<1x8xf32>,
      %c0_i32_562 = arith.constant 0 : i32
      %565 = arith.addi %24, %c0_i32_562 : i32
      %c0_563 = arith.constant 0 : index
      %c11_564 = arith.constant 11 : index
      %566 = arith.index_cast %565 : i32 to index
      %c1_565 = arith.constant 1 : index
      %567 = vector.load %arg1[%c0_563, %c11_564, %566, %c1_565] : memref<1x12x11x11xf32, #tpu.memory_space<vmem>>, vector<1x1x1x8xf32>
      %568 = vector.shape_cast %567 : vector<1x1x1x8xf32> to vector<1x8xf32>
      %c108 = arith.constant 108 : index
      %c0_566 = arith.constant 0 : index
      %569 = vector.load %arg7[%c108, %c0_566] : memref<160x8xf32, #tpu.memory_space<vmem>>, vector<1x8xf32>
      tpu.vector_store %arg7[%c108, %c0_566], %568 {strides = array<i32>} : memref<160x8xf32, #tpu.memory_space<vmem>>, vector<1x8xf32>,
      %c0_i32_567 = arith.constant 0 : i32
      %570 = arith.addi %24, %c0_i32_567 : i32
      %c0_568 = arith.constant 0 : index
      %c10_569 = arith.constant 10 : index
      %571 = arith.index_cast %570 : i32 to index
      %c2_570 = arith.constant 2 : index
      %572 = vector.load %arg1[%c0_568, %c10_569, %571, %c2_570] : memref<1x12x11x11xf32, #tpu.memory_space<vmem>>, vector<1x1x1x8xf32>
      %573 = vector.shape_cast %572 : vector<1x1x1x8xf32> to vector<1x8xf32>
      %c109 = arith.constant 109 : index
      %c0_571 = arith.constant 0 : index
      %574 = vector.load %arg7[%c109, %c0_571] : memref<160x8xf32, #tpu.memory_space<vmem>>, vector<1x8xf32>
      tpu.vector_store %arg7[%c109, %c0_571], %573 {strides = array<i32>} : memref<160x8xf32, #tpu.memory_space<vmem>>, vector<1x8xf32>,
      %c0_i32_572 = arith.constant 0 : i32
      %575 = arith.addi %24, %c0_i32_572 : i32
      %c0_573 = arith.constant 0 : index
      %c11_574 = arith.constant 11 : index
      %576 = arith.index_cast %575 : i32 to index
      %c2_575 = arith.constant 2 : index
      %577 = vector.load %arg1[%c0_573, %c11_574, %576, %c2_575] : memref<1x12x11x11xf32, #tpu.memory_space<vmem>>, vector<1x1x1x8xf32>
      %578 = vector.shape_cast %577 : vector<1x1x1x8xf32> to vector<1x8xf32>
      %c110 = arith.constant 110 : index
      %c0_576 = arith.constant 0 : index
      %579 = vector.load %arg7[%c110, %c0_576] : memref<160x8xf32, #tpu.memory_space<vmem>>, vector<1x8xf32>
      tpu.vector_store %arg7[%c110, %c0_576], %578 {strides = array<i32>} : memref<160x8xf32, #tpu.memory_space<vmem>>, vector<1x8xf32>,
      %c0_i32_577 = arith.constant 0 : i32
      %580 = arith.addi %24, %c0_i32_577 : i32
      %c0_578 = arith.constant 0 : index
      %c10_579 = arith.constant 10 : index
      %581 = arith.index_cast %580 : i32 to index
      %c3_580 = arith.constant 3 : index
      %582 = vector.load %arg1[%c0_578, %c10_579, %581, %c3_580] : memref<1x12x11x11xf32, #tpu.memory_space<vmem>>, vector<1x1x1x8xf32>
      %583 = vector.shape_cast %582 : vector<1x1x1x8xf32> to vector<1x8xf32>
      %c111 = arith.constant 111 : index
      %c0_581 = arith.constant 0 : index
      %584 = vector.load %arg7[%c111, %c0_581] : memref<160x8xf32, #tpu.memory_space<vmem>>, vector<1x8xf32>
      tpu.vector_store %arg7[%c111, %c0_581], %583 {strides = array<i32>} : memref<160x8xf32, #tpu.memory_space<vmem>>, vector<1x8xf32>,
      %c1_i32_582 = arith.constant 1 : i32
      %585 = arith.addi %24, %c1_i32_582 : i32
      %c0_583 = arith.constant 0 : index
      %c8_584 = arith.constant 8 : index
      %586 = arith.index_cast %585 : i32 to index
      %c0_585 = arith.constant 0 : index
      %587 = vector.load %arg1[%c0_583, %c8_584, %586, %c0_585] : memref<1x12x11x11xf32, #tpu.memory_space<vmem>>, vector<1x1x1x8xf32>
      %588 = vector.shape_cast %587 : vector<1x1x1x8xf32> to vector<1x8xf32>
      %c112 = arith.constant 112 : index
      %c0_586 = arith.constant 0 : index
      %589 = vector.load %arg7[%c112, %c0_586] : memref<160x8xf32, #tpu.memory_space<vmem>>, vector<1x8xf32>
      tpu.vector_store %arg7[%c112, %c0_586], %588 {strides = array<i32>} : memref<160x8xf32, #tpu.memory_space<vmem>>, vector<1x8xf32>,
      %c1_i32_587 = arith.constant 1 : i32
      %590 = arith.addi %24, %c1_i32_587 : i32
      %c0_588 = arith.constant 0 : index
      %c9_589 = arith.constant 9 : index
      %591 = arith.index_cast %590 : i32 to index
      %c0_590 = arith.constant 0 : index
      %592 = vector.load %arg1[%c0_588, %c9_589, %591, %c0_590] : memref<1x12x11x11xf32, #tpu.memory_space<vmem>>, vector<1x1x1x8xf32>
      %593 = vector.shape_cast %592 : vector<1x1x1x8xf32> to vector<1x8xf32>
      %c113 = arith.constant 113 : index
      %c0_591 = arith.constant 0 : index
      %594 = vector.load %arg7[%c113, %c0_591] : memref<160x8xf32, #tpu.memory_space<vmem>>, vector<1x8xf32>
      tpu.vector_store %arg7[%c113, %c0_591], %593 {strides = array<i32>} : memref<160x8xf32, #tpu.memory_space<vmem>>, vector<1x8xf32>,
      %c1_i32_592 = arith.constant 1 : i32
      %595 = arith.addi %24, %c1_i32_592 : i32
      %c0_593 = arith.constant 0 : index
      %c8_594 = arith.constant 8 : index
      %596 = arith.index_cast %595 : i32 to index
      %c1_595 = arith.constant 1 : index
      %597 = vector.load %arg1[%c0_593, %c8_594, %596, %c1_595] : memref<1x12x11x11xf32, #tpu.memory_space<vmem>>, vector<1x1x1x8xf32>
      %598 = vector.shape_cast %597 : vector<1x1x1x8xf32> to vector<1x8xf32>
      %c114 = arith.constant 114 : index
      %c0_596 = arith.constant 0 : index
      %599 = vector.load %arg7[%c114, %c0_596] : memref<160x8xf32, #tpu.memory_space<vmem>>, vector<1x8xf32>
      tpu.vector_store %arg7[%c114, %c0_596], %598 {strides = array<i32>} : memref<160x8xf32, #tpu.memory_space<vmem>>, vector<1x8xf32>,
      %c1_i32_597 = arith.constant 1 : i32
      %600 = arith.addi %24, %c1_i32_597 : i32
      %c0_598 = arith.constant 0 : index
      %c9_599 = arith.constant 9 : index
      %601 = arith.index_cast %600 : i32 to index
      %c1_600 = arith.constant 1 : index
      %602 = vector.load %arg1[%c0_598, %c9_599, %601, %c1_600] : memref<1x12x11x11xf32, #tpu.memory_space<vmem>>, vector<1x1x1x8xf32>
      %603 = vector.shape_cast %602 : vector<1x1x1x8xf32> to vector<1x8xf32>
      %c115 = arith.constant 115 : index
      %c0_601 = arith.constant 0 : index
      %604 = vector.load %arg7[%c115, %c0_601] : memref<160x8xf32, #tpu.memory_space<vmem>>, vector<1x8xf32>
      tpu.vector_store %arg7[%c115, %c0_601], %603 {strides = array<i32>} : memref<160x8xf32, #tpu.memory_space<vmem>>, vector<1x8xf32>,
      %c1_i32_602 = arith.constant 1 : i32
      %605 = arith.addi %24, %c1_i32_602 : i32
      %c0_603 = arith.constant 0 : index
      %c8_604 = arith.constant 8 : index
      %606 = arith.index_cast %605 : i32 to index
      %c2_605 = arith.constant 2 : index
      %607 = vector.load %arg1[%c0_603, %c8_604, %606, %c2_605] : memref<1x12x11x11xf32, #tpu.memory_space<vmem>>, vector<1x1x1x8xf32>
      %608 = vector.shape_cast %607 : vector<1x1x1x8xf32> to vector<1x8xf32>
      %c116 = arith.constant 116 : index
      %c0_606 = arith.constant 0 : index
      %609 = vector.load %arg7[%c116, %c0_606] : memref<160x8xf32, #tpu.memory_space<vmem>>, vector<1x8xf32>
      tpu.vector_store %arg7[%c116, %c0_606], %608 {strides = array<i32>} : memref<160x8xf32, #tpu.memory_space<vmem>>, vector<1x8xf32>,
      %c1_i32_607 = arith.constant 1 : i32
      %610 = arith.addi %24, %c1_i32_607 : i32
      %c0_608 = arith.constant 0 : index
      %c9_609 = arith.constant 9 : index
      %611 = arith.index_cast %610 : i32 to index
      %c2_610 = arith.constant 2 : index
      %612 = vector.load %arg1[%c0_608, %c9_609, %611, %c2_610] : memref<1x12x11x11xf32, #tpu.memory_space<vmem>>, vector<1x1x1x8xf32>
      %613 = vector.shape_cast %612 : vector<1x1x1x8xf32> to vector<1x8xf32>
      %c117 = arith.constant 117 : index
      %c0_611 = arith.constant 0 : index
      %614 = vector.load %arg7[%c117, %c0_611] : memref<160x8xf32, #tpu.memory_space<vmem>>, vector<1x8xf32>
      tpu.vector_store %arg7[%c117, %c0_611], %613 {strides = array<i32>} : memref<160x8xf32, #tpu.memory_space<vmem>>, vector<1x8xf32>,
      %c1_i32_612 = arith.constant 1 : i32
      %615 = arith.addi %24, %c1_i32_612 : i32
      %c0_613 = arith.constant 0 : index
      %c8_614 = arith.constant 8 : index
      %616 = arith.index_cast %615 : i32 to index
      %c3_615 = arith.constant 3 : index
      %617 = vector.load %arg1[%c0_613, %c8_614, %616, %c3_615] : memref<1x12x11x11xf32, #tpu.memory_space<vmem>>, vector<1x1x1x8xf32>
      %618 = vector.shape_cast %617 : vector<1x1x1x8xf32> to vector<1x8xf32>
      %c118 = arith.constant 118 : index
      %c0_616 = arith.constant 0 : index
      %619 = vector.load %arg7[%c118, %c0_616] : memref<160x8xf32, #tpu.memory_space<vmem>>, vector<1x8xf32>
      tpu.vector_store %arg7[%c118, %c0_616], %618 {strides = array<i32>} : memref<160x8xf32, #tpu.memory_space<vmem>>, vector<1x8xf32>,
      %c1_i32_617 = arith.constant 1 : i32
      %620 = arith.addi %24, %c1_i32_617 : i32
      %c0_618 = arith.constant 0 : index
      %c10_619 = arith.constant 10 : index
      %621 = arith.index_cast %620 : i32 to index
      %c0_620 = arith.constant 0 : index
      %622 = vector.load %arg1[%c0_618, %c10_619, %621, %c0_620] : memref<1x12x11x11xf32, #tpu.memory_space<vmem>>, vector<1x1x1x8xf32>
      %623 = vector.shape_cast %622 : vector<1x1x1x8xf32> to vector<1x8xf32>
      %c119 = arith.constant 119 : index
      %c0_621 = arith.constant 0 : index
      %624 = vector.load %arg7[%c119, %c0_621] : memref<160x8xf32, #tpu.memory_space<vmem>>, vector<1x8xf32>
      tpu.vector_store %arg7[%c119, %c0_621], %623 {strides = array<i32>} : memref<160x8xf32, #tpu.memory_space<vmem>>, vector<1x8xf32>,
      %c1_i32_622 = arith.constant 1 : i32
      %625 = arith.addi %24, %c1_i32_622 : i32
      %c0_623 = arith.constant 0 : index
      %c11_624 = arith.constant 11 : index
      %626 = arith.index_cast %625 : i32 to index
      %c0_625 = arith.constant 0 : index
      %627 = vector.load %arg1[%c0_623, %c11_624, %626, %c0_625] : memref<1x12x11x11xf32, #tpu.memory_space<vmem>>, vector<1x1x1x8xf32>
      %628 = vector.shape_cast %627 : vector<1x1x1x8xf32> to vector<1x8xf32>
      %c120 = arith.constant 120 : index
      %c0_626 = arith.constant 0 : index
      %629 = vector.load %arg7[%c120, %c0_626] : memref<160x8xf32, #tpu.memory_space<vmem>>, vector<1x8xf32>
      tpu.vector_store %arg7[%c120, %c0_626], %628 {strides = array<i32>} : memref<160x8xf32, #tpu.memory_space<vmem>>, vector<1x8xf32>,
      %c1_i32_627 = arith.constant 1 : i32
      %630 = arith.addi %24, %c1_i32_627 : i32
      %c0_628 = arith.constant 0 : index
      %c10_629 = arith.constant 10 : index
      %631 = arith.index_cast %630 : i32 to index
      %c1_630 = arith.constant 1 : index
      %632 = vector.load %arg1[%c0_628, %c10_629, %631, %c1_630] : memref<1x12x11x11xf32, #tpu.memory_space<vmem>>, vector<1x1x1x8xf32>
      %633 = vector.shape_cast %632 : vector<1x1x1x8xf32> to vector<1x8xf32>
      %c121 = arith.constant 121 : index
      %c0_631 = arith.constant 0 : index
      %634 = vector.load %arg7[%c121, %c0_631] : memref<160x8xf32, #tpu.memory_space<vmem>>, vector<1x8xf32>
      tpu.vector_store %arg7[%c121, %c0_631], %633 {strides = array<i32>} : memref<160x8xf32, #tpu.memory_space<vmem>>, vector<1x8xf32>,
      %c1_i32_632 = arith.constant 1 : i32
      %635 = arith.addi %24, %c1_i32_632 : i32
      %c0_633 = arith.constant 0 : index
      %c11_634 = arith.constant 11 : index
      %636 = arith.index_cast %635 : i32 to index
      %c1_635 = arith.constant 1 : index
      %637 = vector.load %arg1[%c0_633, %c11_634, %636, %c1_635] : memref<1x12x11x11xf32, #tpu.memory_space<vmem>>, vector<1x1x1x8xf32>
      %638 = vector.shape_cast %637 : vector<1x1x1x8xf32> to vector<1x8xf32>
      %c122 = arith.constant 122 : index
      %c0_636 = arith.constant 0 : index
      %639 = vector.load %arg7[%c122, %c0_636] : memref<160x8xf32, #tpu.memory_space<vmem>>, vector<1x8xf32>
      tpu.vector_store %arg7[%c122, %c0_636], %638 {strides = array<i32>} : memref<160x8xf32, #tpu.memory_space<vmem>>, vector<1x8xf32>,
      %c1_i32_637 = arith.constant 1 : i32
      %640 = arith.addi %24, %c1_i32_637 : i32
      %c0_638 = arith.constant 0 : index
      %c10_639 = arith.constant 10 : index
      %641 = arith.index_cast %640 : i32 to index
      %c2_640 = arith.constant 2 : index
      %642 = vector.load %arg1[%c0_638, %c10_639, %641, %c2_640] : memref<1x12x11x11xf32, #tpu.memory_space<vmem>>, vector<1x1x1x8xf32>
      %643 = vector.shape_cast %642 : vector<1x1x1x8xf32> to vector<1x8xf32>
      %c123 = arith.constant 123 : index
      %c0_641 = arith.constant 0 : index
      %644 = vector.load %arg7[%c123, %c0_641] : memref<160x8xf32, #tpu.memory_space<vmem>>, vector<1x8xf32>
      tpu.vector_store %arg7[%c123, %c0_641], %643 {strides = array<i32>} : memref<160x8xf32, #tpu.memory_space<vmem>>, vector<1x8xf32>,
      %c1_i32_642 = arith.constant 1 : i32
      %645 = arith.addi %24, %c1_i32_642 : i32
      %c0_643 = arith.constant 0 : index
      %c11_644 = arith.constant 11 : index
      %646 = arith.index_cast %645 : i32 to index
      %c2_645 = arith.constant 2 : index
      %647 = vector.load %arg1[%c0_643, %c11_644, %646, %c2_645] : memref<1x12x11x11xf32, #tpu.memory_space<vmem>>, vector<1x1x1x8xf32>
      %648 = vector.shape_cast %647 : vector<1x1x1x8xf32> to vector<1x8xf32>
      %c124 = arith.constant 124 : index
      %c0_646 = arith.constant 0 : index
      %649 = vector.load %arg7[%c124, %c0_646] : memref<160x8xf32, #tpu.memory_space<vmem>>, vector<1x8xf32>
      tpu.vector_store %arg7[%c124, %c0_646], %648 {strides = array<i32>} : memref<160x8xf32, #tpu.memory_space<vmem>>, vector<1x8xf32>,
      %c1_i32_647 = arith.constant 1 : i32
      %650 = arith.addi %24, %c1_i32_647 : i32
      %c0_648 = arith.constant 0 : index
      %c10_649 = arith.constant 10 : index
      %651 = arith.index_cast %650 : i32 to index
      %c3_650 = arith.constant 3 : index
      %652 = vector.load %arg1[%c0_648, %c10_649, %651, %c3_650] : memref<1x12x11x11xf32, #tpu.memory_space<vmem>>, vector<1x1x1x8xf32>
      %653 = vector.shape_cast %652 : vector<1x1x1x8xf32> to vector<1x8xf32>
      %c125 = arith.constant 125 : index
      %c0_651 = arith.constant 0 : index
      %654 = vector.load %arg7[%c125, %c0_651] : memref<160x8xf32, #tpu.memory_space<vmem>>, vector<1x8xf32>
      tpu.vector_store %arg7[%c125, %c0_651], %653 {strides = array<i32>} : memref<160x8xf32, #tpu.memory_space<vmem>>, vector<1x8xf32>,
      %c2_i32_652 = arith.constant 2 : i32
      %655 = arith.addi %24, %c2_i32_652 : i32
      %c0_653 = arith.constant 0 : index
      %c8_654 = arith.constant 8 : index
      %656 = arith.index_cast %655 : i32 to index
      %c0_655 = arith.constant 0 : index
      %657 = vector.load %arg1[%c0_653, %c8_654, %656, %c0_655] : memref<1x12x11x11xf32, #tpu.memory_space<vmem>>, vector<1x1x1x8xf32>
      %658 = vector.shape_cast %657 : vector<1x1x1x8xf32> to vector<1x8xf32>
      %c126 = arith.constant 126 : index
      %c0_656 = arith.constant 0 : index
      %659 = vector.load %arg7[%c126, %c0_656] : memref<160x8xf32, #tpu.memory_space<vmem>>, vector<1x8xf32>
      tpu.vector_store %arg7[%c126, %c0_656], %658 {strides = array<i32>} : memref<160x8xf32, #tpu.memory_space<vmem>>, vector<1x8xf32>,
      %c2_i32_657 = arith.constant 2 : i32
      %660 = arith.addi %24, %c2_i32_657 : i32
      %c0_658 = arith.constant 0 : index
      %c9_659 = arith.constant 9 : index
      %661 = arith.index_cast %660 : i32 to index
      %c0_660 = arith.constant 0 : index
      %662 = vector.load %arg1[%c0_658, %c9_659, %661, %c0_660] : memref<1x12x11x11xf32, #tpu.memory_space<vmem>>, vector<1x1x1x8xf32>
      %663 = vector.shape_cast %662 : vector<1x1x1x8xf32> to vector<1x8xf32>
      %c127 = arith.constant 127 : index
      %c0_661 = arith.constant 0 : index
      %664 = vector.load %arg7[%c127, %c0_661] : memref<160x8xf32, #tpu.memory_space<vmem>>, vector<1x8xf32>
      tpu.vector_store %arg7[%c127, %c0_661], %663 {strides = array<i32>} : memref<160x8xf32, #tpu.memory_space<vmem>>, vector<1x8xf32>,
      %c2_i32_662 = arith.constant 2 : i32
      %665 = arith.addi %24, %c2_i32_662 : i32
      %c0_663 = arith.constant 0 : index
      %c8_664 = arith.constant 8 : index
      %666 = arith.index_cast %665 : i32 to index
      %c1_665 = arith.constant 1 : index
      %667 = vector.load %arg1[%c0_663, %c8_664, %666, %c1_665] : memref<1x12x11x11xf32, #tpu.memory_space<vmem>>, vector<1x1x1x8xf32>
      %668 = vector.shape_cast %667 : vector<1x1x1x8xf32> to vector<1x8xf32>
      %c128 = arith.constant 128 : index
      %c0_666 = arith.constant 0 : index
      %669 = vector.load %arg7[%c128, %c0_666] : memref<160x8xf32, #tpu.memory_space<vmem>>, vector<1x8xf32>
      tpu.vector_store %arg7[%c128, %c0_666], %668 {strides = array<i32>} : memref<160x8xf32, #tpu.memory_space<vmem>>, vector<1x8xf32>,
      %c2_i32_667 = arith.constant 2 : i32
      %670 = arith.addi %24, %c2_i32_667 : i32
      %c0_668 = arith.constant 0 : index
      %c9_669 = arith.constant 9 : index
      %671 = arith.index_cast %670 : i32 to index
      %c1_670 = arith.constant 1 : index
      %672 = vector.load %arg1[%c0_668, %c9_669, %671, %c1_670] : memref<1x12x11x11xf32, #tpu.memory_space<vmem>>, vector<1x1x1x8xf32>
      %673 = vector.shape_cast %672 : vector<1x1x1x8xf32> to vector<1x8xf32>
      %c129 = arith.constant 129 : index
      %c0_671 = arith.constant 0 : index
      %674 = vector.load %arg7[%c129, %c0_671] : memref<160x8xf32, #tpu.memory_space<vmem>>, vector<1x8xf32>
      tpu.vector_store %arg7[%c129, %c0_671], %673 {strides = array<i32>} : memref<160x8xf32, #tpu.memory_space<vmem>>, vector<1x8xf32>,
      %c2_i32_672 = arith.constant 2 : i32
      %675 = arith.addi %24, %c2_i32_672 : i32
      %c0_673 = arith.constant 0 : index
      %c8_674 = arith.constant 8 : index
      %676 = arith.index_cast %675 : i32 to index
      %c2_675 = arith.constant 2 : index
      %677 = vector.load %arg1[%c0_673, %c8_674, %676, %c2_675] : memref<1x12x11x11xf32, #tpu.memory_space<vmem>>, vector<1x1x1x8xf32>
      %678 = vector.shape_cast %677 : vector<1x1x1x8xf32> to vector<1x8xf32>
      %c130 = arith.constant 130 : index
      %c0_676 = arith.constant 0 : index
      %679 = vector.load %arg7[%c130, %c0_676] : memref<160x8xf32, #tpu.memory_space<vmem>>, vector<1x8xf32>
      tpu.vector_store %arg7[%c130, %c0_676], %678 {strides = array<i32>} : memref<160x8xf32, #tpu.memory_space<vmem>>, vector<1x8xf32>,
      %c2_i32_677 = arith.constant 2 : i32
      %680 = arith.addi %24, %c2_i32_677 : i32
      %c0_678 = arith.constant 0 : index
      %c9_679 = arith.constant 9 : index
      %681 = arith.index_cast %680 : i32 to index
      %c2_680 = arith.constant 2 : index
      %682 = vector.load %arg1[%c0_678, %c9_679, %681, %c2_680] : memref<1x12x11x11xf32, #tpu.memory_space<vmem>>, vector<1x1x1x8xf32>
      %683 = vector.shape_cast %682 : vector<1x1x1x8xf32> to vector<1x8xf32>
      %c131 = arith.constant 131 : index
      %c0_681 = arith.constant 0 : index
      %684 = vector.load %arg7[%c131, %c0_681] : memref<160x8xf32, #tpu.memory_space<vmem>>, vector<1x8xf32>
      tpu.vector_store %arg7[%c131, %c0_681], %683 {strides = array<i32>} : memref<160x8xf32, #tpu.memory_space<vmem>>, vector<1x8xf32>,
      %c2_i32_682 = arith.constant 2 : i32
      %685 = arith.addi %24, %c2_i32_682 : i32
      %c0_683 = arith.constant 0 : index
      %c8_684 = arith.constant 8 : index
      %686 = arith.index_cast %685 : i32 to index
      %c3_685 = arith.constant 3 : index
      %687 = vector.load %arg1[%c0_683, %c8_684, %686, %c3_685] : memref<1x12x11x11xf32, #tpu.memory_space<vmem>>, vector<1x1x1x8xf32>
      %688 = vector.shape_cast %687 : vector<1x1x1x8xf32> to vector<1x8xf32>
      %c132 = arith.constant 132 : index
      %c0_686 = arith.constant 0 : index
      %689 = vector.load %arg7[%c132, %c0_686] : memref<160x8xf32, #tpu.memory_space<vmem>>, vector<1x8xf32>
      tpu.vector_store %arg7[%c132, %c0_686], %688 {strides = array<i32>} : memref<160x8xf32, #tpu.memory_space<vmem>>, vector<1x8xf32>,
      %c2_i32_687 = arith.constant 2 : i32
      %690 = arith.addi %24, %c2_i32_687 : i32
      %c0_688 = arith.constant 0 : index
      %c10_689 = arith.constant 10 : index
      %691 = arith.index_cast %690 : i32 to index
      %c0_690 = arith.constant 0 : index
      %692 = vector.load %arg1[%c0_688, %c10_689, %691, %c0_690] : memref<1x12x11x11xf32, #tpu.memory_space<vmem>>, vector<1x1x1x8xf32>
      %693 = vector.shape_cast %692 : vector<1x1x1x8xf32> to vector<1x8xf32>
      %c133 = arith.constant 133 : index
      %c0_691 = arith.constant 0 : index
      %694 = vector.load %arg7[%c133, %c0_691] : memref<160x8xf32, #tpu.memory_space<vmem>>, vector<1x8xf32>
      tpu.vector_store %arg7[%c133, %c0_691], %693 {strides = array<i32>} : memref<160x8xf32, #tpu.memory_space<vmem>>, vector<1x8xf32>,
      %c2_i32_692 = arith.constant 2 : i32
      %695 = arith.addi %24, %c2_i32_692 : i32
      %c0_693 = arith.constant 0 : index
      %c11_694 = arith.constant 11 : index
      %696 = arith.index_cast %695 : i32 to index
      %c0_695 = arith.constant 0 : index
      %697 = vector.load %arg1[%c0_693, %c11_694, %696, %c0_695] : memref<1x12x11x11xf32, #tpu.memory_space<vmem>>, vector<1x1x1x8xf32>
      %698 = vector.shape_cast %697 : vector<1x1x1x8xf32> to vector<1x8xf32>
      %c134 = arith.constant 134 : index
      %c0_696 = arith.constant 0 : index
      %699 = vector.load %arg7[%c134, %c0_696] : memref<160x8xf32, #tpu.memory_space<vmem>>, vector<1x8xf32>
      tpu.vector_store %arg7[%c134, %c0_696], %698 {strides = array<i32>} : memref<160x8xf32, #tpu.memory_space<vmem>>, vector<1x8xf32>,
      %c2_i32_697 = arith.constant 2 : i32
      %700 = arith.addi %24, %c2_i32_697 : i32
      %c0_698 = arith.constant 0 : index
      %c10_699 = arith.constant 10 : index
      %701 = arith.index_cast %700 : i32 to index
      %c1_700 = arith.constant 1 : index
      %702 = vector.load %arg1[%c0_698, %c10_699, %701, %c1_700] : memref<1x12x11x11xf32, #tpu.memory_space<vmem>>, vector<1x1x1x8xf32>
      %703 = vector.shape_cast %702 : vector<1x1x1x8xf32> to vector<1x8xf32>
      %c135 = arith.constant 135 : index
      %c0_701 = arith.constant 0 : index
      %704 = vector.load %arg7[%c135, %c0_701] : memref<160x8xf32, #tpu.memory_space<vmem>>, vector<1x8xf32>
      tpu.vector_store %arg7[%c135, %c0_701], %703 {strides = array<i32>} : memref<160x8xf32, #tpu.memory_space<vmem>>, vector<1x8xf32>,
      %c2_i32_702 = arith.constant 2 : i32
      %705 = arith.addi %24, %c2_i32_702 : i32
      %c0_703 = arith.constant 0 : index
      %c11_704 = arith.constant 11 : index
      %706 = arith.index_cast %705 : i32 to index
      %c1_705 = arith.constant 1 : index
      %707 = vector.load %arg1[%c0_703, %c11_704, %706, %c1_705] : memref<1x12x11x11xf32, #tpu.memory_space<vmem>>, vector<1x1x1x8xf32>
      %708 = vector.shape_cast %707 : vector<1x1x1x8xf32> to vector<1x8xf32>
      %c136 = arith.constant 136 : index
      %c0_706 = arith.constant 0 : index
      %709 = vector.load %arg7[%c136, %c0_706] : memref<160x8xf32, #tpu.memory_space<vmem>>, vector<1x8xf32>
      tpu.vector_store %arg7[%c136, %c0_706], %708 {strides = array<i32>} : memref<160x8xf32, #tpu.memory_space<vmem>>, vector<1x8xf32>,
      %c2_i32_707 = arith.constant 2 : i32
      %710 = arith.addi %24, %c2_i32_707 : i32
      %c0_708 = arith.constant 0 : index
      %c10_709 = arith.constant 10 : index
      %711 = arith.index_cast %710 : i32 to index
      %c2_710 = arith.constant 2 : index
      %712 = vector.load %arg1[%c0_708, %c10_709, %711, %c2_710] : memref<1x12x11x11xf32, #tpu.memory_space<vmem>>, vector<1x1x1x8xf32>
      %713 = vector.shape_cast %712 : vector<1x1x1x8xf32> to vector<1x8xf32>
      %c137 = arith.constant 137 : index
      %c0_711 = arith.constant 0 : index
      %714 = vector.load %arg7[%c137, %c0_711] : memref<160x8xf32, #tpu.memory_space<vmem>>, vector<1x8xf32>
      tpu.vector_store %arg7[%c137, %c0_711], %713 {strides = array<i32>} : memref<160x8xf32, #tpu.memory_space<vmem>>, vector<1x8xf32>,
      %c2_i32_712 = arith.constant 2 : i32
      %715 = arith.addi %24, %c2_i32_712 : i32
      %c0_713 = arith.constant 0 : index
      %c11_714 = arith.constant 11 : index
      %716 = arith.index_cast %715 : i32 to index
      %c2_715 = arith.constant 2 : index
      %717 = vector.load %arg1[%c0_713, %c11_714, %716, %c2_715] : memref<1x12x11x11xf32, #tpu.memory_space<vmem>>, vector<1x1x1x8xf32>
      %718 = vector.shape_cast %717 : vector<1x1x1x8xf32> to vector<1x8xf32>
      %c138 = arith.constant 138 : index
      %c0_716 = arith.constant 0 : index
      %719 = vector.load %arg7[%c138, %c0_716] : memref<160x8xf32, #tpu.memory_space<vmem>>, vector<1x8xf32>
      tpu.vector_store %arg7[%c138, %c0_716], %718 {strides = array<i32>} : memref<160x8xf32, #tpu.memory_space<vmem>>, vector<1x8xf32>,
      %c2_i32_717 = arith.constant 2 : i32
      %720 = arith.addi %24, %c2_i32_717 : i32
      %c0_718 = arith.constant 0 : index
      %c10_719 = arith.constant 10 : index
      %721 = arith.index_cast %720 : i32 to index
      %c3_720 = arith.constant 3 : index
      %722 = vector.load %arg1[%c0_718, %c10_719, %721, %c3_720] : memref<1x12x11x11xf32, #tpu.memory_space<vmem>>, vector<1x1x1x8xf32>
      %723 = vector.shape_cast %722 : vector<1x1x1x8xf32> to vector<1x8xf32>
      %c139 = arith.constant 139 : index
      %c0_721 = arith.constant 0 : index
      %724 = vector.load %arg7[%c139, %c0_721] : memref<160x8xf32, #tpu.memory_space<vmem>>, vector<1x8xf32>
      tpu.vector_store %arg7[%c139, %c0_721], %723 {strides = array<i32>} : memref<160x8xf32, #tpu.memory_space<vmem>>, vector<1x8xf32>,
      %c3_i32_722 = arith.constant 3 : i32
      %725 = arith.addi %24, %c3_i32_722 : i32
      %c0_723 = arith.constant 0 : index
      %c8_724 = arith.constant 8 : index
      %726 = arith.index_cast %725 : i32 to index
      %c0_725 = arith.constant 0 : index
      %727 = vector.load %arg1[%c0_723, %c8_724, %726, %c0_725] : memref<1x12x11x11xf32, #tpu.memory_space<vmem>>, vector<1x1x1x8xf32>
      %728 = vector.shape_cast %727 : vector<1x1x1x8xf32> to vector<1x8xf32>
      %c140 = arith.constant 140 : index
      %c0_726 = arith.constant 0 : index
      %729 = vector.load %arg7[%c140, %c0_726] : memref<160x8xf32, #tpu.memory_space<vmem>>, vector<1x8xf32>
      tpu.vector_store %arg7[%c140, %c0_726], %728 {strides = array<i32>} : memref<160x8xf32, #tpu.memory_space<vmem>>, vector<1x8xf32>,
      %c3_i32_727 = arith.constant 3 : i32
      %730 = arith.addi %24, %c3_i32_727 : i32
      %c0_728 = arith.constant 0 : index
      %c9_729 = arith.constant 9 : index
      %731 = arith.index_cast %730 : i32 to index
      %c0_730 = arith.constant 0 : index
      %732 = vector.load %arg1[%c0_728, %c9_729, %731, %c0_730] : memref<1x12x11x11xf32, #tpu.memory_space<vmem>>, vector<1x1x1x8xf32>
      %733 = vector.shape_cast %732 : vector<1x1x1x8xf32> to vector<1x8xf32>
      %c141 = arith.constant 141 : index
      %c0_731 = arith.constant 0 : index
      %734 = vector.load %arg7[%c141, %c0_731] : memref<160x8xf32, #tpu.memory_space<vmem>>, vector<1x8xf32>
      tpu.vector_store %arg7[%c141, %c0_731], %733 {strides = array<i32>} : memref<160x8xf32, #tpu.memory_space<vmem>>, vector<1x8xf32>,
      %c3_i32_732 = arith.constant 3 : i32
      %735 = arith.addi %24, %c3_i32_732 : i32
      %c0_733 = arith.constant 0 : index
      %c8_734 = arith.constant 8 : index
      %736 = arith.index_cast %735 : i32 to index
      %c1_735 = arith.constant 1 : index
      %737 = vector.load %arg1[%c0_733, %c8_734, %736, %c1_735] : memref<1x12x11x11xf32, #tpu.memory_space<vmem>>, vector<1x1x1x8xf32>
      %738 = vector.shape_cast %737 : vector<1x1x1x8xf32> to vector<1x8xf32>
      %c142 = arith.constant 142 : index
      %c0_736 = arith.constant 0 : index
      %739 = vector.load %arg7[%c142, %c0_736] : memref<160x8xf32, #tpu.memory_space<vmem>>, vector<1x8xf32>
      tpu.vector_store %arg7[%c142, %c0_736], %738 {strides = array<i32>} : memref<160x8xf32, #tpu.memory_space<vmem>>, vector<1x8xf32>,
      %c3_i32_737 = arith.constant 3 : i32
      %740 = arith.addi %24, %c3_i32_737 : i32
      %c0_738 = arith.constant 0 : index
      %c9_739 = arith.constant 9 : index
      %741 = arith.index_cast %740 : i32 to index
      %c1_740 = arith.constant 1 : index
      %742 = vector.load %arg1[%c0_738, %c9_739, %741, %c1_740] : memref<1x12x11x11xf32, #tpu.memory_space<vmem>>, vector<1x1x1x8xf32>
      %743 = vector.shape_cast %742 : vector<1x1x1x8xf32> to vector<1x8xf32>
      %c143 = arith.constant 143 : index
      %c0_741 = arith.constant 0 : index
      %744 = vector.load %arg7[%c143, %c0_741] : memref<160x8xf32, #tpu.memory_space<vmem>>, vector<1x8xf32>
      tpu.vector_store %arg7[%c143, %c0_741], %743 {strides = array<i32>} : memref<160x8xf32, #tpu.memory_space<vmem>>, vector<1x8xf32>,
      %c3_i32_742 = arith.constant 3 : i32
      %745 = arith.addi %24, %c3_i32_742 : i32
      %c0_743 = arith.constant 0 : index
      %c8_744 = arith.constant 8 : index
      %746 = arith.index_cast %745 : i32 to index
      %c2_745 = arith.constant 2 : index
      %747 = vector.load %arg1[%c0_743, %c8_744, %746, %c2_745] : memref<1x12x11x11xf32, #tpu.memory_space<vmem>>, vector<1x1x1x8xf32>
      %748 = vector.shape_cast %747 : vector<1x1x1x8xf32> to vector<1x8xf32>
      %c144 = arith.constant 144 : index
      %c0_746 = arith.constant 0 : index
      %749 = vector.load %arg7[%c144, %c0_746] : memref<160x8xf32, #tpu.memory_space<vmem>>, vector<1x8xf32>
      tpu.vector_store %arg7[%c144, %c0_746], %748 {strides = array<i32>} : memref<160x8xf32, #tpu.memory_space<vmem>>, vector<1x8xf32>,
      %c3_i32_747 = arith.constant 3 : i32
      %750 = arith.addi %24, %c3_i32_747 : i32
      %c0_748 = arith.constant 0 : index
      %c9_749 = arith.constant 9 : index
      %751 = arith.index_cast %750 : i32 to index
      %c2_750 = arith.constant 2 : index
      %752 = vector.load %arg1[%c0_748, %c9_749, %751, %c2_750] : memref<1x12x11x11xf32, #tpu.memory_space<vmem>>, vector<1x1x1x8xf32>
      %753 = vector.shape_cast %752 : vector<1x1x1x8xf32> to vector<1x8xf32>
      %c145 = arith.constant 145 : index
      %c0_751 = arith.constant 0 : index
      %754 = vector.load %arg7[%c145, %c0_751] : memref<160x8xf32, #tpu.memory_space<vmem>>, vector<1x8xf32>
      tpu.vector_store %arg7[%c145, %c0_751], %753 {strides = array<i32>} : memref<160x8xf32, #tpu.memory_space<vmem>>, vector<1x8xf32>,
      %c3_i32_752 = arith.constant 3 : i32
      %755 = arith.addi %24, %c3_i32_752 : i32
      %c0_753 = arith.constant 0 : index
      %c8_754 = arith.constant 8 : index
      %756 = arith.index_cast %755 : i32 to index
      %c3_755 = arith.constant 3 : index
      %757 = vector.load %arg1[%c0_753, %c8_754, %756, %c3_755] : memref<1x12x11x11xf32, #tpu.memory_space<vmem>>, vector<1x1x1x8xf32>
      %758 = vector.shape_cast %757 : vector<1x1x1x8xf32> to vector<1x8xf32>
      %c146 = arith.constant 146 : index
      %c0_756 = arith.constant 0 : index
      %759 = vector.load %arg7[%c146, %c0_756] : memref<160x8xf32, #tpu.memory_space<vmem>>, vector<1x8xf32>
      tpu.vector_store %arg7[%c146, %c0_756], %758 {strides = array<i32>} : memref<160x8xf32, #tpu.memory_space<vmem>>, vector<1x8xf32>,
      %c0_757 = arith.constant 0 : index
      %c0_758 = arith.constant 0 : index
      %760 = vector.load %arg7[%c0_757, %c0_758] : memref<160x8xf32, #tpu.memory_space<vmem>>, vector<160x8xf32>
      %761 = arith.truncf %760 : vector<160x8xf32> to vector<160x8xbf16>
      %cst_759 = arith.constant dense<0.000000e+00> : vector<128x8xf32>
      %762 = tpu.matmul %4, %761, %cst_759 {dimension_numbers = #tpu.dot_dimension_numbers<[1], [0], [0], [1], [0, 0, 1, 1], [], []>} : vector<128x160xbf16>, vector<160x8xbf16>, vector<128x8xf32> -> vector<128x8xf32>
      %c0_760 = arith.constant 0 : index
      %c0_761 = arith.constant 0 : index
      %763 = vector.load %arg8[%c0_760, %c0_761] : memref<128x8xf32, #tpu.memory_space<vmem>>, vector<128x8xf32>
      %764 = vector.broadcast %5 : vector<128x1xf32> to vector<128x8xf32>
      %765 = arith.addf %762, %764 : vector<128x8xf32>
      %cst_762 = arith.constant 0.000000e+00 : f32
      %766 = vector.broadcast %cst_762 : f32 to vector<128x8xf32>
      %767 = arith.maximumf %765, %766 : vector<128x8xf32>
      %768 = arith.addf %763, %767 : vector<128x8xf32>
      %c0_763 = arith.constant 0 : index
      %c0_764 = arith.constant 0 : index
      %769 = vector.load %arg8[%c0_763, %c0_764] : memref<128x8xf32, #tpu.memory_space<vmem>>, vector<128x8xf32>
      tpu.vector_store %arg8[%c0_763, %c0_764], %768 {strides = array<i32>} : memref<128x8xf32, #tpu.memory_space<vmem>>, vector<128x8xf32>,
    }
    %c8_i32_8 = arith.constant 8 : i32
    %c0_9 = arith.constant 0 : index
    %c0_10 = arith.constant 0 : index
    %7 = vector.load %arg8[%c0_9, %c0_10] : memref<128x8xf32, #tpu.memory_space<vmem>>, vector<128x8xf32>
    %cst_11 = arith.constant dense<0.000000e+00> : vector<128xf32>
    %8 = vector.multi_reduction <add>, %7, %cst_11 [1] : vector<128x8xf32> to vector<128xf32>
    %9 = vector.shape_cast %8 : vector<128xf32> to vector<128x1xf32>
    %cst_12 = arith.constant 1.562500e-02 : f32
    %10 = vector.broadcast %cst_12 : f32 to vector<128x1xf32>
    %11 = arith.mulf %9, %10 : vector<128x1xf32>
    %c0_13 = arith.constant 0 : index
    %c0_14 = arith.constant 0 : index
    %12 = vector.load %arg4[%c0_13, %c0_14] : memref<128x2048xbf16, #tpu.memory_space<vmem>>, vector<128x2048xbf16>
    %13 = arith.extf %12 : vector<128x2048xbf16> to vector<128x2048xf32>
    %14 = vector.broadcast %11 : vector<128x1xf32> to vector<128x2048xf32>
    %15 = arith.mulf %14, %13 : vector<128x2048xf32>
    %cst_15 = arith.constant dense<0.000000e+00> : vector<2048xf32>
    %16 = vector.multi_reduction <add>, %15, %cst_15 [0] : vector<128x2048xf32> to vector<2048xf32>
    %17 = vector.shape_cast %16 : vector<2048xf32> to vector<1x2048xf32>
    %c0_16 = arith.constant 0 : index
    %c0_17 = arith.constant 0 : index
    %18 = vector.load %arg5[%c0_16, %c0_17] : memref<1x2048xf32, #tpu.memory_space<vmem>>, vector<1x2048xf32>
    %19 = arith.addf %17, %18 : vector<1x2048xf32>
    %c0_18 = arith.constant 0 : index
    %c0_19 = arith.constant 0 : index
    %c0_20 = arith.constant 0 : index
    %20 = vector.load %arg6[%c0_18, %c0_19, %c0_20] : memref<1x1x2048xf32, #tpu.memory_space<vmem>>, vector<1x1x2048xf32>
    %21 = vector.shape_cast %20 : vector<1x1x2048xf32> to vector<1x2048xf32>
    %22 = vector.shape_cast %19 : vector<1x2048xf32> to vector<1x1x2048xf32>
    tpu.vector_store %arg6[%c0_18, %c0_19, %c0_20], %22 {strides = array<i32>} : memref<1x1x2048xf32, #tpu.memory_space<vmem>>, vector<1x1x2048xf32>,
    return
  }
  func.func @transform_0(%arg0: i32) -> (i32, i32, i32, i32) {
    %c0_i32 = arith.constant 0 : i32
    %c0_i32_0 = arith.constant 0 : i32
    %c0_i32_1 = arith.constant 0 : i32
    %c0_i32_2 = arith.constant 0 : i32
    return %arg0, %c0_i32, %c0_i32_0, %c0_i32_1 : i32, i32, i32, i32
  }
  func.func @transform_1(%arg0: i32) -> (i32, i32) {
    %c0_i32 = arith.constant 0 : i32
    %c0_i32_0 = arith.constant 0 : i32
    %c0_i32_1 = arith.constant 0 : i32
    return %c0_i32, %c0_i32_0 : i32, i32
  }
  func.func @transform_2(%arg0: i32) -> (i32, i32) {
    %c0_i32 = arith.constant 0 : i32
    %c0_i32_0 = arith.constant 0 : i32
    %c0_i32_1 = arith.constant 0 : i32
    return %c0_i32, %c0_i32_0 : i32, i32
  }
  func.func @transform_3(%arg0: i32) -> (i32, i32) {
    %c0_i32 = arith.constant 0 : i32
    %c0_i32_0 = arith.constant 0 : i32
    %c0_i32_1 = arith.constant 0 : i32
    return %c0_i32, %c0_i32_0 : i32, i32
  }
  func.func @transform_4(%arg0: i32) -> (i32, i32) {
    %c0_i32 = arith.constant 0 : i32
    %c0_i32_0 = arith.constant 0 : i32
    %c0_i32_1 = arith.constant 0 : i32
    return %c0_i32, %c0_i32_0 : i32, i32
  }
  func.func @transform_5(%arg0: i32) -> (i32, i32, i32) {
    %c0_i32 = arith.constant 0 : i32
    %c0_i32_0 = arith.constant 0 : i32
    %c0_i32_1 = arith.constant 0 : i32
    return %arg0, %c0_i32, %c0_i32_0 : i32, i32, i32
  }
}

</mosaic_0001>

<bundles_post_ra>
// kernel: tpu_custom_call.1
= control target key start
LH: loop header
LB: loop body
LE: loop exit
PB: predicated region body
PF: predicated region fallthrough
CT: control target
= control target key end

     0   :  { %10 = vsyncpa [#allocation5], 0  ;;  %s6634_s0 = inlined_call_operand.vmem [shape: f32[4,12,11,11], index: 0, kind: input, shape index: {}]   ;;  %s6635_s1 = inlined_call_operand.vmem [shape: bf16[128,160], index: 1, kind: input, shape index: {}]   ;;  %s6636_s2 = inlined_call_operand.vmem [shape: f32[128,1], index: 2, kind: input, shape index: {}]   ;;  %s6637_s3 = inlined_call_operand.vmem [shape: bf16[128,2048], index: 3, kind: input, shape index: {}]   ;;  %s6638_s4 = inlined_call_operand.vmem [shape: f32[1,2048], index: 4, kind: input, shape index: {}]   ;;  %s6639_s5 = inlined_call_operand.hbm [shape: f32[4,1,2048], index: 5, kind: output, shape index: {}]  }
   0x1   :  { %12 = vsyncpa [#allocation5 + $0x1], 0  ;;  %s3206_s18 = smov 0   ;;  %s3208_s19 = smov 0  }
   0x2   :  { %s3210_s20 = smov 0   ;;  %s3212_s21 = smov 0  }
   0x3 LB: > { %s3227_s22 = sadd.s32 4294967295, %s3165_s21   ;;  %s2792_s23 = sadd.s32 4294967294, %s3165_s21   ;;  %s3165_s21 = sphi %s3212_s21, %s7690_s21   ;;  %s3161_s20 = sphi %s3210_s20, %s7689_s20   ;;  %s3157_s19 = sphi %s3208_s19, %s7688_s19   ;;  %s3153_s18 = sphi %s3206_s18, %s7687_s18  }
   0x4   : > { %s3231_s24 = sadd.s32 1, %s3165_s21   ;;  %s135_s25 = sadd.s32 1, %s3161_s20 }
   0x5   : > { %s132_s26 = ssub.s32 %s3165_s21, %s3231_s24  ;;  %p145_p0 = scmp.ne.s32.totalorder %s3161_s20, %s3157_s19 }
   0x6   : > { %p133_p1 = scmp.eq.s32.totalorder %s132_s26, 0  ;;  %p146_p2 = scmp.eq.s32.totalorder %s3227_s22, 3 }
   0x7   : > { %p151_p3 = scmp.ne.s32.totalorder %s3157_s19, %s3153_s18  ;;  %p152_p4 = scmp.eq.s32.totalorder %s2792_s23, 3 }
   0x8   : > { %s3242_s27 = scalar_select %p133_p1, %s3161_s20, %s135_s25  }
   0x9   : > { %p3244_p5 = por %p146_p2, %p145_p0  ;;  %p3248_p6 = por %p152_p4, %p151_p3 }
   0xa   : > { %p2795_p7 = scmp.ge.s32.totalorder %s3165_s21, 1  ;;  %p190_p8 = scmp.lt.s32.totalorder %s3165_s21, 5 }
   0xc   : > { %p191_p9 = pnand %p2795_p7, %p190_p8 }
   0xe   : > { %194 = sbr.rel (%p191_p9) target bundleno = 1127 (0x467), region = 40 }
  0x13   : > { %s215_s30 = sand.u32 1, %s3157_s19   ;;  %p218_p10 = scmp.lt.s32.totalorder %s3227_s22, 3  ;;  %vm224_vm0 = vcmask 64512   ;;  %v3171_v0 = vmov 0.0   ;;  %v3272_v1 = vld [vmem:[%s6635_s1 + $0x4] sm:$0xf] }
  0x14   : > { %s3258_s6 = sshll.u32 %s215_s30, 4  ;;  %225 = vst.msk [vmem:[#allocation2] sm:$0xff] %vm224_vm0, %v3171_v0  ;;  %v3277_v2 = vld [vmem:[%s6635_s1] sm:$0xf]  ;;  %v3289_v4 = vld [vmem:[%s6635_s1 + $0x8] sm:$0xf0] }
  0x15   : > { %226 = vst.msk [vmem:[#allocation2 + $0x8] sm:$0xff] %vm224_vm0, %v3171_v0  ;;  %s219_s7 = scalar_select %p218_p10, %s3227_s22, 3  ;;  %v3282_v3 = vld [vmem:[%s6636_s2] sm:$0xff]  ;;  %v3294_v5 = vld [vmem:[%s6635_s1 + $0x4] sm:$0xf0]  ;;  %v3333_v11 = vld [vmem:[%s6636_s2 + $0x10] sm:$0xff] }
  0x16   : > { %227 = vst.msk [vmem:[#allocation2 + $0x10] sm:$0xff] %vm224_vm0, %v3171_v0  ;;  %v3301_v6 = vld [vmem:[%s6635_s1 + $0x14] sm:$0xf]  ;;  %v3306_v7 = vld [vmem:[%s6635_s1 + $0x10] sm:$0xf]  ;;  %v3311_v8 = vld [vmem:[%s6636_s2 + $0x8] sm:$0xff] }
  0x17   : > { %228 = vst.msk [vmem:[#allocation2 + $0x18] sm:$0xff] %vm224_vm0, %v3171_v0  ;;  %s3043_s14 = smul.u32 192, %s219_s7  ;;  %v3323_v9 = vld [vmem:[%s6635_s1 + $0x18] sm:$0xf0]  ;;  %v3328_v10 = vld [vmem:[%s6635_s1 + $0x14] sm:$0xf0] }
  0x18   : > { %6813 = vst [vmem:[#allocation7_spill] sm:$0xff] %v3272_v1  ;;  %v3340_v12 = vld [vmem:[%s6635_s1 + $0x24] sm:$0xf]  ;;  %v3345_v13 = vld [vmem:[%s6635_s1 + $0x20] sm:$0xf]  ;;  %v3350_v14 = vld [vmem:[%s6636_s2 + $0x18] sm:$0xff] }
  0x19   : > { %6814 = vst [vmem:[#allocation8_spill] sm:$0xff] %v3277_v2  ;;  %s3316_s13 = scalar_lea.vmem %s6634_s0, %s3043_s14  ;;  %v3357_v15 = vld [vmem:[%s6635_s1 + $0x28] sm:$0xf0]  ;;  %v3362_v16 = vld [vmem:[%s6635_s1 + $0x24] sm:$0xf0]  ;;  %v3367_v17 = vld [vmem:[%s6636_s2 + $0x20] sm:$0xff] }
  0x1a   : > { %6815 = vst [vmem:[#allocation9_spill] sm:$0xff] %v3282_v3  ;;  %v3374_v18 = vld [vmem:[%s6635_s1 + $0x34] sm:$0xf]  ;;  %v3379_v19 = vld [vmem:[%s6635_s1 + $0x30] sm:$0xf]  ;;  %v3384_v20 = vld [vmem:[%s6636_s2 + $0x28] sm:$0xff] }
  0x1b   : > { %229 = vst.msk [vmem:[#allocation2 + $0x20] sm:$0xff] %vm224_vm0, %v3171_v0  ;;  %v3391_v21 = vld [vmem:[%s6635_s1 + $0x38] sm:$0xf0]  ;;  %v3396_v22 = vld [vmem:[%s6635_s1 + $0x34] sm:$0xf0]  ;;  %v3401_v23 = vld [vmem:[%s6636_s2 + $0x30] sm:$0xff] }
  0x1c   : > { %6816 = vst [vmem:[#allocation10_spill] sm:$0xff] %v3289_v4  ;;  %v3408_v24 = vld [vmem:[%s6635_s1 + $0x44] sm:$0xf]  ;;  %v3413_v25 = vld [vmem:[%s6635_s1 + $0x40] sm:$0xf]  ;;  %v3418_v26 = vld [vmem:[%s6636_s2 + $0x38] sm:$0xff] }
  0x1d   : > { %6817 = vst [vmem:[#allocation11_spill] sm:$0xff] %v3294_v5  ;;  %v3425_v27 = vld [vmem:[%s6635_s1 + $0x48] sm:$0xf0]  ;;  %v3430_v28 = vld [vmem:[%s6635_s1 + $0x44] sm:$0xf0]  ;;  %v3435_v29 = vld [vmem:[%s6636_s2 + $0x40] sm:$0xff] }
  0x1e   : > { %230 = vst.msk [vmem:[#allocation2 + $0x28] sm:$0xff] %vm224_vm0, %v3171_v0  ;;  %v3442_v30 = vld [vmem:[%s6635_s1 + $0x54] sm:$0xf]  ;;  %v3447_v31 = vld [vmem:[%s6635_s1 + $0x50] sm:$0xf]  ;;  %v3452_v32 = vld [vmem:[%s6636_s2 + $0x48] sm:$0xff] }
  0x1f   : > { %6818 = vst [vmem:[#allocation12_spill] sm:$0xff] %v3301_v6  ;;  %v3459_v33 = vld [vmem:[%s6635_s1 + $0x58] sm:$0xf0]  ;;  %v3464_v34 = vld [vmem:[%s6635_s1 + $0x54] sm:$0xf0]  ;;  %v3469_v35 = vld [vmem:[%s6636_s2 + $0x50] sm:$0xff] }
  0x20   : > { %6819 = vst [vmem:[#allocation13_spill] sm:$0xff] %v3306_v7  ;;  %v3476_v36 = vld [vmem:[%s6635_s1 + $0x64] sm:$0xf]  ;;  %v3481_v37 = vld [vmem:[%s6635_s1 + $0x60] sm:$0xf]  ;;  %v3486_v38 = vld [vmem:[%s6636_s2 + $0x58] sm:$0xff] }
  0x21   : > { %6820 = vst [vmem:[#allocation14_spill] sm:$0xff] %v3311_v8  ;;  %v3493_v39 = vld [vmem:[%s6635_s1 + $0x68] sm:$0xf0]  ;;  %v3498_v40 = vld [vmem:[%s6635_s1 + $0x64] sm:$0xf0]  ;;  %v3503_v41 = vld [vmem:[%s6636_s2 + $0x60] sm:$0xff] }
  0x22   : > { %231 = vst.msk [vmem:[#allocation2 + $0x30] sm:$0xff] %vm224_vm0, %v3171_v0  ;;  %v3510_v42 = vld [vmem:[%s6635_s1 + $0x74] sm:$0xf]  ;;  %v3515_v43 = vld [vmem:[%s6635_s1 + $0x70] sm:$0xf]  ;;  %v3520_v44 = vld [vmem:[%s6636_s2 + $0x68] sm:$0xff] }
  0x23   : > { %6821 = vst [vmem:[#allocation15_spill] sm:$0xff] %v3323_v9  ;;  %v3527_v45 = vld [vmem:[%s6635_s1 + $0x78] sm:$0xf0]  ;;  %v3532_v46 = vld [vmem:[%s6635_s1 + $0x74] sm:$0xf0]  ;;  %v3537_v47 = vld [vmem:[%s6636_s2 + $0x70] sm:$0xff] }
  0x24   : > { %6822 = vst [vmem:[#allocation16_spill] sm:$0xff] %v3328_v10  ;;  %v3544_v48 = vld [vmem:[%s6636_s2 + $0x78] sm:$0xff]  ;;  %s3579_s17 = scalar_lea.vmem [#allocation4], %s3258_s6  ;;  %s3581_s23 = smov 0  }
  0x25   : > { %6823 = vst [vmem:[#allocation17_spill] sm:$0xff] %v3333_v11 }
  0x26   : > { %232 = vst.msk [vmem:[#allocation2 + $0x38] sm:$0xff] %vm224_vm0, %v3171_v0 }
  0x27   : > { %6824 = vst [vmem:[#allocation18_spill] sm:$0xff] %v3340_v12 }
  0x28   : > { %6825 = vst [vmem:[#allocation19_spill] sm:$0xff] %v3345_v13 }
  0x29   : > { %6826 = vst [vmem:[#allocation20_spill] sm:$0xff] %v3350_v14 }
  0x2a   : > { %233 = vst.msk [vmem:[#allocation2 + $0x40] sm:$0xff] %vm224_vm0, %v3171_v0 }
  0x2b   : > { %6827 = vst [vmem:[#allocation21_spill] sm:$0xff] %v3357_v15 }
  0x2c   : > { %6828 = vst [vmem:[#allocation22_spill] sm:$0xff] %v3362_v16 }
  0x2d   : > { %6829 = vst [vmem:[#allocation23_spill] sm:$0xff] %v3367_v17 }
  0x2e   : > { %234 = vst.msk [vmem:[#allocation2 + $0x48] sm:$0xff] %vm224_vm0, %v3171_v0 }
  0x2f   : > { %6830 = vst [vmem:[#allocation24_spill] sm:$0xff] %v3374_v18 }
  0x30   : > { %235 = vst.msk [vmem:[#allocation2 + $0x50] sm:$0xff] %vm224_vm0, %v3171_v0 }
  0x31   : > { %236 = vst.msk [vmem:[#allocation2 + $0x58] sm:$0xff] %vm224_vm0, %v3171_v0 }
  0x32   : > { %237 = vst.msk [vmem:[#allocation2 + $0x60] sm:$0xff] %vm224_vm0, %v3171_v0 }
  0x33   : > { %238 = vst.msk [vmem:[#allocation2 + $0x68] sm:$0xff] %vm224_vm0, %v3171_v0 }
  0x34   : > { %239 = vst.msk [vmem:[#allocation2 + $0x70] sm:$0xff] %vm224_vm0, %v3171_v0 }
  0x35   : > { %240 = vst.msk [vmem:[#allocation2 + $0x78] sm:$0xff] %vm224_vm0, %v3171_v0 }
  0x36   : > { %241 = vst.msk [vmem:[#allocation2 + $0x80] sm:$0xff] %vm224_vm0, %v3171_v0 }
  0x37   : > { %242 = vst.msk [vmem:[#allocation2 + $0x88] sm:$0xff] %vm224_vm0, %v3171_v0 }
  0x38   : > { %243 = vst.msk [vmem:[#allocation2 + $0x90] sm:$0xff] %vm224_vm0, %v3171_v0 }
  0x39   : > { %244 = vst.msk [vmem:[#allocation2 + $0x98] sm:$0xff] %vm224_vm0, %v3171_v0 }
  0x3a   : > { %245 = vst.msk [vmem:[#allocation3] sm:$0xff] %vm224_vm0, %v3171_v0 }
  0x3b   : > { %246 = vst.msk [vmem:[#allocation3 + $0x8] sm:$0xff] %vm224_vm0, %v3171_v0 }
  0x3c   : > { %247 = vst.msk [vmem:[#allocation3 + $0x10] sm:$0xff] %vm224_vm0, %v3171_v0 }
  0x3d   : > { %248 = vst.msk [vmem:[#allocation3 + $0x18] sm:$0xff] %vm224_vm0, %v3171_v0 }
  0x3e   : > { %249 = vst.msk [vmem:[#allocation3 + $0x20] sm:$0xff] %vm224_vm0, %v3171_v0 }
  0x3f   : > { %250 = vst.msk [vmem:[#allocation3 + $0x28] sm:$0xff] %vm224_vm0, %v3171_v0 }
  0x40   : > { %251 = vst.msk [vmem:[#allocation3 + $0x30] sm:$0xff] %vm224_vm0, %v3171_v0 }
  0x41   : > { %252 = vst.msk [vmem:[#allocation3 + $0x38] sm:$0xff] %vm224_vm0, %v3171_v0 }
  0x42   : > { %253 = vst.msk [vmem:[#allocation3 + $0x40] sm:$0xff] %vm224_vm0, %v3171_v0 }
  0x43   : > { %254 = vst.msk [vmem:[#allocation3 + $0x48] sm:$0xff] %vm224_vm0, %v3171_v0 }
  0x44   : > { %255 = vst.msk [vmem:[#allocation3 + $0x50] sm:$0xff] %vm224_vm0, %v3171_v0 }
  0x45   : > { %256 = vst.msk [vmem:[#allocation3 + $0x58] sm:$0xff] %vm224_vm0, %v3171_v0 }
  0x46   : > { %257 = vst.msk [vmem:[#allocation3 + $0x60] sm:$0xff] %vm224_vm0, %v3171_v0 }
  0x47   : > { %258 = vst.msk [vmem:[#allocation3 + $0x68] sm:$0xff] %vm224_vm0, %v3171_v0 }
  0x48   : > { %259 = vst.msk [vmem:[#allocation3 + $0x70] sm:$0xff] %vm224_vm0, %v3171_v0 }
  0x49   : > { %260 = vst.msk [vmem:[#allocation3 + $0x78] sm:$0xff] %vm224_vm0, %v3171_v0 }
  0x4a LB: >> { %s3588_s25 = scalar_lea.vmem %s3316_s13, %s3169_s23  ;;  %s3172_s6 = smov 126   ;;  %vm301_vm1 = vcmask 57344   ;;  %v6831_v8 = vld [vmem:[#allocation14_spill] sm:$0xff]  ;;  %v6832_v3 = vld [vmem:[#allocation9_spill] sm:$0xff]  ;;  %v6834_v2 = vld [vmem:[#allocation8_spill] sm:$0xff]  ;;  %vm1295_vm2 = vcmask 261120   ;;  %s3169_s23 = sphi %s3581_s23, %s298_s23  }
  0x4b   : >> { %v319_v49 = vld [vmem:[%s3588_s25] sm:$0x1]  ;;  %s3173_s26 = smov 127   ;;  %s3174_s14 = smov 125   ;;  %v2800_v52 = vld [vmem:[%s3588_s25 + $0x10] sm:$0x1] }
  0x4c   : >> { %v307_v50 = vld [vmem:[%s3588_s25] sm:$0x1]  ;;  %321 = vrot.lane.b32.xlu1 %v319_v49, %s3172_s6  ;;  %v2799_v53 = vld [vmem:[%s3588_s25 + $0x10] sm:$0x1]  ;;  %v2810_v58 = vld [vmem:[%s3588_s25 + $0x1] sm:$0x1] }
  0x4d   : >> { %309 = vrot.lane.b32.xlu0 %v307_v50, %s3173_s26  ;;  %v331_v51 = vld [vmem:[%s3588_s25] sm:$0x1]  ;;  %v2804_v56 = vld [vmem:[%s3588_s25 + $0x30] sm:$0x1]  ;;  %v2811_v60 = vld [vmem:[%s3588_s25 + $0x11] sm:$0x1] }
  0x4e   : >> { %333 = vrot.lane.b32.xlu2 %v331_v51, %s3174_s14  ;;  %v2803_v54 = vld [vmem:[%s3588_s25 + $0x20] sm:$0x1]  ;;  %v2806_v57 = vld [vmem:[%s3588_s25 + $0x30] sm:$0x1]  ;;  %v2813_v61 = vld [vmem:[%s3588_s25 + $0x11] sm:$0x1] }
  0x4f   : >> { %v2805_v55 = vld [vmem:[%s3588_s25 + $0x20] sm:$0x1]  ;;  %v2812_v62 = vld [vmem:[%s3588_s25 + $0x1] sm:$0x1]  ;;  %v2818_v0 = vld [vmem:[%s3588_s25 + $0x31] sm:$0x1] }
  0x50   : >> { %v2807_v59 = vld [vmem:[%s3588_s25 + $0x20] sm:$0x1]  ;;  %v2814_v63 = vld [vmem:[%s3588_s25 + $0x1] sm:$0x1]  ;;  %v6833_v11 = vld [vmem:[#allocation17_spill] sm:$0xff]  ;;  %s298_s23 = sadd.s32 1, %s3169_s23  }
  0x51   : >> { %v2817_v49 = vld [vmem:[%s3588_s25 + $0x21] sm:$0x1]  ;;  %v6836_v14 = vld [vmem:[#allocation20_spill] sm:$0xff]  ;;  %v6838_v7 = vld [vmem:[#allocation13_spill] sm:$0xff]  ;;  %p295_p11 = scmp.ge.s32.totalorder %s298_s23, 8  }
  0x52   : >> { %v2819_v50 = vld [vmem:[%s3588_s25 + $0x21] sm:$0x1]  ;;  %v6839_v10 = vld [vmem:[#allocation16_spill] sm:$0xff]  ;;  %v6840_v4 = vld [vmem:[#allocation10_spill] sm:$0xff]  ;;  %s3014_s16 = sshll.u32 (%p295_p11), %s3227_s22, 4  ;;  %vm2604_vm3 = vcmask (%p295_p11), 1040384  }
  0x53   : >> { %v2821_v51 = vld [vmem:[%s3588_s25 + $0x21] sm:$0x1]  ;;  %v6843_v16 = vld [vmem:[#allocation22_spill] sm:$0xff]  ;;  %v6845_v6 = vld [vmem:[#allocation12_spill] sm:$0xff]  ;;  %vm2606_vm4 = vcmask (%p295_p11), 1042434   ;;  %vm2608_vm5 = vcmask (%p295_p11), 1041408  }
  0x54   : >> { %327 = vrot.lane.b32.xlu1 %v2800_v52, %s3172_s6  ;;  %v2820_v52 = vld [vmem:[%s3588_s25 + $0x31] sm:$0x1]  ;;  %v6835_v5 = vld [vmem:[#allocation11_spill] sm:$0xff]  ;;  %v6847_v12 = vld [vmem:[#allocation18_spill] sm:$0xff]  ;;  %vm2610_vm6 = vcmask (%p295_p11), 1044484   ;;  %vm2612_vm7 = vcmask (%p295_p11), 1046534  }
  0x55   : >> { %315 = vrot.lane.b32.xlu0 %v2799_v53, %s3173_s26  ;;  %v2824_v53 = vld [vmem:[%s3588_s25 + $0x2] sm:$0x1]  ;;  %v6846_v15 = vld [vmem:[#allocation21_spill] sm:$0xff]  ;;  %v6848_v18 = vld [vmem:[#allocation24_spill] sm:$0xff]  ;;  %vm2614_vm8 = vcmask (%p295_p11), 1045508   ;;  %s2642_s22 = sshll.u32 (%p295_p11), %s3579_s17, 4  ;;  %s2643_s22 = int_to_ptr.vmem [resolvable:$true] %s2642_s22 }
  0x56   : >> { %347 = vrot.lane.b32.xlu2 %v2803_v54, %s3173_s26  ;;  %v2826_v54 = vld [vmem:[%s3588_s25 + $0x2] sm:$0x1]  ;;  %vm2616_vm9 = vcmask (%p295_p11), 1043456   ;;  %s3119_s10 = scalar_lea.hbm (%p295_p11), %s6639_s5, 64 }
  0x57   : >> { %v6837_v17 = vld [vmem:[#allocation23_spill] sm:$0xff] }
  0x58   : >> { %v6841_v1 = vld [vmem:[#allocation7_spill] sm:$0xff] }
  0x59   : >> { %v6842_v13 = vld [vmem:[#allocation19_spill] sm:$0xff] }
  0x5a   : >> { %v6844_v9 = vld [vmem:[#allocation15_spill] sm:$0xff] }
  0x5c   : >> { %359 = vrot.lane.b32.xlu1 %v2805_v55, %s3172_s6  ;;  %v2825_v55 = vld [vmem:[%s3588_s25 + $0x12] sm:$0x1] }
  0x5d   : >> { %353 = vrot.lane.b32.xlu0 %v2804_v56, %s3173_s26  ;;  %v2827_v56 = vld [vmem:[%s3588_s25 + $0x12] sm:$0x1] }
  0x5e   : >> { %365 = vrot.lane.b32.xlu2 %v2806_v57, %s3172_s6  ;;  %v2831_v57 = vld [vmem:[%s3588_s25 + $0x22] sm:$0x1] }
  0x64   : >> { %385 = vrot.lane.b32.xlu1 %v2810_v58, %s3173_s26  ;;  %v2828_v58 = vld [vmem:[%s3588_s25 + $0x2] sm:$0x1] }
  0x65   : >> { %371 = vrot.lane.b32.xlu0 %v2807_v59, %s3174_s14  ;;  %v2832_v59 = vld [vmem:[%s3588_s25 + $0x32] sm:$0x1] }
  0x66   : >> { %391 = vrot.lane.b32.xlu2 %v2811_v60, %s3173_s26  ;;  %v2834_v60 = vld [vmem:[%s3588_s25 + $0x32] sm:$0x1] }
  0x6c   : >> { %403 = vrot.lane.b32.xlu1 %v2813_v61, %s3172_s6  ;;  %v2833_v61 = vld [vmem:[%s3588_s25 + $0x22] sm:$0x1] }
  0x6d   : >> { %397 = vrot.lane.b32.xlu0 %v2812_v62, %s3172_s6  ;;  %v2835_v62 = vld [vmem:[%s3588_s25 + $0x22] sm:$0x1] }
  0x6e   : >> { %409 = vrot.lane.b32.xlu2 %v2814_v63, %s3174_s14  ;;  %v2839_v63 = vld [vmem:[%s3588_s25 + $0x13] sm:$0x1] }
  0x74   : >> { %429 = vrot.lane.b32.xlu1 %v2818_v0, %s3173_s26  ;;  %v2838_v0 = vld [vmem:[%s3588_s25 + $0x3] sm:$0x1] }
  0x75   : >> { %423 = vrot.lane.b32.xlu0 %v2817_v49, %s3173_s26  ;;  %v2840_v49 = vld [vmem:[%s3588_s25 + $0x3] sm:$0x1] }
  0x76   : >> { %435 = vrot.lane.b32.xlu2 %v2819_v50, %s3172_s6  ;;  %v2842_v50 = vld [vmem:[%s3588_s25 + $0x3] sm:$0x1] }
  0x7c   : >> { %447 = vrot.lane.b32.xlu1 %v2821_v51, %s3174_s14  ;;  %v2841_v51 = vld [vmem:[%s3588_s25 + $0x13] sm:$0x1] }
  0x7d   : >> { %441 = vrot.lane.b32.xlu0 %v2820_v52, %s3172_s6  ;;  %v2845_v52 = vld [vmem:[%s3588_s25 + $0x40] sm:$0x1] }
  0x7e   : >> { %461 = vrot.lane.b32.xlu2 %v2824_v53, %s3173_s26  ;;  %v2847_v53 = vld [vmem:[%s3588_s25 + $0x40] sm:$0x1] }
  0x84   : >> { %473 = vrot.lane.b32.xlu1 %v2826_v54, %s3172_s6  ;;  %v2846_v54 = vld [vmem:[%s3588_s25 + $0x50] sm:$0x1] }
  0x85   : >> { %467 = vrot.lane.b32.xlu0 %v2825_v55, %s3173_s26 }
  0x86   : >> { %479 = vrot.lane.b32.xlu2 %v2827_v56, %s3172_s6  ;;  %v300_v56 = vld [vmem:[%s3588_s25] sm:$0x1] }
  0x87   : >> { %302 = vst.msk [vmem:[#allocation2] sm:$0x1] %vm301_vm1, %v300_v56 }
  0x8c   : >> { %499 = vrot.lane.b32.xlu1 %v2831_v57, %s3173_s26  ;;  %v2798_v57 = vld [vmem:[%s3588_s25 + $0x10] sm:$0x1] }
  0x8d   : >> { %485 = vrot.lane.b32.xlu0 %v2828_v58, %s3174_s14  ;;  %v2801_v58 = vld [vmem:[%s3588_s25 + $0x20] sm:$0x1]  ;;  %306 = vst.msk [vmem:[#allocation2 + $0x1] sm:$0x1] %vm301_vm1, %v2798_v57 }
  0x8e   : >> { %505 = vrot.lane.b32.xlu2 %v2832_v59, %s3173_s26  ;;  %v2848_v59 = vld [vmem:[%s3588_s25 + $0x50] sm:$0x1]  ;;  %340 = vst.msk [vmem:[#allocation2 + $0x7] sm:$0x1] %vm301_vm1, %v2801_v58  ;;  %v2909_v58 = vld [vmem:[%s3588_s25 + $0x91] sm:$0x1] }
  0x94   : >> { %517 = vrot.lane.b32.xlu1 %v2834_v60, %s3172_s6 }
  0x95   : >> { %511 = vrot.lane.b32.xlu0 %v2833_v61, %s3172_s6  ;;  %v2852_v61 = vld [vmem:[%s3588_s25 + $0x60] sm:$0x1] }
  0x96   : >> { %523 = vrot.lane.b32.xlu2 %v2835_v62, %s3174_s14  ;;  %v2849_v62 = vld [vmem:[%s3588_s25 + $0x40] sm:$0x1] }
  0x9c   : >> { %543 = vrot.lane.b32.xlu1 %v2839_v63, %s3173_s26  ;;  %v2853_v63 = vld [vmem:[%s3588_s25 + $0x70] sm:$0x1] }
  0x9d   : >> { %537 = vrot.lane.b32.xlu0 %v2838_v0, %s3173_s26  ;;  %v2855_v0 = vld [vmem:[%s3588_s25 + $0x70] sm:$0x1] }
  0x9e   : >> { %549 = vrot.lane.b32.xlu2 %v2840_v49, %s3172_s6  ;;  %v2854_v49 = vld [vmem:[%s3588_s25 + $0x60] sm:$0x1] }
  0xa4   : >> { %561 = vrot.lane.b32.xlu1 %v2842_v50, %s3174_s14 }
  0xa5   : >> { %555 = vrot.lane.b32.xlu0 %v2841_v51, %s3172_s6  ;;  %v2802_v51 = vld [vmem:[%s3588_s25 + $0x30] sm:$0x1] }
  0xa6   : >> { %575 = vrot.lane.b32.xlu2 %v2845_v52, %s3173_s26  ;;  %v2808_v52 = vld [vmem:[%s3588_s25 + $0x1] sm:$0x1]  ;;  %344 = vst.msk [vmem:[#allocation2 + $0x8] sm:$0x1] %vm301_vm1, %v2802_v51  ;;  %v2816_v51 = vld [vmem:[%s3588_s25 + $0x31] sm:$0x1] }
  0xa7   : >> { %378 = vst.msk [vmem:[#allocation2 + $0xe] sm:$0x1] %vm301_vm1, %v2808_v52  ;;  %v2915_v52 = vld [vmem:[%s3588_s25 + $0xa1] sm:$0x1] }
  0xa8   : >> { %v334_v55 = vpop.permute.xlu2 %333  ;;  %420 = vst.msk [vmem:[#allocation2 + $0x16] sm:$0x1] %vm301_vm1, %v2816_v51 }
  0xa9   : >> { %336 = vst.msk [vmem:[#allocation2 + $0x6] sm:$0x1] %vm301_vm1, %v334_v55 }
  0xac   : >> { %587 = vrot.lane.b32.xlu1 %v2847_v53, %s3172_s6  ;;  %v2809_v53 = vld [vmem:[%s3588_s25 + $0x11] sm:$0x1] }
  0xad   : >> { %581 = vrot.lane.b32.xlu0 %v2846_v54, %s3173_s26  ;;  %v2856_v54 = vld [vmem:[%s3588_s25 + $0x60] sm:$0x1]  ;;  %382 = vst.msk [vmem:[#allocation2 + $0xf] sm:$0x1] %vm301_vm1, %v2809_v53 }
  0xae   : >> { %593 = vrot.lane.b32.xlu2 %v2848_v59, %s3172_s6  ;;  %v2908_v59 = vld [vmem:[%s3588_s25 + $0x81] sm:$0x1] }
  0xb0   : >> { %v348_v60 = vpop.permute.xlu2 %347 }
  0xb1   : >> { %350 = vst.msk [vmem:[#allocation2 + $0x9] sm:$0x1] %vm301_vm1, %v348_v60  ;;  %v2910_v60 = vld [vmem:[%s3588_s25 + $0x81] sm:$0x1] }
  0xb4   : >> { %613 = vrot.lane.b32.xlu1 %v2852_v61, %s3173_s26 }
  0xb5   : >> { %599 = vrot.lane.b32.xlu0 %v2849_v62, %s3174_s14 }
  0xb6   : >> { %619 = vrot.lane.b32.xlu2 %v2853_v63, %s3173_s26  ;;  %v2912_v63 = vld [vmem:[%s3588_s25 + $0x81] sm:$0x1] }
  0xb8   : >> { %v366_v50 = vpop.permute.xlu2 %365 }
  0xb9   : >> { %368 = vst.msk [vmem:[#allocation2 + $0xc] sm:$0x1] %vm301_vm1, %v366_v50  ;;  %v2815_v50 = vld [vmem:[%s3588_s25 + $0x21] sm:$0x1] }
  0xba   : >> { %416 = vst.msk [vmem:[#allocation2 + $0x15] sm:$0x1] %vm301_vm1, %v2815_v50  ;;  %v2891_v50 = vld [vmem:[%s3588_s25 + $0x43] sm:$0x1] }
  0xbc   : >> { %631 = vrot.lane.b32.xlu1 %v2855_v0, %s3172_s6  ;;  %v2911_v0 = vld [vmem:[%s3588_s25 + $0x91] sm:$0x1] }
  0xbd   : >> { %625 = vrot.lane.b32.xlu0 %v2854_v49, %s3172_s6 }
  0xbe   : >> { %v322_v55 = vpop.permute.xlu1 %321  ;;  %637 = vrot.lane.b32.xlu2 %v2856_v54, %s3174_s14 }
  0xbf   : >> { %v310_v56 = vpop.permute.xlu0 %309  ;;  %324 = vst.msk [vmem:[#allocation2 + $0x4] sm:$0x1] %vm301_vm1, %v322_v55 }
  0xc0   : >> { %312 = vst.msk [vmem:[#allocation2 + $0x2] sm:$0x1] %vm301_vm1, %v310_v56  ;;  %v392_v57 = vpop.permute.xlu2 %391  ;;  %v2917_v56 = vld [vmem:[%s3588_s25 + $0xa1] sm:$0x1] }
  0xc1   : >> { %394 = vst.msk [vmem:[#allocation2 + $0x11] sm:$0x1] %vm301_vm1, %v392_v57  ;;  %v2916_v57 = vld [vmem:[%s3588_s25 + $0xb1] sm:$0x1] }
  0xc4   : >> { %923 = vrot.lane.b32.xlu1 %v2909_v58, %s3173_s26  ;;  %v2918_v58 = vld [vmem:[%s3588_s25 + $0xb1] sm:$0x1] }
  0xc5   : >> { %917 = vrot.lane.b32.xlu0 %v2908_v59, %s3173_s26 }
  0xc6   : >> { %v328_v61 = vpop.permute.xlu1 %327  ;;  %929 = vrot.lane.b32.xlu2 %v2910_v60, %s3172_s6 }
  0xc7   : >> { %v316_v62 = vpop.permute.xlu0 %315  ;;  %330 = vst.msk [vmem:[#allocation2 + $0x5] sm:$0x1] %vm301_vm1, %v328_v61  ;;  %v2890_v61 = vld [vmem:[%s3588_s25 + $0x53] sm:$0x1] }
  0xc8   : >> { %318 = vst.msk [vmem:[#allocation2 + $0x3] sm:$0x1] %vm301_vm1, %v316_v62  ;;  %v410_v49 = vpop.permute.xlu2 %409  ;;  %v2919_v62 = vld [vmem:[%s3588_s25 + $0xa1] sm:$0x1] }
  0xc9   : >> { %412 = vst.msk [vmem:[#allocation2 + $0x14] sm:$0x1] %vm301_vm1, %v410_v49  ;;  %v2823_v49 = vld [vmem:[%s3588_s25 + $0x12] sm:$0x1] }
  0xca   : >> { %458 = vst.msk [vmem:[#allocation2 + $0x1d] sm:$0x1] %vm301_vm1, %v2823_v49 }
  0xcc   : >> { %941 = vrot.lane.b32.xlu1 %v2912_v63, %s3174_s14 }
  0xcd   : >> { %935 = vrot.lane.b32.xlu0 %v2911_v0, %s3172_s6  ;;  %v2822_v0 = vld [vmem:[%s3588_s25 + $0x2] sm:$0x1] }
  0xce   : >> { %v360_v53 = vpop.permute.xlu1 %359  ;;  %955 = vrot.lane.b32.xlu2 %v2915_v52, %s3173_s26  ;;  %454 = vst.msk [vmem:[#allocation2 + $0x1c] sm:$0x1] %vm301_vm1, %v2822_v0  ;;  %v2901_v0 = vld [vmem:[%s3588_s25 + $0xa0] sm:$0x1] }
  0xcf   : >> { %v354_v54 = vpop.permute.xlu0 %353  ;;  %362 = vst.msk [vmem:[#allocation2 + $0xb] sm:$0x1] %vm301_vm1, %v360_v53 }
  0xd0   : >> { %356 = vst.msk [vmem:[#allocation2 + $0xa] sm:$0x1] %vm301_vm1, %v354_v54  ;;  %v436_v55 = vpop.permute.xlu2 %435  ;;  %v2895_v54 = vld [vmem:[%s3588_s25 + $0x90] sm:$0x1] }
  0xd1   : >> { %438 = vst.msk [vmem:[#allocation2 + $0x19] sm:$0x1] %vm301_vm1, %v436_v55  ;;  %v2894_v55 = vld [vmem:[%s3588_s25 + $0x80] sm:$0x1] }
  0xd4   : >> { %967 = vrot.lane.b32.xlu1 %v2917_v56, %s3172_s6  ;;  %v2896_v56 = vld [vmem:[%s3588_s25 + $0x80] sm:$0x1] }
  0xd5   : >> { %961 = vrot.lane.b32.xlu0 %v2916_v57, %s3173_s26 }
  0xd6   : >> { %v386_v59 = vpop.permute.xlu1 %385  ;;  %973 = vrot.lane.b32.xlu2 %v2918_v58, %s3172_s6 }
  0xd7   : >> { %v372_v60 = vpop.permute.xlu0 %371  ;;  %388 = vst.msk [vmem:[#allocation2 + $0x10] sm:$0x1] %vm301_vm1, %v386_v59  ;;  %v2898_v59 = vld [vmem:[%s3588_s25 + $0x80] sm:$0x1] }
  0xd8   : >> { %374 = vst.msk [vmem:[#allocation2 + $0xd] sm:$0x1] %vm301_vm1, %v372_v60  ;;  %v462_v63 = vpop.permute.xlu2 %461  ;;  %v2897_v60 = vld [vmem:[%s3588_s25 + $0x90] sm:$0x1] }
  0xd9   : >> { %464 = vst.msk [vmem:[#allocation2 + $0x1e] sm:$0x1] %vm301_vm1, %v462_v63  ;;  %v2830_v63 = vld [vmem:[%s3588_s25 + $0x32] sm:$0x1] }
  0xda   : >> { %496 = vst.msk [vmem:[#allocation2 + $0x24] sm:$0x1] %vm301_vm1, %v2830_v63 }
  0xdc   : >> { %821 = vrot.lane.b32.xlu1 %v2890_v61, %s3172_s6 }
  0xdd   : >> { %979 = vrot.lane.b32.xlu0 %v2919_v62, %s3174_s14  ;;  %v2829_v62 = vld [vmem:[%s3588_s25 + $0x22] sm:$0x1] }
  0xde   : >> { %v404_v51 = vpop.permute.xlu1 %403  ;;  %827 = vrot.lane.b32.xlu2 %v2891_v50, %s3174_s14  ;;  %492 = vst.msk [vmem:[#allocation2 + $0x23] sm:$0x1] %vm301_vm1, %v2829_v62  ;;  %v2875_v62 = vld [vmem:[%s3588_s25 + $0x42] sm:$0x1] }
  0xdf   : >> { %v398_v52 = vpop.permute.xlu0 %397  ;;  %406 = vst.msk [vmem:[#allocation2 + $0x13] sm:$0x1] %vm301_vm1, %v404_v51 }
  0xe0   : >> { %400 = vst.msk [vmem:[#allocation2 + $0x12] sm:$0x1] %vm301_vm1, %v398_v52  ;;  %v480_v53 = vpop.permute.xlu2 %479  ;;  %v2903_v52 = vld [vmem:[%s3588_s25 + $0xa0] sm:$0x1] }
  0xe1   : >> { %482 = vst.msk [vmem:[#allocation2 + $0x21] sm:$0x1] %vm301_vm1, %v480_v53  ;;  %v2902_v53 = vld [vmem:[%s3588_s25 + $0xb0] sm:$0x1] }
  0xe4   : >> { %847 = vrot.lane.b32.xlu1 %v2895_v54, %s3173_s26  ;;  %v2904_v54 = vld [vmem:[%s3588_s25 + $0xb0] sm:$0x1] }
  0xe5   : >> { %841 = vrot.lane.b32.xlu0 %v2894_v55, %s3173_s26 }
  0xe6   : >> { %v430_v57 = vpop.permute.xlu1 %429  ;;  %853 = vrot.lane.b32.xlu2 %v2896_v56, %s3172_s6 }
  0xe7   : >> { %v424_v58 = vpop.permute.xlu0 %423  ;;  %432 = vst.msk [vmem:[#allocation2 + $0x18] sm:$0x1] %vm301_vm1, %v430_v57  ;;  %v2874_v57 = vld [vmem:[%s3588_s25 + $0x52] sm:$0x1] }
  0xe8   : >> { %426 = vst.msk [vmem:[#allocation2 + $0x17] sm:$0x1] %vm301_vm1, %v424_v58  ;;  %v506_v61 = vpop.permute.xlu2 %505  ;;  %v2905_v58 = vld [vmem:[%s3588_s25 + $0xa0] sm:$0x1] }
  0xe9   : >> { %508 = vst.msk [vmem:[#allocation2 + $0x26] sm:$0x1] %vm301_vm1, %v506_v61  ;;  %v2837_v61 = vld [vmem:[%s3588_s25 + $0x13] sm:$0x1] }
  0xea   : >> { %534 = vst.msk [vmem:[#allocation2 + $0x2b] sm:$0x1] %vm301_vm1, %v2837_v61 }
  0xec   : >> { %865 = vrot.lane.b32.xlu1 %v2898_v59, %s3174_s14 }
  0xed   : >> { %859 = vrot.lane.b32.xlu0 %v2897_v60, %s3172_s6  ;;  %v2836_v60 = vld [vmem:[%s3588_s25 + $0x3] sm:$0x1] }
  0xee   : >> { %v448_v49 = vpop.permute.xlu1 %447  ;;  %879 = vrot.lane.b32.xlu2 %v2901_v0, %s3173_s26  ;;  %530 = vst.msk [vmem:[#allocation2 + $0x2a] sm:$0x1] %vm301_vm1, %v2836_v60  ;;  %v2883_v60 = vld [vmem:[%s3588_s25 + $0x72] sm:$0x1] }
  0xef   : >> { %v442_v50 = vpop.permute.xlu0 %441  ;;  %450 = vst.msk [vmem:[#allocation2 + $0x1b] sm:$0x1] %vm301_vm1, %v448_v49 }
  0xf0   : >> { %444 = vst.msk [vmem:[#allocation2 + $0x1a] sm:$0x1] %vm301_vm1, %v442_v50  ;;  %v524_v51 = vpop.permute.xlu2 %523  ;;  %v2877_v50 = vld [vmem:[%s3588_s25 + $0x42] sm:$0x1] }
  0xf1   : >> { %526 = vst.msk [vmem:[#allocation2 + $0x29] sm:$0x1] %vm301_vm1, %v524_v51  ;;  %v2876_v51 = vld [vmem:[%s3588_s25 + $0x52] sm:$0x1] }
  0xf4   : >> { %891 = vrot.lane.b32.xlu1 %v2903_v52, %s3172_s6  ;;  %v2880_v52 = vld [vmem:[%s3588_s25 + $0x62] sm:$0x1] }
  0xf5   : >> { %885 = vrot.lane.b32.xlu0 %v2902_v53, %s3173_s26 }
  0xf6   : >> { %v474_v55 = vpop.permute.xlu1 %473  ;;  %897 = vrot.lane.b32.xlu2 %v2904_v54, %s3172_s6 }
  0xf7   : >> { %v468_v56 = vpop.permute.xlu0 %467  ;;  %476 = vst.msk [vmem:[#allocation2 + $0x20] sm:$0x1] %vm301_vm1, %v474_v55  ;;  %v2843_v55 = vld [vmem:[%s3588_s25 + $0x40] sm:$0x1] }
  0xf8   : >> { %470 = vst.msk [vmem:[#allocation2 + $0x1f] sm:$0x1] %vm301_vm1, %v468_v56  ;;  %v550_v59 = vpop.permute.xlu2 %549 }
  0xf9   : >> { %552 = vst.msk [vmem:[#allocation2 + $0x2e] sm:$0x1] %vm301_vm1, %v550_v59  ;;  %v2881_v59 = vld [vmem:[%s3588_s25 + $0x72] sm:$0x1] }
  0xfa   : >> { %568 = vst.msk [vmem:[#allocation2 + $0x31] sm:$0x1] %vm301_vm1, %v2843_v55 }
  0xfc   : >> { %733 = vrot.lane.b32.xlu1 %v2874_v57, %s3173_s26  ;;  %v2844_v57 = vld [vmem:[%s3588_s25 + $0x50] sm:$0x1] }
  0xfd   : >> { %903 = vrot.lane.b32.xlu0 %v2905_v58, %s3174_s14  ;;  %v2882_v58 = vld [vmem:[%s3588_s25 + $0x62] sm:$0x1]  ;;  %572 = vst.msk [vmem:[#allocation2 + $0x32] sm:$0x1] %vm301_vm1, %v2844_v57  ;;  %v2859_v57 = vld [vmem:[%s3588_s25 + $0x41] sm:$0x1] }
  0xfe   : >> { %v500_v63 = vpop.permute.xlu1 %499  ;;  %739 = vrot.lane.b32.xlu2 %v2875_v62, %s3172_s6 }
  0xff   : >> { %v486_v0 = vpop.permute.xlu0 %485  ;;  %502 = vst.msk [vmem:[#allocation2 + $0x25] sm:$0x1] %vm301_vm1, %v500_v63  ;;  %v2850_v63 = vld [vmem:[%s3588_s25 + $0x60] sm:$0x1] }
 0x100   : >> { %488 = vst.msk [vmem:[#allocation2 + $0x22] sm:$0x1] %vm301_vm1, %v486_v0  ;;  %v576_v49 = vpop.permute.xlu2 %575  ;;  %v2887_v0 = vld [vmem:[%s3588_s25 + $0x43] sm:$0x1] }
 0x101   : >> { %578 = vst.msk [vmem:[#allocation2 + $0x33] sm:$0x1] %vm301_vm1, %v576_v49 }
 0x102   : >> { %606 = vst.msk [vmem:[#allocation2 + $0x38] sm:$0x1] %vm301_vm1, %v2850_v63  ;;  %v2862_v63 = vld [vmem:[%s3588_s25 + $0x51] sm:$0x1] }
 0x104   : >> { %751 = vrot.lane.b32.xlu1 %v2877_v50, %s3174_s14  ;;  %v2851_v50 = vld [vmem:[%s3588_s25 + $0x70] sm:$0x1] }
 0x105   : >> { %745 = vrot.lane.b32.xlu0 %v2876_v51, %s3172_s6  ;;  %v2884_v51 = vld [vmem:[%s3588_s25 + $0x62] sm:$0x1]  ;;  %610 = vst.msk [vmem:[#allocation2 + $0x39] sm:$0x1] %vm301_vm1, %v2851_v50  ;;  %v2861_v50 = vld [vmem:[%s3588_s25 + $0x41] sm:$0x1] }
 0x106   : >> { %v518_v53 = vpop.permute.xlu1 %517  ;;  %765 = vrot.lane.b32.xlu2 %v2880_v52, %s3173_s26  ;;  %v2857_v52 = vld [vmem:[%s3588_s25 + $0x41] sm:$0x1] }
 0x107   : >> { %v512_v54 = vpop.permute.xlu0 %511  ;;  %520 = vst.msk [vmem:[#allocation2 + $0x28] sm:$0x1] %vm301_vm1, %v518_v53  ;;  %v2888_v53 = vld [vmem:[%s3588_s25 + $0x53] sm:$0x1] }
 0x108   : >> { %514 = vst.msk [vmem:[#allocation2 + $0x27] sm:$0x1] %vm301_vm1, %v512_v54  ;;  %v594_v56 = vpop.permute.xlu2 %593 }
 0x109   : >> { %596 = vst.msk [vmem:[#allocation2 + $0x36] sm:$0x1] %vm301_vm1, %v594_v56 }
 0x10a   : >> { %644 = vst.msk [vmem:[#allocation2 + $0x3f] sm:$0x1] %vm301_vm1, %v2857_v52  ;;  %v2863_v52 = vld [vmem:[%s3588_s25 + $0x41] sm:$0x1] }
 0x10c   : >> { %777 = vrot.lane.b32.xlu1 %v2882_v58, %s3172_s6  ;;  %v2889_v58 = vld [vmem:[%s3588_s25 + $0x43] sm:$0x1] }
 0x10d   : >> { %771 = vrot.lane.b32.xlu0 %v2881_v59, %s3173_s26  ;;  %v2860_v59 = vld [vmem:[%s3588_s25 + $0x51] sm:$0x1] }
 0x10e   : >> { %v544_v61 = vpop.permute.xlu1 %543  ;;  %783 = vrot.lane.b32.xlu2 %v2883_v60, %s3172_s6 }
 0x10f   : >> { %v538_v62 = vpop.permute.xlu0 %537  ;;  %546 = vst.msk [vmem:[#allocation2 + $0x2d] sm:$0x1] %vm301_vm1, %v544_v61 }
 0x110   : >> { %540 = vst.msk [vmem:[#allocation2 + $0x2c] sm:$0x1] %vm301_vm1, %v538_v62  ;;  %v620_v49 = vpop.permute.xlu2 %619  ;;  %v2906_v62 = vld [vmem:[%s3588_s25 + $0x81] sm:$0x1] }
 0x111   : >> { %622 = vst.msk [vmem:[#allocation2 + $0x3b] sm:$0x1] %vm301_vm1, %v620_v49  ;;  %v2907_v49 = vld [vmem:[%s3588_s25 + $0x91] sm:$0x1] }
 0x112   : >> { %910 = vst.msk [vmem:[#allocation2 + $0x70] sm:$0x1] %vm301_vm1, %v2906_v62  ;;  %v2870_v62 = vld [vmem:[%s3588_s25 + $0x61] sm:$0x1] }
 0x113   : >> { %914 = vst.msk [vmem:[#allocation2 + $0x71] sm:$0x1] %vm301_vm1, %v2907_v49  ;;  %v2869_v49 = vld [vmem:[%s3588_s25 + $0x71] sm:$0x1] }
 0x114   : >> { %803 = vrot.lane.b32.xlu1 %v2887_v0, %s3173_s26 }
 0x115   : >> { %789 = vrot.lane.b32.xlu0 %v2884_v51, %s3174_s14  ;;  %v2913_v51 = vld [vmem:[%s3588_s25 + $0xa1] sm:$0x1] }
 0x116   : >> { %v562_v54 = vpop.permute.xlu1 %561  ;;  %809 = vrot.lane.b32.xlu2 %v2888_v53, %s3173_s26  ;;  %948 = vst.msk [vmem:[#allocation2 + $0x77] sm:$0x1] %vm301_vm1, %v2913_v51  ;;  %v2873_v51 = vld [vmem:[%s3588_s25 + $0x42] sm:$0x1] }
 0x117   : >> { %v556_v55 = vpop.permute.xlu0 %555  ;;  %564 = vst.msk [vmem:[#allocation2 + $0x30] sm:$0x1] %vm301_vm1, %v562_v54 }
 0x118   : >> { %558 = vst.msk [vmem:[#allocation2 + $0x2f] sm:$0x1] %vm301_vm1, %v556_v55  ;;  %v638_v56 = vpop.permute.xlu2 %637 }
 0x119   : >> { %640 = vst.msk [vmem:[#allocation2 + $0x3e] sm:$0x1] %vm301_vm1, %v638_v56  ;;  %v2867_v56 = vld [vmem:[%s3588_s25 + $0x71] sm:$0x1] }
 0x11c   : >> { %651 = vrot.lane.b32.xlu1 %v2859_v57, %s3173_s26  ;;  %v2866_v57 = vld [vmem:[%s3588_s25 + $0x61] sm:$0x1] }
 0x11d   : >> { %815 = vrot.lane.b32.xlu0 %v2889_v58, %s3172_s6  ;;  %v2868_v58 = vld [vmem:[%s3588_s25 + $0x61] sm:$0x1] }
 0x11e   : >> { %v588_v60 = vpop.permute.xlu1 %587  ;;  %657 = vrot.lane.b32.xlu2 %v2860_v59, %s3173_s26 }
 0x11f   : >> { %v582_v61 = vpop.permute.xlu0 %581  ;;  %590 = vst.msk [vmem:[#allocation2 + $0x35] sm:$0x1] %vm301_vm1, %v588_v60 }
 0x120   : >> { %584 = vst.msk [vmem:[#allocation2 + $0x34] sm:$0x1] %vm301_vm1, %v582_v61  ;;  %v930_v0 = vpop.permute.xlu2 %929  ;;  %v2914_v61 = vld [vmem:[%s3588_s25 + $0xb1] sm:$0x1] }
 0x121   : >> { %932 = vst.msk [vmem:[#allocation2 + $0x74] sm:$0x1] %vm301_vm1, %v930_v0  ;;  %v2920_v0 = vld [vmem:[%s3588_s25 + $0x82] sm:$0x1] }
 0x122   : >> { %952 = vst.msk [vmem:[#allocation2 + $0x78] sm:$0x1] %vm301_vm1, %v2914_v61 }
 0x123   : >> { %986 = vst.msk [vmem:[#allocation2 + $0x7e] sm:$0x1] %vm301_vm1, %v2920_v0  ;;  %v2922_v0 = vld [vmem:[%s3588_s25 + $0x82] sm:$0x1] }
 0x124   : >> { %669 = vrot.lane.b32.xlu1 %v2862_v63, %s3172_s6 }
 0x125   : >> { %663 = vrot.lane.b32.xlu0 %v2861_v50, %s3172_s6  ;;  %v2921_v50 = vld [vmem:[%s3588_s25 + $0x92] sm:$0x1] }
 0x126   : >> { %v614_v53 = vpop.permute.xlu1 %613  ;;  %675 = vrot.lane.b32.xlu2 %v2863_v52, %s3174_s14  ;;  %990 = vst.msk [vmem:[#allocation2 + $0x7f] sm:$0x1] %vm301_vm1, %v2921_v50 }
 0x127   : >> { %v600_v54 = vpop.permute.xlu0 %599  ;;  %616 = vst.msk [vmem:[#allocation2 + $0x3a] sm:$0x1] %vm301_vm1, %v614_v53 }
 0x128   : >> { %602 = vst.msk [vmem:[#allocation2 + $0x37] sm:$0x1] %vm301_vm1, %v600_v54  ;;  %v956_v55 = vpop.permute.xlu2 %955 }
 0x129   : >> { %958 = vst.msk [vmem:[#allocation2 + $0x79] sm:$0x1] %vm301_vm1, %v956_v55  ;;  %v2939_v55 = vld [vmem:[%s3588_s25 + $0x93] sm:$0x1] }
 0x12c   : >> { %695 = vrot.lane.b32.xlu1 %v2867_v56, %s3173_s26  ;;  %v2938_v56 = vld [vmem:[%s3588_s25 + $0x83] sm:$0x1] }
 0x12d   : >> { %689 = vrot.lane.b32.xlu0 %v2866_v57, %s3173_s26  ;;  %v2940_v57 = vld [vmem:[%s3588_s25 + $0x83] sm:$0x1] }
 0x12e   : >> { %v632_v59 = vpop.permute.xlu1 %631  ;;  %701 = vrot.lane.b32.xlu2 %v2868_v58, %s3172_s6 }
 0x12f   : >> { %v626_v60 = vpop.permute.xlu0 %625  ;;  %634 = vst.msk [vmem:[#allocation2 + $0x3d] sm:$0x1] %vm301_vm1, %v632_v59 }
 0x130   : >> { %628 = vst.msk [vmem:[#allocation2 + $0x3c] sm:$0x1] %vm301_vm1, %v626_v60  ;;  %v974_v63 = vpop.permute.xlu2 %973  ;;  %v2892_v60 = vld [vmem:[%s3588_s25 + $0x80] sm:$0x1] }
 0x131   : >> { %976 = vst.msk [vmem:[#allocation2 + $0x7c] sm:$0x1] %vm301_vm1, %v974_v63  ;;  %v2923_v63 = vld [vmem:[%s3588_s25 + $0x92] sm:$0x1] }
 0x132   : >> { %834 = vst.msk [vmem:[#allocation2 + $0x62] sm:$0x1] %vm301_vm1, %v2892_v60  ;;  %v2900_v60 = vld [vmem:[%s3588_s25 + $0xb0] sm:$0x1] }
 0x133   : >> { %876 = vst.msk [vmem:[#allocation2 + $0x6a] sm:$0x1] %vm301_vm1, %v2900_v60 }
 0x134   : >> { %713 = vrot.lane.b32.xlu1 %v2870_v62, %s3174_s14  ;;  %v2893_v62 = vld [vmem:[%s3588_s25 + $0x90] sm:$0x1] }
 0x135   : >> { %707 = vrot.lane.b32.xlu0 %v2869_v49, %s3172_s6  ;;  %v2924_v49 = vld [vmem:[%s3588_s25 + $0x82] sm:$0x1]  ;;  %838 = vst.msk [vmem:[#allocation2 + $0x63] sm:$0x1] %vm301_vm1, %v2893_v62  ;;  %v2930_v62 = vld [vmem:[%s3588_s25 + $0xb2] sm:$0x1] }
 0x136   : >> { %v924_v52 = vpop.permute.xlu1 %923  ;;  %727 = vrot.lane.b32.xlu2 %v2873_v51, %s3173_s26 }
 0x137   : >> { %v918_v53 = vpop.permute.xlu0 %917  ;;  %926 = vst.msk [vmem:[#allocation2 + $0x73] sm:$0x1] %vm301_vm1, %v924_v52 }
 0x138   : >> { %920 = vst.msk [vmem:[#allocation2 + $0x72] sm:$0x1] %vm301_vm1, %v918_v53  ;;  %v828_v54 = vpop.permute.xlu2 %827  ;;  %v2926_v53 = vld [vmem:[%s3588_s25 + $0x82] sm:$0x1] }
 0x139   : >> { %830 = vst.msk [vmem:[#allocation2 + $0x61] sm:$0x1] %vm301_vm1, %v828_v54  ;;  %v2925_v54 = vld [vmem:[%s3588_s25 + $0x92] sm:$0x1] }
 0x13c   : >> { %1087 = vrot.lane.b32.xlu1 %v2939_v55, %s3172_s6  ;;  %v2929_v55 = vld [vmem:[%s3588_s25 + $0xa2] sm:$0x1] }
 0x13d   : >> { %1081 = vrot.lane.b32.xlu0 %v2938_v56, %s3172_s6 }
 0x13e   : >> { %v942_v58 = vpop.permute.xlu1 %941  ;;  %1093 = vrot.lane.b32.xlu2 %v2940_v57, %s3174_s14 }
 0x13f   : >> { %v936_v59 = vpop.permute.xlu0 %935  ;;  %944 = vst.msk [vmem:[#allocation2 + $0x76] sm:$0x1] %vm301_vm1, %v942_v58  ;;  %v2899_v58 = vld [vmem:[%s3588_s25 + $0xa0] sm:$0x1] }
 0x140   : >> { %938 = vst.msk [vmem:[#allocation2 + $0x75] sm:$0x1] %vm301_vm1, %v936_v59  ;;  %v854_v61 = vpop.permute.xlu2 %853 }
 0x141   : >> { %856 = vst.msk [vmem:[#allocation2 + $0x66] sm:$0x1] %vm301_vm1, %v854_v61  ;;  %v2931_v61 = vld [vmem:[%s3588_s25 + $0xa2] sm:$0x1] }
 0x142   : >> { %872 = vst.msk [vmem:[#allocation2 + $0x69] sm:$0x1] %vm301_vm1, %v2899_v58 }
 0x144   : >> { %999 = vrot.lane.b32.xlu1 %v2923_v63, %s3173_s26  ;;  %v2932_v63 = vld [vmem:[%s3588_s25 + $0xb2] sm:$0x1] }
 0x145   : >> { %993 = vrot.lane.b32.xlu0 %v2922_v0, %s3173_s26 }
 0x146   : >> { %v968_v50 = vpop.permute.xlu1 %967  ;;  %1005 = vrot.lane.b32.xlu2 %v2924_v49, %s3172_s6 }
 0x147   : >> { %v962_v51 = vpop.permute.xlu0 %961  ;;  %970 = vst.msk [vmem:[#allocation2 + $0x7b] sm:$0x1] %vm301_vm1, %v968_v50  ;;  %v1111_v50 = vld [vmem:[#allocation2 + $0x70] sm:$0xff] }
 0x148   : >> { %964 = vst.msk [vmem:[#allocation2 + $0x7a] sm:$0x1] %vm301_vm1, %v962_v51  ;;  %v880_v52 = vpop.permute.xlu2 %879 }
 0x149   : >> { %882 = vst.msk [vmem:[#allocation2 + $0x6b] sm:$0x1] %vm301_vm1, %v880_v52 }
 0x14c   : >> { %1017 = vrot.lane.b32.xlu1 %v2926_v53, %s3174_s14 }
 0x14d   : >> { %1011 = vrot.lane.b32.xlu0 %v2925_v54, %s3172_s6  ;;  %v2936_v54 = vld [vmem:[%s3588_s25 + $0x83] sm:$0x1] }
 0x14e   : >> { %v822_v56 = vpop.permute.xlu1 %821  ;;  %1031 = vrot.lane.b32.xlu2 %v2929_v55, %s3173_s26  ;;  %v2933_v55 = vld [vmem:[%s3588_s25 + $0xa2] sm:$0x1] }
 0x14f   : >> { %v980_v57 = vpop.permute.xlu0 %979  ;;  %824 = vst.msk [vmem:[#allocation2 + $0x60] sm:$0x1] %vm301_vm1, %v822_v56  ;;  %v2937_v56 = vld [vmem:[%s3588_s25 + $0x93] sm:$0x1] }
 0x150   : >> { %982 = vst.msk [vmem:[#allocation2 + $0x7d] sm:$0x1] %vm301_vm1, %v980_v57  ;;  %v898_v59 = vpop.permute.xlu2 %897 }
 0x151   : >> { %900 = vst.msk [vmem:[#allocation2 + $0x6e] sm:$0x1] %vm301_vm1, %v898_v59  ;;  %v2878_v59 = vld [vmem:[%s3588_s25 + $0x62] sm:$0x1] }
 0x152   : >> { %758 = vst.msk [vmem:[#allocation2 + $0x54] sm:$0x1] %vm301_vm1, %v2878_v59 }
 0x154   : >> { %1043 = vrot.lane.b32.xlu1 %v2931_v61, %s3172_s6  ;;  %v2879_v61 = vld [vmem:[%s3588_s25 + $0x72] sm:$0x1] }
 0x155   : >> { %1037 = vrot.lane.b32.xlu0 %v2930_v62, %s3173_s26  ;;  %762 = vst.msk [vmem:[#allocation2 + $0x55] sm:$0x1] %vm301_vm1, %v2879_v61  ;;  %v2864_v61 = vld [vmem:[%s3588_s25 + $0x61] sm:$0x1] }
 0x156   : >> { %v848_v0 = vpop.permute.xlu1 %847  ;;  %1049 = vrot.lane.b32.xlu2 %v2932_v63, %s3172_s6  ;;  %682 = vst.msk [vmem:[#allocation2 + $0x46] sm:$0x1] %vm301_vm1, %v2864_v61  ;;  %s2640_s6 = scalar_lea.hbm (%p295_p11), %s6639_s5, %s3014_s16 }
 0x157   : >> { %v842_v49 = vpop.permute.xlu0 %841  ;;  %850 = vst.msk [vmem:[#allocation2 + $0x65] sm:$0x1] %vm301_vm1, %v848_v0  ;;  %v1112_v51 = vld [vmem:[#allocation2 + $0x78] sm:$0xff] }
 0x158   : >> { %844 = vst.msk [vmem:[#allocation2 + $0x64] sm:$0x1] %vm301_vm1, %v842_v49  ;;  %v1124_v52 = vpack.c.bf16 %v1112_v51, %v1111_v50  ;;  %v740_v53 = vpop.permute.xlu2 %739  ;;  %v2885_v51 = vld [vmem:[%s3588_s25 + $0x43] sm:$0x1] }
 0x159   : >> { %742 = vst.msk [vmem:[#allocation2 + $0x51] sm:$0x1] %vm301_vm1, %v740_v53  ;;  %v2886_v53 = vld [vmem:[%s3588_s25 + $0x53] sm:$0x1] }
 0x15a   : >> { %1320 = vmatpush.bf16.msra.mxu0 %v1124_v52  ;;  %3033 = vmatpush.bf16.msra.mxu2 %v1124_v52  ;;  %796 = vst.msk [vmem:[#allocation2 + $0x5b] sm:$0x1] %vm301_vm1, %v2885_v51 }
 0x15b   : >> { %800 = vst.msk [vmem:[#allocation2 + $0x5c] sm:$0x1] %vm301_vm1, %v2886_v53 }
 0x15c   : >> { %1069 = vrot.lane.b32.xlu1 %v2936_v54, %s3173_s26 }
 0x15d   : >> { %1055 = vrot.lane.b32.xlu0 %v2933_v55, %s3174_s14  ;;  %s2630_s14 = scalar_lea.sflag (%p295_p11), [#allocation5], %s215_s30 }
 0x15e   : >> { %v866_v57 = vpop.permute.xlu1 %865  ;;  %1075 = vrot.lane.b32.xlu2 %v2937_v56, %s3173_s26  ;;  %s2644_s26 = sshll.u32 (%p295_p11), %s2640_s6, 4  ;;  %s2645_s26 = int_to_ptr.hbm [resolvable:$true] %s2644_s26 }
 0x15f   : >> { %v860_v58 = vpop.permute.xlu0 %859  ;;  %868 = vst.msk [vmem:[#allocation2 + $0x68] sm:$0x1] %vm301_vm1, %v866_v57  ;;  %s3113_s13 = sshra.s32 (%p295_p11), %s2645_s26, 4  ;;  %s3114_s13 = int_to_ptr.hbm [resolvable:$true] %s3113_s13 }
 0x160   : >> { %862 = vst.msk [vmem:[#allocation2 + $0x67] sm:$0x1] %vm301_vm1, %v860_v58  ;;  %v766_v60 = vpop.permute.xlu2 %765  ;;  %v2858_v58 = vld [vmem:[%s3588_s25 + $0x51] sm:$0x1]  ;;  %s3115_s7 = scalar_lea.hbm (%p295_p11), %s3114_s13, 16  ;;  %p3120_p1 = scmp.lt.s32.totalorder (%p295_p11), %s3114_s13, %s6639_s5 }
 0x161   : >> { %768 = vst.msk [vmem:[#allocation2 + $0x56] sm:$0x1] %vm301_vm1, %v766_v60  ;;  %p3116_p12 = scmp.ne.s32.totalorder (%p295_p11), %s3114_s13, %s3115_s7  ;;  %p3121_p2 = scmp.lt.s32.totalorder (%p295_p11), %s3119_s10, %s3115_s7 }
 0x162   : >> { %648 = vst.msk [vmem:[#allocation2 + $0x40] sm:$0x1] %vm301_vm1, %v2858_v58 }
 0x163   : > { %p3117_p13 = pnand (%p295_p11), %p3116_p12, %p3244_p5  ;;  %p3122_p3 = por (%p295_p11), %p3121_p2, %p3120_p1 }
 0x165   : > { %p3118_p0 = pneg (%p295_p11), %p3117_p13 }
 0x166   : >> { %v892_v62 = vpop.permute.xlu1 %891 }
 0x167   : >> { %v886_v63 = vpop.permute.xlu0 %885  ;;  %894 = vst.msk [vmem:[#allocation2 + $0x6d] sm:$0x1] %vm301_vm1, %v892_v62  ;;  %v1109_v56 = vld [vmem:[#allocation2 + $0x60] sm:$0xff]  ;;  %v2865_v62 = vld [vmem:[%s3588_s25 + $0x71] sm:$0x1]  ;;  %p3123_p4 = pnand (%p295_p11), %p3122_p3, %p3118_p0 }
 0x168   : >> { %888 = vst.msk [vmem:[#allocation2 + $0x6c] sm:$0x1] %vm301_vm1, %v886_v63  ;;  %v784_v0 = vpop.permute.xlu2 %783 }
 0x169   : >> { %786 = vst.msk [vmem:[#allocation2 + $0x59] sm:$0x1] %vm301_vm1, %v784_v0 }
 0x16a   : >> { %686 = vst.msk [vmem:[#allocation2 + $0x47] sm:$0x1] %vm301_vm1, %v2865_v62 }
 0x16e   : >> { %v734_v49 = vpop.permute.xlu1 %733 }
 0x16f   : >> { %v904_v50 = vpop.permute.xlu0 %903  ;;  %736 = vst.msk [vmem:[#allocation2 + $0x50] sm:$0x1] %vm301_vm1, %v734_v49 }
 0x170   : >> { %906 = vst.msk [vmem:[#allocation2 + $0x6f] sm:$0x1] %vm301_vm1, %v904_v50  ;;  %v810_v52 = vpop.permute.xlu2 %809 }
 0x171   : >> { %812 = vst.msk [vmem:[#allocation2 + $0x5e] sm:$0x1] %vm301_vm1, %v810_v52  ;;  %v2871_v52 = vld [vmem:[%s3588_s25 + $0x42] sm:$0x1] }
 0x172   : >> { %720 = vst.msk [vmem:[#allocation2 + $0x4d] sm:$0x1] %vm301_vm1, %v2871_v52  ;;  %v2928_v52 = vld [vmem:[%s3588_s25 + $0xb2] sm:$0x1] }
 0x173   : >> { %1028 = vst.msk [vmem:[#allocation2 + $0x86] sm:$0x1] %vm301_vm1, %v2928_v52  ;;  %v1116_v52 = vld [vmem:[#allocation2 + $0x98] sm:$0xff] }
 0x176   : >> { %v752_v54 = vpop.permute.xlu1 %751 }
 0x177   : >> { %v746_v55 = vpop.permute.xlu0 %745  ;;  %754 = vst.msk [vmem:[#allocation2 + $0x53] sm:$0x1] %vm301_vm1, %v752_v54  ;;  %v1110_v57 = vld [vmem:[#allocation2 + $0x68] sm:$0xff]  ;;  %v2872_v54 = vld [vmem:[%s3588_s25 + $0x52] sm:$0x1] }
 0x178   : >> { %748 = vst.msk [vmem:[#allocation2 + $0x52] sm:$0x1] %vm301_vm1, %v746_v55  ;;  %v1123_v59 = vpack.c.bf16 %v1110_v57, %v1109_v56  ;;  %v658_v60 = vpop.permute.xlu2 %657 }
 0x179   : >> { %660 = vst.msk [vmem:[#allocation2 + $0x42] sm:$0x1] %vm301_vm1, %v658_v60 }
 0x17a   : >> { %1321 = vmatpush.bf16.msra.mxu0 %v1123_v59  ;;  %3034 = vmatpush.bf16.msra.mxu2 %v1123_v59  ;;  %724 = vst.msk [vmem:[#allocation2 + $0x4e] sm:$0x1] %vm301_vm1, %v2872_v54 }
 0x17e   : >> { %v778_v63 = vpop.permute.xlu1 %777 }
 0x17f   : >> { %v772_v0 = vpop.permute.xlu0 %771  ;;  %780 = vst.msk [vmem:[#allocation2 + $0x58] sm:$0x1] %vm301_vm1, %v778_v63 }
 0x180   : >> { %774 = vst.msk [vmem:[#allocation2 + $0x57] sm:$0x1] %vm301_vm1, %v772_v0  ;;  %v676_v49 = vpop.permute.xlu2 %675 }
 0x181   : >> { %678 = vst.msk [vmem:[#allocation2 + $0x45] sm:$0x1] %vm301_vm1, %v676_v49 }
 0x186   : >> { %v804_v50 = vpop.permute.xlu1 %803 }
 0x187   : >> { %v790_v51 = vpop.permute.xlu0 %789  ;;  %806 = vst.msk [vmem:[#allocation2 + $0x5d] sm:$0x1] %vm301_vm1, %v804_v50  ;;  %v1107_v60 = vld [vmem:[#allocation2 + $0x50] sm:$0xff] }
 0x188   : >> { %792 = vst.msk [vmem:[#allocation2 + $0x5a] sm:$0x1] %vm301_vm1, %v790_v51  ;;  %v702_v53 = vpop.permute.xlu2 %701  ;;  %v2927_v51 = vld [vmem:[%s3588_s25 + $0xa2] sm:$0x1] }
 0x189   : >> { %704 = vst.msk [vmem:[#allocation2 + $0x4a] sm:$0x1] %vm301_vm1, %v702_v53 }
 0x18a   : >> { %1024 = vst.msk [vmem:[#allocation2 + $0x85] sm:$0x1] %vm301_vm1, %v2927_v51  ;;  %v1102_v51 = vld [vmem:[#allocation2 + $0x28] sm:$0xff] }
 0x18e   : >> { %v652_v55 = vpop.permute.xlu1 %651 }
 0x18f   : >> { %v816_v56 = vpop.permute.xlu0 %815  ;;  %654 = vst.msk [vmem:[#allocation2 + $0x41] sm:$0x1] %vm301_vm1, %v652_v55 }
 0x190   : >> { %818 = vst.msk [vmem:[#allocation2 + $0x5f] sm:$0x1] %vm301_vm1, %v816_v56  ;;  %v728_v57 = vpop.permute.xlu2 %727 }
 0x191   : >> { %730 = vst.msk [vmem:[#allocation2 + $0x4f] sm:$0x1] %vm301_vm1, %v728_v57 }
 0x196   : >> { %v670_v58 = vpop.permute.xlu1 %669 }
 0x197   : >> { %v664_v59 = vpop.permute.xlu0 %663  ;;  %672 = vst.msk [vmem:[#allocation2 + $0x44] sm:$0x1] %vm301_vm1, %v670_v58  ;;  %v1108_v61 = vld [vmem:[#allocation2 + $0x58] sm:$0xff] }
 0x198   : >> { %666 = vst.msk [vmem:[#allocation2 + $0x43] sm:$0x1] %vm301_vm1, %v664_v59  ;;  %v1122_v62 = vpack.c.bf16 %v1108_v61, %v1107_v60  ;;  %v1094_v63 = vpop.permute.xlu2 %1093  ;;  %v1104_v61 = vld [vmem:[#allocation2 + $0x38] sm:$0xff] }
 0x199   : >> { %1096 = vst.msk [vmem:[#allocation2 + $0x92] sm:$0x1] %vm301_vm1, %v1094_v63  ;;  %v2934_v63 = vld [vmem:[%s3588_s25 + $0x83] sm:$0x1] }
 0x19a   : >> { %1322 = vmatpush.bf16.msra.mxu0 %v1122_v62  ;;  %3035 = vmatpush.bf16.msra.mxu2 %v1122_v62  ;;  %1062 = vst.msk [vmem:[#allocation2 + $0x8c] sm:$0x1] %vm301_vm1, %v2934_v63  ;;  %v3175_v63 = vmov 0  }
 0x19b   : >> { %3097 = vset.pattern.permute.xlu1 %v3175_v63  ;;  %3096 = vset.pattern.permute.xlu0 %v3175_v63 }
 0x19c   : >> { %1150 = vperm.xlu1 %3097, %v6831_v8   ;;  %1145 = vperm.xlu0 %3096, %v6832_v3  }
 0x19d   : >> { %3098 = vset.pattern.permute.xlu2 %v3175_v63 }
 0x19e   : >> { %v696_v0 = vpop.permute.xlu1 %695  ;;  %1155 = vperm.xlu2 %3098, %v6833_v11  }
 0x19f   : >> { %v690_v49 = vpop.permute.xlu0 %689  ;;  %698 = vst.msk [vmem:[#allocation2 + $0x49] sm:$0x1] %vm301_vm1, %v696_v0  ;;  %v1105_v58 = vld [vmem:[#allocation2 + $0x40] sm:$0xff]  ;;  %v2935_v0 = vld [vmem:[%s3588_s25 + $0x93] sm:$0x1] }
 0x1a0   : >> { %692 = vst.msk [vmem:[#allocation2 + $0x48] sm:$0x1] %vm301_vm1, %v690_v49  ;;  %v1006_v50 = vpop.permute.xlu2 %1005  ;;  %v1103_v49 = vld [vmem:[#allocation2 + $0x30] sm:$0xff] }
 0x1a1   : >> { %1008 = vst.msk [vmem:[#allocation2 + $0x82] sm:$0x1] %vm301_vm1, %v1006_v50  ;;  %v1120_v50 = vpack.c.bf16 %v1104_v61, %v1103_v49  ;;  %v1099_v61 = vld [vmem:[#allocation2 + $0x10] sm:$0xff] }
 0x1a2   : >> { %1066 = vst.msk [vmem:[#allocation2 + $0x8d] sm:$0x1] %vm301_vm1, %v2935_v0  ;;  %v1098_v0 = vld [vmem:[#allocation2 + $0x8] sm:$0xff] }
 0x1a4   : >> { %1160 = vperm.xlu1 %3097, %v6836_v14   ;;  %1170 = vperm.xlu0 %3096, %v3384_v20  }
 0x1a6   : >> { %v714_v53 = vpop.permute.xlu1 %713  ;;  %1165 = vperm.xlu2 %3098, %v6837_v17  }
 0x1a7   : >> { %v708_v54 = vpop.permute.xlu0 %707  ;;  %716 = vst.msk [vmem:[#allocation2 + $0x4c] sm:$0x1] %vm301_vm1, %v714_v53 }
 0x1a8   : >> { %710 = vst.msk [vmem:[#allocation2 + $0x4b] sm:$0x1] %vm301_vm1, %v708_v54  ;;  %v1032_v55 = vpop.permute.xlu2 %1031 }
 0x1a9   : >> { %1034 = vst.msk [vmem:[#allocation2 + $0x87] sm:$0x1] %vm301_vm1, %v1032_v55  ;;  %v1101_v55 = vld [vmem:[#allocation2 + $0x20] sm:$0xff] }
 0x1ac   : >> { %1175 = vperm.xlu1 %3097, %v3401_v23   ;;  %1185 = vperm.xlu0 %3096, %v3435_v29  }
 0x1ae   : >> { %v1088_v56 = vpop.permute.xlu1 %1087  ;;  %1180 = vperm.xlu2 %3098, %v3418_v26  }
 0x1af   : >> { %v1082_v57 = vpop.permute.xlu0 %1081  ;;  %1090 = vst.msk [vmem:[#allocation2 + $0x91] sm:$0x1] %vm301_vm1, %v1088_v56  ;;  %v1106_v59 = vld [vmem:[#allocation2 + $0x48] sm:$0xff] }
 0x1b0   : >> { %1084 = vst.msk [vmem:[#allocation2 + $0x90] sm:$0x1] %vm301_vm1, %v1082_v57  ;;  %v1121_v60 = vpack.c.bf16 %v1106_v59, %v1105_v58  ;;  %v1050_v62 = vpop.permute.xlu2 %1049  ;;  %v1119_v57 = vpack.c.bf16 %v1102_v51, %v1101_v55  ;;  %v1097_v51 = vld [vmem:[#allocation2] sm:$0xff] }
 0x1b1   : >> { %1052 = vst.msk [vmem:[#allocation2 + $0x8a] sm:$0x1] %vm301_vm1, %v1050_v62 }
 0x1b2   : >> { %1323 = vmatpush.bf16.msra.mxu0 %v1121_v60  ;;  %3036 = vmatpush.bf16.msra.mxu2 %v1121_v60  ;;  %v1100_v60 = vld [vmem:[#allocation2 + $0x18] sm:$0xff] }
 0x1b3   : >> { %v1118_v62 = vpack.c.bf16 %v1100_v60, %v1099_v61  ;;  %v2952_v60 = vor.u32 %v6839_v10, %v6838_v7 }
 0x1b4   : >> { %1190 = vperm.xlu1 %3097, %v3452_v32   ;;  %1200 = vperm.xlu0 %3096, %v3486_v38  }
 0x1b6   : >> { %1324 = vmatpush.bf16.msra.mxu0 %v1120_v50  ;;  %3037 = vmatpush.bf16.msra.mxu2 %v1120_v50  ;;  %v1000_v53 = vpop.permute.xlu1 %999 }
 0x1b7   : >> { %v994_v54 = vpop.permute.xlu0 %993  ;;  %1002 = vst.msk [vmem:[#allocation2 + $0x81] sm:$0x1] %vm301_vm1, %v1000_v53  ;;  %v1115_v56 = vld [vmem:[#allocation2 + $0x90] sm:$0xff]  ;;  %v2976_v53 = vor.u32 %v3430_v28, %v3413_v25  ;;  %1195 = vperm.xlu2 %3098, %v3469_v35  }
 0x1b8   : >> { %996 = vst.msk [vmem:[#allocation2 + $0x80] sm:$0x1] %vm301_vm1, %v994_v54  ;;  %v1126_v58 = vpack.c.bf16 %v1116_v52, %v1115_v56  ;;  %v1076_v59 = vpop.permute.xlu2 %1075  ;;  %v1117_v52 = vpack.c.bf16 %v1098_v0, %v1097_v51  ;;  %v2944_v54 = vor.u32 %v6835_v5, %v6834_v2  ;;  %v2948_v0 = vor.u32 %v6841_v1, %v6840_v4  ;;  %v1127_v4 = vld [vmem:[#allocation3] sm:$0xff] }
 0x1b9   : >> { %1078 = vst.msk [vmem:[#allocation2 + $0x8f] sm:$0x1] %vm301_vm1, %v1076_v59  ;;  %v2984_v59 = vor.u32 %v3464_v34, %v3447_v31  ;;  %v2960_v51 = vor.u32 %v6843_v16, %v6842_v13  ;;  %v1128_v16 = vld [vmem:[#allocation3 + $0x8] sm:$0xff] }
 0x1ba   : >> { %1325 = vmatpush.bf16.msra.mxu0 %v1119_v57  ;;  %3038 = vmatpush.bf16.msra.mxu2 %v1119_v57 }
 0x1bb   : >> { %1375 = vmatpush.bf16.msra.mxu1 %v1126_v58  ;;  %3041 = vmatpush.bf16.msra.mxu3 %v1126_v58 }
 0x1bc   : >> { %1205 = vperm.xlu1 %3097, %v3503_v41   ;;  %1215 = vperm.xlu0 %3096, %v3537_v47   ;;  %v4112_v41 = vld [vmem:[%s6637_s3 + $0x8] sm:$0xff] (%p295_p11)  ;;  %v4557_v47 = vld [vmem:[%s6637_s3 + $0x210] sm:$0xff] (%p295_p11) }
 0x1bd   : > { %6875 = vst [vmem:[#allocation33_spill] sm:$0xff] (%p295_p11), %v4557_v47  ;;  %v4721_v47 = vld [vmem:[%s6637_s3 + $0x2c0] sm:$0xff] (%p295_p11) }
 0x1be   : >> { %1326 = vmatpush.bf16.msra.mxu0 %v1118_v62  ;;  %3039 = vmatpush.bf16.msra.mxu2 %v1118_v62  ;;  %v1018_v49 = vpop.permute.xlu1 %1017  ;;  %6898 = vst [vmem:[#allocation56_spill] sm:$0xff] (%p295_p11), %v4721_v47  ;;  %v4781_v47 = vld [vmem:[%s6637_s3 + $0x300] sm:$0xff] (%p295_p11) }
 0x1bf   : >> { %v1012_v50 = vpop.permute.xlu0 %1011  ;;  %1020 = vst.msk [vmem:[#allocation2 + $0x84] sm:$0x1] %vm301_vm1, %v1018_v49  ;;  %v2988_v49 = vor.u32 %v3442_v30, %v3459_v33  ;;  %1210 = vperm.xlu2 %3098, %v3520_v44   ;;  %v4127_v44 = vld [vmem:[%s6637_s3 + $0x20] sm:$0xff] (%p295_p11) }
 0x1c0   : >> { %1014 = vst.msk [vmem:[#allocation2 + $0x83] sm:$0x1] %vm301_vm1, %v1012_v50  ;;  %v2992_v50 = vor.u32 %v3498_v40, %v3481_v37  ;;  %v4107_v40 = vld [vmem:[%s6637_s3] sm:$0xff] (%p295_p11) }
 0x1c1   : > { %6906 = vst [vmem:[#allocation64_spill] sm:$0xff] (%p295_p11), %v4781_v47  ;;  %v4859_v47 = vld [vmem:[%s6637_s3 + $0x358] sm:$0xff] (%p295_p11) }
 0x1c2   : >> { %1327 = vmatpush.bf16.msra.mxu0 %v1117_v52  ;;  %3040 = vmatpush.bf16.msra.mxu2 %v1117_v52  ;;  %v2956_v52 = vor.u32 %v6845_v6, %v6844_v9  ;;  %6920 = vst [vmem:[#allocation78_spill] sm:$0xff] (%p295_p11), %v4859_v47  ;;  %v6941_v47 = vunpack.c.h.bf16 (%p295_p11), %v4112_v41 }
 0x1c4   : >> { %1220 = vperm.xlu1 %3097, %v3544_v48   ;;  %v4492_v48 = vld [vmem:[%s6637_s3 + $0x1c8] sm:$0xff] (%p295_p11) }
 0x1c5   : >> { %1348 = vmatmul.bf16.vlgmr.msra.gmra.mxu2 %v2976_v53  ;;  %1328 = vmatmul.bf16.vlgmr.msra.gmra.mxu0 %v2944_v54  ;;  %v2996_v53 = vor.u32 %v3476_v36, %v3493_v39  ;;  %v3000_v54 = vor.u32 %v3532_v46, %v3515_v43  ;;  %v4122_v43 = vld [vmem:[%s6637_s3 + $0x18] sm:$0xff] (%p295_p11)  ;;  %6866 = vst [vmem:[#allocation24_spill] sm:$0xff] (%p295_p11), %v4492_v48 }
 0x1c6   : >> { %v1044_v55 = vpop.permute.xlu1 %1043  ;;  %v4506_v46 = vld [vmem:[%s6637_s3 + $0x1d8] sm:$0xff] (%p295_p11) }
 0x1c7   : >> { %v1038_v56 = vpop.permute.xlu0 %1037  ;;  %1046 = vst.msk [vmem:[#allocation2 + $0x89] sm:$0x1] %vm301_vm1, %v1044_v55  ;;  %v1113_v61 = vld [vmem:[#allocation2 + $0x80] sm:$0xff]  ;;  %v2968_v55 = vor.u32 %v3396_v22, %v3379_v19 }
 0x1c8   : >> { %1040 = vst.msk [vmem:[#allocation2 + $0x88] sm:$0x1] %vm301_vm1, %v1038_v56  ;;  %v2964_v56 = vor.u32 %v6847_v12, %v6846_v15  ;;  %v1137_v12 = vld [vmem:[#allocation3 + $0x50] sm:$0xff] }
 0x1c9   : > { %6868 = vst [vmem:[#allocation26_spill] sm:$0xff] (%p295_p11), %v4506_v46  ;;  %v4566_v46 = vld [vmem:[%s6637_s3 + $0x218] sm:$0xff] (%p295_p11) }
 0x1ca   : > { %6876 = vst [vmem:[#allocation34_spill] sm:$0xff] (%p295_p11), %v4566_v46  ;;  %v4644_v46 = vld [vmem:[%s6637_s3 + $0x270] sm:$0xff] (%p295_p11) }
 0x1cb   : > { %6887 = vst [vmem:[#allocation45_spill] sm:$0xff] (%p295_p11), %v4644_v46  ;;  %v4804_v46 = vld [vmem:[%s6637_s3 + $0x318] sm:$0xff] (%p295_p11) }
 0x1cc   : > { %6911 = vst [vmem:[#allocation69_spill] sm:$0xff] (%p295_p11), %v4804_v46  ;;  %v4987_v46 = vld [vmem:[%s6637_s3 + $0x3e0] sm:$0xff] (%p295_p11) }
 0x1ce   : >> { %v1070_v57 = vpop.permute.xlu1 %1069 }
 0x1cf   : >> { %v1056_v58 = vpop.permute.xlu0 %1055  ;;  %1072 = vst.msk [vmem:[#allocation2 + $0x8e] sm:$0x1] %vm301_vm1, %v1070_v57  ;;  %v3004_v57 = vor.u32 %v3510_v42, %v3527_v45  ;;  %v4117_v42 = vld [vmem:[%s6637_s3 + $0x10] sm:$0xff] (%p295_p11)  ;;  %v4132_v45 = vld [vmem:[%s6637_s3 + $0x28] sm:$0xff] (%p295_p11) }
 0x1d0   : >> { %1058 = vst.msk [vmem:[#allocation2 + $0x8b] sm:$0x1] %vm301_vm1, %v1056_v58  ;;  %v2972_v58 = vor.u32 %v6848_v18, %v3391_v21 }
 0x1d5   : >> { %1353 = vmatmul.bf16.gmra.mxu2 %v2984_v59  ;;  %1333 = vmatmul.bf16.gmra.mxu0 %v2952_v60  ;;  %v2980_v59 = vor.u32 %v3408_v24, %v3425_v27 }
 0x1d7   : >> { %v1114_v62 = vld [vmem:[#allocation2 + $0x88] sm:$0xff] }
 0x1d8   : >> { %v1125_v63 = vpack.c.bf16 %v1114_v62, %v1113_v61 }
 0x1da   : >> { %1376 = vmatpush.bf16.msra.mxu1 %v1125_v63  ;;  %3042 = vmatpush.bf16.msra.mxu3 %v1125_v63 }
 0x1dd   : >> { %3005 = vmatmul.msk.bf16.vlgmr.msra.gmra.mxu1 %vm1295_vm2, %v2948_v0  ;;  %3010 = vmatmul.msk.bf16.vlgmr.msra.gmra.mxu3 %vm1295_vm2, %v2988_v49 }
 0x1e5   : >> { %1358 = vmatmul.bf16.gmra.mxu2 %v2992_v50  ;;  %1338 = vmatmul.bf16.gmra.mxu0 %v2960_v51 }
 0x1ed   : >> { %3006 = vmatmul.msk.bf16.gmra.mxu1 %vm1295_vm2, %v2956_v52  ;;  %3011 = vmatmul.msk.bf16.gmra.mxu3 %vm1295_vm2, %v2996_v53 }
 0x1f5   : >> { %1363 = vmatmul.bf16.gmra.mxu2 %v3000_v54  ;;  %1343 = vmatmul.bf16.gmra.mxu0 %v2968_v55 }
 0x1f8   : >> { %v1156_v60 = vpop.permute.xlu2 %1155 }
 0x1fd   : >> { %3007 = vmatmul.msk.bf16.gmra.mxu1 %vm1295_vm2, %v2964_v56  ;;  %3012 = vmatmul.msk.bf16.gmra.mxu3 %vm1295_vm2, %v3004_v57 }
 0x200   : >> { %v4047_v49 = vpop.permute.xlu2 %1165 }
 0x208   : >> { %v4053_v54 = vpop.permute.xlu2 %1180 }
 0x20d   : >> { %3008 = vmatmul.msk.bf16.gmra.mxu1 %vm1295_vm2, %v2972_v58 }
 0x20e   : >> { %v1151_v61 = vpop.permute.xlu1 %1150  ;;  %v1146_v62 = vpop.permute.xlu0 %1145 }
 0x211   : >> { %v1196_v1 = vpop.permute.xlu2 %1195 }
 0x216   : >> { %v1161_v50 = vpop.permute.xlu1 %1160  ;;  %v4049_v51 = vpop.permute.xlu0 %1170 }
 0x21d   : >> { %3009 = vmatmul.msk.bf16.gmra.mxu1 %vm1295_vm2, %v2980_v59 }
 0x21e   : >> { %v4055_v56 = vpop.permute.xlu1 %1175  ;;  %v4057_v58 = vpop.permute.xlu0 %1185 }
 0x226   : >> { %v4060_v11 = vpop.permute.xlu1 %1190  ;;  %v1201_v13 = vpop.permute.xlu0 %1200 }
 0x242   : >> { %v1329_v63 = vpop.f32.mrf.mxu0 }
 0x243   : >> { %v1330_v55 = vadd.f32 %v1329_v63, %v1146_v62 }
 0x248   : >> { %v4045_v0 = vpop.f32.mrf.mxu2 }
 0x24a   : >> { %v1331_v53 = vpop.f32.mrf.mxu0 }
 0x24b   : >> { %v1332_v7 = vadd.f32 %v1331_v53, %v1151_v61 }
 0x250   : >> { %v4051_v52 = vpop.f32.mrf.mxu2 }
 0x252   : >> { %v1334_v2 = vpop.f32.mrf.mxu0 }
 0x258   : >> { %v1354_v57 = vpop.f32.mrf.mxu2 }
 0x259   : >> { %v1355_v6 = vadd.f32 %v1354_v57, %v1196_v1  ;;  %v1335_v1 = vadd.f32 %v1334_v2, %v1156_v60  ;;  %v1139_v60 = vld [vmem:[#allocation3 + $0x60] sm:$0xff] }
 0x25a   : >> { %v1378_v59 = vpop.f32.mrf.mxu1  ;;  %v1336_v17 = vpop.f32.mrf.mxu0 }
 0x25b   : >> { %v1379_v3 = vadd.f32 %v1378_v59, %v1330_v55 }
 0x25d   : >> { %v1418_v5 = vmax.f32 %v1379_v3, 0.0 }
 0x25f   : >> { %v1434_v8 = vadd.f32 %v1418_v5, %v1127_v4 }
 0x260   : >> { %v1403_v9 = vpop.f32.mrf.mxu3  ;;  %v1356_v10 = vpop.f32.mrf.mxu2 }
 0x261   : >> { %1450 = vst.msk [vmem:[#allocation3] sm:$0xff] %vm224_vm0, %v1434_v8  ;;  %v1404_v62 = vadd.f32 %v1403_v9, %v1355_v6  ;;  %v1357_v3 = vadd.f32 %v1356_v10, %v1201_v13  ;;  %v1138_v9 = vld [vmem:[#allocation3 + $0x58] sm:$0xff] }
 0x262   : >> { %v1380_v63 = vpop.f32.mrf.mxu1  ;;  %v1339_v10 = vpop.f32.mrf.mxu0 }
 0x263   : >> { %v1381_v14 = vadd.f32 %v1380_v63, %v1332_v7  ;;  %v1428_v15 = vmax.f32 %v1404_v62, 0.0  ;;  %v1129_v7 = vld [vmem:[#allocation3 + $0x10] sm:$0xff]  ;;  %v1206_v62 = vpop.permute.xlu1 %1205 }
 0x265   : >> { %v1419_v55 = vmax.f32 %v1381_v14, 0.0  ;;  %v1444_v59 = vadd.f32 %v1428_v15, %v1137_v12  ;;  %v1337_v12 = vadd.f32 %v1336_v17, %v1161_v50  ;;  %v1340_v17 = vadd.f32 %v1339_v10, %v4047_v49 }
 0x267   : >> { %v1435_v61 = vadd.f32 %v1419_v55, %v1128_v16  ;;  %1460 = vst.msk [vmem:[#allocation3 + $0x50] sm:$0xff] %vm224_vm0, %v1444_v59  ;;  %v1211_v59 = vpop.permute.xlu2 %1210 }
 0x268   : >> { %v1405_v4 = vpop.f32.mrf.mxu3  ;;  %v1359_v5 = vpop.f32.mrf.mxu2 }
 0x269   : >> { %1451 = vst.msk [vmem:[#allocation3 + $0x8] sm:$0xff] %vm224_vm0, %v1435_v61  ;;  %v1406_v8 = vadd.f32 %v1405_v4, %v1357_v3  ;;  %v1360_v18 = vadd.f32 %v1359_v5, %v1206_v62  ;;  %v1130_v61 = vld [vmem:[#allocation3 + $0x18] sm:$0xff]  ;;  %v1140_v62 = vld [vmem:[#allocation3 + $0x68] sm:$0xff] }
 0x26a   : >> { %v1383_v6 = vpop.f32.mrf.mxu1 }
 0x26b   : >> { %v1384_v53 = vadd.f32 %v1383_v6, %v1335_v1  ;;  %v1429_v57 = vmax.f32 %v1406_v8, 0.0 }
 0x26d   : >> { %v1420_v63 = vmax.f32 %v1384_v53, 0.0  ;;  %v1445_v14 = vadd.f32 %v1429_v57, %v1138_v9  ;;  %v1341_v9 = vpop.f32.mrf.mxu0 }
 0x26e   : >> { %v1342_v49 = vadd.f32 %v1341_v9, %v4049_v51  ;;  %v1476_v27 = vld [vmem:[#allocation3 + $0x50] sm:$0xff] (%p295_p11) }
 0x26f   : >> { %v1436_v2 = vadd.f32 %v1420_v63, %v1129_v7  ;;  %1461 = vst.msk [vmem:[#allocation3 + $0x58] sm:$0xff] %vm224_vm0, %v1445_v14  ;;  %v1512_v30 = vsel (%p295_p11), %vm224_vm0, %v1476_v27, 0.0  ;;  %v4234_v27 = vld [vmem:[%s6637_s3 + $0x58] sm:$0xff] (%p295_p11) }
 0x270   : >> { %v1361_v13 = vpop.f32.mrf.mxu2  ;;  %v1408_v15 = vpop.f32.mrf.mxu3 }
 0x271   : >> { %1452 = vst.msk [vmem:[#allocation3 + $0x10] sm:$0xff] %vm224_vm0, %v1436_v2  ;;  %v1409_v16 = vadd.f32 %v1408_v15, %v1360_v18  ;;  %v1362_v5 = vadd.f32 %v1361_v13, %v1211_v59  ;;  %v1216_v18 = vpop.permute.xlu0 %1215 }
 0x272   : >> { %v1385_v55 = vpop.f32.mrf.mxu1 }
 0x273   : >> { %v1430_v3 = vmax.f32 %v1409_v16, 0.0  ;;  %v1386_v1 = vadd.f32 %v1385_v55, %v1337_v12  ;;  %v1131_v12 = vld [vmem:[#allocation3 + $0x20] sm:$0xff]  ;;  %v1141_v55 = vld [vmem:[#allocation3 + $0x70] sm:$0xff] }
 0x275   : >> { %v1446_v4 = vadd.f32 %v1430_v3, %v1139_v60  ;;  %v1421_v8 = vmax.f32 %v1386_v1, 0.0 }
 0x276   : > { %v1477_v28 = vld [vmem:[#allocation3 + $0x58] sm:$0xff] (%p295_p11) }
 0x277   : >> { %1462 = vst.msk [vmem:[#allocation3 + $0x60] sm:$0xff] %vm224_vm0, %v1446_v4  ;;  %v1437_v50 = vadd.f32 %v1421_v8, %v1130_v61  ;;  %v1344_v61 = vpop.f32.mrf.mxu0  ;;  %v1132_v8 = vld [vmem:[#allocation3 + $0x28] sm:$0xff]  ;;  %v1515_v31 = vsel (%p295_p11), %vm224_vm0, %v1477_v28, 0.0  ;;  %v4239_v28 = vld [vmem:[%s6637_s3 + $0x60] sm:$0xff] (%p295_p11) }
 0x278   : >> { %v1410_v6 = vpop.f32.mrf.mxu3  ;;  %v1364_v57 = vpop.f32.mrf.mxu2 }
 0x279   : >> { %1453 = vst.msk [vmem:[#allocation3 + $0x18] sm:$0xff] %vm224_vm0, %v1437_v50  ;;  %v1411_v53 = vadd.f32 %v1410_v6, %v1362_v5  ;;  %v1365_v13 = vadd.f32 %v1364_v57, %v1216_v18  ;;  %v1221_v50 = vpop.permute.xlu1 %1220  ;;  %v1142_v57 = vld [vmem:[#allocation3 + $0x78] sm:$0xff] }
 0x27a   : >> { %v1388_v7 = vpop.f32.mrf.mxu1 }
 0x27b   : >> { %v1389_v63 = vadd.f32 %v1388_v7, %v1340_v17  ;;  %v1431_v14 = vmax.f32 %v1411_v53, 0.0  ;;  %v1345_v53 = vadd.f32 %v1344_v61, %v4055_v56  ;;  %v1135_v61 = vld [vmem:[#allocation3 + $0x40] sm:$0xff] }
 0x27d   : >> { %v1422_v2 = vmax.f32 %v1389_v63, 0.0  ;;  %v1447_v15 = vadd.f32 %v1431_v14, %v1140_v62  ;;  %v1133_v14 = vld [vmem:[#allocation3 + $0x30] sm:$0xff] }
 0x27e   : > { %v1478_v32 = vld [vmem:[#allocation3 + $0x60] sm:$0xff] (%p295_p11) }
 0x27f   : >> { %v1438_v10 = vadd.f32 %v1422_v2, %v1131_v12  ;;  %1463 = vst.msk [vmem:[#allocation3 + $0x68] sm:$0xff] %vm224_vm0, %v1447_v15  ;;  %v1346_v15 = vpop.f32.mrf.mxu0  ;;  %v1518_v35 = vsel (%p295_p11), %vm224_vm0, %v1478_v32, 0.0  ;;  %v4380_v32 = vld [vmem:[%s6637_s3 + $0x148] sm:$0xff] (%p295_p11) }
 0x280   : >> { %v1413_v16 = vpop.f32.mrf.mxu3  ;;  %v1366_v4 = vpop.f32.mrf.mxu2  ;;  %6850 = vst [vmem:[#allocation8_spill] sm:$0xff] (%p295_p11), %v4380_v32 }
 0x281   : >> { %1454 = vst.msk [vmem:[#allocation3 + $0x20] sm:$0xff] %vm224_vm0, %v1438_v10  ;;  %v1414_v60 = vadd.f32 %v1413_v16, %v1365_v13  ;;  %v1367_v51 = vadd.f32 %v1366_v4, %v1221_v50  ;;  %v1134_v16 = vld [vmem:[#allocation3 + $0x38] sm:$0xff]  ;;  %v1136_v50 = vld [vmem:[#allocation3 + $0x48] sm:$0xff] }
 0x282   : >> { %v1390_v59 = vpop.f32.mrf.mxu1 }
 0x283   : >> { %v1432_v3 = vmax.f32 %v1414_v60, 0.0  ;;  %v1391_v1 = vadd.f32 %v1390_v59, %v1342_v49  ;;  %v1347_v49 = vadd.f32 %v1346_v15, %v4053_v54  ;;  %v1350_v59 = vadd.f32 %v4045_v0, %v4057_v58  ;;  %v1466_v0 = vld [vmem:[#allocation3] sm:$0xff] (%p295_p11)  ;;  %v1468_v58 = vld [vmem:[#allocation3 + $0x10] sm:$0xff] (%p295_p11)  ;;  %v4478_v15 = vld [vmem:[%s6637_s3 + $0x1b8] sm:$0xff] (%p295_p11) }
 0x284   : >> { %v1352_v54 = vadd.f32 %v4051_v52, %v4060_v11  ;;  %v1482_v11 = vsel (%p295_p11), %vm224_vm0, %v1466_v0, 0.0  ;;  %v1488_v52 = vsel (%p295_p11), %vm224_vm0, %v1468_v58, 0.0  ;;  %v4295_v58 = vld [vmem:[%s6637_s3 + $0xd8] sm:$0xff] (%p295_p11)  ;;  %v4300_v0 = vld [vmem:[%s6637_s3 + $0xe0] sm:$0xff] (%p295_p11)  ;;  %6864 = vst [vmem:[#allocation22_spill] sm:$0xff] (%p295_p11), %v4478_v15 }
 0x285   : >> { %v1448_v5 = vadd.f32 %v1432_v3, %v1141_v55  ;;  %v1423_v17 = vmax.f32 %v1391_v1, 0.0  ;;  %1483 = vadd.xlane.f32.xlu0 (%p295_p11), %v1482_v11  ;;  %1489 = vadd.xlane.f32.xlu1 (%p295_p11), %v1488_v52  ;;  %v4202_v11 = vld [vmem:[%s6637_s3 + $0xb8] sm:$0xff] (%p295_p11)  ;;  %v4375_v52 = vld [vmem:[%s6637_s3 + $0x140] sm:$0xff] (%p295_p11) }
 0x286   : > { %v1479_v33 = vld [vmem:[#allocation3 + $0x68] sm:$0xff] (%p295_p11)  ;;  %6849 = vst [vmem:[#allocation7_spill] sm:$0xff] (%p295_p11), %v4375_v52  ;;  %v4625_v15 = vld [vmem:[%s6637_s3 + $0x258] sm:$0xff] (%p295_p11) }
 0x287   : >> { %1464 = vst.msk [vmem:[#allocation3 + $0x70] sm:$0xff] %vm224_vm0, %v1448_v5  ;;  %v1439_v6 = vadd.f32 %v1423_v17, %v1132_v8  ;;  %v1521_v36 = vsel (%p295_p11), %vm224_vm0, %v1479_v33, 0.0  ;;  %v4431_v33 = vld [vmem:[%s6637_s3 + $0x180] sm:$0xff] (%p295_p11)  ;;  %v4891_v52 = vld [vmem:[%s6637_s3 + $0x378] sm:$0xff] (%p295_p11) }
 0x288   : >> { %v1415_v9 = vpop.f32.mrf.mxu3  ;;  %6857 = vst [vmem:[#allocation15_spill] sm:$0xff] (%p295_p11), %v4431_v33 }
 0x289   : >> { %1455 = vst.msk [vmem:[#allocation3 + $0x28] sm:$0xff] %vm224_vm0, %v1439_v6  ;;  %v1416_v18 = vadd.f32 %v1415_v9, %v1367_v51  ;;  %v1470_v9 = vld [vmem:[#allocation3 + $0x20] sm:$0xff] (%p295_p11) }
 0x28a   : >> { %v1393_v7 = vpop.f32.mrf.mxu1  ;;  %6884 = vst [vmem:[#allocation42_spill] sm:$0xff] (%p295_p11), %v4625_v15 }
 0x28b   : >> { %v1433_v62 = vmax.f32 %v1416_v18, 0.0  ;;  %v1394_v63 = vadd.f32 %v1393_v7, %v1345_v53  ;;  %v1494_v53 = vsel (%p295_p11), %vm224_vm0, %v1470_v9, 0.0  ;;  %v1467_v18 = vld [vmem:[#allocation3 + $0x8] sm:$0xff] (%p295_p11)  ;;  %v4197_v9 = vld [vmem:[%s6637_s3 + $0xb0] sm:$0xff] (%p295_p11)  ;;  %6924 = vst [vmem:[#allocation82_spill] sm:$0xff] (%p295_p11), %v4891_v52 }
 0x28c   : > { %1495 = vadd.xlane.f32.xlu2 (%p295_p11), %v1494_v53  ;;  %v4389_v53 = vld [vmem:[%s6637_s3 + $0x150] sm:$0xff] (%p295_p11)  ;;  %v4964_v52 = vld [vmem:[%s6637_s3 + $0x3c8] sm:$0xff] (%p295_p11) }
 0x28d   : >> { %v1449_v12 = vadd.f32 %v1433_v62, %v1142_v57  ;;  %v1424_v2 = vmax.f32 %v1394_v63, 0.0  ;;  %v1469_v57 = vld [vmem:[#allocation3 + $0x18] sm:$0xff] (%p295_p11)  ;;  %v1485_v62 = vsel (%p295_p11), %vm224_vm0, %v1467_v18, 0.0  ;;  %v4361_v18 = vld [vmem:[%s6637_s3 + $0x130] sm:$0xff] (%p295_p11)  ;;  %6851 = vst [vmem:[#allocation9_spill] sm:$0xff] (%p295_p11), %v4389_v53 }
 0x28e   : > { %v1491_v63 = vsel (%p295_p11), %vm224_vm0, %v1469_v57, 0.0  ;;  %1486 = vadd.xlane.f32.xlu0 (%p295_p11), %v1485_v62  ;;  %v1480_v34 = vld [vmem:[#allocation3 + $0x70] sm:$0xff] (%p295_p11)  ;;  %6937 = vst [vmem:[#allocation95_spill] sm:$0xff] (%p295_p11), %v4964_v52  ;;  %v6940_v52 = vunpack.c.l.bf16 (%p295_p11), %v4112_v41  ;;  %v6947_v41 = vunpack.c.h.bf16 (%p295_p11), %v4122_v43 }
 0x28f   : >> { %1465 = vst.msk [vmem:[#allocation3 + $0x78] sm:$0xff] %vm224_vm0, %v1449_v12  ;;  %v1440_v13 = vadd.f32 %v1424_v2, %v1133_v14  ;;  %1492 = vadd.xlane.f32.xlu1 (%p295_p11), %v1491_v63  ;;  %v1524_v37 = vsel (%p295_p11), %vm224_vm0, %v1480_v34, 0.0  ;;  %v4141_v12 = vld [vmem:[%s6637_s3 + $0x30] sm:$0xff] (%p295_p11)  ;;  %v4146_v2 = vld [vmem:[%s6637_s3 + $0x38] sm:$0xff] (%p295_p11)  ;;  %v4276_v63 = vld [vmem:[%s6637_s3 + $0xc8] sm:$0xff] (%p295_p11) }
 0x290   : > { %v1471_v7 = vld [vmem:[#allocation3 + $0x28] sm:$0xff] (%p295_p11)  ;;  %v4253_v34 = vld [vmem:[%s6637_s3 + $0x70] sm:$0xff] (%p295_p11)  ;;  %v4543_v14 = vld [vmem:[%s6637_s3 + $0x200] sm:$0xff] (%p295_p11) }
 0x291   : >> { %1456 = vst.msk [vmem:[#allocation3 + $0x30] sm:$0xff] %vm224_vm0, %v1440_v13  ;;  %v1497_v19 = vsel (%p295_p11), %vm224_vm0, %v1471_v7, 0.0  ;;  %v4281_v62 = vld [vmem:[%s6637_s3 + $0xd0] sm:$0xff] (%p295_p11)  ;;  %v4286_v7 = vld [vmem:[%s6637_s3 + $0x100] sm:$0xff] (%p295_p11) }
 0x292   : >> { %v1395_v10 = vpop.f32.mrf.mxu1  ;;  %v4314_v57 = vld [vmem:[%s6637_s3 + $0xf0] sm:$0xff] (%p295_p11)  ;;  %6873 = vst [vmem:[#allocation31_spill] sm:$0xff] (%p295_p11), %v4543_v14  ;;  %v4730_v14 = vld [vmem:[%s6637_s3 + $0x2c8] sm:$0xff] (%p295_p11) }
 0x293   : >> { %v1396_v56 = vadd.f32 %v1395_v10, %v1347_v49  ;;  %v4464_v49 = vld [vmem:[%s6637_s3 + $0x1a8] sm:$0xff] (%p295_p11)  ;;  %v4515_v10 = vld [vmem:[%s6637_s3 + $0x1e0] sm:$0xff] (%p295_p11)  ;;  %v4529_v13 = vld [vmem:[%s6637_s3 + $0x1f0] sm:$0xff] (%p295_p11)  ;;  %6899 = vst [vmem:[#allocation57_spill] sm:$0xff] (%p295_p11), %v4730_v14 }
 0x294   : > { %1498 = vadd.xlane.f32.xlu2 (%p295_p11), %v1497_v19  ;;  %v4271_v19 = vld [vmem:[%s6637_s3 + $0xc0] sm:$0xff] (%p295_p11)  ;;  %6862 = vst [vmem:[#allocation20_spill] sm:$0xff] (%p295_p11), %v4464_v49  ;;  %v4534_v49 = vld [vmem:[%s6637_s3 + $0x1f8] sm:$0xff] (%p295_p11) }
 0x295   : >> { %v1425_v60 = vmax.f32 %v1396_v56, 0.0  ;;  %v4450_v56 = vld [vmem:[%s6637_s3 + $0x198] sm:$0xff] (%p295_p11)  ;;  %6869 = vst [vmem:[#allocation27_spill] sm:$0xff] (%p295_p11), %v4515_v10 }
 0x296   : > { %v1481_v38 = vld [vmem:[#allocation3 + $0x78] sm:$0xff] (%p295_p11)  ;;  %6860 = vst [vmem:[#allocation18_spill] sm:$0xff] (%p295_p11), %v4450_v56  ;;  %v4520_v56 = vld [vmem:[%s6637_s3 + $0x1e8] sm:$0xff] (%p295_p11) }
 0x297   : >> { %v1441_v55 = vadd.f32 %v1425_v60, %v1134_v16  ;;  %v1527_v39 = vsel (%p295_p11), %vm224_vm0, %v1481_v38, 0.0  ;;  %v4352_v38 = vld [vmem:[%s6637_s3 + $0x128] sm:$0xff] (%p295_p11)  ;;  %v4501_v16 = vld [vmem:[%s6637_s3 + $0x1d0] sm:$0xff] (%p295_p11)  ;;  %6870 = vst [vmem:[#allocation28_spill] sm:$0xff] (%p295_p11), %v4520_v56 }
 0x298   : > { %v1472_v20 = vld [vmem:[#allocation3 + $0x30] sm:$0xff] (%p295_p11)  ;;  %v4436_v60 = vld [vmem:[%s6637_s3 + $0x188] sm:$0xff] (%p295_p11)  ;;  %6867 = vst [vmem:[#allocation25_spill] sm:$0xff] (%p295_p11), %v4501_v16  ;;  %v4571_v16 = vld [vmem:[%s6637_s3 + $0x220] sm:$0xff] (%p295_p11) }
 0x299   : >> { %1457 = vst.msk [vmem:[#allocation3 + $0x38] sm:$0xff] %vm224_vm0, %v1441_v55  ;;  %v1500_v23 = vsel (%p295_p11), %vm224_vm0, %v1472_v20, 0.0  ;;  %v4215_v20 = vld [vmem:[%s6637_s3 + $0x40] sm:$0xff] (%p295_p11) }
 0x29a   : >> { %v1398_v3 = vpop.f32.mrf.mxu1  ;;  %1501 = vadd.xlane.f32.xlu0 (%p295_p11), %v1500_v23  ;;  %v4319_v23 = vld [vmem:[%s6637_s3 + $0xf8] sm:$0xff] (%p295_p11)  ;;  %6858 = vst [vmem:[#allocation16_spill] sm:$0xff] (%p295_p11), %v4436_v60  ;;  %v4487_v55 = vld [vmem:[%s6637_s3 + $0x1c0] sm:$0xff] (%p295_p11)  ;;  %v4589_v60 = vld [vmem:[%s6637_s3 + $0x230] sm:$0xff] (%p295_p11) }
 0x29b   : >> { %v1399_v1 = vadd.f32 %v1398_v3, %v1350_v59  ;;  %v4159_v59 = vld [vmem:[%s6637_s3 + $0x80] sm:$0xff] (%p295_p11)  ;;  %v4164_v3 = vld [vmem:[%s6637_s3 + $0x88] sm:$0xff] (%p295_p11)  ;;  %6865 = vst [vmem:[#allocation23_spill] sm:$0xff] (%p295_p11), %v4487_v55 }
 0x29c   : > { %6871 = vst [vmem:[#allocation29_spill] sm:$0xff] (%p295_p11), %v4529_v13  ;;  %v4584_v55 = vld [vmem:[%s6637_s3 + $0x228] sm:$0xff] (%p295_p11) }
 0x29d   : >> { %v1426_v4 = vmax.f32 %v1399_v1, 0.0  ;;  %v4169_v1 = vld [vmem:[%s6637_s3 + $0x90] sm:$0xff] (%p295_p11)  ;;  %6872 = vst [vmem:[#allocation30_spill] sm:$0xff] (%p295_p11), %v4534_v49  ;;  %v4639_v13 = vld [vmem:[%s6637_s3 + $0x268] sm:$0xff] (%p295_p11)  ;;  %v4653_v49 = vld [vmem:[%s6637_s3 + $0x278] sm:$0xff] (%p295_p11) }
 0x29e   : > { %6877 = vst [vmem:[#allocation35_spill] sm:$0xff] (%p295_p11), %v4571_v16 }
 0x29f   : >> { %v1442_v8 = vadd.f32 %v1426_v4, %v1135_v61  ;;  %v4422_v61 = vld [vmem:[%s6637_s3 + $0x178] sm:$0xff] (%p295_p11)  ;;  %v4473_v4 = vld [vmem:[%s6637_s3 + $0x1b0] sm:$0xff] (%p295_p11)  ;;  %6878 = vst [vmem:[#allocation36_spill] sm:$0xff] (%p295_p11), %v4584_v55 }
 0x2a0   : > { %v1473_v21 = vld [vmem:[#allocation3 + $0x38] sm:$0xff] (%p295_p11)  ;;  %6856 = vst [vmem:[#allocation14_spill] sm:$0xff] (%p295_p11), %v4422_v61 }
 0x2a1   : >> { %1458 = vst.msk [vmem:[#allocation3 + $0x40] sm:$0xff] %vm224_vm0, %v1442_v8  ;;  %v1503_v24 = vsel (%p295_p11), %vm224_vm0, %v1473_v21, 0.0  ;;  %v4220_v21 = vld [vmem:[%s6637_s3 + $0x48] sm:$0xff] (%p295_p11) }
 0x2a2   : >> { %v1400_v5 = vpop.f32.mrf.mxu1  ;;  %1504 = vadd.xlane.f32.xlu1 (%p295_p11), %v1503_v24  ;;  %v4347_v24 = vld [vmem:[%s6637_s3 + $0x120] sm:$0xff] (%p295_p11)  ;;  %v4408_v8 = vld [vmem:[%s6637_s3 + $0x168] sm:$0xff] (%p295_p11)  ;;  %6863 = vst [vmem:[#allocation21_spill] sm:$0xff] (%p295_p11), %v4473_v4  ;;  %v4616_v4 = vld [vmem:[%s6637_s3 + $0x250] sm:$0xff] (%p295_p11) }
 0x2a3   : >> { %v1401_v17 = vadd.f32 %v1400_v5, %v1352_v54  ;;  %v4178_v5 = vld [vmem:[%s6637_s3 + $0x98] sm:$0xff] (%p295_p11)  ;;  %6854 = vst [vmem:[#allocation12_spill] sm:$0xff] (%p295_p11), %v4408_v8  ;;  %v4459_v54 = vld [vmem:[%s6637_s3 + $0x1a0] sm:$0xff] (%p295_p11) }
 0x2a4   : > { %6861 = vst [vmem:[#allocation19_spill] sm:$0xff] (%p295_p11), %v4459_v54  ;;  %v4662_v8 = vld [vmem:[%s6637_s3 + $0x280] sm:$0xff] (%p295_p11) }
 0x2a5   : >> { %v1427_v51 = vmax.f32 %v1401_v17, 0.0  ;;  %297 = sbr.rel (!%p295_p11) target bundleno = 74 (0x4a), region = 124  ;;  %v4183_v17 = vld [vmem:[%s6637_s3 + $0xa0] sm:$0xff] (%p295_p11)  ;;  %6879 = vst [vmem:[#allocation37_spill] sm:$0xff] (%p295_p11), %v4589_v60  ;;  %v4772_v60 = vld [vmem:[%s6637_s3 + $0x2f8] sm:$0xff] (%p295_p11) }
 0x2a6   : > { %6883 = vst [vmem:[#allocation41_spill] sm:$0xff] (%p295_p11), %v4616_v4 }
 0x2a7   : >> { %v1443_v6 = vadd.f32 %v1427_v51, %v1136_v50  ;;  %v4188_v50 = vld [vmem:[%s6637_s3 + $0xa8] sm:$0xff] (%p295_p11)  ;;  %6886 = vst [vmem:[#allocation44_spill] sm:$0xff] (%p295_p11), %v4639_v13 }
 0x2a8   : > { %v1474_v22 = vld [vmem:[#allocation3 + $0x40] sm:$0xff] (%p295_p11)  ;;  %v4324_v51 = vld [vmem:[%s6637_s3 + $0x108] sm:$0xff] (%p295_p11)  ;;  %6888 = vst [vmem:[#allocation46_spill] sm:$0xff] (%p295_p11), %v4653_v49  ;;  %v4767_v49 = vld [vmem:[%s6637_s3 + $0x2f0] sm:$0xff] (%p295_p11) }
 0x2a9   : >> { %1459 = vst.msk [vmem:[#allocation3 + $0x48] sm:$0xff] %vm224_vm0, %v1443_v6  ;;  %v1506_v25 = vsel (%p295_p11), %vm224_vm0, %v1474_v22, 0.0  ;;  %v4225_v22 = vld [vmem:[%s6637_s3 + $0x50] sm:$0xff] (%p295_p11)  ;;  %v4305_v6 = vld [vmem:[%s6637_s3 + $0xe8] sm:$0xff] (%p295_p11) }
 0x2aa   : > { %1507 = vadd.xlane.f32.xlu2 %v1506_v25  ;;  %1513 = vadd.xlane.f32.xlu1 %v1512_v30  ;;  %v4333_v25 = vld [vmem:[%s6637_s3 + $0x110] sm:$0xff]  ;;  %v4394_v30 = vld [vmem:[%s6637_s3 + $0x158] sm:$0xff]  ;;  %6889 = vst [vmem:[#allocation47_spill] sm:$0xff] %v4662_v8  ;;  %v4758_v13 = vld [vmem:[%s6637_s3 + $0x2e8] sm:$0xff] }
 0x2ab   : > { %6852 = vst [vmem:[#allocation10_spill] sm:$0xff] %v4394_v30  ;;  %v4676_v30 = vld [vmem:[%s6637_s3 + $0x290] sm:$0xff] }
 0x2ac   : > { %6891 = vst [vmem:[#allocation49_spill] sm:$0xff] %v4676_v30  ;;  %v4735_v8 = vld [vmem:[%s6637_s3 + $0x2d0] sm:$0xff]  ;;  %v4749_v30 = vld [vmem:[%s6637_s3 + $0x2e0] sm:$0xff] }
 0x2ad   : > { %6900 = vst [vmem:[#allocation58_spill] sm:$0xff] %v4735_v8 }
 0x2ae   : > { %6902 = vst [vmem:[#allocation60_spill] sm:$0xff] %v4749_v30  ;;  %v4868_v30 = vld [vmem:[%s6637_s3 + $0x360] sm:$0xff] }
 0x2af   : > { %6903 = vst [vmem:[#allocation61_spill] sm:$0xff] %v4758_v13  ;;  %v4945_v13 = vld [vmem:[%s6637_s3 + $0x3b0] sm:$0xff] }
 0x2b0   : > { %v1475_v26 = vld [vmem:[#allocation3 + $0x48] sm:$0xff]  ;;  %6904 = vst [vmem:[#allocation62_spill] sm:$0xff] %v4767_v49 }
 0x2b1   : > { %v1509_v29 = vsel %vm224_vm0, %v1475_v26, 0.0  ;;  %v4338_v26 = vld [vmem:[%s6637_s3 + $0x118] sm:$0xff]  ;;  %6905 = vst [vmem:[#allocation63_spill] sm:$0xff] %v4772_v60  ;;  %v4845_v49 = vld [vmem:[%s6637_s3 + $0x348] sm:$0xff] }
 0x2b2   : > { %1510 = vadd.xlane.f32.xlu0 %v1509_v29  ;;  %1516 = vadd.xlane.f32.xlu2 %v1515_v31  ;;  %v4244_v29 = vld [vmem:[%s6637_s3 + $0x68] sm:$0xff]  ;;  %v4445_v31 = vld [vmem:[%s6637_s3 + $0x190] sm:$0xff]  ;;  %6918 = vst [vmem:[#allocation76_spill] sm:$0xff] %v4845_v49  ;;  %v4959_v49 = vld [vmem:[%s6637_s3 + $0x3c0] sm:$0xff] }
 0x2b3   : > { %1522 = vadd.xlane.f32.xlu1 %v1521_v36  ;;  %v4366_v36 = vld [vmem:[%s6637_s3 + $0x138] sm:$0xff]  ;;  %6859 = vst [vmem:[#allocation17_spill] sm:$0xff] %v4445_v31  ;;  %v4552_v31 = vld [vmem:[%s6637_s3 + $0x208] sm:$0xff] }
 0x2b4   : > { %6874 = vst [vmem:[#allocation32_spill] sm:$0xff] %v4552_v31  ;;  %v4630_v31 = vld [vmem:[%s6637_s3 + $0x260] sm:$0xff]  ;;  %v4936_v60 = vld [vmem:[%s6637_s3 + $0x3a8] sm:$0xff] }
 0x2b5   : > { %6885 = vst [vmem:[#allocation43_spill] sm:$0xff] %v4630_v31  ;;  %v4744_v31 = vld [vmem:[%s6637_s3 + $0x2d8] sm:$0xff] }
 0x2b6   : > { %6901 = vst [vmem:[#allocation59_spill] sm:$0xff] %v4744_v31  ;;  %v4854_v31 = vld [vmem:[%s6637_s3 + $0x350] sm:$0xff] }
 0x2b7   : > { %6919 = vst [vmem:[#allocation77_spill] sm:$0xff] %v4854_v31  ;;  %v4973_v31 = vld [vmem:[%s6637_s3 + $0x3d0] sm:$0xff] }
 0x2b8   : > { %6921 = vst [vmem:[#allocation79_spill] sm:$0xff] %v4868_v30  ;;  %v4982_v30 = vld [vmem:[%s6637_s3 + $0x3d8] sm:$0xff] }
 0x2b9   : > { %6933 = vst [vmem:[#allocation91_spill] sm:$0xff] %v4936_v60  ;;  %v4996_v60 = vld [vmem:[%s6637_s3 + $0x3e8] sm:$0xff] }
 0x2ba   : > { %1519 = vadd.xlane.f32.xlu0 %v1518_v35  ;;  %1525 = vadd.xlane.f32.xlu2 %v1524_v37  ;;  %v4258_v35 = vld [vmem:[%s6637_s3 + $0x78] sm:$0xff]  ;;  %v4417_v37 = vld [vmem:[%s6637_s3 + $0x170] sm:$0xff]  ;;  %6934 = vst [vmem:[#allocation92_spill] sm:$0xff] %v4945_v13 }
 0x2bb   : > { %6855 = vst [vmem:[#allocation13_spill] sm:$0xff] %v4417_v37  ;;  %v4694_v37 = vld [vmem:[%s6637_s3 + $0x2a0] sm:$0xff] }
 0x2bc   : > { %6893 = vst [vmem:[#allocation51_spill] sm:$0xff] %v4694_v37  ;;  %v4840_v37 = vld [vmem:[%s6637_s3 + $0x340] sm:$0xff] }
 0x2bd   : > { %6917 = vst [vmem:[#allocation75_spill] sm:$0xff] %v4840_v37 }
 0x2be   : > { %6936 = vst [vmem:[#allocation94_spill] sm:$0xff] %v4959_v49 }
 0x2c2   : > { %1528 = vadd.xlane.f32.xlu0 %v1527_v39  ;;  %v4403_v39 = vld [vmem:[%s6637_s3 + $0x160] sm:$0xff] }
 0x2c3   : > { %6853 = vst [vmem:[#allocation11_spill] sm:$0xff] %v4403_v39  ;;  %v4671_v39 = vld [vmem:[%s6637_s3 + $0x288] sm:$0xff] }
 0x2c4   : > { %6890 = vst [vmem:[#allocation48_spill] sm:$0xff] %v4671_v39 }
 0x2f8   : > { %v1484_v54 = vpop.xlane.xlu0 %1483  ;;  %v1490_v61 = vpop.xlane.xlu1 %1489 }
 0x2f9   : > { %v4577_v56 = vmul.f32 0.015625, %v1484_v54  ;;  %v4579_v10 = vmul.f32 0.015625, %v1490_v61  ;;  %v4598_v61 = vld [vmem:[%s6637_s3 + $0x238] sm:$0xff]  ;;  %v4603_v54 = vld [vmem:[%s6637_s3 + $0x240] sm:$0xff] }
 0x2fa   : > { %6880 = vst [vmem:[#allocation38_spill] sm:$0xff] %v4598_v61 }
 0x2fb   : > { %6881 = vst [vmem:[#allocation39_spill] sm:$0xff] %v4603_v54  ;;  %v5043_v49 = vmul.f32 %v6940_v52, %v4577_v56 }
 0x2ff   : > { %v1496_v48 = vpop.xlane.xlu2 %1495 }
 0x300   : > { %v4593_v33 = vmul.f32 0.015625, %v1496_v48  ;;  %v4611_v48 = vld [vmem:[%s6637_s3 + $0x248] sm:$0xff] }
 0x301   : > { %6882 = vst [vmem:[#allocation40_spill] sm:$0xff] %v4611_v48  ;;  %v1487_v55 = vpop.xlane.xlu0 %1486  ;;  %v4689_v48 = vld [vmem:[%s6637_s3 + $0x298] sm:$0xff] }
 0x302   : > { %v1493_v54 = vpop.xlane.xlu1 %1492  ;;  %v4682_v16 = vmul.f32 0.015625, %v1487_v55  ;;  %6892 = vst [vmem:[#allocation50_spill] sm:$0xff] %v4689_v48  ;;  %v4703_v55 = vld [vmem:[%s6637_s3 + $0x2a8] sm:$0xff]  ;;  %v4831_v48 = vld [vmem:[%s6637_s3 + $0x338] sm:$0xff] }
 0x303   : > { %v4684_v15 = vmul.f32 0.015625, %v1493_v54  ;;  %6895 = vst [vmem:[#allocation53_spill] sm:$0xff] %v4703_v55  ;;  %v4708_v54 = vld [vmem:[%s6637_s3 + $0x2b0] sm:$0xff] }
 0x304   : > { %6896 = vst [vmem:[#allocation54_spill] sm:$0xff] %v4708_v54  ;;  %v4799_v55 = vld [vmem:[%s6637_s3 + $0x310] sm:$0xff] }
 0x305   : > { %6910 = vst [vmem:[#allocation68_spill] sm:$0xff] %v4799_v55 }
 0x306   : > { %6916 = vst [vmem:[#allocation74_spill] sm:$0xff] %v4831_v48 }
 0x307   : > { %v1499_v4 = vpop.xlane.xlu2 %1498 }
 0x308   : > { %v4698_v61 = vmul.f32 0.015625, %v1499_v4  ;;  %v4716_v4 = vld [vmem:[%s6637_s3 + $0x2b8] sm:$0xff] }
 0x309   : > { %6897 = vst [vmem:[#allocation55_spill] sm:$0xff] %v4716_v4  ;;  %v4786_v4 = vld [vmem:[%s6637_s3 + $0x308] sm:$0xff] }
 0x30a   : > { %6894 = vst [vmem:[#allocation52_spill] sm:$0xff] %v4698_v61 }
 0x30b   : > { %6907 = vst [vmem:[#allocation65_spill] sm:$0xff] %v4786_v4 }
 0x30d   : > { %v1502_v39 = vpop.xlane.xlu0 %1501 }
 0x30e   : > { %v4792_v8 = vmul.f32 0.015625, %v1502_v39  ;;  %v4818_v39 = vld [vmem:[%s6637_s3 + $0x328] sm:$0xff] }
 0x30f   : > { %6914 = vst [vmem:[#allocation72_spill] sm:$0xff] %v4818_v39 }
 0x310   : > { %6908 = vst [vmem:[#allocation66_spill] sm:$0xff] %v4792_v8  ;;  %v4886_v8 = vld [vmem:[%s6637_s3 + $0x370] sm:$0xff] }
 0x311   : > { %6923 = vst [vmem:[#allocation81_spill] sm:$0xff] %v4886_v8 }
 0x315   : > { %v1505_v32 = vpop.xlane.xlu1 %1504 }
 0x316   : > { %v4794_v14 = vmul.f32 0.015625, %v1505_v32  ;;  %v4813_v32 = vld [vmem:[%s6637_s3 + $0x320] sm:$0xff] }
 0x317   : > { %6913 = vst [vmem:[#allocation71_spill] sm:$0xff] %v4813_v32 }
 0x318   : > { %6909 = vst [vmem:[#allocation67_spill] sm:$0xff] %v4794_v14  ;;  %v4877_v14 = vld [vmem:[%s6637_s3 + $0x368] sm:$0xff] }
 0x319   : > { %6922 = vst [vmem:[#allocation80_spill] sm:$0xff] %v4877_v14  ;;  %v4950_v14 = vld [vmem:[%s6637_s3 + $0x3b8] sm:$0xff] }
 0x31a   : > { %6935 = vst [vmem:[#allocation93_spill] sm:$0xff] %v4950_v14 }
 0x31d   : > { %v1508_v54 = vpop.xlane.xlu2 %1507  ;;  %v1514_v39 = vpop.xlane.xlu1 %1513 }
 0x31e   : > { %v4808_v53 = vmul.f32 0.015625, %v1508_v54  ;;  %v4826_v54 = vld [vmem:[%s6637_s3 + $0x330] sm:$0xff]  ;;  %v4899_v37 = vmul.f32 0.015625, %v1514_v39  ;;  %v4923_v39 = vld [vmem:[%s6637_s3 + $0x398] sm:$0xff] }
 0x31f   : > { %6915 = vst [vmem:[#allocation73_spill] sm:$0xff] %v4826_v54  ;;  %v4904_v54 = vld [vmem:[%s6637_s3 + $0x380] sm:$0xff] }
 0x320   : > { %6912 = vst [vmem:[#allocation70_spill] sm:$0xff] %v4808_v53  ;;  %v4909_v53 = vld [vmem:[%s6637_s3 + $0x388] sm:$0xff] }
 0x321   : > { %6926 = vst [vmem:[#allocation84_spill] sm:$0xff] %v4899_v37 }
 0x322   : > { %6927 = vst [vmem:[#allocation85_spill] sm:$0xff] %v4904_v54  ;;  %v6938_v54 = vunpack.c.l.bf16 %v4107_v40 }
 0x323   : > { %6928 = vst [vmem:[#allocation86_spill] sm:$0xff] %v4909_v53  ;;  %v6946_v53 = vunpack.c.l.bf16 %v4122_v43  ;;  %v6955_v43 = vunpack.c.h.bf16 %v4132_v45 }
 0x324   : > { %6931 = vst [vmem:[#allocation89_spill] sm:$0xff] %v4923_v39 }
 0x325   : > { %v1511_v55 = vpop.xlane.xlu0 %1510  ;;  %v1517_v48 = vpop.xlane.xlu2 %1516  ;;  %v5063_v52 = vmul.f32 %v6946_v53, %v4577_v56 }
 0x326   : > { %v4897_v4 = vmul.f32 0.015625, %v1511_v55  ;;  %v4913_v32 = vmul.f32 0.015625, %v1517_v48  ;;  %v4918_v55 = vld [vmem:[%s6637_s3 + $0x390] sm:$0xff]  ;;  %v4931_v48 = vld [vmem:[%s6637_s3 + $0x3a0] sm:$0xff]  ;;  %v1523_v37 = vpop.xlane.xlu1 %1522 }
 0x327   : > { %6930 = vst [vmem:[#allocation88_spill] sm:$0xff] %v4918_v55  ;;  %v5009_v13 = vmul.f32 0.015625, %v1523_v37  ;;  %v5014_v55 = vld [vmem:[%s6637_s3 + $0x3f8] sm:$0xff]  ;;  %v6939_v37 = vunpack.c.h.bf16 %v4107_v40  ;;  %v6944_v40 = vunpack.c.h.bf16 %v4117_v42 }
 0x328   : > { %6925 = vst [vmem:[#allocation83_spill] sm:$0xff] %v4897_v4  ;;  %v5048_v4 = vmul.f32 %v6941_v47, %v4577_v56  ;;  %v5068_v47 = vmul.f32 %v6947_v41, %v4577_v56  ;;  %v5088_v41 = vmul.f32 %v6955_v43, %v4577_v56 }
 0x329   : > { %6929 = vst [vmem:[#allocation87_spill] sm:$0xff] %v4913_v32  ;;  %v5033_v32 = vmul.f32 %v6938_v54, %v4577_v56 }
 0x32a   : > { %6932 = vst [vmem:[#allocation90_spill] sm:$0xff] %v4931_v48  ;;  %v5001_v48 = vld [vmem:[%s6637_s3 + $0x3f0] sm:$0xff] }
 0x32b   : > { %6942 = vst [vmem:[#allocation96_spill] sm:$0xff] %v5048_v4  ;;  %v6949_v4 = vunpack.c.l.bf16 %v4127_v44 }
 0x32c   : > { %6948 = vst [vmem:[#allocation98_spill] sm:$0xff] %v5068_v47  ;;  %v6957_v47 = vunpack.c.l.bf16 %v4141_v12 }
 0x32d   : > { %v1520_v8 = vpop.xlane.xlu0 %1519  ;;  %v1526_v39 = vpop.xlane.xlu2 %1525  ;;  %6956 = vst [vmem:[#allocation102_spill] sm:$0xff] %v5088_v41 }
 0x32e   : > { %v5007_v14 = vmul.f32 0.015625, %v1520_v8  ;;  %v5018_v61 = vmul.f32 0.015625, %v1526_v39  ;;  %v5038_v8 = vmul.f32 %v6939_v37, %v4577_v56  ;;  %v6943_v39 = vunpack.c.l.bf16 %v4117_v42 }
 0x32f   : > { %v5058_v37 = vmul.f32 %v6944_v40, %v4577_v56  ;;  %v6951_v42 = vunpack.c.h.bf16 %v4127_v44  ;;  %v6959_v44 = vunpack.c.h.bf16 %v4141_v12  ;;  %v6966_v12 = vunpack.c.h.bf16 %v4215_v20 }
 0x330   : > { %v5053_v54 = vmul.f32 %v6943_v39, %v4577_v56  ;;  %v5073_v39 = vmul.f32 %v6949_v4, %v4577_v56  ;;  %v5093_v4 = vmul.f32 %v6957_v47, %v4577_v56  ;;  %v6965_v47 = vunpack.c.l.bf16 %v4215_v20 }
 0x331   : > { %6945 = vst [vmem:[#allocation97_spill] sm:$0xff] %v5058_v37  ;;  %v5078_v40 = vmul.f32 %v6951_v42, %v4577_v56  ;;  %v6953_v37 = vunpack.c.l.bf16 %v4132_v45  ;;  %v5098_v42 = vmul.f32 %v6959_v44, %v4577_v56  ;;  %v6963_v45 = vunpack.c.h.bf16 %v4146_v2 }
 0x332   : > { %6950 = vst [vmem:[#allocation99_spill] sm:$0xff] %v5073_v39  ;;  %v5120_v44 = vmul.f32 %v6966_v12, %v4682_v16  ;;  %v6970_v20 = vunpack.c.h.bf16 %v4225_v22  ;;  %v6971_v12 = vunpack.c.l.bf16 %v4234_v27 }
 0x333   : > { %6952 = vst [vmem:[#allocation100_spill] sm:$0xff] %v5078_v40  ;;  %v5083_v53 = vmul.f32 %v6953_v37, %v4577_v56  ;;  %v6961_v37 = vunpack.c.l.bf16 %v4146_v2  ;;  %v5108_v43 = vmul.f32 %v6963_v45, %v4577_v56  ;;  %v6968_v2 = vunpack.c.h.bf16 %v4220_v21 }
 0x334   : > { %6958 = vst [vmem:[#allocation103_spill] sm:$0xff] %v5093_v4  ;;  %v5113_v4 = vmul.f32 %v6965_v47, %v4682_v16  ;;  %v6969_v45 = vunpack.c.l.bf16 %v4225_v22  ;;  %v5140_v47 = vmul.f32 %v6970_v20, %v4682_v16  ;;  %v6975_v22 = vunpack.c.h.bf16 %v4239_v28 }
 0x335   : > { %6954 = vst [vmem:[#allocation101_spill] sm:$0xff] %v5083_v53  ;;  %v1529_v39 = vpop.xlane.xlu0 %1528  ;;  %v5103_v53 = vmul.f32 %v6961_v37, %v4577_v56  ;;  %v6967_v37 = vunpack.c.l.bf16 %v4220_v21  ;;  %v5130_v56 = vmul.f32 %v6968_v2, %v4682_v16  ;;  %v6972_v21 = vunpack.c.h.bf16 %v4234_v27 }
 0x336   : > { %6960 = vst [vmem:[#allocation104_spill] sm:$0xff] %v5098_v42  ;;  %v5115_v41 = vmul.f32 0.015625, %v1529_v39  ;;  %v5135_v39 = vmul.f32 %v6969_v45, %v4682_v16  ;;  %v5160_v20 = vmul.f32 %v6975_v22, %v4682_v16  ;;  %v6977_v42 = vunpack.c.l.bf16 %v4244_v29 }
 0x337   : > { %6962 = vst [vmem:[#allocation105_spill] sm:$0xff] %v5103_v53  ;;  %v5125_v53 = vmul.f32 %v6967_v37, %v4682_v16  ;;  %v5145_v37 = vmul.f32 %v6971_v12, %v4682_v16  ;;  %v5150_v2 = vmul.f32 %v6972_v21, %v4682_v16  ;;  %v6979_v27 = vunpack.c.h.bf16 %v4244_v29 }
 0x338   : > { %6964 = vst [vmem:[#allocation106_spill] sm:$0xff] %v5108_v43  ;;  %v6973_v43 = vunpack.c.l.bf16 %v4239_v28  ;;  %v5165_v12 = vmul.f32 %v6977_v42, %v4682_v16  ;;  %v6981_v40 = vunpack.c.l.bf16 %v4253_v34  ;;  %v6983_v28 = vunpack.c.h.bf16 %v4253_v34 }
 0x339   : > { %6976 = vst [vmem:[#allocation108_spill] sm:$0xff] %v5160_v20  ;;  %v5170_v21 = vmul.f32 %v6979_v27, %v4682_v16  ;;  %v6985_v20 = vunpack.c.l.bf16 %v4258_v35  ;;  %v6987_v29 = vunpack.c.h.bf16 %v4258_v35  ;;  %v6990_v34 = vunpack.c.h.bf16 %v4159_v59 }
 0x33a   : > { %v5155_v45 = vmul.f32 %v6973_v43, %v4682_v16  ;;  %6978 = vst [vmem:[#allocation109_spill] sm:$0xff] %v5165_v12  ;;  %v5175_v43 = vmul.f32 %v6981_v40, %v4682_v16  ;;  %v5180_v22 = vmul.f32 %v6983_v28, %v4682_v16  ;;  %v6992_v35 = vunpack.c.h.bf16 %v4164_v3 }
 0x33b   : > { %6980 = vst [vmem:[#allocation110_spill] sm:$0xff] %v5170_v21  ;;  %v5185_v42 = vmul.f32 %v6985_v20, %v4682_v16  ;;  %v5190_v27 = vmul.f32 %v6987_v29, %v4682_v16  ;;  %v6989_v21 = vunpack.c.l.bf16 %v4159_v59  ;;  %v5200_v28 = vmul.f32 %v6990_v34, %v4579_v10 }
 0x33c   : > { %6974 = vst [vmem:[#allocation107_spill] sm:$0xff] %v5155_v45  ;;  %v5210_v16 = vmul.f32 %v6992_v35, %v4579_v10  ;;  %v6993_v29 = vunpack.c.l.bf16 %v4169_v1  ;;  %v6994_v59 = vunpack.c.h.bf16 %v4169_v1  ;;  %v6999_v1 = vunpack.c.h.bf16 %v4183_v17 }
 0x33d   : > { %6982 = vst [vmem:[#allocation111_spill] sm:$0xff] %v5175_v43  ;;  %v5195_v40 = vmul.f32 %v6989_v21, %v4579_v10  ;;  %v7001_v43 = vunpack.c.l.bf16 %v4188_v50  ;;  %v7005_v12 = vunpack.c.l.bf16 %v4197_v9 }
 0x33e   : > { %6984 = vst [vmem:[#allocation112_spill] sm:$0xff] %v5180_v22  ;;  %v6991_v22 = vunpack.c.l.bf16 %v4164_v3  ;;  %v5215_v21 = vmul.f32 %v6993_v29, %v4579_v10  ;;  %v5220_v34 = vmul.f32 %v6994_v59, %v4579_v10  ;;  %v6996_v3 = vunpack.c.h.bf16 %v4178_v5 }
 0x33f   : > { %6986 = vst [vmem:[#allocation113_spill] sm:$0xff] %v5185_v42  ;;  %v6997_v42 = vunpack.c.l.bf16 %v4183_v17  ;;  %v5240_v59 = vmul.f32 %v6999_v1, %v4579_v10  ;;  %v7007_v17 = vunpack.c.h.bf16 %v4197_v9  ;;  %v7014_v9 = vunpack.c.h.bf16 %v4271_v19 }
 0x340   : > { %6988 = vst [vmem:[#allocation114_spill] sm:$0xff] %v5190_v27  ;;  %v5205_v20 = vmul.f32 %v6991_v22, %v4579_v10  ;;  %v6995_v27 = vunpack.c.l.bf16 %v4178_v5  ;;  %v5230_v35 = vmul.f32 %v6996_v3, %v4579_v10  ;;  %v7003_v5 = vunpack.c.h.bf16 %v4188_v50 }
 0x341   : > { %v5235_v29 = vmul.f32 %v6997_v42, %v4579_v10  ;;  %7000 = vst [vmem:[#allocation116_spill] sm:$0xff] %v5240_v59  ;;  %v5255_v42 = vmul.f32 %v7005_v12, %v4579_v10  ;;  %v5260_v1 = vmul.f32 %v7007_v17, %v4579_v10  ;;  %v7009_v59 = vunpack.c.l.bf16 %v4202_v11 }
 0x342   : > { %v5225_v22 = vmul.f32 %v6995_v27, %v4579_v10  ;;  %v5245_v27 = vmul.f32 %v7001_v43, %v4579_v10  ;;  %v5250_v3 = vmul.f32 %v7003_v5, %v4579_v10  ;;  %v7011_v50 = vunpack.c.h.bf16 %v4202_v11 }
 0x343   : > { %6998 = vst [vmem:[#allocation115_spill] sm:$0xff] %v5235_v29  ;;  %v5265_v43 = vmul.f32 %v7009_v59, %v4579_v10  ;;  %v5280_v17 = vmul.f32 %v7014_v9, %v4684_v15  ;;  %v7016_v11 = vunpack.c.h.bf16 %v4276_v63  ;;  %v7079_v29 = vld [vmem:[#allocation11_spill] sm:$0xff] }
 0x344   : > { %7002 = vst [vmem:[#allocation117_spill] sm:$0xff] %v5245_v27  ;;  %v5270_v5 = vmul.f32 %v7011_v50, %v4579_v10  ;;  %v7017_v50 = vunpack.c.l.bf16 %v4281_v62  ;;  %v7029_v27 = vunpack.c.l.bf16 %v4314_v57  ;;  %v7080_v45 = vunpack.c.l.bf16 %v7079_v29 }
 0x345   : > { %7004 = vst [vmem:[#allocation118_spill] sm:$0xff] %v5250_v3  ;;  %v7013_v3 = vunpack.c.l.bf16 %v4271_v19  ;;  %v5290_v10 = vmul.f32 %v7016_v11, %v4684_v15  ;;  %v7018_v19 = vunpack.c.h.bf16 %v4281_v62  ;;  %v7023_v62 = vunpack.c.h.bf16 %v4300_v0 }
 0x346   : > { %7006 = vst [vmem:[#allocation119_spill] sm:$0xff] %v5255_v42  ;;  %v7025_v42 = vunpack.c.l.bf16 %v4305_v6 }
 0x347   : > { %7008 = vst [vmem:[#allocation120_spill] sm:$0xff] %v5260_v1  ;;  %v5275_v12 = vmul.f32 %v7013_v3, %v4684_v15  ;;  %v7015_v1 = vunpack.c.l.bf16 %v4276_v63  ;;  %v5295_v3 = vmul.f32 %v7017_v50, %v4684_v15  ;;  %v5300_v9 = vmul.f32 %v7018_v19, %v4684_v15 }
 0x348   : > { %7010 = vst [vmem:[#allocation121_spill] sm:$0xff] %v5265_v43  ;;  %v7020_v63 = vunpack.c.h.bf16 %v4295_v58  ;;  %v7021_v43 = vunpack.c.l.bf16 %v4300_v0  ;;  %v5320_v19 = vmul.f32 %v7023_v62, %v4684_v15  ;;  %v7031_v0 = vunpack.c.h.bf16 %v4314_v57 }
 0x349   : > { %7012 = vst [vmem:[#allocation122_spill] sm:$0xff] %v5270_v5  ;;  %v5285_v59 = vmul.f32 %v7015_v1, %v4684_v15  ;;  %v7019_v5 = vunpack.c.l.bf16 %v4295_v58  ;;  %v7027_v58 = vunpack.c.h.bf16 %v4305_v6  ;;  %v7035_v6 = vunpack.c.h.bf16 %v4319_v23 }
 0x34a   : > { %v5310_v11 = vmul.f32 %v7020_v63, %v4684_v15  ;;  %v5315_v50 = vmul.f32 %v7021_v43, %v4684_v15  ;;  %7024 = vst [vmem:[#allocation124_spill] sm:$0xff] %v5320_v19  ;;  %v5335_v43 = vmul.f32 %v7029_v27, %v4684_v15  ;;  %v5340_v62 = vmul.f32 %v7031_v0, %v4684_v15 }
 0x34b   : > { %v5305_v1 = vmul.f32 %v7019_v5, %v4684_v15  ;;  %v5325_v5 = vmul.f32 %v7025_v42, %v4684_v15  ;;  %v5330_v63 = vmul.f32 %v7027_v58, %v4684_v15  ;;  %v7033_v19 = vunpack.c.l.bf16 %v4319_v23 }
 0x34c   : > { %7022 = vst [vmem:[#allocation123_spill] sm:$0xff] %v5315_v50  ;;  %v5350_v58 = vmul.f32 %v7035_v6, %v4684_v15  ;;  %v7038_v57 = vunpack.c.h.bf16 %v4286_v7  ;;  %v7040_v23 = vunpack.c.h.bf16 %v4324_v51  ;;  %v7041_v6 = vunpack.c.l.bf16 %v4333_v25 }
 0x34d   : > { %7026 = vst [vmem:[#allocation125_spill] sm:$0xff] %v5325_v5  ;;  %v5345_v42 = vmul.f32 %v7033_v19, %v4684_v15  ;;  %v7053_v5 = vunpack.c.l.bf16 %v4361_v18 }
 0x34e   : > { %7028 = vst [vmem:[#allocation126_spill] sm:$0xff] %v5330_v63  ;;  %v7037_v63 = vunpack.c.l.bf16 %v4286_v7  ;;  %v5360_v0 = vmul.f32 %v7038_v57, %v4593_v33  ;;  %v5370_v15 = vmul.f32 %v7040_v23, %v4593_v33  ;;  %v7042_v7 = vunpack.c.h.bf16 %v4333_v25 }
 0x34f   : > { %7030 = vst [vmem:[#allocation127_spill] sm:$0xff] %v5335_v43  ;;  %v7047_v25 = vunpack.c.h.bf16 %v4347_v24  ;;  %v7049_v43 = vunpack.c.l.bf16 %v4352_v38 }
 0x350   : > { %7032 = vst [vmem:[#allocation128_spill] sm:$0xff] %v5340_v62  ;;  %v5355_v27 = vmul.f32 %v7037_v63, %v4593_v33  ;;  %v7039_v62 = vunpack.c.l.bf16 %v4324_v51  ;;  %v5375_v63 = vmul.f32 %v7041_v6, %v4593_v33  ;;  %v5380_v57 = vmul.f32 %v7042_v7, %v4593_v33 }
 0x351   : > { %7034 = vst [vmem:[#allocation129_spill] sm:$0xff] %v5345_v42  ;;  %v7044_v51 = vunpack.c.h.bf16 %v4338_v26  ;;  %v7045_v42 = vunpack.c.l.bf16 %v4347_v24  ;;  %v5400_v7 = vmul.f32 %v7047_v25, %v4593_v33  ;;  %v7055_v24 = vunpack.c.h.bf16 %v4361_v18 }
 0x352   : > { %7036 = vst [vmem:[#allocation130_spill] sm:$0xff] %v5350_v58  ;;  %v5365_v19 = vmul.f32 %v7039_v62, %v4593_v33  ;;  %v7043_v58 = vunpack.c.l.bf16 %v4338_v26  ;;  %v7051_v26 = vunpack.c.h.bf16 %v4352_v38  ;;  %v7059_v38 = vunpack.c.h.bf16 %v4366_v36 }
 0x353   : > { %v5390_v23 = vmul.f32 %v7044_v51, %v4593_v33  ;;  %v5395_v6 = vmul.f32 %v7045_v42, %v4593_v33  ;;  %7048 = vst [vmem:[#allocation132_spill] sm:$0xff] %v5400_v7  ;;  %v5415_v42 = vmul.f32 %v7053_v5, %v4593_v33  ;;  %v5420_v25 = vmul.f32 %v7055_v24, %v4593_v33 }
 0x354   : > { %v5385_v62 = vmul.f32 %v7043_v58, %v4593_v33  ;;  %v5405_v58 = vmul.f32 %v7049_v43, %v4593_v33  ;;  %v5410_v51 = vmul.f32 %v7051_v26, %v4593_v33  ;;  %v7057_v7 = vunpack.c.l.bf16 %v4366_v36 }
 0x355   : > { %7046 = vst [vmem:[#allocation131_spill] sm:$0xff] %v5395_v6  ;;  %v5430_v26 = vmul.f32 %v7059_v38, %v4593_v33  ;;  %v7069_v38 = vld [vmem:[#allocation9_spill] sm:$0xff] }
 0x356   : > { %7050 = vst [vmem:[#allocation133_spill] sm:$0xff] %v5405_v58  ;;  %v5425_v43 = vmul.f32 %v7057_v7, %v4593_v33  ;;  %v7062_v58 = vld [vmem:[#allocation7_spill] sm:$0xff] }
 0x357   : > { %7052 = vst [vmem:[#allocation134_spill] sm:$0xff] %v5410_v51  ;;  %v7061_v51 = vld [vmem:[#allocation52_spill] sm:$0xff]  ;;  %v7063_v6 = vunpack.c.l.bf16 %v7062_v58  ;;  %v7064_v18 = vunpack.c.h.bf16 %v7062_v58  ;;  %v7072_v58 = vunpack.c.h.bf16 %v7069_v38 }
 0x358   : > { %7054 = vst [vmem:[#allocation135_spill] sm:$0xff] %v5415_v42 }
 0x359   : > { %7056 = vst [vmem:[#allocation136_spill] sm:$0xff] %v5420_v25  ;;  %v5435_v5 = vmul.f32 %v7063_v6, %v7061_v51  ;;  %v5440_v24 = vmul.f32 %v7064_v18, %v7061_v51  ;;  %v7065_v25 = vld [vmem:[#allocation8_spill] sm:$0xff]  ;;  %v5460_v18 = vmul.f32 %v7072_v58, %v7061_v51 }
 0x35a   : > { %7058 = vst [vmem:[#allocation137_spill] sm:$0xff] %v5425_v43  ;;  %v7066_v42 = vunpack.c.l.bf16 %v7065_v25  ;;  %v7067_v36 = vunpack.c.h.bf16 %v7065_v25  ;;  %v7074_v43 = vld [vmem:[#allocation10_spill] sm:$0xff] }
 0x35b   : > { %7060 = vst [vmem:[#allocation138_spill] sm:$0xff] %v5430_v26  ;;  %v7070_v26 = vunpack.c.l.bf16 %v7069_v38  ;;  %v7075_v50 = vunpack.c.l.bf16 %v7074_v43  ;;  %v7077_v25 = vunpack.c.h.bf16 %v7074_v43  ;;  %v7082_v38 = vunpack.c.h.bf16 %v7079_v29 }
 0x35c   : > { %v5445_v7 = vmul.f32 %v7066_v42, %v7061_v51  ;;  %v5450_v33 = vmul.f32 %v7067_v36, %v7061_v51  ;;  %7073 = vst [vmem:[#allocation8_spill] sm:$0xff] %v5460_v18  ;;  %v7084_v18 = vld [vmem:[#allocation12_spill] sm:$0xff] }
 0x35d   : > { %v5455_v6 = vmul.f32 %v7070_v26, %v7061_v51  ;;  %v5465_v42 = vmul.f32 %v7075_v50, %v7061_v51  ;;  %v5470_v36 = vmul.f32 %v7077_v25, %v7061_v51  ;;  %v5475_v26 = vmul.f32 %v7080_v45, %v7061_v51 }
 0x35e   : > { %7068 = vst [vmem:[#allocation52_spill] sm:$0xff] %v5450_v33  ;;  %v5480_v58 = vmul.f32 %v7082_v38, %v7061_v51  ;;  %v7087_v43 = vunpack.c.h.bf16 %v7084_v18 }
 0x35f   : > { %7071 = vst [vmem:[#allocation7_spill] sm:$0xff] %v5455_v6  ;;  %v7085_v6 = vunpack.c.l.bf16 %v7084_v18 }
 0x360   : > { %7076 = vst [vmem:[#allocation9_spill] sm:$0xff] %v5465_v42  ;;  %v5490_v25 = vmul.f32 %v7087_v43, %v7061_v51 }
 0x361   : > { %7078 = vst [vmem:[#allocation10_spill] sm:$0xff] %v5470_v36  ;;  %v5485_v50 = vmul.f32 %v7085_v6, %v7061_v51  ;;  %v7089_v36 = vld [vmem:[#allocation13_spill] sm:$0xff] }
 0x362   : > { %7081 = vst [vmem:[#allocation11_spill] sm:$0xff] %v5475_v26  ;;  %v7090_v42 = vunpack.c.l.bf16 %v7089_v36  ;;  %v7092_v29 = vunpack.c.h.bf16 %v7089_v36 }
 0x363   : > { %7083 = vst [vmem:[#allocation139_spill] sm:$0xff] %v5480_v58  ;;  %v7094_v58 = vld [vmem:[#allocation14_spill] sm:$0xff] }
 0x364   : > { %7086 = vst [vmem:[#allocation12_spill] sm:$0xff] %v5485_v50  ;;  %v5495_v45 = vmul.f32 %v7090_v42, %v7061_v51  ;;  %v5500_v38 = vmul.f32 %v7092_v29, %v7061_v51  ;;  %v7095_v26 = vunpack.c.l.bf16 %v7094_v58  ;;  %v7097_v18 = vunpack.c.h.bf16 %v7094_v58  ;;  %v7100_v50 = vld [vmem:[#allocation15_spill] sm:$0xff] }
 0x365   : > { %7088 = vst [vmem:[#allocation140_spill] sm:$0xff] %v5490_v25  ;;  %v7099_v25 = vld [vmem:[#allocation66_spill] sm:$0xff]  ;;  %v7101_v33 = vunpack.c.l.bf16 %v7100_v50  ;;  %v7103_v36 = vunpack.c.h.bf16 %v7100_v50 }
 0x366   : > { %7091 = vst [vmem:[#allocation13_spill] sm:$0xff] %v5495_v45  ;;  %v5505_v6 = vmul.f32 %v7095_v26, %v7061_v51  ;;  %v5510_v43 = vmul.f32 %v7097_v18, %v7061_v51  ;;  %v7110_v18 = vld [vmem:[#allocation17_spill] sm:$0xff] }
 0x367   : > { %7093 = vst [vmem:[#allocation141_spill] sm:$0xff] %v5500_v38  ;;  %v5515_v42 = vmul.f32 %v7101_v33, %v7099_v25  ;;  %v5520_v29 = vmul.f32 %v7103_v36, %v7099_v25  ;;  %v7105_v38 = vld [vmem:[#allocation16_spill] sm:$0xff]  ;;  %v7113_v50 = vunpack.c.h.bf16 %v7110_v18 }
 0x368   : > { %7096 = vst [vmem:[#allocation14_spill] sm:$0xff] %v5505_v6  ;;  %v7106_v45 = vunpack.c.l.bf16 %v7105_v38  ;;  %v7108_v58 = vunpack.c.h.bf16 %v7105_v38  ;;  %v7115_v6 = vld [vmem:[#allocation18_spill] sm:$0xff] }
 0x369   : > { %7098 = vst [vmem:[#allocation142_spill] sm:$0xff] %v5510_v43  ;;  %v7111_v43 = vunpack.c.l.bf16 %v7110_v18  ;;  %v5540_v36 = vmul.f32 %v7113_v50, %v7099_v25  ;;  %v7118_v38 = vunpack.c.h.bf16 %v7115_v6 }
 0x36a   : > { %7102 = vst [vmem:[#allocation66_spill] sm:$0xff] %v5515_v42  ;;  %v5525_v26 = vmul.f32 %v7106_v45, %v7099_v25  ;;  %v5530_v51 = vmul.f32 %v7108_v58, %v7099_v25 }
 0x36b   : > { %7104 = vst [vmem:[#allocation15_spill] sm:$0xff] %v5520_v29  ;;  %v5535_v33 = vmul.f32 %v7111_v43, %v7099_v25  ;;  %v7116_v29 = vunpack.c.l.bf16 %v7115_v6  ;;  %v5550_v58 = vmul.f32 %v7118_v38, %v7099_v25 }
 0x36c   : > { %7107 = vst [vmem:[#allocation16_spill] sm:$0xff] %v5525_v26 }
 0x36d   : > { %7109 = vst [vmem:[#allocation143_spill] sm:$0xff] %v5530_v51  ;;  %v5545_v45 = vmul.f32 %v7116_v29, %v7099_v25  ;;  %v7120_v51 = vld [vmem:[#allocation19_spill] sm:$0xff] }
 0x36e   : > { %7112 = vst [vmem:[#allocation17_spill] sm:$0xff] %v5535_v33  ;;  %v7121_v26 = vunpack.c.l.bf16 %v7120_v51  ;;  %v7123_v18 = vunpack.c.h.bf16 %v7120_v51 }
 0x36f   : > { %7114 = vst [vmem:[#allocation144_spill] sm:$0xff] %v5540_v36  ;;  %v7125_v36 = vld [vmem:[#allocation20_spill] sm:$0xff] }
 0x370   : > { %7117 = vst [vmem:[#allocation18_spill] sm:$0xff] %v5545_v45  ;;  %v5555_v43 = vmul.f32 %v7121_v26, %v7099_v25  ;;  %v5560_v50 = vmul.f32 %v7123_v18, %v7099_v25  ;;  %v7126_v33 = vunpack.c.l.bf16 %v7125_v36  ;;  %v7128_v6 = vunpack.c.h.bf16 %v7125_v36 }
 0x371   : > { %7119 = vst [vmem:[#allocation145_spill] sm:$0xff] %v5550_v58  ;;  %v7130_v58 = vld [vmem:[#allocation21_spill] sm:$0xff] }
 0x372   : > { %7122 = vst [vmem:[#allocation19_spill] sm:$0xff] %v5555_v43  ;;  %v5565_v29 = vmul.f32 %v7126_v33, %v7099_v25  ;;  %v5570_v38 = vmul.f32 %v7128_v6, %v7099_v25  ;;  %v7131_v45 = vunpack.c.l.bf16 %v7130_v58  ;;  %v7133_v51 = vunpack.c.h.bf16 %v7130_v58 }
 0x373   : > { %7124 = vst [vmem:[#allocation146_spill] sm:$0xff] %v5560_v50  ;;  %v7135_v50 = vld [vmem:[#allocation22_spill] sm:$0xff] }
 0x374   : > { %7127 = vst [vmem:[#allocation20_spill] sm:$0xff] %v5565_v29  ;;  %v5575_v26 = vmul.f32 %v7131_v45, %v7099_v25  ;;  %v5580_v18 = vmul.f32 %v7133_v51, %v7099_v25  ;;  %v7136_v43 = vunpack.c.l.bf16 %v7135_v50  ;;  %v7138_v36 = vunpack.c.h.bf16 %v7135_v50  ;;  %v7141_v29 = vld [vmem:[#allocation23_spill] sm:$0xff] }
 0x375   : > { %7129 = vst [vmem:[#allocation147_spill] sm:$0xff] %v5570_v38  ;;  %v7140_v38 = vld [vmem:[#allocation67_spill] sm:$0xff]  ;;  %v7142_v42 = vunpack.c.l.bf16 %v7141_v29  ;;  %v7144_v58 = vunpack.c.h.bf16 %v7141_v29 }
 0x376   : > { %7132 = vst [vmem:[#allocation21_spill] sm:$0xff] %v5575_v26  ;;  %v5585_v33 = vmul.f32 %v7136_v43, %v7099_v25  ;;  %v5590_v6 = vmul.f32 %v7138_v36, %v7099_v25  ;;  %v7151_v36 = vld [vmem:[#allocation25_spill] sm:$0xff] }
 0x377   : > { %7134 = vst [vmem:[#allocation148_spill] sm:$0xff] %v5580_v18  ;;  %v5595_v45 = vmul.f32 %v7142_v42, %v7140_v38  ;;  %v5600_v51 = vmul.f32 %v7144_v58, %v7140_v38  ;;  %v7146_v18 = vld [vmem:[#allocation24_spill] sm:$0xff]  ;;  %v7154_v29 = vunpack.c.h.bf16 %v7151_v36 }
 0x378   : > { %7137 = vst [vmem:[#allocation22_spill] sm:$0xff] %v5585_v33  ;;  %v7147_v26 = vunpack.c.l.bf16 %v7146_v18  ;;  %v7149_v50 = vunpack.c.h.bf16 %v7146_v18  ;;  %v7156_v33 = vld [vmem:[#allocation26_spill] sm:$0xff] }
 0x379   : > { %7139 = vst [vmem:[#allocation149_spill] sm:$0xff] %v5590_v6  ;;  %v7152_v6 = vunpack.c.l.bf16 %v7151_v36  ;;  %v5620_v58 = vmul.f32 %v7154_v29, %v7140_v38  ;;  %v7159_v18 = vunpack.c.h.bf16 %v7156_v33 }
 0x37a   : > { %7143 = vst [vmem:[#allocation67_spill] sm:$0xff] %v5595_v45  ;;  %v5605_v43 = vmul.f32 %v7147_v26, %v7140_v38  ;;  %v5610_v25 = vmul.f32 %v7149_v50, %v7140_v38 }
 0x37b   : > { %7145 = vst [vmem:[#allocation23_spill] sm:$0xff] %v5600_v51  ;;  %v5615_v42 = vmul.f32 %v7152_v6, %v7140_v38  ;;  %v7157_v51 = vunpack.c.l.bf16 %v7156_v33  ;;  %v5630_v50 = vmul.f32 %v7159_v18, %v7140_v38 }
 0x37c   : > { %7148 = vst [vmem:[#allocation24_spill] sm:$0xff] %v5605_v43 }
 0x37d   : > { %7150 = vst [vmem:[#allocation150_spill] sm:$0xff] %v5610_v25  ;;  %v5625_v26 = vmul.f32 %v7157_v51, %v7140_v38  ;;  %v7161_v25 = vld [vmem:[#allocation27_spill] sm:$0xff] }
 0x37e   : > { %7153 = vst [vmem:[#allocation25_spill] sm:$0xff] %v5615_v42  ;;  %v7162_v43 = vunpack.c.l.bf16 %v7161_v25  ;;  %v7164_v36 = vunpack.c.h.bf16 %v7161_v25 }
 0x37f   : > { %7155 = vst [vmem:[#allocation151_spill] sm:$0xff] %v5620_v58  ;;  %v7166_v58 = vld [vmem:[#allocation28_spill] sm:$0xff] }
 0x380   : > { %7158 = vst [vmem:[#allocation26_spill] sm:$0xff] %v5625_v26  ;;  %v5635_v6 = vmul.f32 %v7162_v43, %v7140_v38  ;;  %v5640_v29 = vmul.f32 %v7164_v36, %v7140_v38  ;;  %v7167_v42 = vunpack.c.l.bf16 %v7166_v58  ;;  %v7169_v33 = vunpack.c.h.bf16 %v7166_v58 }
 0x381   : > { %7160 = vst [vmem:[#allocation152_spill] sm:$0xff] %v5630_v50  ;;  %v7171_v50 = vld [vmem:[#allocation29_spill] sm:$0xff] }
 0x382   : > { %7163 = vst [vmem:[#allocation27_spill] sm:$0xff] %v5635_v6  ;;  %v5645_v51 = vmul.f32 %v7167_v42, %v7140_v38  ;;  %v5650_v18 = vmul.f32 %v7169_v33, %v7140_v38  ;;  %v7172_v26 = vunpack.c.l.bf16 %v7171_v50  ;;  %v7174_v25 = vunpack.c.h.bf16 %v7171_v50 }
 0x383   : > { %7165 = vst [vmem:[#allocation153_spill] sm:$0xff] %v5640_v29  ;;  %v7176_v29 = vld [vmem:[#allocation30_spill] sm:$0xff] }
 0x384   : > { %7168 = vst [vmem:[#allocation28_spill] sm:$0xff] %v5645_v51  ;;  %v5655_v43 = vmul.f32 %v7172_v26, %v7140_v38  ;;  %v5660_v36 = vmul.f32 %v7174_v25, %v7140_v38  ;;  %v7177_v6 = vunpack.c.l.bf16 %v7176_v29  ;;  %v7179_v58 = vunpack.c.h.bf16 %v7176_v29  ;;  %v7182_v51 = vld [vmem:[#allocation31_spill] sm:$0xff] }
 0x385   : > { %7170 = vst [vmem:[#allocation154_spill] sm:$0xff] %v5650_v18  ;;  %v7181_v18 = vld [vmem:[#allocation70_spill] sm:$0xff]  ;;  %v7183_v45 = vunpack.c.l.bf16 %v7182_v51  ;;  %v7185_v50 = vunpack.c.h.bf16 %v7182_v51 }
 0x386   : > { %7173 = vst [vmem:[#allocation29_spill] sm:$0xff] %v5655_v43  ;;  %v5665_v42 = vmul.f32 %v7177_v6, %v7140_v38  ;;  %v5670_v33 = vmul.f32 %v7179_v58, %v7140_v38  ;;  %v7192_v58 = vld [vmem:[#allocation33_spill] sm:$0xff] }
 0x387   : > { %7175 = vst [vmem:[#allocation155_spill] sm:$0xff] %v5660_v36  ;;  %v5675_v26 = vmul.f32 %v7183_v45, %v7181_v18  ;;  %v5680_v25 = vmul.f32 %v7185_v50, %v7181_v18  ;;  %v7187_v36 = vld [vmem:[#allocation32_spill] sm:$0xff]  ;;  %v7195_v51 = vunpack.c.h.bf16 %v7192_v58 }
 0x388   : > { %7178 = vst [vmem:[#allocation30_spill] sm:$0xff] %v5665_v42  ;;  %v7188_v43 = vunpack.c.l.bf16 %v7187_v36  ;;  %v7190_v29 = vunpack.c.h.bf16 %v7187_v36  ;;  %v7197_v42 = vld [vmem:[#allocation34_spill] sm:$0xff] }
 0x389   : > { %7180 = vst [vmem:[#allocation156_spill] sm:$0xff] %v5670_v33  ;;  %v7193_v33 = vunpack.c.l.bf16 %v7192_v58  ;;  %v5700_v50 = vmul.f32 %v7195_v51, %v7181_v18  ;;  %v7200_v36 = vunpack.c.h.bf16 %v7197_v42 }
 0x38a   : > { %7184 = vst [vmem:[#allocation70_spill] sm:$0xff] %v5675_v26  ;;  %v5685_v6 = vmul.f32 %v7188_v43, %v7181_v18  ;;  %v5690_v38 = vmul.f32 %v7190_v29, %v7181_v18 }
 0x38b   : > { %7186 = vst [vmem:[#allocation31_spill] sm:$0xff] %v5680_v25  ;;  %v5695_v45 = vmul.f32 %v7193_v33, %v7181_v18  ;;  %v7198_v25 = vunpack.c.l.bf16 %v7197_v42  ;;  %v5710_v29 = vmul.f32 %v7200_v36, %v7181_v18 }
 0x38c   : > { %7189 = vst [vmem:[#allocation32_spill] sm:$0xff] %v5685_v6 }
 0x38d   : > { %7191 = vst [vmem:[#allocation157_spill] sm:$0xff] %v5690_v38  ;;  %v5705_v43 = vmul.f32 %v7198_v25, %v7181_v18  ;;  %v7202_v38 = vld [vmem:[#allocation35_spill] sm:$0xff] }
 0x38e   : > { %7194 = vst [vmem:[#allocation33_spill] sm:$0xff] %v5695_v45  ;;  %v7203_v6 = vunpack.c.l.bf16 %v7202_v38  ;;  %v7205_v58 = vunpack.c.h.bf16 %v7202_v38 }
 0x38f   : > { %7196 = vst [vmem:[#allocation158_spill] sm:$0xff] %v5700_v50  ;;  %v7207_v50 = vld [vmem:[#allocation36_spill] sm:$0xff] }
 0x390   : > { %7199 = vst [vmem:[#allocation34_spill] sm:$0xff] %v5705_v43  ;;  %v5715_v33 = vmul.f32 %v7203_v6, %v7181_v18  ;;  %v5720_v51 = vmul.f32 %v7205_v58, %v7181_v18  ;;  %v7208_v45 = vunpack.c.l.bf16 %v7207_v50  ;;  %v7210_v42 = vunpack.c.h.bf16 %v7207_v50 }
 0x391   : > { %7201 = vst [vmem:[#allocation159_spill] sm:$0xff] %v5710_v29  ;;  %v7212_v29 = vld [vmem:[#allocation37_spill] sm:$0xff] }
 0x392   : > { %7204 = vst [vmem:[#allocation35_spill] sm:$0xff] %v5715_v33  ;;  %v5725_v25 = vmul.f32 %v7208_v45, %v7181_v18  ;;  %v5730_v36 = vmul.f32 %v7210_v42, %v7181_v18  ;;  %v7213_v43 = vunpack.c.l.bf16 %v7212_v29  ;;  %v7215_v38 = vunpack.c.h.bf16 %v7212_v29 }
 0x393   : > { %7206 = vst [vmem:[#allocation160_spill] sm:$0xff] %v5720_v51  ;;  %v7217_v51 = vld [vmem:[#allocation38_spill] sm:$0xff] }
 0x394   : > { %7209 = vst [vmem:[#allocation36_spill] sm:$0xff] %v5725_v25  ;;  %v5735_v6 = vmul.f32 %v7213_v43, %v7181_v18  ;;  %v5740_v58 = vmul.f32 %v7215_v38, %v7181_v18  ;;  %v7218_v33 = vunpack.c.l.bf16 %v7217_v51  ;;  %v7220_v50 = vunpack.c.h.bf16 %v7217_v51  ;;  %v7223_v25 = vld [vmem:[#allocation39_spill] sm:$0xff] }
 0x395   : > { %7211 = vst [vmem:[#allocation161_spill] sm:$0xff] %v5730_v36  ;;  %v7222_v36 = vld [vmem:[#allocation83_spill] sm:$0xff]  ;;  %v7224_v26 = vunpack.c.l.bf16 %v7223_v25  ;;  %v7226_v29 = vunpack.c.h.bf16 %v7223_v25 }
 0x396   : > { %7214 = vst [vmem:[#allocation37_spill] sm:$0xff] %v5735_v6  ;;  %v5745_v45 = vmul.f32 %v7218_v33, %v7181_v18  ;;  %v5750_v42 = vmul.f32 %v7220_v50, %v7181_v18  ;;  %v7233_v50 = vld [vmem:[#allocation41_spill] sm:$0xff] }
 0x397   : > { %7216 = vst [vmem:[#allocation162_spill] sm:$0xff] %v5740_v58  ;;  %v5755_v43 = vmul.f32 %v7224_v26, %v7222_v36  ;;  %v5760_v38 = vmul.f32 %v7226_v29, %v7222_v36  ;;  %v7228_v58 = vld [vmem:[#allocation40_spill] sm:$0xff]  ;;  %v7236_v25 = vunpack.c.h.bf16 %v7233_v50 }
 0x398   : > { %7219 = vst [vmem:[#allocation38_spill] sm:$0xff] %v5745_v45  ;;  %v7229_v6 = vunpack.c.l.bf16 %v7228_v58  ;;  %v7231_v51 = vunpack.c.h.bf16 %v7228_v58  ;;  %v7238_v45 = vld [vmem:[#allocation42_spill] sm:$0xff] }
 0x399   : > { %7221 = vst [vmem:[#allocation163_spill] sm:$0xff] %v5750_v42  ;;  %v7234_v42 = vunpack.c.l.bf16 %v7233_v50  ;;  %v5780_v29 = vmul.f32 %v7236_v25, %v7222_v36  ;;  %v7241_v58 = vunpack.c.h.bf16 %v7238_v45 }
 0x39a   : > { %7225 = vst [vmem:[#allocation83_spill] sm:$0xff] %v5755_v43  ;;  %v5765_v33 = vmul.f32 %v7229_v6, %v7222_v36  ;;  %v5770_v18 = vmul.f32 %v7231_v51, %v7222_v36 }
 0x39b   : > { %7227 = vst [vmem:[#allocation39_spill] sm:$0xff] %v5760_v38  ;;  %v5775_v26 = vmul.f32 %v7234_v42, %v7222_v36  ;;  %v7239_v38 = vunpack.c.l.bf16 %v7238_v45  ;;  %v5790_v51 = vmul.f32 %v7241_v58, %v7222_v36 }
 0x39c   : > { %7230 = vst [vmem:[#allocation40_spill] sm:$0xff] %v5765_v33 }
 0x39d   : > { %7232 = vst [vmem:[#allocation164_spill] sm:$0xff] %v5770_v18  ;;  %v5785_v6 = vmul.f32 %v7239_v38, %v7222_v36  ;;  %v7243_v18 = vld [vmem:[#allocation43_spill] sm:$0xff] }
 0x39e   : > { %7235 = vst [vmem:[#allocation41_spill] sm:$0xff] %v5775_v26  ;;  %v7244_v33 = vunpack.c.l.bf16 %v7243_v18  ;;  %v7246_v50 = vunpack.c.h.bf16 %v7243_v18 }
 0x39f   : > { %7237 = vst [vmem:[#allocation165_spill] sm:$0xff] %v5780_v29  ;;  %v7248_v29 = vld [vmem:[#allocation44_spill] sm:$0xff] }
 0x3a0   : > { %7240 = vst [vmem:[#allocation42_spill] sm:$0xff] %v5785_v6  ;;  %v5795_v42 = vmul.f32 %v7244_v33, %v7222_v36  ;;  %v5800_v25 = vmul.f32 %v7246_v50, %v7222_v36  ;;  %v7249_v26 = vunpack.c.l.bf16 %v7248_v29  ;;  %v7251_v45 = vunpack.c.h.bf16 %v7248_v29 }
 0x3a1   : > { %7242 = vst [vmem:[#allocation166_spill] sm:$0xff] %v5790_v51  ;;  %v7253_v51 = vld [vmem:[#allocation45_spill] sm:$0xff] }
 0x3a2   : > { %7245 = vst [vmem:[#allocation43_spill] sm:$0xff] %v5795_v42  ;;  %v5805_v38 = vmul.f32 %v7249_v26, %v7222_v36  ;;  %v5810_v58 = vmul.f32 %v7251_v45, %v7222_v36  ;;  %v7254_v6 = vunpack.c.l.bf16 %v7253_v51  ;;  %v7256_v18 = vunpack.c.h.bf16 %v7253_v51 }
 0x3a3   : > { %7247 = vst [vmem:[#allocation167_spill] sm:$0xff] %v5800_v25  ;;  %v7258_v25 = vld [vmem:[#allocation46_spill] sm:$0xff] }
 0x3a4   : > { %7250 = vst [vmem:[#allocation44_spill] sm:$0xff] %v5805_v38  ;;  %v5815_v33 = vmul.f32 %v7254_v6, %v7222_v36  ;;  %v5820_v50 = vmul.f32 %v7256_v18, %v7222_v36  ;;  %v7259_v42 = vunpack.c.l.bf16 %v7258_v25  ;;  %v7261_v29 = vunpack.c.h.bf16 %v7258_v25  ;;  %v7264_v38 = vld [vmem:[#allocation47_spill] sm:$0xff] }
 0x3a5   : > { %7252 = vst [vmem:[#allocation168_spill] sm:$0xff] %v5810_v58  ;;  %v7263_v58 = vld [vmem:[#allocation84_spill] sm:$0xff]  ;;  %v7265_v43 = vunpack.c.l.bf16 %v7264_v38  ;;  %v7267_v51 = vunpack.c.h.bf16 %v7264_v38 }
 0x3a6   : > { %7255 = vst [vmem:[#allocation45_spill] sm:$0xff] %v5815_v33  ;;  %v5825_v26 = vmul.f32 %v7259_v42, %v7222_v36  ;;  %v5830_v45 = vmul.f32 %v7261_v29, %v7222_v36  ;;  %v7274_v29 = vld [vmem:[#allocation49_spill] sm:$0xff] }
 0x3a7   : > { %7257 = vst [vmem:[#allocation169_spill] sm:$0xff] %v5820_v50  ;;  %v5835_v6 = vmul.f32 %v7265_v43, %v7263_v58  ;;  %v5840_v18 = vmul.f32 %v7267_v51, %v7263_v58  ;;  %v7269_v50 = vld [vmem:[#allocation48_spill] sm:$0xff]  ;;  %v7277_v38 = vunpack.c.h.bf16 %v7274_v29 }
 0x3a8   : > { %7260 = vst [vmem:[#allocation46_spill] sm:$0xff] %v5825_v26  ;;  %v7270_v33 = vunpack.c.l.bf16 %v7269_v50  ;;  %v7272_v25 = vunpack.c.h.bf16 %v7269_v50  ;;  %v7279_v26 = vld [vmem:[#allocation50_spill] sm:$0xff] }
 0x3a9   : > { %7262 = vst [vmem:[#allocation170_spill] sm:$0xff] %v5830_v45  ;;  %v7275_v45 = vunpack.c.l.bf16 %v7274_v29  ;;  %v5860_v51 = vmul.f32 %v7277_v38, %v7263_v58  ;;  %v7282_v50 = vunpack.c.h.bf16 %v7279_v26 }
 0x3aa   : > { %7266 = vst [vmem:[#allocation84_spill] sm:$0xff] %v5835_v6  ;;  %v5845_v42 = vmul.f32 %v7270_v33, %v7263_v58  ;;  %v5850_v36 = vmul.f32 %v7272_v25, %v7263_v58 }
 0x3ab   : > { %7268 = vst [vmem:[#allocation47_spill] sm:$0xff] %v5840_v18  ;;  %v5855_v43 = vmul.f32 %v7275_v45, %v7263_v58  ;;  %v7280_v18 = vunpack.c.l.bf16 %v7279_v26  ;;  %v5870_v25 = vmul.f32 %v7282_v50, %v7263_v58 }
 0x3ac   : > { %7271 = vst [vmem:[#allocation48_spill] sm:$0xff] %v5845_v42 }
 0x3ad   : > { %7273 = vst [vmem:[#allocation171_spill] sm:$0xff] %v5850_v36  ;;  %v5865_v33 = vmul.f32 %v7280_v18, %v7263_v58  ;;  %v7284_v36 = vld [vmem:[#allocation51_spill] sm:$0xff] }
 0x3ae   : > { %7276 = vst [vmem:[#allocation49_spill] sm:$0xff] %v5855_v43  ;;  %v7285_v42 = vunpack.c.l.bf16 %v7284_v36  ;;  %v7287_v29 = vunpack.c.h.bf16 %v7284_v36 }
 0x3af   : > { %7278 = vst [vmem:[#allocation172_spill] sm:$0xff] %v5860_v51  ;;  %v7289_v51 = vld [vmem:[#allocation53_spill] sm:$0xff] }
 0x3b0   : > { %7281 = vst [vmem:[#allocation50_spill] sm:$0xff] %v5865_v33  ;;  %v5875_v45 = vmul.f32 %v7285_v42, %v7263_v58  ;;  %v5880_v38 = vmul.f32 %v7287_v29, %v7263_v58  ;;  %v7290_v43 = vunpack.c.l.bf16 %v7289_v51  ;;  %v7292_v26 = vunpack.c.h.bf16 %v7289_v51 }
 0x3b1   : > { %7283 = vst [vmem:[#allocation173_spill] sm:$0xff] %v5870_v25  ;;  %v7294_v25 = vld [vmem:[#allocation54_spill] sm:$0xff] }
 0x3b2   : > { %7286 = vst [vmem:[#allocation51_spill] sm:$0xff] %v5875_v45  ;;  %v5885_v18 = vmul.f32 %v7290_v43, %v7263_v58  ;;  %v5890_v50 = vmul.f32 %v7292_v26, %v7263_v58  ;;  %v7295_v33 = vunpack.c.l.bf16 %v7294_v25  ;;  %v7297_v36 = vunpack.c.h.bf16 %v7294_v25 }
 0x3b3   : > { %7288 = vst [vmem:[#allocation174_spill] sm:$0xff] %v5880_v38  ;;  %v7299_v38 = vld [vmem:[#allocation55_spill] sm:$0xff] }
 0x3b4   : > { %7291 = vst [vmem:[#allocation53_spill] sm:$0xff] %v5885_v18  ;;  %v5895_v42 = vmul.f32 %v7295_v33, %v7263_v58  ;;  %v5900_v29 = vmul.f32 %v7297_v36, %v7263_v58  ;;  %v7300_v45 = vunpack.c.l.bf16 %v7299_v38  ;;  %v7302_v51 = vunpack.c.h.bf16 %v7299_v38  ;;  %v7305_v18 = vld [vmem:[#allocation56_spill] sm:$0xff] }
 0x3b5   : > { %7293 = vst [vmem:[#allocation175_spill] sm:$0xff] %v5890_v50  ;;  %v7304_v50 = vld [vmem:[#allocation87_spill] sm:$0xff]  ;;  %v7306_v6 = vunpack.c.l.bf16 %v7305_v18  ;;  %v7307_v25 = vunpack.c.h.bf16 %v7305_v18 }
 0x3b6   : > { %7296 = vst [vmem:[#allocation54_spill] sm:$0xff] %v5895_v42  ;;  %v5905_v43 = vmul.f32 %v7300_v45, %v7263_v58  ;;  %v5910_v26 = vmul.f32 %v7302_v51, %v7263_v58  ;;  %v7314_v51 = vld [vmem:[#allocation58_spill] sm:$0xff] }
 0x3b7   : > { %7298 = vst [vmem:[#allocation176_spill] sm:$0xff] %v5900_v29  ;;  %v5915_v33 = vmul.f32 %v7306_v6, %v7304_v50  ;;  %v5920_v36 = vmul.f32 %v7307_v25, %v7304_v50  ;;  %v7309_v29 = vld [vmem:[#allocation57_spill] sm:$0xff]  ;;  %v7317_v18 = vunpack.c.h.bf16 %v7314_v51 }
 0x3b8   : > { %7301 = vst [vmem:[#allocation55_spill] sm:$0xff] %v5905_v43  ;;  %v7310_v42 = vunpack.c.l.bf16 %v7309_v29  ;;  %v7312_v38 = vunpack.c.h.bf16 %v7309_v29  ;;  %v7319_v43 = vld [vmem:[#allocation59_spill] sm:$0xff] }
 0x3b9   : > { %7303 = vst [vmem:[#allocation177_spill] sm:$0xff] %v5910_v26  ;;  %v7315_v26 = vunpack.c.l.bf16 %v7314_v51  ;;  %v5940_v25 = vmul.f32 %v7317_v18, %v7304_v50  ;;  %v7322_v29 = vunpack.c.h.bf16 %v7319_v43 }
 0x3ba   : > { %7308 = vst [vmem:[#allocation87_spill] sm:$0xff] %v5920_v36  ;;  %v5925_v45 = vmul.f32 %v7310_v42, %v7304_v50  ;;  %v5930_v58 = vmul.f32 %v7312_v38, %v7304_v50  ;;  %v7320_v36 = vunpack.c.l.bf16 %v7319_v43 }
 0x3bb   : > { %v5935_v6 = vmul.f32 %v7315_v26, %v7304_v50  ;;  %7318 = vst [vmem:[#allocation178_spill] sm:$0xff] %v5940_v25  ;;  %v5950_v38 = vmul.f32 %v7322_v29, %v7304_v50  ;;  %v7329_v25 = vld [vmem:[#allocation61_spill] sm:$0xff] }
 0x3bc   : > { %7311 = vst [vmem:[#allocation56_spill] sm:$0xff] %v5925_v45  ;;  %v5945_v42 = vmul.f32 %v7320_v36, %v7304_v50  ;;  %v7332_v43 = vunpack.c.h.bf16 %v7329_v25 }
 0x3bd   : > { %7313 = vst [vmem:[#allocation57_spill] sm:$0xff] %v5930_v58  ;;  %v7324_v58 = vld [vmem:[#allocation60_spill] sm:$0xff] }
 0x3be   : > { %7316 = vst [vmem:[#allocation58_spill] sm:$0xff] %v5935_v6  ;;  %v7325_v45 = vunpack.c.l.bf16 %v7324_v58  ;;  %v7327_v51 = vunpack.c.h.bf16 %v7324_v58  ;;  %v7330_v6 = vunpack.c.l.bf16 %v7329_v25  ;;  %v5970_v29 = vmul.f32 %v7332_v43, %v7304_v50 }
 0x3bf   : > { %7321 = vst [vmem:[#allocation59_spill] sm:$0xff] %v5945_v42 }
 0x3c0   : > { %7323 = vst [vmem:[#allocation179_spill] sm:$0xff] %v5950_v38  ;;  %v5955_v26 = vmul.f32 %v7325_v45, %v7304_v50  ;;  %v5960_v18 = vmul.f32 %v7327_v51, %v7304_v50  ;;  %v5965_v36 = vmul.f32 %v7330_v6, %v7304_v50  ;;  %v7334_v38 = vld [vmem:[#allocation62_spill] sm:$0xff] }
 0x3c1   : > { %7333 = vst [vmem:[#allocation181_spill] sm:$0xff] %v5970_v29  ;;  %v7335_v42 = vunpack.c.l.bf16 %v7334_v38  ;;  %v7337_v58 = vunpack.c.h.bf16 %v7334_v38  ;;  %v7344_v29 = vld [vmem:[#allocation64_spill] sm:$0xff] }
 0x3c2   : > { %7326 = vst [vmem:[#allocation60_spill] sm:$0xff] %v5955_v26  ;;  %v7346_v38 = vunpack.c.h.bf16 %v7344_v29 }
 0x3c3   : > { %7328 = vst [vmem:[#allocation180_spill] sm:$0xff] %v5960_v18  ;;  %v5975_v45 = vmul.f32 %v7335_v42, %v7304_v50  ;;  %v5980_v51 = vmul.f32 %v7337_v58, %v7304_v50  ;;  %v7339_v18 = vld [vmem:[#allocation63_spill] sm:$0xff] }
 0x3c4   : > { %7331 = vst [vmem:[#allocation61_spill] sm:$0xff] %v5965_v36  ;;  %v7340_v26 = vunpack.c.l.bf16 %v7339_v18  ;;  %v7342_v25 = vunpack.c.h.bf16 %v7339_v18  ;;  %v7345_v36 = vunpack.c.l.bf16 %v7344_v29  ;;  %v6000_v58 = vmul.f32 %v7346_v38, %v5007_v14 }
 0x3c5   : > { %7336 = vst [vmem:[#allocation62_spill] sm:$0xff] %v5975_v45 }
 0x3c6   : > { %7338 = vst [vmem:[#allocation182_spill] sm:$0xff] %v5980_v51  ;;  %v5985_v6 = vmul.f32 %v7340_v26, %v7304_v50  ;;  %v5990_v43 = vmul.f32 %v7342_v25, %v7304_v50  ;;  %v5995_v42 = vmul.f32 %v7345_v36, %v5007_v14  ;;  %v7348_v51 = vld [vmem:[#allocation65_spill] sm:$0xff]  ;;  %v7353_v25 = vld [vmem:[#allocation68_spill] sm:$0xff] }
 0x3c7   : > { %7347 = vst [vmem:[#allocation64_spill] sm:$0xff] %v6000_v58  ;;  %v7349_v45 = vunpack.c.l.bf16 %v7348_v51  ;;  %v7351_v18 = vunpack.c.h.bf16 %v7348_v51  ;;  %v7356_v29 = vunpack.c.h.bf16 %v7353_v25 }
 0x3c8   : > { %7341 = vst [vmem:[#allocation63_spill] sm:$0xff] %v5985_v6  ;;  %v7358_v6 = vld [vmem:[#allocation69_spill] sm:$0xff] }
 0x3c9   : > { %7343 = vst [vmem:[#allocation183_spill] sm:$0xff] %v5990_v43  ;;  %v6005_v26 = vmul.f32 %v7349_v45, %v5007_v14  ;;  %v6010_v50 = vmul.f32 %v7351_v18, %v5007_v14  ;;  %v7354_v43 = vunpack.c.l.bf16 %v7353_v25  ;;  %v6020_v38 = vmul.f32 %v7356_v29, %v5007_v14 }
 0x3ca   : > { %v7359_v58 = vunpack.c.l.bf16 %v7358_v6  ;;  %v7361_v51 = vunpack.c.h.bf16 %v7358_v6 }
 0x3cb   : > { %7350 = vst [vmem:[#allocation65_spill] sm:$0xff] %v6005_v26  ;;  %v6015_v36 = vmul.f32 %v7354_v43, %v5007_v14 }
 0x3cc   : > { %7352 = vst [vmem:[#allocation184_spill] sm:$0xff] %v6010_v50  ;;  %v6025_v45 = vmul.f32 %v7359_v58, %v5007_v14  ;;  %v6030_v18 = vmul.f32 %v7361_v51, %v5007_v14  ;;  %v7363_v50 = vld [vmem:[#allocation71_spill] sm:$0xff] }
 0x3cd   : > { %7355 = vst [vmem:[#allocation68_spill] sm:$0xff] %v6015_v36  ;;  %v7364_v26 = vunpack.c.l.bf16 %v7363_v50  ;;  %v7366_v25 = vunpack.c.h.bf16 %v7363_v50 }
 0x3ce   : > { %7357 = vst [vmem:[#allocation185_spill] sm:$0xff] %v6020_v38  ;;  %v7368_v38 = vld [vmem:[#allocation72_spill] sm:$0xff] }
 0x3cf   : > { %7360 = vst [vmem:[#allocation69_spill] sm:$0xff] %v6025_v45  ;;  %v6035_v43 = vmul.f32 %v7364_v26, %v5007_v14  ;;  %v6040_v29 = vmul.f32 %v7366_v25, %v5007_v14  ;;  %v7369_v36 = vunpack.c.l.bf16 %v7368_v38  ;;  %v7371_v6 = vunpack.c.h.bf16 %v7368_v38 }
 0x3d0   : > { %7362 = vst [vmem:[#allocation186_spill] sm:$0xff] %v6030_v18  ;;  %v7373_v18 = vld [vmem:[#allocation73_spill] sm:$0xff] }
 0x3d1   : > { %7365 = vst [vmem:[#allocation71_spill] sm:$0xff] %v6035_v43  ;;  %v6045_v58 = vmul.f32 %v7369_v36, %v5007_v14  ;;  %v6050_v51 = vmul.f32 %v7371_v6, %v5007_v14  ;;  %v7374_v45 = vunpack.c.l.bf16 %v7373_v18  ;;  %v7376_v50 = vunpack.c.h.bf16 %v7373_v18 }
 0x3d2   : > { %7367 = vst [vmem:[#allocation187_spill] sm:$0xff] %v6040_v29  ;;  %v7378_v29 = vld [vmem:[#allocation74_spill] sm:$0xff] }
 0x3d3   : > { %7370 = vst [vmem:[#allocation72_spill] sm:$0xff] %v6045_v58  ;;  %v6055_v26 = vmul.f32 %v7374_v45, %v5007_v14  ;;  %v6060_v25 = vmul.f32 %v7376_v50, %v5007_v14  ;;  %v7379_v43 = vunpack.c.l.bf16 %v7378_v29  ;;  %v7381_v38 = vunpack.c.h.bf16 %v7378_v29 }
 0x3d4   : > { %7372 = vst [vmem:[#allocation188_spill] sm:$0xff] %v6050_v51  ;;  %v7383_v51 = vld [vmem:[#allocation75_spill] sm:$0xff] }
 0x3d5   : > { %7375 = vst [vmem:[#allocation73_spill] sm:$0xff] %v6055_v26  ;;  %v6065_v36 = vmul.f32 %v7379_v43, %v5007_v14  ;;  %v6070_v6 = vmul.f32 %v7381_v38, %v5007_v14  ;;  %v7384_v58 = vunpack.c.l.bf16 %v7383_v51  ;;  %v7385_v18 = vunpack.c.h.bf16 %v7383_v51  ;;  %v7392_v38 = vld [vmem:[#allocation77_spill] sm:$0xff] }
 0x3d6   : > { %7377 = vst [vmem:[#allocation189_spill] sm:$0xff] %v6060_v25  ;;  %v7387_v25 = vld [vmem:[#allocation76_spill] sm:$0xff]  ;;  %v7395_v51 = vunpack.c.h.bf16 %v7392_v38 }
 0x3d7   : > { %7380 = vst [vmem:[#allocation74_spill] sm:$0xff] %v6065_v36  ;;  %v6075_v45 = vmul.f32 %v7384_v58, %v5009_v13  ;;  %v6080_v50 = vmul.f32 %v7385_v18, %v5009_v13  ;;  %v7388_v26 = vunpack.c.l.bf16 %v7387_v25  ;;  %v7390_v29 = vunpack.c.h.bf16 %v7387_v25  ;;  %v7397_v36 = vld [vmem:[#allocation78_spill] sm:$0xff] }
 0x3d8   : > { %7382 = vst [vmem:[#allocation190_spill] sm:$0xff] %v6070_v6  ;;  %v7393_v6 = vunpack.c.l.bf16 %v7392_v38  ;;  %v6100_v18 = vmul.f32 %v7395_v51, %v5009_v13  ;;  %v7400_v25 = vunpack.c.h.bf16 %v7397_v36 }
 0x3d9   : > { %7386 = vst [vmem:[#allocation75_spill] sm:$0xff] %v6080_v50  ;;  %v6085_v43 = vmul.f32 %v7388_v26, %v5009_v13  ;;  %v6090_v14 = vmul.f32 %v7390_v29, %v5009_v13  ;;  %v7398_v50 = vunpack.c.l.bf16 %v7397_v36 }
 0x3da   : > { %v6095_v58 = vmul.f32 %v7393_v6, %v5009_v13  ;;  %7396 = vst [vmem:[#allocation192_spill] sm:$0xff] %v6100_v18  ;;  %v6110_v29 = vmul.f32 %v7400_v25, %v5009_v13  ;;  %v7407_v18 = vld [vmem:[#allocation80_spill] sm:$0xff] }
 0x3db   : > { %7389 = vst [vmem:[#allocation76_spill] sm:$0xff] %v6085_v43  ;;  %v6105_v26 = vmul.f32 %v7398_v50, %v5009_v13  ;;  %v7410_v36 = vunpack.c.h.bf16 %v7407_v18 }
 0x3dc   : > { %7391 = vst [vmem:[#allocation191_spill] sm:$0xff] %v6090_v14  ;;  %v7402_v14 = vld [vmem:[#allocation79_spill] sm:$0xff] }
 0x3dd   : > { %7394 = vst [vmem:[#allocation77_spill] sm:$0xff] %v6095_v58  ;;  %v7403_v43 = vunpack.c.l.bf16 %v7402_v14  ;;  %v7405_v38 = vunpack.c.h.bf16 %v7402_v14  ;;  %v7408_v58 = vunpack.c.l.bf16 %v7407_v18  ;;  %v6130_v25 = vmul.f32 %v7410_v36, %v5009_v13 }
 0x3de   : > { %7399 = vst [vmem:[#allocation78_spill] sm:$0xff] %v6105_v26 }
 0x3df   : > { %7401 = vst [vmem:[#allocation193_spill] sm:$0xff] %v6110_v29  ;;  %v6115_v6 = vmul.f32 %v7403_v43, %v5009_v13  ;;  %v6120_v51 = vmul.f32 %v7405_v38, %v5009_v13  ;;  %v6125_v50 = vmul.f32 %v7408_v58, %v5009_v13  ;;  %v7412_v29 = vld [vmem:[#allocation81_spill] sm:$0xff] }
 0x3e0   : > { %7411 = vst [vmem:[#allocation195_spill] sm:$0xff] %v6130_v25  ;;  %v7413_v26 = vunpack.c.l.bf16 %v7412_v29  ;;  %v7415_v14 = vunpack.c.h.bf16 %v7412_v29  ;;  %v7422_v25 = vld [vmem:[#allocation85_spill] sm:$0xff] }
 0x3e1   : > { %7404 = vst [vmem:[#allocation79_spill] sm:$0xff] %v6115_v6  ;;  %v7424_v29 = vunpack.c.h.bf16 %v7422_v25 }
 0x3e2   : > { %7406 = vst [vmem:[#allocation194_spill] sm:$0xff] %v6120_v51  ;;  %v6135_v43 = vmul.f32 %v7413_v26, %v5009_v13  ;;  %v6140_v38 = vmul.f32 %v7415_v14, %v5009_v13  ;;  %v7417_v51 = vld [vmem:[#allocation82_spill] sm:$0xff] }
 0x3e3   : > { %7409 = vst [vmem:[#allocation80_spill] sm:$0xff] %v6125_v50  ;;  %v7418_v6 = vunpack.c.l.bf16 %v7417_v51  ;;  %v7420_v18 = vunpack.c.h.bf16 %v7417_v51  ;;  %v7423_v50 = vunpack.c.l.bf16 %v7422_v25  ;;  %v6160_v14 = vmul.f32 %v7424_v29, %v5018_v61 }
 0x3e4   : > { %7414 = vst [vmem:[#allocation81_spill] sm:$0xff] %v6135_v43 }
 0x3e5   : > { %7416 = vst [vmem:[#allocation196_spill] sm:$0xff] %v6140_v38  ;;  %v6145_v58 = vmul.f32 %v7418_v6, %v5009_v13  ;;  %v6150_v36 = vmul.f32 %v7420_v18, %v5009_v13  ;;  %v6155_v26 = vmul.f32 %v7423_v50, %v5018_v61  ;;  %v7426_v38 = vld [vmem:[#allocation86_spill] sm:$0xff]  ;;  %v7431_v18 = vld [vmem:[#allocation88_spill] sm:$0xff] }
 0x3e6   : > { %7425 = vst [vmem:[#allocation85_spill] sm:$0xff] %v6160_v14  ;;  %v7427_v43 = vunpack.c.l.bf16 %v7426_v38  ;;  %v7429_v51 = vunpack.c.h.bf16 %v7426_v38  ;;  %v7434_v25 = vunpack.c.h.bf16 %v7431_v18 }
 0x3e7   : > { %7419 = vst [vmem:[#allocation82_spill] sm:$0xff] %v6145_v58  ;;  %v7436_v58 = vld [vmem:[#allocation89_spill] sm:$0xff] }
 0x3e8   : > { %7421 = vst [vmem:[#allocation197_spill] sm:$0xff] %v6150_v36  ;;  %v6165_v6 = vmul.f32 %v7427_v43, %v5018_v61  ;;  %v6170_v13 = vmul.f32 %v7429_v51, %v5018_v61  ;;  %v7432_v36 = vunpack.c.l.bf16 %v7431_v18  ;;  %v6180_v29 = vmul.f32 %v7434_v25, %v5018_v61 }
 0x3e9   : > { %v7437_v14 = vunpack.c.l.bf16 %v7436_v58  ;;  %v7439_v38 = vunpack.c.h.bf16 %v7436_v58 }
 0x3ea   : > { %7428 = vst [vmem:[#allocation86_spill] sm:$0xff] %v6165_v6  ;;  %v6175_v50 = vmul.f32 %v7432_v36, %v5018_v61 }
 0x3eb   : > { %7430 = vst [vmem:[#allocation198_spill] sm:$0xff] %v6170_v13  ;;  %v6185_v43 = vmul.f32 %v7437_v14, %v5018_v61  ;;  %v6190_v51 = vmul.f32 %v7439_v38, %v5018_v61  ;;  %v7441_v13 = vld [vmem:[#allocation90_spill] sm:$0xff] }
 0x3ec   : > { %7433 = vst [vmem:[#allocation88_spill] sm:$0xff] %v6175_v50  ;;  %v7442_v6 = vunpack.c.l.bf16 %v7441_v13  ;;  %v7444_v18 = vunpack.c.h.bf16 %v7441_v13 }
 0x3ed   : > { %7435 = vst [vmem:[#allocation199_spill] sm:$0xff] %v6180_v29  ;;  %v7446_v29 = vld [vmem:[#allocation91_spill] sm:$0xff] }
 0x3ee   : > { %7438 = vst [vmem:[#allocation89_spill] sm:$0xff] %v6185_v43  ;;  %v6195_v36 = vmul.f32 %v7442_v6, %v5018_v61  ;;  %v6200_v25 = vmul.f32 %v7444_v18, %v5018_v61  ;;  %v7447_v50 = vunpack.c.l.bf16 %v7446_v29  ;;  %v7449_v58 = vunpack.c.h.bf16 %v7446_v29 }
 0x3ef   : > { %7440 = vst [vmem:[#allocation200_spill] sm:$0xff] %v6190_v51  ;;  %v7451_v51 = vld [vmem:[#allocation92_spill] sm:$0xff] }
 0x3f0   : > { %7443 = vst [vmem:[#allocation90_spill] sm:$0xff] %v6195_v36  ;;  %v6205_v14 = vmul.f32 %v7447_v50, %v5018_v61  ;;  %v6210_v38 = vmul.f32 %v7449_v58, %v5018_v61  ;;  %v7452_v43 = vunpack.c.l.bf16 %v7451_v51  ;;  %v7454_v13 = vunpack.c.h.bf16 %v7451_v51 }
 0x3f1   : > { %7445 = vst [vmem:[#allocation201_spill] sm:$0xff] %v6200_v25  ;;  %v7456_v25 = vld [vmem:[#allocation93_spill] sm:$0xff] }
 0x3f2   : > { %7448 = vst [vmem:[#allocation91_spill] sm:$0xff] %v6205_v14  ;;  %v6215_v6 = vmul.f32 %v7452_v43, %v5018_v61  ;;  %v6220_v18 = vmul.f32 %v7454_v13, %v5018_v61  ;;  %v7457_v36 = vunpack.c.l.bf16 %v7456_v25  ;;  %v7459_v29 = vunpack.c.h.bf16 %v7456_v25 }
 0x3f3   : > { %7450 = vst [vmem:[#allocation202_spill] sm:$0xff] %v6210_v38  ;;  %v7461_v38 = vld [vmem:[#allocation94_spill] sm:$0xff] }
 0x3f4   : > { %7453 = vst [vmem:[#allocation92_spill] sm:$0xff] %v6215_v6  ;;  %v6225_v50 = vmul.f32 %v7457_v36, %v5018_v61  ;;  %v6230_v58 = vmul.f32 %v7459_v29, %v5018_v61  ;;  %v7462_v14 = vunpack.c.l.bf16 %v7461_v38  ;;  %v7463_v51 = vunpack.c.h.bf16 %v7461_v38 }
 0x3f5   : > { %7455 = vst [vmem:[#allocation203_spill] sm:$0xff] %v6220_v18  ;;  %v7464_v18 = vld [vmem:[#allocation95_spill] sm:$0xff]  ;;  %v7467_v29 = vunpack.c.l.bf16 %v4973_v31  ;;  %v7468_v38 = vunpack.c.h.bf16 %v4973_v31  ;;  %v7474_v31 = vunpack.c.h.bf16 %v4987_v46 }
 0x3f6   : > { %7458 = vst [vmem:[#allocation93_spill] sm:$0xff] %v6225_v50  ;;  %v6235_v43 = vmul.f32 %v7462_v14, %v5115_v41  ;;  %v6240_v13 = vmul.f32 %v7463_v51, %v5115_v41  ;;  %v7465_v6 = vunpack.c.l.bf16 %v7464_v18  ;;  %v7466_v25 = vunpack.c.h.bf16 %v7464_v18 }
 0x3f7   : > { %7460 = vst [vmem:[#allocation204_spill] sm:$0xff] %v6230_v58  ;;  %v6255_v14 = vmul.f32 %v7467_v29, %v5115_v41  ;;  %v6260_v51 = vmul.f32 %v7468_v38, %v5115_v41  ;;  %v7470_v58 = vunpack.c.l.bf16 %v4982_v30  ;;  %v7471_v18 = vunpack.c.h.bf16 %v4982_v30 }
 0x3f8   : > { %v6245_v36 = vmul.f32 %v7465_v6, %v5115_v41  ;;  %v6250_v61 = vmul.f32 %v7466_v25, %v5115_v41  ;;  %v7473_v50 = vunpack.c.l.bf16 %v4987_v46  ;;  %v6280_v38 = vmul.f32 %v7474_v31, %v5115_v41 }
 0x3f9   : > { %7469 = vst [vmem:[#allocation94_spill] sm:$0xff] %v6260_v51  ;;  %v6265_v6 = vmul.f32 %v7470_v58, %v5115_v41  ;;  %v6270_v25 = vmul.f32 %v7471_v18, %v5115_v41  ;;  %v7476_v51 = vunpack.c.l.bf16 %v4996_v60  ;;  %v7477_v30 = vunpack.c.h.bf16 %v4996_v60 }
 0x3fa   : > { %v6275_v29 = vmul.f32 %v7473_v50, %v5115_v41  ;;  %7475 = vst [vmem:[#allocation205_spill] sm:$0xff] %v6280_v38  ;;  %v7480_v46 = vunpack.c.h.bf16 %v5001_v48  ;;  %v7482_v38 = vunpack.c.l.bf16 %v5014_v55  ;;  %v7484_v60 = vunpack.c.h.bf16 %v5014_v55 }
 0x3fb   : > { %7472 = vst [vmem:[#allocation95_spill] sm:$0xff] %v6270_v25  ;;  %v6285_v58 = vmul.f32 %v7476_v51, %v5115_v41  ;;  %v6290_v18 = vmul.f32 %v7477_v30, %v5115_v41  ;;  %v7479_v25 = vunpack.c.l.bf16 %v5001_v48  ;;  %v2228_v48 = vadd.f32 %v5125_v53, %v5043_v49 }
 0x3fc   : > { %v6300_v31 = vmul.f32 %v7480_v46, %v5115_v41  ;;  %v6305_v51 = vmul.f32 %v7482_v38, %v5115_v41  ;;  %v6310_v30 = vmul.f32 %v7484_v60, %v5115_v41  ;;  %v7485_v46 = vld [vmem:[#allocation96_spill] sm:$0xff]  ;;  %v2270_v38 = vadd.f32 %v5135_v39, %v5053_v54  ;;  %v7487_v60 = vld [vmem:[#allocation98_spill] sm:$0xff] }
 0x3fd   : > { %7478 = vst [vmem:[#allocation206_spill] sm:$0xff] %v6290_v18  ;;  %v6295_v50 = vmul.f32 %v7479_v25, %v5115_v41  ;;  %v2186_v18 = vadd.f32 %v5113_v4, %v5033_v32  ;;  %v2207_v25 = vadd.f32 %v5120_v44, %v5038_v8  ;;  %v2312_v41 = vadd.f32 %v5145_v37, %v5063_v52 }
 0x3fe   : > { %7481 = vst [vmem:[#allocation207_spill] sm:$0xff] %v6300_v31  ;;  %v2249_v31 = vadd.f32 %v5130_v56, %v7485_v46  ;;  %v2333_v32 = vadd.f32 %v5150_v2, %v7487_v60  ;;  %v2229_v49 = vadd.f32 %v2228_v48, %v5205_v20  ;;  %v2271_v44 = vadd.f32 %v2270_v38, %v5215_v21  ;;  %v7494_v48 = vld [vmem:[#allocation15_spill] sm:$0xff]  ;;  %v7495_v46 = vld [vmem:[#allocation16_spill] sm:$0xff] }
 0x3ff   : > { %7483 = vst [vmem:[#allocation208_spill] sm:$0xff] %v6305_v51  ;;  %v7486_v51 = vld [vmem:[#allocation97_spill] sm:$0xff]  ;;  %v2187_v8 = vadd.f32 %v2186_v18, %v5195_v40  ;;  %v2208_v4 = vadd.f32 %v2207_v25, %v5200_v28  ;;  %v2313_v56 = vadd.f32 %v2312_v41, %v5225_v22  ;;  %v7490_v18 = vld [vmem:[#allocation8_spill] sm:$0xff]  ;;  %v7493_v25 = vld [vmem:[#allocation66_spill] sm:$0xff] }
 0x400   : > { %v2291_v55 = vadd.f32 %v5140_v47, %v7486_v51  ;;  %v2250_v53 = vadd.f32 %v2249_v31, %v5210_v16  ;;  %v2334_v39 = vadd.f32 %v2333_v32, %v5230_v35  ;;  %v2230_v37 = vadd.f32 %v2229_v49, %v5285_v59  ;;  %v7491_v31 = vld [vmem:[#allocation9_spill] sm:$0xff]  ;;  %v7492_v51 = vld [vmem:[#allocation10_spill] sm:$0xff]  ;;  %v7496_v38 = vld [vmem:[#allocation143_spill] sm:$0xff] }
 0x401   : > { %v2188_v52 = vadd.f32 %v2187_v8, %v5275_v12  ;;  %v2209_v47 = vadd.f32 %v2208_v4, %v5280_v17  ;;  %v2272_v40 = vadd.f32 %v2271_v44, %v5295_v3  ;;  %v2314_v20 = vadd.f32 %v2313_v56, %v5305_v1  ;;  %v7498_v41 = vld [vmem:[#allocation144_spill] sm:$0xff]  ;;  %v7499_v32 = vld [vmem:[#allocation18_spill] sm:$0xff]  ;;  %v7500_v4 = vld [vmem:[#allocation145_spill] sm:$0xff] }
 0x402   : > { %v2292_v54 = vadd.f32 %v2291_v55, %v5220_v34  ;;  %v2251_v2 = vadd.f32 %v2250_v53, %v5290_v10  ;;  %v2335_v16 = vadd.f32 %v2334_v39, %v5310_v11  ;;  %v2231_v22 = vadd.f32 %v2230_v37, %v5365_v19  ;;  %v7488_v11 = vld [vmem:[#allocation52_spill] sm:$0xff]  ;;  %v7497_v55 = vld [vmem:[#allocation17_spill] sm:$0xff]  ;;  %v7501_v53 = vld [vmem:[#allocation67_spill] sm:$0xff] }
 0x403   : > { %v2189_v21 = vadd.f32 %v2188_v52, %v5355_v27  ;;  %v2210_v34 = vadd.f32 %v2209_v47, %v5360_v0  ;;  %v2273_v12 = vadd.f32 %v2272_v40, %v5375_v63  ;;  %v2315_v59 = vadd.f32 %v2314_v20, %v5385_v62  ;;  %v7489_v0 = vld [vmem:[#allocation7_spill] sm:$0xff]  ;;  %v7503_v39 = vld [vmem:[#allocation24_spill] sm:$0xff]  ;;  %v7504_v47 = vld [vmem:[#allocation150_spill] sm:$0xff] }
 0x404   : > { %v2293_v28 = vadd.f32 %v2292_v54, %v5300_v9  ;;  %v2252_v35 = vadd.f32 %v2251_v2, %v5370_v15  ;;  %v2336_v10 = vadd.f32 %v2335_v16, %v5390_v23  ;;  %v2232_v1 = vadd.f32 %v2231_v22, %v5445_v7  ;;  %v7502_v54 = vld [vmem:[#allocation23_spill] sm:$0xff]  ;;  %v7505_v2 = vld [vmem:[#allocation25_spill] sm:$0xff]  ;;  %v7507_v16 = vld [vmem:[#allocation26_spill] sm:$0xff] }
 0x405   : > { %v2190_v3 = vadd.f32 %v2189_v21, %v5435_v5  ;;  %v2211_v9 = vadd.f32 %v2210_v34, %v5440_v24  ;;  %v2274_v19 = vadd.f32 %v2273_v12, %v7489_v0  ;;  %v2316_v63 = vadd.f32 %v2315_v59, %v7491_v31  ;;  %v7508_v34 = vld [vmem:[#allocation152_spill] sm:$0xff]  ;;  %v7514_v0 = vld [vmem:[#allocation158_spill] sm:$0xff]  ;;  %v7516_v31 = vld [vmem:[#allocation159_spill] sm:$0xff] }
 0x406   : > { %v2294_v17 = vadd.f32 %v2293_v28, %v5380_v57  ;;  %v2253_v27 = vadd.f32 %v2252_v35, %v7488_v11  ;;  %v2337_v57 = vadd.f32 %v2336_v10, %v7492_v51  ;;  %v2233_v5 = vadd.f32 %v2232_v1, %v7495_v46  ;;  %v7506_v28 = vld [vmem:[#allocation151_spill] sm:$0xff]  ;;  %v7509_v35 = vld [vmem:[#allocation70_spill] sm:$0xff]  ;;  %v7511_v10 = vld [vmem:[#allocation32_spill] sm:$0xff] }
 0x407   : > { %v2191_v62 = vadd.f32 %v2190_v3, %v7493_v25  ;;  %v2212_v23 = vadd.f32 %v2211_v9, %v7494_v48  ;;  %v2275_v7 = vadd.f32 %v2274_v19, %v7497_v55  ;;  %v2317_v8 = vadd.f32 %v2316_v63, %v7499_v32  ;;  %v7512_v9 = vld [vmem:[#allocation157_spill] sm:$0xff]  ;;  %v7517_v51 = vld [vmem:[#allocation83_spill] sm:$0xff]  ;;  %v7519_v48 = vld [vmem:[#allocation40_spill] sm:$0xff] }
 0x408   : > { %v2295_v15 = vadd.f32 %v2294_v17, %v7490_v18  ;;  %v2254_v24 = vadd.f32 %v2253_v27, %v7496_v38  ;;  %v2338_v49 = vadd.f32 %v2337_v57, %v7500_v4  ;;  %v2234_v52 = vadd.f32 %v2233_v5, %v7503_v39  ;;  %v7510_v17 = vld [vmem:[#allocation31_spill] sm:$0xff]  ;;  %v7513_v11 = vld [vmem:[#allocation33_spill] sm:$0xff]  ;;  %v7515_v18 = vld [vmem:[#allocation34_spill] sm:$0xff] }
 0x409   : > { %v2192_v44 = vadd.f32 %v2191_v62, %v7501_v53  ;;  %v2213_v56 = vadd.f32 %v2212_v23, %v7502_v54  ;;  %v2276_v40 = vadd.f32 %v2275_v7, %v7505_v2  ;;  %v2318_v21 = vadd.f32 %v2317_v8, %v7507_v16  ;;  %v7518_v25 = vld [vmem:[#allocation39_spill] sm:$0xff]  ;;  %v7520_v46 = vld [vmem:[#allocation164_spill] sm:$0xff]  ;;  %v7521_v38 = vld [vmem:[#allocation41_spill] sm:$0xff] }
 0x40a   : > { %v2296_v60 = vadd.f32 %v2295_v15, %v7498_v41  ;;  %v2255_v37 = vadd.f32 %v2254_v24, %v7504_v47  ;;  %v2339_v22 = vadd.f32 %v2338_v49, %v7508_v34  ;;  %v2235_v3 = vadd.f32 %v2234_v52, %v7511_v10  ;;  %v7522_v55 = vld [vmem:[#allocation165_spill] sm:$0xff]  ;;  %v7523_v41 = vld [vmem:[#allocation42_spill] sm:$0xff]  ;;  %v7525_v4 = vld [vmem:[#allocation84_spill] sm:$0xff] }
 0x40b   : > { %v2193_v12 = vadd.f32 %v2192_v44, %v7509_v35  ;;  %v2214_v59 = vadd.f32 %v2213_v56, %v7510_v17  ;;  %v2277_v27 = vadd.f32 %v2276_v40, %v7513_v11  ;;  %v2319_v15 = vadd.f32 %v2318_v21, %v7515_v18  ;;  %v7524_v32 = vld [vmem:[#allocation166_spill] sm:$0xff]  ;;  %v7526_v53 = vld [vmem:[#allocation47_spill] sm:$0xff]  ;;  %v7527_v54 = vld [vmem:[#allocation48_spill] sm:$0xff] }
 0x40c   : > { %v2297_v20 = vadd.f32 %v2296_v60, %v7506_v28  ;;  %v2256_v1 = vadd.f32 %v2255_v37, %v7512_v9  ;;  %v2340_v63 = vadd.f32 %v2339_v22, %v7516_v31  ;;  %v2236_v23 = vadd.f32 %v2235_v3, %v7519_v48  ;;  %v7528_v39 = vld [vmem:[#allocation171_spill] sm:$0xff]  ;;  %v7529_v47 = vld [vmem:[#allocation49_spill] sm:$0xff]  ;;  %v7530_v2 = vld [vmem:[#allocation172_spill] sm:$0xff] }
 0x40d   : > { %v2194_v57 = vadd.f32 %v2193_v12, %v7517_v51  ;;  %v2215_v62 = vadd.f32 %v2214_v59, %v7518_v25  ;;  %v2278_v24 = vadd.f32 %v2277_v27, %v7521_v38  ;;  %v2320_v60 = vadd.f32 %v2319_v15, %v7523_v41  ;;  %v7531_v28 = vld [vmem:[#allocation50_spill] sm:$0xff]  ;;  %v7532_v16 = vld [vmem:[#allocation173_spill] sm:$0xff]  ;;  %v7533_v22 = vld [vmem:[#allocation87_spill] sm:$0xff] }
 0x40e   : > { %v2298_v19 = vadd.f32 %v2297_v20, %v7514_v0  ;;  %v2257_v5 = vadd.f32 %v2256_v1, %v7520_v46  ;;  %v2341_v8 = vadd.f32 %v2340_v63, %v7524_v32  ;;  %v2237_v56 = vadd.f32 %v2236_v23, %v7527_v54  ;;  %v7534_v12 = vld [vmem:[#allocation56_spill] sm:$0xff]  ;;  %v7535_v59 = vld [vmem:[#allocation57_spill] sm:$0xff]  ;;  %v7536_v3 = vld [vmem:[#allocation58_spill] sm:$0xff] }
 0x40f   : > { %v2195_v49 = vadd.f32 %v2194_v57, %v7525_v4  ;;  %v2216_v44 = vadd.f32 %v2215_v62, %v7526_v53  ;;  %v2279_v37 = vadd.f32 %v2278_v24, %v7529_v47  ;;  %v2321_v20 = vadd.f32 %v2320_v60, %v7531_v28  ;;  %v7537_v1 = vld [vmem:[#allocation178_spill] sm:$0xff]  ;;  %v7538_v27 = vld [vmem:[#allocation59_spill] sm:$0xff]  ;;  %v7540_v31 = vld [vmem:[#allocation64_spill] sm:$0xff] }
 0x410   : > { %v2299_v7 = vadd.f32 %v2298_v19, %v7522_v55  ;;  %v2258_v52 = vadd.f32 %v2257_v5, %v7528_v39  ;;  %v2342_v21 = vadd.f32 %v2341_v8, %v7532_v16  ;;  %v2238_v17 = vadd.f32 %v2237_v56, %v7534_v12  ;;  %v7539_v19 = vld [vmem:[#allocation179_spill] sm:$0xff]  ;;  %v7541_v51 = vld [vmem:[#allocation65_spill] sm:$0xff]  ;;  %v7542_v57 = vld [vmem:[#allocation184_spill] sm:$0xff] }
 0x411   : > { %v2196_v34 = vadd.f32 %v2195_v49, %v5915_v33  ;;  %v2217_v35 = vadd.f32 %v2216_v44, %v7533_v22  ;;  %v2280_v9 = vadd.f32 %v2279_v37, %v7536_v3  ;;  %v2322_v0 = vadd.f32 %v2321_v20, %v7538_v27  ;;  %v7543_v62 = vld [vmem:[#allocation68_spill] sm:$0xff]  ;;  %v7544_v23 = vld [vmem:[#allocation185_spill] sm:$0xff]  ;;  %v7546_v24 = vld [vmem:[#allocation186_spill] sm:$0xff] }
 0x412   : > { %v2300_v40 = vadd.f32 %v2299_v7, %v7530_v2  ;;  %v2259_v10 = vadd.f32 %v2258_v52, %v7535_v59  ;;  %v2343_v18 = vadd.f32 %v2342_v21, %v7539_v19  ;;  %v2239_v33 = vadd.f32 %v2238_v17, %v7541_v51  ;;  %v7545_v5 = vld [vmem:[#allocation69_spill] sm:$0xff]  ;;  %v7547_v41 = vld [vmem:[#allocation75_spill] sm:$0xff]  ;;  %v7548_v32 = vld [vmem:[#allocation76_spill] sm:$0xff] }
 0x413   : > { %v2197_v15 = vadd.f32 %v2196_v34, %v5995_v42  ;;  %v2218_v63 = vadd.f32 %v2217_v35, %v7540_v31  ;;  %v2281_v48 = vadd.f32 %v2280_v9, %v7543_v62  ;;  %v2323_v38 = vadd.f32 %v2322_v0, %v7545_v5  ;;  %v7549_v8 = vld [vmem:[#allocation191_spill] sm:$0xff]  ;;  %v7550_v49 = vld [vmem:[#allocation77_spill] sm:$0xff]  ;;  %v7551_v44 = vld [vmem:[#allocation192_spill] sm:$0xff] }
 0x414   : > { %v2301_v11 = vadd.f32 %v2300_v40, %v7537_v1  ;;  %v2260_v25 = vadd.f32 %v2259_v10, %v7542_v57  ;;  %v2344_v55 = vadd.f32 %v2343_v18, %v7546_v24  ;;  %v2240_v42 = vadd.f32 %v2239_v33, %v7548_v32  ;;  %v7552_v56 = vld [vmem:[#allocation78_spill] sm:$0xff]  ;;  %v7553_v52 = vld [vmem:[#allocation193_spill] sm:$0xff]  ;;  %v7557_v21 = vld [vmem:[#allocation88_spill] sm:$0xff] }
 0x415   : > { %v2198_v7 = vadd.f32 %v2197_v15, %v6075_v45  ;;  %v2219_v60 = vadd.f32 %v2218_v63, %v7547_v41  ;;  %v2282_v53 = vadd.f32 %v2281_v48, %v7550_v49  ;;  %v2324_v39 = vadd.f32 %v2323_v38, %v7552_v56  ;;  %v7554_v2 = vld [vmem:[#allocation85_spill] sm:$0xff]  ;;  %v7555_v28 = vld [vmem:[#allocation86_spill] sm:$0xff]  ;;  %v7558_v22 = vld [vmem:[#allocation199_spill] sm:$0xff] }
 0x416   : > { %v2302_v46 = vadd.f32 %v2301_v11, %v7544_v23  ;;  %v2261_v4 = vadd.f32 %v2260_v25, %v7549_v8  ;;  %v2345_v47 = vadd.f32 %v2344_v55, %v7553_v52  ;;  %v2241_v45 = vadd.f32 %v2240_v42, %v7555_v28  ;;  %v7556_v20 = vld [vmem:[#allocation198_spill] sm:$0xff]  ;;  %v7559_v12 = vld [vmem:[#allocation89_spill] sm:$0xff]  ;;  %v7560_v59 = vld [vmem:[#allocation200_spill] sm:$0xff] }
 0x417   : > { %v2199_v37 = vadd.f32 %v2198_v7, %v6155_v26  ;;  %v2220_v40 = vadd.f32 %v2219_v60, %v7554_v2  ;;  %v2283_v34 = vadd.f32 %v2282_v53, %v7557_v21  ;;  %v2325_v17 = vadd.f32 %v2324_v39, %v7559_v12  ;;  %v7561_v27 = vld [vmem:[#allocation94_spill] sm:$0xff]  ;;  %v7562_v18 = vld [vmem:[#allocation95_spill] sm:$0xff] }
 0x418   : > { %v2303_v54 = vadd.f32 %v2302_v46, %v7551_v44  ;;  %v2262_v16 = vadd.f32 %v2261_v4, %v7556_v20  ;;  %v2346_v10 = vadd.f32 %v2345_v47, %v7560_v59  ;;  %v2242_v26 = vadd.f32 %v2241_v45, %v6245_v36  ;;  %v7563_v59 = vld [vmem:[#allocation99_spill] sm:$0xff] }
 0x419   : > { %v2200_v3 = vadd.f32 %v2199_v37, %v6235_v43  ;;  %v2221_v9 = vadd.f32 %v2220_v40, %v6240_v13  ;;  %v2284_v11 = vadd.f32 %v2283_v34, %v6255_v14  ;;  %v2326_v19 = vadd.f32 %v2325_v17, %v6265_v6 }
 0x41a   : > { %v2304_v35 = vadd.f32 %v2303_v54, %v7558_v22  ;;  %v2263_v1 = vadd.f32 %v2262_v16, %v6250_v61  ;;  %v2347_v15 = vadd.f32 %v2346_v10, %v7562_v18  ;;  %v2243_v51 = vrot.slane %v2242_v26, 4  ;;  %v7564_v10 = vld [vmem:[#allocation107_spill] sm:$0xff]  ;;  %v7570_v18 = vld [vmem:[#allocation110_spill] sm:$0xff] }
 0x41b   : > { %v2201_v31 = vrot.slane %v2200_v3, 4  ;;  %v2222_v63 = vrot.slane %v2221_v9, 4  ;;  %v2285_v57 = vrot.slane %v2284_v11, 4  ;;  %v2327_v25 = vrot.slane %v2326_v19, 4 }
 0x41c   : > { %v2305_v0 = vadd.f32 %v2304_v35, %v7561_v27  ;;  %v2264_v33 = vrot.slane %v2263_v1, 4  ;;  %v2348_v13 = vrot.slane %v2347_v15, 4  ;;  %v2244_v48 = vadd.f32 %v2243_v51, %v2242_v26  ;;  %v7566_v26 = vld [vmem:[#allocation108_spill] sm:$0xff]  ;;  %v7568_v27 = vld [vmem:[#allocation109_spill] sm:$0xff] }
 0x41d   : > { %v2202_v62 = vadd.f32 %v2201_v31, %v2200_v3  ;;  %v2223_v36 = vadd.f32 %v2222_v63, %v2221_v9  ;;  %v2286_v23 = vadd.f32 %v2285_v57, %v2284_v11  ;;  %v2328_v46 = vadd.f32 %v2327_v25, %v2326_v19  ;;  %v7565_v9 = vld [vmem:[#allocation100_spill] sm:$0xff]  ;;  %v7567_v11 = vld [vmem:[#allocation101_spill] sm:$0xff]  ;;  %v7569_v19 = vld [vmem:[#allocation102_spill] sm:$0xff] }
 0x41e   : > { %v2306_v43 = vrot.slane %v2305_v0, 4  ;;  %v2265_v61 = vadd.f32 %v2264_v33, %v2263_v1  ;;  %v2349_v5 = vadd.f32 %v2348_v13, %v2347_v15  ;;  %v2245_v24 = vrot.slane %v2244_v48, 2  ;;  %v7571_v31 = vld [vmem:[#allocation103_spill] sm:$0xff]  ;;  %v7573_v33 = vld [vmem:[#allocation104_spill] sm:$0xff]  ;;  %v7575_v25 = vld [vmem:[#allocation105_spill] sm:$0xff] }
 0x41f   : > { %v2203_v38 = vrot.slane %v2202_v62, 2  ;;  %v2224_v6 = vrot.slane %v2223_v36, 2  ;;  %v2287_v7 = vrot.slane %v2286_v23, 2  ;;  %v2329_v60 = vrot.slane %v2328_v46, 2  ;;  %v7572_v63 = vld [vmem:[#allocation111_spill] sm:$0xff]  ;;  %v7574_v57 = vld [vmem:[#allocation112_spill] sm:$0xff] }
 0x420   : > { %v2307_v14 = vadd.f32 %v2306_v43, %v2305_v0  ;;  %v2266_v55 = vrot.slane %v2265_v61, 2  ;;  %v2350_v32 = vrot.slane %v2349_v5, 2  ;;  %v2246_v4 = vadd.f32 %v2245_v24, %v2244_v48  ;;  %v7576_v13 = vld [vmem:[#allocation113_spill] sm:$0xff]  ;;  %v7578_v48 = vld [vmem:[#allocation114_spill] sm:$0xff] }
 0x421   : > { %v2204_v42 = vadd.f32 %v2203_v38, %v2202_v62  ;;  %v2225_v8 = vadd.f32 %v2224_v6, %v2223_v36  ;;  %v2288_v53 = vadd.f32 %v2287_v7, %v2286_v23  ;;  %v2330_v54 = vadd.f32 %v2329_v60, %v2328_v46  ;;  %v7577_v36 = vld [vmem:[#allocation106_spill] sm:$0xff]  ;;  %v7579_v23 = vld [vmem:[#allocation115_spill] sm:$0xff]  ;;  %v7580_v46 = vld [vmem:[#allocation116_spill] sm:$0xff] }
 0x422   : > { %v2308_v41 = vrot.slane %v2307_v14, 2  ;;  %v2267_v49 = vadd.f32 %v2266_v55, %v2265_v61  ;;  %v2351_v56 = vadd.f32 %v2350_v32, %v2349_v5  ;;  %v2247_v47 = vrot.slane %v2246_v4, 1  ;;  %v7581_v38 = vld [vmem:[#allocation117_spill] sm:$0xff]  ;;  %v7582_v24 = vld [vmem:[#allocation118_spill] sm:$0xff]  ;;  %v7583_v7 = vld [vmem:[#allocation119_spill] sm:$0xff] }
 0x423   : > { %v2205_v39 = vrot.slane %v2204_v42, 1  ;;  %v2226_v52 = vrot.slane %v2225_v8, 1  ;;  %v2289_v2 = vrot.slane %v2288_v53, 1  ;;  %v2331_v28 = vrot.slane %v2330_v54, 1  ;;  %v7584_v60 = vld [vmem:[#allocation120_spill] sm:$0xff] }
 0x424   : > { %v2309_v44 = vadd.f32 %v2308_v41, %v2307_v14  ;;  %v2268_v37 = vrot.slane %v2267_v49, 1  ;;  %v2352_v45 = vrot.slane %v2351_v56, 1  ;;  %v6444_v21 = vadd.f32 %v2247_v47, %v2246_v4  ;;  %v7586_v4 = vld [vmem:[#allocation122_spill] sm:$0xff] }
 0x425   : > { %v6440_v20 = vadd.f32 %v2205_v39, %v2204_v42  ;;  %v6442_v16 = vadd.f32 %v2226_v52, %v2225_v8  ;;  %v6448_v22 = vadd.f32 %v2289_v2, %v2288_v53  ;;  %v6452_v12 = vadd.f32 %v2331_v28, %v2330_v54  ;;  %v7585_v42 = vld [vmem:[#allocation121_spill] sm:$0xff]  ;;  %v7587_v53 = vld [vmem:[#allocation123_spill] sm:$0xff]  ;;  %v7588_v54 = vld [vmem:[#allocation124_spill] sm:$0xff] }
 0x426   : > { %v2310_v40 = vrot.slane %v2309_v44, 1  ;;  %v6446_v34 = vadd.f32 %v2268_v37, %v2267_v49  ;;  %v6454_v17 = vadd.f32 %v2352_v45, %v2351_v56  ;;  %v2354_v3 = vadd.f32 %v7564_v10, %v7563_v59  ;;  %v7589_v39 = vld [vmem:[#allocation125_spill] sm:$0xff]  ;;  %v7590_v47 = vld [vmem:[#allocation126_spill] sm:$0xff]  ;;  %v7591_v2 = vld [vmem:[#allocation127_spill] sm:$0xff] }
 0x427   : > { %v2375_v1 = vadd.f32 %v7566_v26, %v7565_v9  ;;  %v2396_v0 = vadd.f32 %v7568_v27, %v7567_v11  ;;  %v2417_v15 = vadd.f32 %v7570_v18, %v7569_v19  ;;  %v2438_v51 = vadd.f32 %v7572_v63, %v7571_v31  ;;  %v7592_v28 = vld [vmem:[#allocation128_spill] sm:$0xff]  ;;  %v7593_v59 = vld [vmem:[#allocation129_spill] sm:$0xff]  ;;  %v7595_v26 = vld [vmem:[#allocation131_spill] sm:$0xff] }
 0x428   : > { %v6450_v35 = vadd.f32 %v2310_v40, %v2309_v44  ;;  %v2459_v43 = vadd.f32 %v7574_v57, %v7573_v33  ;;  %v2480_v62 = vadd.f32 %v7576_v13, %v7575_v25  ;;  %v2501_v61 = vadd.f32 %v7578_v48, %v7577_v36  ;;  %v7596_v11 = vld [vmem:[#allocation132_spill] sm:$0xff]  ;;  %v7598_v18 = vld [vmem:[#allocation134_spill] sm:$0xff]  ;;  %v7599_v31 = vld [vmem:[#allocation135_spill] sm:$0xff] }
 0x429   : > { %v2355_v14 = vadd.f32 %v2354_v3, %v7579_v23  ;;  %v2376_v5 = vadd.f32 %v2375_v1, %v7580_v46  ;;  %v2397_v6 = vadd.f32 %v2396_v0, %v7581_v38  ;;  %v2418_v55 = vadd.f32 %v2417_v15, %v7582_v24  ;;  %v7594_v3 = vld [vmem:[#allocation130_spill] sm:$0xff]  ;;  %v7597_v0 = vld [vmem:[#allocation133_spill] sm:$0xff]  ;;  %v7604_v48 = vld [vmem:[#allocation139_spill] sm:$0xff] }
 0x42a   : > { %v2439_v41 = vadd.f32 %v2438_v51, %v7583_v7  ;;  %v2460_v32 = vadd.f32 %v2459_v43, %v7584_v60  ;;  %v2481_v8 = vadd.f32 %v2480_v62, %v7585_v42  ;;  %v2502_v49 = vadd.f32 %v2501_v61, %v7586_v4  ;;  %v7600_v51 = vld [vmem:[#allocation136_spill] sm:$0xff]  ;;  %v7601_v57 = vld [vmem:[#allocation137_spill] sm:$0xff]  ;;  %v7602_v25 = vld [vmem:[#allocation138_spill] sm:$0xff] }
 0x42b   : > { %v2356_v44 = vadd.f32 %v2355_v14, %v7587_v53  ;;  %v2377_v56 = vadd.f32 %v2376_v5, %v7588_v54  ;;  %v2398_v52 = vadd.f32 %v2397_v6, %v7589_v39  ;;  %v2419_v37 = vadd.f32 %v2418_v55, %v7590_v47  ;;  %v7603_v62 = vld [vmem:[#allocation11_spill] sm:$0xff]  ;;  %v7605_v23 = vld [vmem:[#allocation12_spill] sm:$0xff]  ;;  %v7607_v38 = vld [vmem:[#allocation13_spill] sm:$0xff] }
 0x42c   : > { %v2440_v40 = vadd.f32 %v2439_v41, %v7591_v2  ;;  %v2461_v45 = vadd.f32 %v2460_v32, %v7592_v28  ;;  %v2482_v10 = vadd.f32 %v2481_v8, %v7593_v59  ;;  %v2503_v9 = vadd.f32 %v2502_v49, %v7594_v3  ;;  %v7606_v46 = vld [vmem:[#allocation140_spill] sm:$0xff]  ;;  %v7608_v24 = vld [vmem:[#allocation141_spill] sm:$0xff]  ;;  %v7609_v7 = vld [vmem:[#allocation14_spill] sm:$0xff] }
 0x42d   : > { %v2357_v1 = vadd.f32 %v2356_v44, %v7595_v26  ;;  %v2378_v27 = vadd.f32 %v2377_v56, %v7596_v11  ;;  %v2399_v19 = vadd.f32 %v2398_v52, %v7597_v0  ;;  %v2420_v15 = vadd.f32 %v2419_v37, %v7598_v18  ;;  %v7610_v60 = vld [vmem:[#allocation142_spill] sm:$0xff]  ;;  %v7611_v42 = vld [vmem:[#allocation19_spill] sm:$0xff]  ;;  %v7613_v53 = vld [vmem:[#allocation20_spill] sm:$0xff] }
 0x42e   : > { %v2441_v63 = vadd.f32 %v2440_v40, %v7599_v31  ;;  %v2462_v33 = vadd.f32 %v2461_v45, %v7600_v51  ;;  %v2483_v43 = vadd.f32 %v2482_v10, %v7601_v57  ;;  %v2504_v13 = vadd.f32 %v2503_v9, %v7602_v25  ;;  %v7612_v4 = vld [vmem:[#allocation146_spill] sm:$0xff]  ;;  %v7614_v54 = vld [vmem:[#allocation147_spill] sm:$0xff]  ;;  %v7615_v39 = vld [vmem:[#allocation21_spill] sm:$0xff] }
 0x42f   : > { %v2358_v36 = vadd.f32 %v2357_v1, %v7603_v62  ;;  %v2379_v61 = vadd.f32 %v2378_v27, %v7604_v48  ;;  %v2400_v14 = vadd.f32 %v2399_v19, %v7605_v23  ;;  %v2421_v5 = vadd.f32 %v2420_v15, %v7606_v46  ;;  %v7616_v47 = vld [vmem:[#allocation148_spill] sm:$0xff]  ;;  %v7617_v2 = vld [vmem:[#allocation22_spill] sm:$0xff]  ;;  %v7618_v28 = vld [vmem:[#allocation149_spill] sm:$0xff] }
 0x430   : > { %v2442_v6 = vadd.f32 %v2441_v63, %v7607_v38  ;;  %v2463_v55 = vadd.f32 %v2462_v33, %v7608_v24  ;;  %v2484_v41 = vadd.f32 %v2483_v43, %v7609_v7  ;;  %v2505_v32 = vadd.f32 %v2504_v13, %v7610_v60  ;;  %v7619_v59 = vld [vmem:[#allocation27_spill] sm:$0xff]  ;;  %v7620_v3 = vld [vmem:[#allocation153_spill] sm:$0xff]  ;;  %v7621_v26 = vld [vmem:[#allocation28_spill] sm:$0xff] }
 0x431   : > { %v2359_v8 = vadd.f32 %v2358_v36, %v7611_v42  ;;  %v2380_v49 = vadd.f32 %v2379_v61, %v7612_v4  ;;  %v2401_v44 = vadd.f32 %v2400_v14, %v7613_v53  ;;  %v2422_v56 = vadd.f32 %v2421_v5, %v7614_v54  ;;  %v7622_v11 = vld [vmem:[#allocation154_spill] sm:$0xff]  ;;  %v7623_v0 = vld [vmem:[#allocation29_spill] sm:$0xff]  ;;  %v7624_v18 = vld [vmem:[#allocation155_spill] sm:$0xff] }
 0x432   : > { %v2443_v52 = vadd.f32 %v2442_v6, %v7615_v39  ;;  %v2464_v37 = vadd.f32 %v2463_v55, %v7616_v47  ;;  %v2485_v40 = vadd.f32 %v2484_v41, %v7617_v2  ;;  %v2506_v45 = vadd.f32 %v2505_v32, %v7618_v28  ;;  %v7625_v31 = vld [vmem:[#allocation30_spill] sm:$0xff]  ;;  %v7626_v51 = vld [vmem:[#allocation156_spill] sm:$0xff]  ;;  %v7627_v57 = vld [vmem:[#allocation35_spill] sm:$0xff] }
 0x433   : > { %v2360_v10 = vadd.f32 %v2359_v8, %v7619_v59  ;;  %v2381_v9 = vadd.f32 %v2380_v49, %v7620_v3  ;;  %v2402_v1 = vadd.f32 %v2401_v44, %v7621_v26  ;;  %v2423_v27 = vadd.f32 %v2422_v56, %v7622_v11  ;;  %v7628_v25 = vld [vmem:[#allocation160_spill] sm:$0xff]  ;;  %v7630_v48 = vld [vmem:[#allocation161_spill] sm:$0xff]  ;;  %v7632_v46 = vld [vmem:[#allocation162_spill] sm:$0xff] }
 0x434   : > { %v2444_v19 = vadd.f32 %v2443_v52, %v7623_v0  ;;  %v2465_v15 = vadd.f32 %v2464_v37, %v7624_v18  ;;  %v2486_v63 = vadd.f32 %v2485_v40, %v7625_v31  ;;  %v2507_v33 = vadd.f32 %v2506_v45, %v7626_v51  ;;  %v7629_v62 = vld [vmem:[#allocation36_spill] sm:$0xff]  ;;  %v7631_v23 = vld [vmem:[#allocation37_spill] sm:$0xff]  ;;  %v7633_v38 = vld [vmem:[#allocation38_spill] sm:$0xff] }
 0x435   : > { %v2361_v43 = vadd.f32 %v2360_v10, %v7627_v57  ;;  %v2382_v13 = vadd.f32 %v2381_v9, %v7628_v25  ;;  %v2403_v36 = vadd.f32 %v2402_v1, %v7629_v62  ;;  %v2424_v61 = vadd.f32 %v2423_v27, %v7630_v48  ;;  %v7634_v24 = vld [vmem:[#allocation163_spill] sm:$0xff]  ;;  %v7637_v42 = vld [vmem:[#allocation44_spill] sm:$0xff]  ;;  %v7639_v53 = vld [vmem:[#allocation45_spill] sm:$0xff] }
 0x436   : > { %v2445_v14 = vadd.f32 %v2444_v19, %v7631_v23  ;;  %v2466_v5 = vadd.f32 %v2465_v15, %v7632_v46  ;;  %v2487_v6 = vadd.f32 %v2486_v63, %v7633_v38  ;;  %v2508_v55 = vadd.f32 %v2507_v33, %v7634_v24  ;;  %v7635_v7 = vld [vmem:[#allocation43_spill] sm:$0xff]  ;;  %v7638_v4 = vld [vmem:[#allocation168_spill] sm:$0xff]  ;;  %v7640_v54 = vld [vmem:[#allocation169_spill] sm:$0xff] }
 0x437   : > { %v2362_v41 = vadd.f32 %v2361_v43, %v7635_v7  ;;  %v7636_v60 = vld [vmem:[#allocation167_spill] sm:$0xff]  ;;  %v2404_v8 = vadd.f32 %v2403_v36, %v7637_v42  ;;  %v2425_v49 = vadd.f32 %v2424_v61, %v7638_v4  ;;  %v7641_v39 = vld [vmem:[#allocation46_spill] sm:$0xff]  ;;  %v7645_v59 = vld [vmem:[#allocation53_spill] sm:$0xff] }
 0x438   : > { %v2383_v32 = vadd.f32 %v2382_v13, %v7636_v60  ;;  %v2446_v44 = vadd.f32 %v2445_v14, %v7639_v53  ;;  %v2467_v56 = vadd.f32 %v2466_v5, %v7640_v54  ;;  %v2488_v52 = vadd.f32 %v2487_v6, %v7641_v39  ;;  %v7642_v47 = vld [vmem:[#allocation170_spill] sm:$0xff]  ;;  %v7643_v2 = vld [vmem:[#allocation51_spill] sm:$0xff]  ;;  %v7648_v11 = vld [vmem:[#allocation176_spill] sm:$0xff] }
 0x439   : > { %v2509_v37 = vadd.f32 %v2508_v55, %v7642_v47  ;;  %v2363_v40 = vadd.f32 %v2362_v41, %v7643_v2  ;;  %v7644_v28 = vld [vmem:[#allocation174_spill] sm:$0xff]  ;;  %v2405_v10 = vadd.f32 %v2404_v8, %v7645_v59  ;;  %v7646_v3 = vld [vmem:[#allocation175_spill] sm:$0xff]  ;;  %v7650_v18 = vld [vmem:[#allocation177_spill] sm:$0xff] }
 0x43a   : > { %v2384_v45 = vadd.f32 %v2383_v32, %v7644_v28  ;;  %v2426_v9 = vadd.f32 %v2425_v49, %v7646_v3  ;;  %v7647_v26 = vld [vmem:[#allocation54_spill] sm:$0xff]  ;;  %v2468_v27 = vadd.f32 %v2467_v56, %v7648_v11  ;;  %v7649_v0 = vld [vmem:[#allocation55_spill] sm:$0xff]  ;;  %v7651_v31 = vld [vmem:[#allocation60_spill] sm:$0xff] }
 0x43b   : > { %v2447_v1 = vadd.f32 %v2446_v44, %v7647_v26  ;;  %v2489_v19 = vadd.f32 %v2488_v52, %v7649_v0  ;;  %v2510_v15 = vadd.f32 %v2509_v37, %v7650_v18  ;;  %v2364_v63 = vadd.f32 %v2363_v40, %v7651_v31  ;;  %v7652_v51 = vld [vmem:[#allocation180_spill] sm:$0xff]  ;;  %v7653_v57 = vld [vmem:[#allocation61_spill] sm:$0xff]  ;;  %v7655_v62 = vld [vmem:[#allocation62_spill] sm:$0xff] }
 0x43c   : > { %v2385_v33 = vadd.f32 %v2384_v45, %v7652_v51  ;;  %v2406_v43 = vadd.f32 %v2405_v10, %v7653_v57  ;;  %v7654_v25 = vld [vmem:[#allocation181_spill] sm:$0xff]  ;;  %v7656_v48 = vld [vmem:[#allocation182_spill] sm:$0xff]  ;;  %v7657_v23 = vld [vmem:[#allocation63_spill] sm:$0xff] }
 0x43d   : > { %v2427_v13 = vadd.f32 %v2426_v9, %v7654_v25  ;;  %v2448_v36 = vadd.f32 %v2447_v1, %v7655_v62  ;;  %v2469_v61 = vadd.f32 %v2468_v27, %v7656_v48  ;;  %v2490_v14 = vadd.f32 %v2489_v19, %v7657_v23  ;;  %v7658_v46 = vld [vmem:[#allocation183_spill] sm:$0xff]  ;;  %v7661_v7 = vld [vmem:[#allocation72_spill] sm:$0xff]  ;;  %v7663_v42 = vld [vmem:[#allocation73_spill] sm:$0xff] }
 0x43e   : > { %v2511_v5 = vadd.f32 %v2510_v15, %v7658_v46  ;;  %v7659_v38 = vld [vmem:[#allocation71_spill] sm:$0xff]  ;;  %v2407_v41 = vadd.f32 %v2406_v43, %v7661_v7  ;;  %v7662_v60 = vld [vmem:[#allocation188_spill] sm:$0xff]  ;;  %v7664_v4 = vld [vmem:[#allocation189_spill] sm:$0xff] }
 0x43f   : > { %v2365_v6 = vadd.f32 %v2364_v63, %v7659_v38  ;;  %v7660_v24 = vld [vmem:[#allocation187_spill] sm:$0xff]  ;;  %v2428_v32 = vadd.f32 %v2427_v13, %v7662_v60  ;;  %v2449_v8 = vadd.f32 %v2448_v36, %v7663_v42  ;;  %v2470_v49 = vadd.f32 %v2469_v61, %v7664_v4  ;;  %v7665_v53 = vld [vmem:[#allocation74_spill] sm:$0xff]  ;;  %v7669_v2 = vld [vmem:[#allocation80_spill] sm:$0xff] }
 0x440   : > { %v2386_v55 = vadd.f32 %v2385_v33, %v7660_v24  ;;  %v2491_v44 = vadd.f32 %v2490_v14, %v7665_v53  ;;  %v7666_v54 = vld [vmem:[#allocation190_spill] sm:$0xff]  ;;  %v7667_v39 = vld [vmem:[#allocation79_spill] sm:$0xff]  ;;  %v2408_v40 = vadd.f32 %v2407_v41, %v7669_v2  ;;  %v7671_v59 = vld [vmem:[#allocation81_spill] sm:$0xff] }
 0x441   : > { %v2512_v56 = vadd.f32 %v2511_v5, %v7666_v54  ;;  %v2366_v52 = vadd.f32 %v2365_v6, %v7667_v39  ;;  %v7668_v47 = vld [vmem:[#allocation194_spill] sm:$0xff]  ;;  %v7670_v28 = vld [vmem:[#allocation195_spill] sm:$0xff]  ;;  %v2450_v10 = vadd.f32 %v2449_v8, %v7671_v59  ;;  %v7672_v3 = vld [vmem:[#allocation196_spill] sm:$0xff] }
 0x442   : > { %v2387_v37 = vadd.f32 %v2386_v55, %v7668_v47  ;;  %v2429_v45 = vadd.f32 %v2428_v32, %v7670_v28  ;;  %v2471_v9 = vadd.f32 %v2470_v49, %v7672_v3  ;;  %v7673_v26 = vld [vmem:[#allocation82_spill] sm:$0xff]  ;;  %v7674_v11 = vld [vmem:[#allocation197_spill] sm:$0xff]  ;;  %v7677_v31 = vld [vmem:[#allocation91_spill] sm:$0xff] }
 0x443   : > { %v2492_v1 = vadd.f32 %v2491_v44, %v7673_v26  ;;  %v2513_v27 = vadd.f32 %v2512_v56, %v7674_v11  ;;  %v7675_v0 = vld [vmem:[#allocation90_spill] sm:$0xff]  ;;  %v7676_v18 = vld [vmem:[#allocation201_spill] sm:$0xff]  ;;  %v2409_v63 = vadd.f32 %v2408_v40, %v7677_v31  ;;  %v7679_v57 = vld [vmem:[#allocation92_spill] sm:$0xff] }
 0x444   : > { %v2367_v19 = vadd.f32 %v2366_v52, %v7675_v0  ;;  %v2388_v15 = vadd.f32 %v2387_v37, %v7676_v18  ;;  %v7678_v51 = vld [vmem:[#allocation202_spill] sm:$0xff]  ;;  %v2451_v43 = vadd.f32 %v2450_v10, %v7679_v57  ;;  %v7680_v25 = vld [vmem:[#allocation203_spill] sm:$0xff]  ;;  %v7681_v62 = vld [vmem:[#allocation93_spill] sm:$0xff] }
 0x445   : > { %v2430_v33 = vadd.f32 %v2429_v45, %v7678_v51  ;;  %v2472_v13 = vadd.f32 %v2471_v9, %v7680_v25  ;;  %v2493_v36 = vadd.f32 %v2492_v1, %v7681_v62  ;;  %v7682_v48 = vld [vmem:[#allocation204_spill] sm:$0xff]  ;;  %v7683_v14 = vld [vmem:[#allocation205_spill] sm:$0xff]  ;;  %v2410_v5 = vadd.f32 %v2409_v63, %v6285_v58  ;;  %v7684_v38 = vld [vmem:[#allocation206_spill] sm:$0xff] }
 0x446   : > { %v2514_v61 = vadd.f32 %v2513_v27, %v7682_v48  ;;  %v2368_v23 = vadd.f32 %v2367_v19, %v6275_v29  ;;  %v2389_v46 = vadd.f32 %v2388_v15, %v7683_v14  ;;  %v2452_v24 = vadd.f32 %v2451_v43, %v6295_v50  ;;  %v7685_v55 = vld [vmem:[#allocation207_spill] sm:$0xff]  ;;  %v7686_v41 = vld [vmem:[#allocation208_spill] sm:$0xff] }
 0x447   : > { %v2431_v6 = vadd.f32 %v2430_v33, %v7684_v38  ;;  %v2473_v7 = vadd.f32 %v2472_v13, %v7685_v55  ;;  %v2494_v60 = vadd.f32 %v2493_v36, %v7686_v41  ;;  %v2411_v4 = vrot.slane %v2410_v5, 4  ;;  %v2522_v62 = vld [vmem:[%s6638_s4] sm:$0xff] }
 0x448   : > { %v2515_v32 = vadd.f32 %v2514_v61, %v6310_v30  ;;  %v2369_v42 = vrot.slane %v2368_v23, 4  ;;  %v2390_v8 = vrot.slane %v2389_v46, 4  ;;  %v2453_v53 = vrot.slane %v2452_v24, 4 }
 0x449   : > { %v2432_v49 = vrot.slane %v2431_v6, 4  ;;  %v2474_v29 = vrot.slane %v2473_v7, 4  ;;  %v2495_v44 = vrot.slane %v2494_v60, 4  ;;  %v2412_v39 = vadd.f32 %v2411_v4, %v2410_v5 }
 0x44a   : > { %v2516_v54 = vrot.slane %v2515_v32, 4  ;;  %v2370_v56 = vadd.f32 %v2369_v42, %v2368_v23  ;;  %v2391_v58 = vadd.f32 %v2390_v8, %v2389_v46  ;;  %v2454_v47 = vadd.f32 %v2453_v53, %v2452_v24 }
 0x44b   : > { %v2433_v52 = vadd.f32 %v2432_v49, %v2431_v6  ;;  %v2475_v50 = vadd.f32 %v2474_v29, %v2473_v7  ;;  %v2496_v37 = vadd.f32 %v2495_v44, %v2494_v60  ;;  %v2413_v45 = vrot.slane %v2412_v39, 2  ;;  %v2523_v6 = vld [vmem:[%s6638_s4 + $0x8] sm:$0xff] }
 0x44c   : > { %v2517_v2 = vadd.f32 %v2516_v54, %v2515_v32  ;;  %v2371_v40 = vrot.slane %v2370_v56, 2  ;;  %v2392_v28 = vrot.slane %v2391_v58, 2  ;;  %v2455_v59 = vrot.slane %v2454_v47, 2 }
 0x44d   : > { %v2434_v30 = vrot.slane %v2433_v52, 2  ;;  %v2476_v10 = vrot.slane %v2475_v50, 2  ;;  %v2497_v3 = vrot.slane %v2496_v37, 2  ;;  %v2414_v11 = vadd.f32 %v2413_v45, %v2412_v39 }
 0x44e   : > { %v2518_v9 = vrot.slane %v2517_v2, 2  ;;  %v2372_v26 = vadd.f32 %v2371_v40, %v2370_v56  ;;  %v2393_v1 = vadd.f32 %v2392_v28, %v2391_v58  ;;  %v2456_v0 = vadd.f32 %v2455_v59, %v2454_v47 }
 0x44f   : > { %v2435_v27 = vadd.f32 %v2434_v30, %v2433_v52  ;;  %v2477_v19 = vadd.f32 %v2476_v10, %v2475_v50  ;;  %v2498_v18 = vadd.f32 %v2497_v3, %v2496_v37  ;;  %v2415_v51 = vrot.slane %v2414_v11, 1 }
 0x450   : > { %v2519_v15 = vadd.f32 %v2518_v9, %v2517_v2  ;;  %v2373_v31 = vrot.slane %v2372_v26, 1  ;;  %v2394_v63 = vrot.slane %v2393_v1, 1  ;;  %v2457_v57 = vrot.slane %v2456_v0, 1 }
 0x451   : > { %v2436_v33 = vrot.slane %v2435_v27, 1  ;;  %v2478_v43 = vrot.slane %v2477_v19, 1  ;;  %v2499_v25 = vrot.slane %v2498_v18, 1  ;;  %v2416_v61 = vadd.f32 %v2415_v51, %v2414_v11 }
 0x452   : > { %v2520_v13 = vrot.slane %v2519_v15, 1  ;;  %v2374_v36 = vadd.f32 %v2373_v31, %v2372_v26  ;;  %v2395_v48 = vadd.f32 %v2394_v63, %v2393_v1  ;;  %v2458_v14 = vadd.f32 %v2457_v57, %v2456_v0 }
 0x453   : > { %v2437_v23 = vadd.f32 %v2436_v33, %v2435_v27  ;;  %v2479_v46 = vadd.f32 %v2478_v43, %v2477_v19  ;;  %v2500_v5 = vadd.f32 %v2499_v25, %v2498_v18  ;;  %v2526_v24 = vperm.slane %v2522_v62, 0 }
 0x454   : > { %v2521_v38 = vadd.f32 %v2520_v13, %v2519_v15  ;;  %v2527_v55 = vperm.slane %v2522_v62, 1  ;;  %v2528_v7 = vperm.slane %v2522_v62, 2  ;;  %v2529_v41 = vperm.slane %v2522_v62, 3 }
 0x455   : > { %v2530_v60 = vperm.slane %v2522_v62, 4  ;;  %v2531_v32 = vperm.slane %v2522_v62, 5  ;;  %v2532_v42 = vperm.slane %v2522_v62, 6  ;;  %v2533_v8 = vperm.slane %v2522_v62, 7 }
 0x456   : > { %v2534_v4 = vperm.slane %v2523_v6, 0  ;;  %v2535_v49 = vperm.slane %v2523_v6, 1  ;;  %v2536_v53 = vperm.slane %v2523_v6, 2  ;;  %v2537_v29 = vperm.slane %v2523_v6, 3 }
 0x457   : > { %v2538_v44 = vperm.slane %v2523_v6, 4  ;;  %v2539_v54 = vperm.slane %v2523_v6, 5  ;;  %v2540_v56 = vperm.slane %v2523_v6, 6  ;;  %v2541_v58 = vperm.slane %v2523_v6, 7 }
 0x458   : > { %v2558_v39 = vadd.f32 %v2526_v24, %v6440_v20  ;;  %v2559_v52 = vadd.f32 %v2527_v55, %v6442_v16  ;;  %v2560_v47 = vadd.f32 %v2528_v7, %v6444_v21  ;;  %v2561_v50 = vadd.f32 %v2529_v41, %v6446_v34 }
 0x459   : > { %v2562_v37 = vadd.f32 %v2530_v60, %v6448_v22  ;;  %v2563_v2 = vadd.f32 %v2531_v32, %v6450_v35  ;;  %v2564_v40 = vadd.f32 %v2532_v42, %v6452_v12  ;;  %v2565_v28 = vadd.f32 %v2533_v8, %v6454_v17 }
 0x45a   : > { %v2566_v45 = vadd.f32 %v2534_v4, %v2374_v36  ;;  %v2567_v30 = vadd.f32 %v2535_v49, %v2395_v48  ;;  %v2568_v59 = vadd.f32 %v2536_v53, %v2416_v61  ;;  %v2569_v10 = vadd.f32 %v2537_v29, %v2437_v23 }
 0x45b   : > { %v2570_v20 = vadd.f32 %v2538_v44, %v2458_v14  ;;  %v2571_v3 = vadd.f32 %v2539_v54, %v2479_v46  ;;  %v2572_v9 = vadd.f32 %v2540_v56, %v2500_v5  ;;  %v2573_v16 = vadd.f32 %v2541_v58, %v2521_v38 }
 0x45c   : > { %v2590_v21 = vrot.slane %v2559_v52, 7  ;;  %v2591_v26 = vrot.slane %v2560_v47, 6  ;;  %v2592_v34 = vrot.slane %v2561_v50, 5  ;;  %v2593_v1 = vrot.slane %v2562_v37, 4 }
 0x45d   : > { %v2594_v22 = vrot.slane %v2563_v2, 3  ;;  %v2595_v11 = vrot.slane %v2564_v40, 2  ;;  %v2596_v35 = vrot.slane %v2565_v28, 1  ;;  %v2597_v27 = vrot.slane %v2567_v30, 7 }
 0x45e   : > { %v2598_v12 = vrot.slane %v2568_v59, 6  ;;  %v2599_v0 = vrot.slane %v2569_v10, 5  ;;  %v2600_v17 = vrot.slane %v2570_v20, 4  ;;  %v2601_v19 = vrot.slane %v2571_v3, 3 }
 0x45f   : > { %v2602_v18 = vrot.slane %v2572_v9, 2  ;;  %v2603_v15 = vrot.slane %v2573_v16, 1  ;;  %v2605_v31 = vsel %vm2604_vm3, %v2558_v39, %v2590_v21  ;;  %v2607_v63 = vsel %vm2606_vm4, %v2591_v26, %v2592_v34 }
 0x460   : > { %v2609_v51 = vsel %vm2608_vm5, %v2605_v31, %v2607_v63  ;;  %v2611_v33 = vsel %vm2610_vm6, %v2593_v1, %v2594_v22  ;;  %v2613_v57 = vsel %vm2612_vm7, %v2595_v11, %v2596_v35  ;;  %v2618_v43 = vsel %vm2604_vm3, %v2566_v45, %v2597_v27 }
 0x461   : > { %v2619_v25 = vsel %vm2606_vm4, %v2598_v12, %v2599_v0  ;;  %v2615_v13 = vsel %vm2614_vm8, %v2611_v33, %v2613_v57  ;;  %v2621_v36 = vsel %vm2610_vm6, %v2600_v17, %v2601_v19  ;;  %v2622_v48 = vsel %vm2612_vm7, %v2602_v18, %v2603_v15 }
 0x462   : > { %v2620_v62 = vsel %vm2608_vm5, %v2618_v43, %v2619_v25  ;;  %v2617_v61 = vsel %vm2616_vm9, %v2609_v51, %v2615_v13  ;;  %v2623_v23 = vsel %vm2614_vm8, %v2621_v36, %v2622_v48 }
 0x463   : > { %v2624_v14 = vsel %vm2616_vm9, %v2620_v62, %v2623_v23  ;;  %2627 = vst [vmem:[%s3579_s17] sm:$0xff] %v2617_v61 }
 0x464   : > { %2628 = vst [vmem:[%s3579_s17 + $0x8] sm:$0xff] %v2624_v14 }
 0x465   : > { %3126 = shalt.err (!%p3123_p4)
}
 0x466   : > { %3044 = dma.vmem_to_hbm [thread:$0]  (%p3244_p5), %s2643_s22, 256, %s2645_s26, %s2630_s14  }
 0x467 PF: > { %p3050_p7 = scmp.ge.s32.totalorder %s3165_s21, 2  ;;  %s2656_s30 = sand.u32 1, %s3153_s18  }
 0x468   : > { %s2657_s17 = scalar_lea.sflag [#allocation5], %s2656_s30 }
 0x469   : > { %p3047_p8 = pnand %p3050_p7, %p3248_p6 }
 0x46b   : > { %p3048_p9 = pneg %p3047_p8 }
 0x46d   : > { %3148 = dma.done.wait (%p3048_p9), %s2657_s17, 256  }
 0x46e   : > { %3150 = vsyncadd (%p3048_p9), %s2657_s17, 4294967040  ;;  %p15_p10 = scmp.ge.s32.totalorder %s3231_s24, 6   ;;  %s7687_s18 = smov %s3157_s19 }
 0x46f   : > { %s7688_s19 = smov %s3161_s20  ;;  %s7689_s20 = smov %s3242_s27 }
 0x470   : > { %s7690_s21 = smov %s3231_s24  ;;  %17 = sbr.rel (!%p15_p10) target bundleno = 3 (0x3), region = 135 }
 0x475   :  { %2663 = vsyncpa [#allocation5], 1 }
 0x476   :  { %2665 = vsyncpa [#allocation5 + $0x1], 1 }

</bundles_post_ra>
